<compile_context>
chip_gen: v5e
topology: v5e:2x2
jax: 0.10.0
libtpu: 0.0.40
codegen_flags: <defaults>
</compile_context>

<pallas_src>
import functools
import math

import jax
import jax.numpy as jnp
import numpy as np
from jax import lax
from jax.experimental import pallas as pl
from jax.experimental.pallas import tpu as pltpu


# ----------------------------------------------------------------------------
# Kernel 1: x + 1e-6 followed by InstanceNorm1d(C) (no affine), per (b, c) over T
# ----------------------------------------------------------------------------
def _instancenorm_kernel(x_ref, o_ref):
    x = x_ref[0].astype(jnp.float32) + 1e-6                   # [C, T]
    mean = jnp.mean(x, axis=1, keepdims=True)
    var = jnp.mean(jnp.square(x - mean), axis=1, keepdims=True)
    o_ref[0] = ((x - mean) * lax.rsqrt(var + 1e-5)).astype(o_ref.dtype)


def instance_norm_pallas(x):
    B, C, T = x.shape
    return pl.pallas_call(
        _instancenorm_kernel,
        out_shape=jax.ShapeDtypeStruct((B, C, T), x.dtype),
        grid=(B,),
        in_specs=[pl.BlockSpec((1, C, T), lambda b: (b, 0, 0))],
        out_specs=pl.BlockSpec((1, C, T), lambda b: (b, 0, 0)),
        compiler_params=pltpu.CompilerParams(dimension_semantics=("parallel",)),
    )(x)


# ----------------------------------------------------------------------------
# Kernel 2: Conv1d(k=3, stride=1, pad=1) + folded BatchNorm (running stats) + ReLU
#   conv done as three shifted [C_out, C_in] x [C_in, T] MXU matmuls.
# ----------------------------------------------------------------------------
def _conv_bn_relu_kernel(x_ref, w_ref, s_ref, b_ref, o_ref, *, T):
    x = x_ref[0].astype(jnp.float32)                          # [C_in, T+2]
    acc = jnp.dot(w_ref[0], x[:, 0:T], preferred_element_type=jnp.float32)
    acc = acc + jnp.dot(w_ref[1], x[:, 1:T + 1], preferred_element_type=jnp.float32)
    acc = acc + jnp.dot(w_ref[2], x[:, 2:T + 2], preferred_element_type=jnp.float32)
    y = acc * s_ref[...] + b_ref[...]                         # folded BN (+conv bias)
    o_ref[0] = jnp.maximum(y, 0.0).astype(o_ref.dtype)


def conv_bn_relu_pallas(x, p):
    # TODO(synk): training-mode BatchNorm batch statistics are not computed;
    # BN always uses the provided running stats (inference semantics).
    B, C_in, T = x.shape
    C_out = p["w"].shape[0]
    eps = 1e-5
    w_taps = jnp.transpose(p["w"], (2, 0, 1))                 # [3, C_out, C_in]
    scale = p["gamma"] / jnp.sqrt(p["var"] + eps)             # [C_out]
    bias = p["beta"] + scale * (p["b"] - p["mean"])           # [C_out]
    scale = scale[:, None]
    bias = bias[:, None]
    x_pad = jnp.pad(x, ((0, 0), (0, 0), (1, 1)))              # zero pad time

    flops = 2 * B * C_out * C_in * 3 * T + 3 * B * C_out * T
    bytes_accessed = 4 * (x_pad.size + w_taps.size + 2 * C_out + B * C_out * T)
    return pl.pallas_call(
        functools.partial(_conv_bn_relu_kernel, T=T),
        out_shape=jax.ShapeDtypeStruct((B, C_out, T), x.dtype),
        grid=(B,),
        in_specs=[
            pl.BlockSpec((1, C_in, T + 2), lambda b: (b, 0, 0)),
            pl.BlockSpec((3, C_out, C_in), lambda b: (0, 0, 0)),   # resident
            pl.BlockSpec((C_out, 1), lambda b: (0, 0)),            # resident
            pl.BlockSpec((C_out, 1), lambda b: (0, 0)),            # resident
        ],
        out_specs=pl.BlockSpec((1, C_out, T), lambda b: (b, 0, 0)),
        compiler_params=pltpu.CompilerParams(dimension_semantics=("parallel",)),
        cost_estimate=pl.CostEstimate(flops=flops, transcendentals=0,
                                      bytes_accessed=bytes_accessed),
    )(x_pad, w_taps, scale, bias)


# ----------------------------------------------------------------------------
# Kernel 3: dropout (training only).  Integer-threshold compare on externally
#   generated uint32 bits, fused mask+scale via jnp.where.
# ----------------------------------------------------------------------------
def _dropout_kernel(x_ref, bits_ref, o_ref, *, threshold, inv_keep):
    keep = bits_ref[...] >= jnp.uint32(threshold)
    o_ref[...] = jnp.where(keep, x_ref[...] * inv_keep, 0.0).astype(o_ref.dtype)


def dropout_pallas(x, key, p):
    if p <= 0.0:
        return x
    orig_shape = x.shape
    C = orig_shape[-1]
    R = int(np.prod(orig_shape[:-1]))
    x2 = x.reshape(R, C)                                      # lane-dense 2-D slab
    bits = jax.random.bits(key, shape=(R, C), dtype=jnp.uint32)
    TR = R if R <= 256 else 256
    threshold = min(int(round(p * (2 ** 32))), 2 ** 32 - 1)
    inv_keep = float(1.0 / (1.0 - p))
    out = pl.pallas_call(
        functools.partial(_dropout_kernel, threshold=threshold, inv_keep=inv_keep),
        out_shape=jax.ShapeDtypeStruct((R, C), x.dtype),
        grid=(pl.cdiv(R, TR),),
        in_specs=[pl.BlockSpec((TR, C), lambda i: (i, 0)),
                  pl.BlockSpec((TR, C), lambda i: (i, 0))],
        out_specs=pl.BlockSpec((TR, C), lambda i: (i, 0)),
        compiler_params=pltpu.CompilerParams(dimension_semantics=("parallel",)),
    )(x2, bits)
    return out.reshape(orig_shape)


# ----------------------------------------------------------------------------
# Kernel 4: one LSTM layer, one direction.  Sequential grid over time; h/c live
#   in VMEM scratch across grid steps; weights stay resident (constant index_map).
# ----------------------------------------------------------------------------
def _lstm_kernel(x_ref, wih_ref, whh_ref, b_ref, o_ref, h_sc, c_sc, *, H):
    t = pl.program_id(0)

    @pl.when(t == 0)
    def _():
        h_sc[...] = jnp.zeros_like(h_sc)
        c_sc[...] = jnp.zeros_like(c_sc)

    x = x_ref[0].astype(jnp.float32)                          # [B, D_in]
    gates = (jnp.dot(x, wih_ref[...], preferred_element_type=jnp.float32)
             + jnp.dot(h_sc[...], whh_ref[...], preferred_element_type=jnp.float32)
             + b_ref[...])                                    # [B, 4H]
    i = jax.nn.sigmoid(gates[:, 0:H])
    f = jax.nn.sigmoid(gates[:, H:2 * H])
    g = jnp.tanh(gates[:, 2 * H:3 * H])
    o = jax.nn.sigmoid(gates[:, 3 * H:4 * H])
    c = f * c_sc[...] + i * g
    h = o * jnp.tanh(c)
    c_sc[...] = c
    h_sc[...] = h
    o_ref[0] = h.astype(o_ref.dtype)


def lstm_dir_pallas(x_seq, p):
    T, B, D_in = x_seq.shape
    H = p["whh"].shape[1]
    wih_t = jnp.transpose(p["wih"])                           # [D_in, 4H]
    whh_t = jnp.transpose(p["whh"])                           # [H, 4H]
    b = (p["bih"] + p["bhh"])[None, :]                        # [1, 4H]

    flops = 2 * T * B * (D_in + H) * 4 * H
    bytes_accessed = 4 * (x_seq.size + wih_t.size + whh_t.size + b.size + T * B * H)
    return pl.pallas_call(
        functools.partial(_lstm_kernel, H=H),
        out_shape=jax.ShapeDtypeStruct((T, B, H), x_seq.dtype),
        grid=(T,),
        in_specs=[
            pl.BlockSpec((1, B, D_in), lambda t: (t, 0, 0)),
            pl.BlockSpec((D_in, 4 * H), lambda t: (0, 0)),    # resident
            pl.BlockSpec((H, 4 * H), lambda t: (0, 0)),       # resident
            pl.BlockSpec((1, 4 * H), lambda t: (0, 0)),       # resident
        ],
        out_specs=pl.BlockSpec((1, B, H), lambda t: (t, 0, 0)),
        scratch_shapes=[pltpu.VMEM((B, H), jnp.float32),      # h carry
                        pltpu.VMEM((B, H), jnp.float32)],     # c carry
        compiler_params=pltpu.CompilerParams(dimension_semantics=("arbitrary",)),
        cost_estimate=pl.CostEstimate(flops=flops, transcendentals=5 * T * B * H,
                                      bytes_accessed=bytes_accessed),
    )(x_seq, wih_t, whh_t, b)


# ----------------------------------------------------------------------------
# Kernel 5: Linear(2H -> n_classes) + log_softmax(dim=-1)
# ----------------------------------------------------------------------------
def _classifier_kernel(x_ref, w_ref, b_ref, o_ref):
    logits = jnp.dot(x_ref[...], w_ref[...],
                     preferred_element_type=jnp.float32) + b_ref[...]
    m = jnp.max(logits, axis=-1, keepdims=True)
    s = logits - m
    lse = jnp.log(jnp.sum(jnp.exp(s), axis=-1, keepdims=True))
    o_ref[...] = (s - lse).astype(o_ref.dtype)


def classifier_pallas(x, p):
    T, B, D = x.shape
    n_classes = p["w"].shape[0]
    w_t = jnp.transpose(p["w"])                               # [D, n_classes]
    b = p["b"][None, :]                                       # [1, n_classes]
    R = T * B
    x2 = x.reshape(R, D)
    TR = R if R <= 512 else 256
    out = pl.pallas_call(
        _classifier_kernel,
        out_shape=jax.ShapeDtypeStruct((R, n_classes), x.dtype),
        grid=(pl.cdiv(R, TR),),
        in_specs=[pl.BlockSpec((TR, D), lambda i: (i, 0)),
                  pl.BlockSpec((D, n_classes), lambda i: (0, 0)),
                  pl.BlockSpec((1, n_classes), lambda i: (0, 0))],
        out_specs=pl.BlockSpec((TR, n_classes), lambda i: (i, 0)),
        compiler_params=pltpu.CompilerParams(dimension_semantics=("parallel",)),
    )(x2, w_t, b)
    return out.reshape(T, B, n_classes)


# ----------------------------------------------------------------------------
# Full forward (Pallas)
# ----------------------------------------------------------------------------
@functools.partial(jax.jit, static_argnames=("training", "dropout_p"))
def model_forward(params, x, rng, training=False, dropout_p=0.1):
    # TODO(synk): torchaudio.transforms.MFCC (STFT + mel filterbank + DCT) has no
    # clean Pallas equivalent here; `x` is assumed to already be MFCC features
    # of shape [B, 40, T].
    h = instance_norm_pallas(x)                               # +1e-6 & InstanceNorm1d(40)

    for p in params["conv"]:                                  # 4 x (Dropout, Conv, BN, ReLU)
        if training and dropout_p > 0.0:
            rng, k = jax.random.split(rng)
            h = dropout_pallas(h, k, dropout_p)
        h = conv_bn_relu_pallas(h, p)

    h = jnp.transpose(h, (2, 0, 1))                           # x.permute(2, 0, 1): [T, B, 64]

    n_layers = len(params["lstm"])
    for li, layer in enumerate(params["lstm"]):               # 3-layer bidirectional LSTM
        fwd = lstm_dir_pallas(h, layer["fwd"])
        bwd = lstm_dir_pallas(h[::-1], layer["bwd"])[::-1]
        h = jnp.concatenate([fwd, bwd], axis=-1)              # [T, B, 512]
        if training and dropout_p > 0.0 and li < n_layers - 1:
            rng, k = jax.random.split(rng)
            h = dropout_pallas(h, k, dropout_p)

    return classifier_pallas(h, params["cls"])                # [T, B, n_classes], log-probs


# ----------------------------------------------------------------------------
# Pure-JAX reference (eval mode) for correctness checking
# ----------------------------------------------------------------------------
def _ref_lstm_dir(x_seq, p, H):
    Bb = x_seq.shape[1]
    wih_t = p["wih"].T
    whh_t = p["whh"].T
    b = p["bih"] + p["bhh"]

    def step(carry, x_t):
        h, c = carry
        gates = (jnp.dot(x_t, wih_t, precision=lax.Precision.HIGHEST)
                 + jnp.dot(h, whh_t, precision=lax.Precision.HIGHEST) + b)
        i = jax.nn.sigmoid(gates[:, :H])
        f = jax.nn.sigmoid(gates[:, H:2 * H])
        g = jnp.tanh(gates[:, 2 * H:3 * H])
        o = jax.nn.sigmoid(gates[:, 3 * H:])
        c = f * c + i * g
        h = o * jnp.tanh(c)
        return (h, c), h

    init = (jnp.zeros((Bb, H), jnp.float32), jnp.zeros((Bb, H), jnp.float32))
    return lax.scan(step, init, x_seq)[1]


@jax.jit
def reference_forward(params, x):
    h = x + 1e-6
    mean = jnp.mean(h, axis=2, keepdims=True)
    var = jnp.mean(jnp.square(h - mean), axis=2, keepdims=True)
    h = (h - mean) / jnp.sqrt(var + 1e-5)
    for p in params["conv"]:
        y = lax.conv_general_dilated(
            h, p["w"], window_strides=(1,), padding=((1, 1),),
            dimension_numbers=("NCH", "OIH", "NCH"),
            precision=lax.Precision.HIGHEST) + p["b"][None, :, None]
        y = (p["gamma"][None, :, None] * (y - p["mean"][None, :, None])
             / jnp.sqrt(p["var"][None, :, None] + 1e-5) + p["beta"][None, :, None])
        h = jnp.maximum(y, 0.0)
    h = jnp.transpose(h, (2, 0, 1))
    H = params["lstm"][0]["fwd"]["whh"].shape[1]
    for layer in params["lstm"]:
        fwd = _ref_lstm_dir(h, layer["fwd"], H)
        bwd = _ref_lstm_dir(h[::-1], layer["bwd"], H)[::-1]
        h = jnp.concatenate([fwd, bwd], axis=-1)
    logits = jnp.dot(h, params["cls"]["w"].T,
                     precision=lax.Precision.HIGHEST) + params["cls"]["b"]
    return jax.nn.log_softmax(logits, axis=-1)


# ----------------------------------------------------------------------------
# Parameter construction (PyTorch-shaped weights, random init)
# ----------------------------------------------------------------------------
def init_params(key, n_classes=11, n_mfcc=40, conv_ch=64, hidden=256, num_lstm_layers=3):
    keys = iter(jax.random.split(key, 128))

    def u(shape, scale):
        return jax.random.uniform(next(keys), shape, jnp.float32, -scale, scale)

    conv = []
    c_in = n_mfcc
    for _ in range(4):
        s = 1.0 / math.sqrt(c_in * 3)
        conv.append(dict(
            w=u((conv_ch, c_in, 3), s),
            b=u((conv_ch,), s),
            gamma=1.0 + u((conv_ch,), 0.2),
            beta=u((conv_ch,), 0.1),
            mean=u((conv_ch,), 0.1),
            var=1.0 + u((conv_ch,), 0.3),
        ))
        c_in = conv_ch

    lstm = []
    d_in = conv_ch
    s = 1.0 / math.sqrt(hidden)
    for _ in range(num_lstm_layers):
        layer = {}
        for d in ("fwd", "bwd"):
            layer[d] = dict(
                wih=u((4 * hidden, d_in), s),
                whh=u((4 * hidden, hidden), s),
                bih=u((4 * hidden,), s),
                bhh=u((4 * hidden,), s),
            )
        lstm.append(layer)
        d_in = 2 * hidden

    s = 1.0 / math.sqrt(2 * hidden)
    cls = dict(w=u((n_classes, 2 * hidden), s), b=u((n_classes,), s))
    return dict(conv=conv, lstm=lstm, cls=cls)


if __name__ == "__main__":
    B, T = 2, 128                       # small batch, lane-dense time axis
    n_mfcc, n_classes = 40, 11

    root = jax.random.PRNGKey(0)
    k_input, k_params, k_drop = jax.random.split(root, 3)
    params = init_params(k_params, n_classes=n_classes, n_mfcc=n_mfcc)

    # Input = precomputed MFCC features [B, 40, T] (see TODO on MFCC above).
    x = jax.random.normal(k_input, (B, n_mfcc, T), dtype=jnp.float32)

    # Eval-mode forward (dropout = identity): check against pure-JAX reference.
    out_eval = model_forward(params, x, k_drop, training=False)
    jax.block_until_ready(out_eval)
    assert out_eval.shape == (T, B, n_classes) and out_eval.dtype == jnp.float32

    ref = reference_forward(params, x)
    jax.block_until_ready(ref)
    np.testing.assert_allclose(np.asarray(out_eval), np.asarray(ref),
                               rtol=2e-2, atol=2e-2)
    # log-softmax rows must normalize.
    np.testing.assert_allclose(np.exp(np.asarray(out_eval)).sum(-1), 1.0,
                               rtol=1e-3, atol=1e-3)

    # Training-mode forward exercises the integer-threshold dropout kernels.
    out_train = model_forward(params, x, k_drop, training=True)
    jax.block_until_ready(out_train)
    assert out_train.shape == (T, B, n_classes)
    assert bool(jnp.all(jnp.isfinite(out_train)))

    print("KERNEL_OK")
</pallas_src>

<mosaic_0001>
module attributes {stable_mosaic.version = 11 : i64} {
  func.func @_instancenorm_kernel(%arg0: i32, %arg1: memref<1x40x128xf32, #tpu.memory_space<vmem>>, %arg2: memref<1x40x128xf32, #tpu.memory_space<vmem>>) attributes {dimension_semantics = [#tpu.dimension_semantics<parallel>], iteration_bounds = array<i64: 2>, scalar_prefetch = 0 : i64, scratch_operands = 0 : i64, tpu.core_type = #tpu.core_type<tc>, window_params = [{transform_indices = @transform_0, window_bounds = array<i64: 1, 40, 128>}, {transform_indices = @transform_1, window_bounds = array<i64: 1, 40, 128>}]} {
    %c0 = arith.constant 0 : index
    %c0_0 = arith.constant 0 : index
    %c0_1 = arith.constant 0 : index
    %0 = vector.load %arg1[%c0, %c0_0, %c0_1] : memref<1x40x128xf32, #tpu.memory_space<vmem>>, vector<1x40x128xf32>
    %1 = vector.shape_cast %0 : vector<1x40x128xf32> to vector<40x128xf32>
    %cst = arith.constant 9.99999997E-7 : f32
    %2 = vector.broadcast %cst : f32 to vector<40x128xf32>
    %3 = arith.addf %1, %2 : vector<40x128xf32>
    %cst_2 = arith.constant dense<0.000000e+00> : vector<40xf32>
    %4 = vector.multi_reduction <add>, %3, %cst_2 [1] : vector<40x128xf32> to vector<40xf32>
    %5 = vector.shape_cast %4 : vector<40xf32> to vector<40x1xf32>
    %cst_3 = arith.constant 1.280000e+02 : f32
    %6 = vector.broadcast %cst_3 : f32 to vector<40x1xf32>
    %7 = arith.divf %5, %6 : vector<40x1xf32>
    %8 = vector.broadcast %7 : vector<40x1xf32> to vector<40x128xf32>
    %9 = arith.subf %3, %8 : vector<40x128xf32>
    %10 = arith.mulf %9, %9 : vector<40x128xf32>
    %cst_4 = arith.constant dense<0.000000e+00> : vector<40xf32>
    %11 = vector.multi_reduction <add>, %10, %cst_4 [1] : vector<40x128xf32> to vector<40xf32>
    %12 = vector.shape_cast %11 : vector<40xf32> to vector<40x1xf32>
    %cst_5 = arith.constant 1.280000e+02 : f32
    %13 = vector.broadcast %cst_5 : f32 to vector<40x1xf32>
    %14 = arith.divf %12, %13 : vector<40x1xf32>
    %15 = vector.broadcast %7 : vector<40x1xf32> to vector<40x128xf32>
    %16 = arith.subf %3, %15 : vector<40x128xf32>
    %cst_6 = arith.constant 9.99999974E-6 : f32
    %17 = vector.broadcast %cst_6 : f32 to vector<40x1xf32>
    %18 = arith.addf %14, %17 : vector<40x1xf32>
    %19 = math.rsqrt %18 : vector<40x1xf32>
    %20 = vector.broadcast %19 : vector<40x1xf32> to vector<40x128xf32>
    %21 = arith.mulf %16, %20 : vector<40x128xf32>
    %c0_7 = arith.constant 0 : index
    %c0_8 = arith.constant 0 : index
    %c0_9 = arith.constant 0 : index
    %22 = vector.load %arg2[%c0_7, %c0_8, %c0_9] : memref<1x40x128xf32, #tpu.memory_space<vmem>>, vector<1x40x128xf32>
    %23 = vector.shape_cast %22 : vector<1x40x128xf32> to vector<40x128xf32>
    %24 = vector.shape_cast %21 : vector<40x128xf32> to vector<1x40x128xf32>
    tpu.vector_store %arg2[%c0_7, %c0_8, %c0_9], %24 {strides = array<i32>} : memref<1x40x128xf32, #tpu.memory_space<vmem>>, vector<1x40x128xf32>,
    return
  }
  func.func @transform_0(%arg0: i32) -> (i32, i32, i32) {
    %c0_i32 = arith.constant 0 : i32
    %c0_i32_0 = arith.constant 0 : i32
    %c0_i32_1 = arith.constant 0 : i32
    return %arg0, %c0_i32, %c0_i32_0 : i32, i32, i32
  }
  func.func @transform_1(%arg0: i32) -> (i32, i32, i32) {
    %c0_i32 = arith.constant 0 : i32
    %c0_i32_0 = arith.constant 0 : i32
    %c0_i32_1 = arith.constant 0 : i32
    return %arg0, %c0_i32, %c0_i32_0 : i32, i32, i32
  }
}

module attributes {stable_mosaic.version = 11 : i64} {
  func.func @_conv_bn_relu_kernel(%arg0: i32, %arg1: memref<1x40x130xf32, #tpu.memory_space<vmem>>, %arg2: memref<3x64x40xf32, #tpu.memory_space<vmem>>, %arg3: memref<64x1xf32, #tpu.memory_space<vmem>>, %arg4: memref<64x1xf32, #tpu.memory_space<vmem>>, %arg5: memref<1x64x128xf32, #tpu.memory_space<vmem>>) attributes {dimension_semantics = [#tpu.dimension_semantics<parallel>], iteration_bounds = array<i64: 2>, scalar_prefetch = 0 : i64, scratch_operands = 0 : i64, tpu.core_type = #tpu.core_type<tc>, window_params = [{transform_indices = @transform_0, window_bounds = array<i64: 1, 40, 130>}, {pipeline_mode = #tpu.pipeline_mode<synchronous>, transform_indices = @transform_1, window_bounds = array<i64: 3, 64, 40>}, {pipeline_mode = #tpu.pipeline_mode<synchronous>, transform_indices = @transform_2, window_bounds = array<i64: 64, 1>}, {pipeline_mode = #tpu.pipeline_mode<synchronous>, transform_indices = @transform_3, window_bounds = array<i64: 64, 1>}, {transform_indices = @transform_4, window_bounds = array<i64: 1, 64, 128>}]} {
    %c0 = arith.constant 0 : index
    %c0_0 = arith.constant 0 : index
    %c0_1 = arith.constant 0 : index
    %0 = vector.load %arg1[%c0, %c0_0, %c0_1] : memref<1x40x130xf32, #tpu.memory_space<vmem>>, vector<1x40x130xf32>
    %1 = vector.shape_cast %0 : vector<1x40x130xf32> to vector<40x130xf32>
    %c0_2 = arith.constant 0 : index
    %c0_3 = arith.constant 0 : index
    %c0_4 = arith.constant 0 : index
    %2 = vector.load %arg2[%c0_2, %c0_3, %c0_4] : memref<3x64x40xf32, #tpu.memory_space<vmem>>, vector<1x64x40xf32>
    %3 = vector.shape_cast %2 : vector<1x64x40xf32> to vector<64x40xf32>
    %4 = vector.extract_strided_slice %1 {offsets = [0, 0], sizes = [40, 128], strides = [1, 1]} : vector<40x130xf32> to vector<40x128xf32>
    %cst = arith.constant dense<0.000000e+00> : vector<64x128xf32>
    %5 = tpu.matmul %3, %4, %cst {dimension_numbers = #tpu.dot_dimension_numbers<[1], [0], [0], [1], [0, 0, 1, 1], [], []>} : vector<64x40xf32>, vector<40x128xf32>, vector<64x128xf32> -> vector<64x128xf32>
    %c1 = arith.constant 1 : index
    %c0_5 = arith.constant 0 : index
    %c0_6 = arith.constant 0 : index
    %6 = vector.load %arg2[%c1, %c0_5, %c0_6] : memref<3x64x40xf32, #tpu.memory_space<vmem>>, vector<1x64x40xf32>
    %7 = vector.shape_cast %6 : vector<1x64x40xf32> to vector<64x40xf32>
    %8 = vector.extract_strided_slice %1 {offsets = [0, 1], sizes = [40, 128], strides = [1, 1]} : vector<40x130xf32> to vector<40x128xf32>
    %cst_7 = arith.constant dense<0.000000e+00> : vector<64x128xf32>
    %9 = tpu.matmul %7, %8, %cst_7 {dimension_numbers = #tpu.dot_dimension_numbers<[1], [0], [0], [1], [0, 0, 1, 1], [], []>} : vector<64x40xf32>, vector<40x128xf32>, vector<64x128xf32> -> vector<64x128xf32>
    %10 = arith.addf %5, %9 : vector<64x128xf32>
    %c2 = arith.constant 2 : index
    %c0_8 = arith.constant 0 : index
    %c0_9 = arith.constant 0 : index
    %11 = vector.load %arg2[%c2, %c0_8, %c0_9] : memref<3x64x40xf32, #tpu.memory_space<vmem>>, vector<1x64x40xf32>
    %12 = vector.shape_cast %11 : vector<1x64x40xf32> to vector<64x40xf32>
    %13 = vector.extract_strided_slice %1 {offsets = [0, 2], sizes = [40, 128], strides = [1, 1]} : vector<40x130xf32> to vector<40x128xf32>
    %cst_10 = arith.constant dense<0.000000e+00> : vector<64x128xf32>
    %14 = tpu.matmul %12, %13, %cst_10 {dimension_numbers = #tpu.dot_dimension_numbers<[1], [0], [0], [1], [0, 0, 1, 1], [], []>} : vector<64x40xf32>, vector<40x128xf32>, vector<64x128xf32> -> vector<64x128xf32>
    %15 = arith.addf %10, %14 : vector<64x128xf32>
    %c0_11 = arith.constant 0 : index
    %c0_12 = arith.constant 0 : index
    %16 = vector.load %arg3[%c0_11, %c0_12] : memref<64x1xf32, #tpu.memory_space<vmem>>, vector<64x1xf32>
    %17 = vector.broadcast %16 : vector<64x1xf32> to vector<64x128xf32>
    %18 = arith.mulf %15, %17 : vector<64x128xf32>
    %c0_13 = arith.constant 0 : index
    %c0_14 = arith.constant 0 : index
    %19 = vector.load %arg4[%c0_13, %c0_14] : memref<64x1xf32, #tpu.memory_space<vmem>>, vector<64x1xf32>
    %20 = vector.broadcast %19 : vector<64x1xf32> to vector<64x128xf32>
    %21 = arith.addf %18, %20 : vector<64x128xf32>
    %cst_15 = arith.constant 0.000000e+00 : f32
    %22 = vector.broadcast %cst_15 : f32 to vector<64x128xf32>
    %23 = arith.maximumf %21, %22 : vector<64x128xf32>
    %c0_16 = arith.constant 0 : index
    %c0_17 = arith.constant 0 : index
    %c0_18 = arith.constant 0 : index
    %24 = vector.load %arg5[%c0_16, %c0_17, %c0_18] : memref<1x64x128xf32, #tpu.memory_space<vmem>>, vector<1x64x128xf32>
    %25 = vector.shape_cast %24 : vector<1x64x128xf32> to vector<64x128xf32>
    %26 = vector.shape_cast %23 : vector<64x128xf32> to vector<1x64x128xf32>
    tpu.vector_store %arg5[%c0_16, %c0_17, %c0_18], %26 {strides = array<i32>} : memref<1x64x128xf32, #tpu.memory_space<vmem>>, vector<1x64x128xf32>,
    return
  }
  func.func @transform_0(%arg0: i32) -> (i32, i32, i32) {
    %c0_i32 = arith.constant 0 : i32
    %c0_i32_0 = arith.constant 0 : i32
    %c0_i32_1 = arith.constant 0 : i32
    return %arg0, %c0_i32, %c0_i32_0 : i32, i32, i32
  }
  func.func @transform_1(%arg0: i32) -> (i32, i32, i32) {
    %c0_i32 = arith.constant 0 : i32
    %c0_i32_0 = arith.constant 0 : i32
    %c0_i32_1 = arith.constant 0 : i32
    %c0_i32_2 = arith.constant 0 : i32
    return %c0_i32, %c0_i32_0, %c0_i32_1 : i32, i32, i32
  }
  func.func @transform_2(%arg0: i32) -> (i32, i32) {
    %c0_i32 = arith.constant 0 : i32
    %c0_i32_0 = arith.constant 0 : i32
    %c0_i32_1 = arith.constant 0 : i32
    return %c0_i32, %c0_i32_0 : i32, i32
  }
  func.func @transform_3(%arg0: i32) -> (i32, i32) {
    %c0_i32 = arith.constant 0 : i32
    %c0_i32_0 = arith.constant 0 : i32
    %c0_i32_1 = arith.constant 0 : i32
    return %c0_i32, %c0_i32_0 : i32, i32
  }
  func.func @transform_4(%arg0: i32) -> (i32, i32, i32) {
    %c0_i32 = arith.constant 0 : i32
    %c0_i32_0 = arith.constant 0 : i32
    %c0_i32_1 = arith.constant 0 : i32
    return %arg0, %c0_i32, %c0_i32_0 : i32, i32, i32
  }
}

module attributes {stable_mosaic.version = 11 : i64} {
  func.func @_conv_bn_relu_kernel(%arg0: i32, %arg1: memref<1x64x130xf32, #tpu.memory_space<vmem>>, %arg2: memref<3x64x64xf32, #tpu.memory_space<vmem>>, %arg3: memref<64x1xf32, #tpu.memory_space<vmem>>, %arg4: memref<64x1xf32, #tpu.memory_space<vmem>>, %arg5: memref<1x64x128xf32, #tpu.memory_space<vmem>>) attributes {dimension_semantics = [#tpu.dimension_semantics<parallel>], iteration_bounds = array<i64: 2>, scalar_prefetch = 0 : i64, scratch_operands = 0 : i64, tpu.core_type = #tpu.core_type<tc>, window_params = [{transform_indices = @transform_0, window_bounds = array<i64: 1, 64, 130>}, {pipeline_mode = #tpu.pipeline_mode<synchronous>, transform_indices = @transform_1, window_bounds = array<i64: 3, 64, 64>}, {pipeline_mode = #tpu.pipeline_mode<synchronous>, transform_indices = @transform_2, window_bounds = array<i64: 64, 1>}, {pipeline_mode = #tpu.pipeline_mode<synchronous>, transform_indices = @transform_3, window_bounds = array<i64: 64, 1>}, {transform_indices = @transform_4, window_bounds = array<i64: 1, 64, 128>}]} {
    %c0 = arith.constant 0 : index
    %c0_0 = arith.constant 0 : index
    %c0_1 = arith.constant 0 : index
    %0 = vector.load %arg1[%c0, %c0_0, %c0_1] : memref<1x64x130xf32, #tpu.memory_space<vmem>>, vector<1x64x130xf32>
    %1 = vector.shape_cast %0 : vector<1x64x130xf32> to vector<64x130xf32>
    %c0_2 = arith.constant 0 : index
    %c0_3 = arith.constant 0 : index
    %c0_4 = arith.constant 0 : index
    %2 = vector.load %arg2[%c0_2, %c0_3, %c0_4] : memref<3x64x64xf32, #tpu.memory_space<vmem>>, vector<1x64x64xf32>
    %3 = vector.shape_cast %2 : vector<1x64x64xf32> to vector<64x64xf32>
    %4 = vector.extract_strided_slice %1 {offsets = [0, 0], sizes = [64, 128], strides = [1, 1]} : vector<64x130xf32> to vector<64x128xf32>
    %cst = arith.constant dense<0.000000e+00> : vector<64x128xf32>
    %5 = tpu.matmul %3, %4, %cst {dimension_numbers = #tpu.dot_dimension_numbers<[1], [0], [0], [1], [0, 0, 1, 1], [], []>} : vector<64x64xf32>, vector<64x128xf32>, vector<64x128xf32> -> vector<64x128xf32>
    %c1 = arith.constant 1 : index
    %c0_5 = arith.constant 0 : index
    %c0_6 = arith.constant 0 : index
    %6 = vector.load %arg2[%c1, %c0_5, %c0_6] : memref<3x64x64xf32, #tpu.memory_space<vmem>>, vector<1x64x64xf32>
    %7 = vector.shape_cast %6 : vector<1x64x64xf32> to vector<64x64xf32>
    %8 = vector.extract_strided_slice %1 {offsets = [0, 1], sizes = [64, 128], strides = [1, 1]} : vector<64x130xf32> to vector<64x128xf32>
    %cst_7 = arith.constant dense<0.000000e+00> : vector<64x128xf32>
    %9 = tpu.matmul %7, %8, %cst_7 {dimension_numbers = #tpu.dot_dimension_numbers<[1], [0], [0], [1], [0, 0, 1, 1], [], []>} : vector<64x64xf32>, vector<64x128xf32>, vector<64x128xf32> -> vector<64x128xf32>
    %10 = arith.addf %5, %9 : vector<64x128xf32>
    %c2 = arith.constant 2 : index
    %c0_8 = arith.constant 0 : index
    %c0_9 = arith.constant 0 : index
    %11 = vector.load %arg2[%c2, %c0_8, %c0_9] : memref<3x64x64xf32, #tpu.memory_space<vmem>>, vector<1x64x64xf32>
    %12 = vector.shape_cast %11 : vector<1x64x64xf32> to vector<64x64xf32>
    %13 = vector.extract_strided_slice %1 {offsets = [0, 2], sizes = [64, 128], strides = [1, 1]} : vector<64x130xf32> to vector<64x128xf32>
    %cst_10 = arith.constant dense<0.000000e+00> : vector<64x128xf32>
    %14 = tpu.matmul %12, %13, %cst_10 {dimension_numbers = #tpu.dot_dimension_numbers<[1], [0], [0], [1], [0, 0, 1, 1], [], []>} : vector<64x64xf32>, vector<64x128xf32>, vector<64x128xf32> -> vector<64x128xf32>
    %15 = arith.addf %10, %14 : vector<64x128xf32>
    %c0_11 = arith.constant 0 : index
    %c0_12 = arith.constant 0 : index
    %16 = vector.load %arg3[%c0_11, %c0_12] : memref<64x1xf32, #tpu.memory_space<vmem>>, vector<64x1xf32>
    %17 = vector.broadcast %16 : vector<64x1xf32> to vector<64x128xf32>
    %18 = arith.mulf %15, %17 : vector<64x128xf32>
    %c0_13 = arith.constant 0 : index
    %c0_14 = arith.constant 0 : index
    %19 = vector.load %arg4[%c0_13, %c0_14] : memref<64x1xf32, #tpu.memory_space<vmem>>, vector<64x1xf32>
    %20 = vector.broadcast %19 : vector<64x1xf32> to vector<64x128xf32>
    %21 = arith.addf %18, %20 : vector<64x128xf32>
    %cst_15 = arith.constant 0.000000e+00 : f32
    %22 = vector.broadcast %cst_15 : f32 to vector<64x128xf32>
    %23 = arith.maximumf %21, %22 : vector<64x128xf32>
    %c0_16 = arith.constant 0 : index
    %c0_17 = arith.constant 0 : index
    %c0_18 = arith.constant 0 : index
    %24 = vector.load %arg5[%c0_16, %c0_17, %c0_18] : memref<1x64x128xf32, #tpu.memory_space<vmem>>, vector<1x64x128xf32>
    %25 = vector.shape_cast %24 : vector<1x64x128xf32> to vector<64x128xf32>
    %26 = vector.shape_cast %23 : vector<64x128xf32> to vector<1x64x128xf32>
    tpu.vector_store %arg5[%c0_16, %c0_17, %c0_18], %26 {strides = array<i32>} : memref<1x64x128xf32, #tpu.memory_space<vmem>>, vector<1x64x128xf32>,
    return
  }
  func.func @transform_0(%arg0: i32) -> (i32, i32, i32) {
    %c0_i32 = arith.constant 0 : i32
    %c0_i32_0 = arith.constant 0 : i32
    %c0_i32_1 = arith.constant 0 : i32
    return %arg0, %c0_i32, %c0_i32_0 : i32, i32, i32
  }
  func.func @transform_1(%arg0: i32) -> (i32, i32, i32) {
    %c0_i32 = arith.constant 0 : i32
    %c0_i32_0 = arith.constant 0 : i32
    %c0_i32_1 = arith.constant 0 : i32
    %c0_i32_2 = arith.constant 0 : i32
    return %c0_i32, %c0_i32_0, %c0_i32_1 : i32, i32, i32
  }
  func.func @transform_2(%arg0: i32) -> (i32, i32) {
    %c0_i32 = arith.constant 0 : i32
    %c0_i32_0 = arith.constant 0 : i32
    %c0_i32_1 = arith.constant 0 : i32
    return %c0_i32, %c0_i32_0 : i32, i32
  }
  func.func @transform_3(%arg0: i32) -> (i32, i32) {
    %c0_i32 = arith.constant 0 : i32
    %c0_i32_0 = arith.constant 0 : i32
    %c0_i32_1 = arith.constant 0 : i32
    return %c0_i32, %c0_i32_0 : i32, i32
  }
  func.func @transform_4(%arg0: i32) -> (i32, i32, i32) {
    %c0_i32 = arith.constant 0 : i32
    %c0_i32_0 = arith.constant 0 : i32
    %c0_i32_1 = arith.constant 0 : i32
    return %arg0, %c0_i32, %c0_i32_0 : i32, i32, i32
  }
}

module attributes {stable_mosaic.version = 11 : i64} {
  func.func @_lstm_kernel(%arg0: i32, %arg1: memref<1x2x64xf32, #tpu.memory_space<vmem>>, %arg2: memref<64x1024xf32, #tpu.memory_space<vmem>>, %arg3: memref<256x1024xf32, #tpu.memory_space<vmem>>, %arg4: memref<1x1024xf32, #tpu.memory_space<vmem>>, %arg5: memref<1x2x256xf32, #tpu.memory_space<vmem>>, %arg6: memref<2x256xf32, #tpu.memory_space<vmem>>, %arg7: memref<2x256xf32, #tpu.memory_space<vmem>>) attributes {dimension_semantics = [#tpu.dimension_semantics<arbitrary>], iteration_bounds = array<i64: 128>, scalar_prefetch = 0 : i64, scratch_operands = 2 : i64, tpu.core_type = #tpu.core_type<tc>, window_params = [{transform_indices = @transform_0, window_bounds = array<i64: 1, 2, 64>}, {pipeline_mode = #tpu.pipeline_mode<synchronous>, transform_indices = @transform_1, window_bounds = array<i64: 64, 1024>}, {pipeline_mode = #tpu.pipeline_mode<synchronous>, transform_indices = @transform_2, window_bounds = array<i64: 256, 1024>}, {pipeline_mode = #tpu.pipeline_mode<synchronous>, transform_indices = @transform_3, window_bounds = array<i64: 1, 1024>}, {transform_indices = @transform_4, window_bounds = array<i64: 1, 2, 256>}]} {
    %c0_i32 = arith.constant 0 : i32
    %0 = arith.cmpi eq, %arg0, %c0_i32 : i32
    %1 = arith.extui %0 : i1 to i32
    %c0_i32_0 = arith.constant 0 : i32
    %2 = arith.cmpi ne, %1, %c0_i32_0 : i32
    scf.if %2 {
      %cst_24 = arith.constant 0.000000e+00 : f32
      %45 = vector.broadcast %cst_24 : f32 to vector<2x256xf32>
      %c0_25 = arith.constant 0 : index
      %c0_26 = arith.constant 0 : index
      %46 = vector.load %arg6[%c0_25, %c0_26] : memref<2x256xf32, #tpu.memory_space<vmem>>, vector<2x256xf32>
      tpu.vector_store %arg6[%c0_25, %c0_26], %45 {strides = array<i32>} : memref<2x256xf32, #tpu.memory_space<vmem>>, vector<2x256xf32>,
      %cst_27 = arith.constant 0.000000e+00 : f32
      %47 = vector.broadcast %cst_27 : f32 to vector<2x256xf32>
      %c0_28 = arith.constant 0 : index
      %c0_29 = arith.constant 0 : index
      %48 = vector.load %arg7[%c0_28, %c0_29] : memref<2x256xf32, #tpu.memory_space<vmem>>, vector<2x256xf32>
      tpu.vector_store %arg7[%c0_28, %c0_29], %47 {strides = array<i32>} : memref<2x256xf32, #tpu.memory_space<vmem>>, vector<2x256xf32>,
    } else {
    }
    %c0 = arith.constant 0 : index
    %c0_1 = arith.constant 0 : index
    %c0_2 = arith.constant 0 : index
    %3 = vector.load %arg1[%c0, %c0_1, %c0_2] : memref<1x2x64xf32, #tpu.memory_space<vmem>>, vector<1x2x64xf32>
    %4 = vector.shape_cast %3 : vector<1x2x64xf32> to vector<2x64xf32>
    %c0_3 = arith.constant 0 : index
    %c0_4 = arith.constant 0 : index
    %5 = vector.load %arg2[%c0_3, %c0_4] : memref<64x1024xf32, #tpu.memory_space<vmem>>, vector<64x1024xf32>
    %cst = arith.constant dense<0.000000e+00> : vector<2x1024xf32>
    %6 = tpu.matmul %4, %5, %cst {dimension_numbers = #tpu.dot_dimension_numbers<[1], [0], [0], [1], [0, 0, 1, 1], [], []>} : vector<2x64xf32>, vector<64x1024xf32>, vector<2x1024xf32> -> vector<2x1024xf32>
    %c0_5 = arith.constant 0 : index
    %c0_6 = arith.constant 0 : index
    %7 = vector.load %arg6[%c0_5, %c0_6] : memref<2x256xf32, #tpu.memory_space<vmem>>, vector<2x256xf32>
    %c0_7 = arith.constant 0 : index
    %c0_8 = arith.constant 0 : index
    %8 = vector.load %arg3[%c0_7, %c0_8] : memref<256x1024xf32, #tpu.memory_space<vmem>>, vector<256x1024xf32>
    %cst_9 = arith.constant dense<0.000000e+00> : vector<2x1024xf32>
    %9 = tpu.matmul %7, %8, %cst_9 {dimension_numbers = #tpu.dot_dimension_numbers<[1], [0], [0], [1], [0, 0, 1, 1], [], []>} : vector<2x256xf32>, vector<256x1024xf32>, vector<2x1024xf32> -> vector<2x1024xf32>
    %10 = arith.addf %6, %9 : vector<2x1024xf32>
    %c0_10 = arith.constant 0 : index
    %c0_11 = arith.constant 0 : index
    %11 = vector.load %arg4[%c0_10, %c0_11] : memref<1x1024xf32, #tpu.memory_space<vmem>>, vector<1x1024xf32>
    %12 = vector.broadcast %11 : vector<1x1024xf32> to vector<2x1024xf32>
    %13 = arith.addf %10, %12 : vector<2x1024xf32>
    %14 = vector.extract_strided_slice %13 {offsets = [0, 0], sizes = [2, 256], strides = [1, 1]} : vector<2x1024xf32> to vector<2x256xf32>
    %15 = arith.negf %14 : vector<2x256xf32>
    %16 = math.exp %15 : vector<2x256xf32>
    %cst_12 = arith.constant 1.000000e+00 : f32
    %17 = vector.broadcast %cst_12 : f32 to vector<2x256xf32>
    %18 = arith.addf %17, %16 : vector<2x256xf32>
    %19 = arith.divf %17, %18 : vector<2x256xf32>
    %20 = vector.extract_strided_slice %13 {offsets = [0, 256], sizes = [2, 256], strides = [1, 1]} : vector<2x1024xf32> to vector<2x256xf32>
    %21 = arith.negf %20 : vector<2x256xf32>
    %22 = math.exp %21 : vector<2x256xf32>
    %cst_13 = arith.constant 1.000000e+00 : f32
    %23 = vector.broadcast %cst_13 : f32 to vector<2x256xf32>
    %24 = arith.addf %23, %22 : vector<2x256xf32>
    %25 = arith.divf %23, %24 : vector<2x256xf32>
    %26 = vector.extract_strided_slice %13 {offsets = [0, 512], sizes = [2, 256], strides = [1, 1]} : vector<2x1024xf32> to vector<2x256xf32>
    %27 = math.tanh %26 : vector<2x256xf32>
    %28 = vector.extract_strided_slice %13 {offsets = [0, 768], sizes = [2, 256], strides = [1, 1]} : vector<2x1024xf32> to vector<2x256xf32>
    %29 = arith.negf %28 : vector<2x256xf32>
    %30 = math.exp %29 : vector<2x256xf32>
    %cst_14 = arith.constant 1.000000e+00 : f32
    %31 = vector.broadcast %cst_14 : f32 to vector<2x256xf32>
    %32 = arith.addf %31, %30 : vector<2x256xf32>
    %33 = arith.divf %31, %32 : vector<2x256xf32>
    %c0_15 = arith.constant 0 : index
    %c0_16 = arith.constant 0 : index
    %34 = vector.load %arg7[%c0_15, %c0_16] : memref<2x256xf32, #tpu.memory_space<vmem>>, vector<2x256xf32>
    %35 = arith.mulf %25, %34 : vector<2x256xf32>
    %36 = arith.mulf %19, %27 : vector<2x256xf32>
    %37 = arith.addf %35, %36 : vector<2x256xf32>
    %38 = math.tanh %37 : vector<2x256xf32>
    %39 = arith.mulf %33, %38 : vector<2x256xf32>
    %c0_17 = arith.constant 0 : index
    %c0_18 = arith.constant 0 : index
    %40 = vector.load %arg7[%c0_17, %c0_18] : memref<2x256xf32, #tpu.memory_space<vmem>>, vector<2x256xf32>
    tpu.vector_store %arg7[%c0_17, %c0_18], %37 {strides = array<i32>} : memref<2x256xf32, #tpu.memory_space<vmem>>, vector<2x256xf32>,
    %c0_19 = arith.constant 0 : index
    %c0_20 = arith.constant 0 : index
    %41 = vector.load %arg6[%c0_19, %c0_20] : memref<2x256xf32, #tpu.memory_space<vmem>>, vector<2x256xf32>
    tpu.vector_store %arg6[%c0_19, %c0_20], %39 {strides = array<i32>} : memref<2x256xf32, #tpu.memory_space<vmem>>, vector<2x256xf32>,
    %c0_21 = arith.constant 0 : index
    %c0_22 = arith.constant 0 : index
    %c0_23 = arith.constant 0 : index
    %42 = vector.load %arg5[%c0_21, %c0_22, %c0_23] : memref<1x2x256xf32, #tpu.memory_space<vmem>>, vector<1x2x256xf32>
    %43 = vector.shape_cast %42 : vector<1x2x256xf32> to vector<2x256xf32>
    %44 = vector.shape_cast %39 : vector<2x256xf32> to vector<1x2x256xf32>
    tpu.vector_store %arg5[%c0_21, %c0_22, %c0_23], %44 {strides = array<i32>} : memref<1x2x256xf32, #tpu.memory_space<vmem>>, vector<1x2x256xf32>,
    return
  }
  func.func @transform_0(%arg0: i32) -> (i32, i32, i32) {
    %c0_i32 = arith.constant 0 : i32
    %c0_i32_0 = arith.constant 0 : i32
    %c0_i32_1 = arith.constant 0 : i32
    return %arg0, %c0_i32, %c0_i32_0 : i32, i32, i32
  }
  func.func @transform_1(%arg0: i32) -> (i32, i32) {
    %c0_i32 = arith.constant 0 : i32
    %c0_i32_0 = arith.constant 0 : i32
    %c0_i32_1 = arith.constant 0 : i32
    return %c0_i32, %c0_i32_0 : i32, i32
  }
  func.func @transform_2(%arg0: i32) -> (i32, i32) {
    %c0_i32 = arith.constant 0 : i32
    %c0_i32_0 = arith.constant 0 : i32
    %c0_i32_1 = arith.constant 0 : i32
    return %c0_i32, %c0_i32_0 : i32, i32
  }
  func.func @transform_3(%arg0: i32) -> (i32, i32) {
    %c0_i32 = arith.constant 0 : i32
    %c0_i32_0 = arith.constant 0 : i32
    %c0_i32_1 = arith.constant 0 : i32
    return %c0_i32, %c0_i32_0 : i32, i32
  }
  func.func @transform_4(%arg0: i32) -> (i32, i32, i32) {
    %c0_i32 = arith.constant 0 : i32
    %c0_i32_0 = arith.constant 0 : i32
    %c0_i32_1 = arith.constant 0 : i32
    return %arg0, %c0_i32, %c0_i32_0 : i32, i32, i32
  }
}

module attributes {stable_mosaic.version = 11 : i64} {
  func.func @_lstm_kernel(%arg0: i32, %arg1: memref<1x2x512xf32, #tpu.memory_space<vmem>>, %arg2: memref<512x1024xf32, #tpu.memory_space<vmem>>, %arg3: memref<256x1024xf32, #tpu.memory_space<vmem>>, %arg4: memref<1x1024xf32, #tpu.memory_space<vmem>>, %arg5: memref<1x2x256xf32, #tpu.memory_space<vmem>>, %arg6: memref<2x256xf32, #tpu.memory_space<vmem>>, %arg7: memref<2x256xf32, #tpu.memory_space<vmem>>) attributes {dimension_semantics = [#tpu.dimension_semantics<arbitrary>], iteration_bounds = array<i64: 128>, scalar_prefetch = 0 : i64, scratch_operands = 2 : i64, tpu.core_type = #tpu.core_type<tc>, window_params = [{transform_indices = @transform_0, window_bounds = array<i64: 1, 2, 512>}, {pipeline_mode = #tpu.pipeline_mode<synchronous>, transform_indices = @transform_1, window_bounds = array<i64: 512, 1024>}, {pipeline_mode = #tpu.pipeline_mode<synchronous>, transform_indices = @transform_2, window_bounds = array<i64: 256, 1024>}, {pipeline_mode = #tpu.pipeline_mode<synchronous>, transform_indices = @transform_3, window_bounds = array<i64: 1, 1024>}, {transform_indices = @transform_4, window_bounds = array<i64: 1, 2, 256>}]} {
    %c0_i32 = arith.constant 0 : i32
    %0 = arith.cmpi eq, %arg0, %c0_i32 : i32
    %1 = arith.extui %0 : i1 to i32
    %c0_i32_0 = arith.constant 0 : i32
    %2 = arith.cmpi ne, %1, %c0_i32_0 : i32
    scf.if %2 {
      %cst_24 = arith.constant 0.000000e+00 : f32
      %45 = vector.broadcast %cst_24 : f32 to vector<2x256xf32>
      %c0_25 = arith.constant 0 : index
      %c0_26 = arith.constant 0 : index
      %46 = vector.load %arg6[%c0_25, %c0_26] : memref<2x256xf32, #tpu.memory_space<vmem>>, vector<2x256xf32>
      tpu.vector_store %arg6[%c0_25, %c0_26], %45 {strides = array<i32>} : memref<2x256xf32, #tpu.memory_space<vmem>>, vector<2x256xf32>,
      %cst_27 = arith.constant 0.000000e+00 : f32
      %47 = vector.broadcast %cst_27 : f32 to vector<2x256xf32>
      %c0_28 = arith.constant 0 : index
      %c0_29 = arith.constant 0 : index
      %48 = vector.load %arg7[%c0_28, %c0_29] : memref<2x256xf32, #tpu.memory_space<vmem>>, vector<2x256xf32>
      tpu.vector_store %arg7[%c0_28, %c0_29], %47 {strides = array<i32>} : memref<2x256xf32, #tpu.memory_space<vmem>>, vector<2x256xf32>,
    } else {
    }
    %c0 = arith.constant 0 : index
    %c0_1 = arith.constant 0 : index
    %c0_2 = arith.constant 0 : index
    %3 = vector.load %arg1[%c0, %c0_1, %c0_2] : memref<1x2x512xf32, #tpu.memory_space<vmem>>, vector<1x2x512xf32>
    %4 = vector.shape_cast %3 : vector<1x2x512xf32> to vector<2x512xf32>
    %c0_3 = arith.constant 0 : index
    %c0_4 = arith.constant 0 : index
    %5 = vector.load %arg2[%c0_3, %c0_4] : memref<512x1024xf32, #tpu.memory_space<vmem>>, vector<512x1024xf32>
    %cst = arith.constant dense<0.000000e+00> : vector<2x1024xf32>
    %6 = tpu.matmul %4, %5, %cst {dimension_numbers = #tpu.dot_dimension_numbers<[1], [0], [0], [1], [0, 0, 1, 1], [], []>} : vector<2x512xf32>, vector<512x1024xf32>, vector<2x1024xf32> -> vector<2x1024xf32>
    %c0_5 = arith.constant 0 : index
    %c0_6 = arith.constant 0 : index
    %7 = vector.load %arg6[%c0_5, %c0_6] : memref<2x256xf32, #tpu.memory_space<vmem>>, vector<2x256xf32>
    %c0_7 = arith.constant 0 : index
    %c0_8 = arith.constant 0 : index
    %8 = vector.load %arg3[%c0_7, %c0_8] : memref<256x1024xf32, #tpu.memory_space<vmem>>, vector<256x1024xf32>
    %cst_9 = arith.constant dense<0.000000e+00> : vector<2x1024xf32>
    %9 = tpu.matmul %7, %8, %cst_9 {dimension_numbers = #tpu.dot_dimension_numbers<[1], [0], [0], [1], [0, 0, 1, 1], [], []>} : vector<2x256xf32>, vector<256x1024xf32>, vector<2x1024xf32> -> vector<2x1024xf32>
    %10 = arith.addf %6, %9 : vector<2x1024xf32>
    %c0_10 = arith.constant 0 : index
    %c0_11 = arith.constant 0 : index
    %11 = vector.load %arg4[%c0_10, %c0_11] : memref<1x1024xf32, #tpu.memory_space<vmem>>, vector<1x1024xf32>
    %12 = vector.broadcast %11 : vector<1x1024xf32> to vector<2x1024xf32>
    %13 = arith.addf %10, %12 : vector<2x1024xf32>
    %14 = vector.extract_strided_slice %13 {offsets = [0, 0], sizes = [2, 256], strides = [1, 1]} : vector<2x1024xf32> to vector<2x256xf32>
    %15 = arith.negf %14 : vector<2x256xf32>
    %16 = math.exp %15 : vector<2x256xf32>
    %cst_12 = arith.constant 1.000000e+00 : f32
    %17 = vector.broadcast %cst_12 : f32 to vector<2x256xf32>
    %18 = arith.addf %17, %16 : vector<2x256xf32>
    %19 = arith.divf %17, %18 : vector<2x256xf32>
    %20 = vector.extract_strided_slice %13 {offsets = [0, 256], sizes = [2, 256], strides = [1, 1]} : vector<2x1024xf32> to vector<2x256xf32>
    %21 = arith.negf %20 : vector<2x256xf32>
    %22 = math.exp %21 : vector<2x256xf32>
    %cst_13 = arith.constant 1.000000e+00 : f32
    %23 = vector.broadcast %cst_13 : f32 to vector<2x256xf32>
    %24 = arith.addf %23, %22 : vector<2x256xf32>
    %25 = arith.divf %23, %24 : vector<2x256xf32>
    %26 = vector.extract_strided_slice %13 {offsets = [0, 512], sizes = [2, 256], strides = [1, 1]} : vector<2x1024xf32> to vector<2x256xf32>
    %27 = math.tanh %26 : vector<2x256xf32>
    %28 = vector.extract_strided_slice %13 {offsets = [0, 768], sizes = [2, 256], strides = [1, 1]} : vector<2x1024xf32> to vector<2x256xf32>
    %29 = arith.negf %28 : vector<2x256xf32>
    %30 = math.exp %29 : vector<2x256xf32>
    %cst_14 = arith.constant 1.000000e+00 : f32
    %31 = vector.broadcast %cst_14 : f32 to vector<2x256xf32>
    %32 = arith.addf %31, %30 : vector<2x256xf32>
    %33 = arith.divf %31, %32 : vector<2x256xf32>
    %c0_15 = arith.constant 0 : index
    %c0_16 = arith.constant 0 : index
    %34 = vector.load %arg7[%c0_15, %c0_16] : memref<2x256xf32, #tpu.memory_space<vmem>>, vector<2x256xf32>
    %35 = arith.mulf %25, %34 : vector<2x256xf32>
    %36 = arith.mulf %19, %27 : vector<2x256xf32>
    %37 = arith.addf %35, %36 : vector<2x256xf32>
    %38 = math.tanh %37 : vector<2x256xf32>
    %39 = arith.mulf %33, %38 : vector<2x256xf32>
    %c0_17 = arith.constant 0 : index
    %c0_18 = arith.constant 0 : index
    %40 = vector.load %arg7[%c0_17, %c0_18] : memref<2x256xf32, #tpu.memory_space<vmem>>, vector<2x256xf32>
    tpu.vector_store %arg7[%c0_17, %c0_18], %37 {strides = array<i32>} : memref<2x256xf32, #tpu.memory_space<vmem>>, vector<2x256xf32>,
    %c0_19 = arith.constant 0 : index
    %c0_20 = arith.constant 0 : index
    %41 = vector.load %arg6[%c0_19, %c0_20] : memref<2x256xf32, #tpu.memory_space<vmem>>, vector<2x256xf32>
    tpu.vector_store %arg6[%c0_19, %c0_20], %39 {strides = array<i32>} : memref<2x256xf32, #tpu.memory_space<vmem>>, vector<2x256xf32>,
    %c0_21 = arith.constant 0 : index
    %c0_22 = arith.constant 0 : index
    %c0_23 = arith.constant 0 : index
    %42 = vector.load %arg5[%c0_21, %c0_22, %c0_23] : memref<1x2x256xf32, #tpu.memory_space<vmem>>, vector<1x2x256xf32>
    %43 = vector.shape_cast %42 : vector<1x2x256xf32> to vector<2x256xf32>
    %44 = vector.shape_cast %39 : vector<2x256xf32> to vector<1x2x256xf32>
    tpu.vector_store %arg5[%c0_21, %c0_22, %c0_23], %44 {strides = array<i32>} : memref<1x2x256xf32, #tpu.memory_space<vmem>>, vector<1x2x256xf32>,
    return
  }
  func.func @transform_0(%arg0: i32) -> (i32, i32, i32) {
    %c0_i32 = arith.constant 0 : i32
    %c0_i32_0 = arith.constant 0 : i32
    %c0_i32_1 = arith.constant 0 : i32
    return %arg0, %c0_i32, %c0_i32_0 : i32, i32, i32
  }
  func.func @transform_1(%arg0: i32) -> (i32, i32) {
    %c0_i32 = arith.constant 0 : i32
    %c0_i32_0 = arith.constant 0 : i32
    %c0_i32_1 = arith.constant 0 : i32
    return %c0_i32, %c0_i32_0 : i32, i32
  }
  func.func @transform_2(%arg0: i32) -> (i32, i32) {
    %c0_i32 = arith.constant 0 : i32
    %c0_i32_0 = arith.constant 0 : i32
    %c0_i32_1 = arith.constant 0 : i32
    return %c0_i32, %c0_i32_0 : i32, i32
  }
  func.func @transform_3(%arg0: i32) -> (i32, i32) {
    %c0_i32 = arith.constant 0 : i32
    %c0_i32_0 = arith.constant 0 : i32
    %c0_i32_1 = arith.constant 0 : i32
    return %c0_i32, %c0_i32_0 : i32, i32
  }
  func.func @transform_4(%arg0: i32) -> (i32, i32, i32) {
    %c0_i32 = arith.constant 0 : i32
    %c0_i32_0 = arith.constant 0 : i32
    %c0_i32_1 = arith.constant 0 : i32
    return %arg0, %c0_i32, %c0_i32_0 : i32, i32, i32
  }
}

module attributes {stable_mosaic.version = 11 : i64} {
  func.func @_classifier_kernel(%arg0: i32, %arg1: memref<256x512xf32, #tpu.memory_space<vmem>>, %arg2: memref<512x11xf32, #tpu.memory_space<vmem>>, %arg3: memref<1x11xf32, #tpu.memory_space<vmem>>, %arg4: memref<256x11xf32, #tpu.memory_space<vmem>>) attributes {dimension_semantics = [#tpu.dimension_semantics<parallel>], iteration_bounds = array<i64: 1>, scalar_prefetch = 0 : i64, scratch_operands = 0 : i64, tpu.core_type = #tpu.core_type<tc>, window_params = [{transform_indices = @transform_0, window_bounds = array<i64: 256, 512>}, {pipeline_mode = #tpu.pipeline_mode<synchronous>, transform_indices = @transform_1, window_bounds = array<i64: 512, 11>}, {pipeline_mode = #tpu.pipeline_mode<synchronous>, transform_indices = @transform_2, window_bounds = array<i64: 1, 11>}, {transform_indices = @transform_3, window_bounds = array<i64: 256, 11>}]} {
    %c0 = arith.constant 0 : index
    %c0_0 = arith.constant 0 : index
    %0 = vector.load %arg1[%c0, %c0_0] : memref<256x512xf32, #tpu.memory_space<vmem>>, vector<256x512xf32>
    %c0_1 = arith.constant 0 : index
    %c0_2 = arith.constant 0 : index
    %1 = vector.load %arg2[%c0_1, %c0_2] : memref<512x11xf32, #tpu.memory_space<vmem>>, vector<512x11xf32>
    %cst = arith.constant dense<0.000000e+00> : vector<256x11xf32>
    %2 = tpu.matmul %0, %1, %cst {dimension_numbers = #tpu.dot_dimension_numbers<[1], [0], [0], [1], [0, 0, 1, 1], [], []>} : vector<256x512xf32>, vector<512x11xf32>, vector<256x11xf32> -> vector<256x11xf32>
    %c0_3 = arith.constant 0 : index
    %c0_4 = arith.constant 0 : index
    %3 = vector.load %arg3[%c0_3, %c0_4] : memref<1x11xf32, #tpu.memory_space<vmem>>, vector<1x11xf32>
    %4 = vector.broadcast %3 : vector<1x11xf32> to vector<256x11xf32>
    %5 = arith.addf %2, %4 : vector<256x11xf32>
    %cst_5 = arith.constant dense<0xFF800000> : vector<256xf32>
    %6 = vector.multi_reduction <maximumf>, %5, %cst_5 [1] : vector<256x11xf32> to vector<256xf32>
    %7 = vector.shape_cast %6 : vector<256xf32> to vector<256x1xf32>
    %8 = vector.broadcast %7 : vector<256x1xf32> to vector<256x11xf32>
    %9 = arith.subf %5, %8 : vector<256x11xf32>
    %10 = math.exp %9 : vector<256x11xf32>
    %cst_6 = arith.constant dense<0.000000e+00> : vector<256xf32>
    %11 = vector.multi_reduction <add>, %10, %cst_6 [1] : vector<256x11xf32> to vector<256xf32>
    %12 = vector.shape_cast %11 : vector<256xf32> to vector<256x1xf32>
    %13 = math.log %12 : vector<256x1xf32>
    %14 = vector.broadcast %13 : vector<256x1xf32> to vector<256x11xf32>
    %15 = arith.subf %9, %14 : vector<256x11xf32>
    %c0_7 = arith.constant 0 : index
    %c0_8 = arith.constant 0 : index
    %16 = vector.load %arg4[%c0_7, %c0_8] : memref<256x11xf32, #tpu.memory_space<vmem>>, vector<256x11xf32>
    tpu.vector_store %arg4[%c0_7, %c0_8], %15 {strides = array<i32>} : memref<256x11xf32, #tpu.memory_space<vmem>>, vector<256x11xf32>,
    return
  }
  func.func @transform_0(%arg0: i32) -> (i32, i32) {
    %c0_i32 = arith.constant 0 : i32
    %c0_i32_0 = arith.constant 0 : i32
    return %arg0, %c0_i32 : i32, i32
  }
  func.func @transform_1(%arg0: i32) -> (i32, i32) {
    %c0_i32 = arith.constant 0 : i32
    %c0_i32_0 = arith.constant 0 : i32
    %c0_i32_1 = arith.constant 0 : i32
    return %c0_i32, %c0_i32_0 : i32, i32
  }
  func.func @transform_2(%arg0: i32) -> (i32, i32) {
    %c0_i32 = arith.constant 0 : i32
    %c0_i32_0 = arith.constant 0 : i32
    %c0_i32_1 = arith.constant 0 : i32
    return %c0_i32, %c0_i32_0 : i32, i32
  }
  func.func @transform_3(%arg0: i32) -> (i32, i32) {
    %c0_i32 = arith.constant 0 : i32
    %c0_i32_0 = arith.constant 0 : i32
    return %arg0, %c0_i32 : i32, i32
  }
}

</mosaic_0001>

<bundles_post_ra>
// kernel: model_forward.12
= control target key start
LH: loop header
LB: loop body
LE: loop exit
PB: predicated region body
PF: predicated region fallthrough
CT: control target
= control target key end

     0   :  { %6 = vsyncpa [#allocation3], 0  ;;  %s591_s0 = inlined_call_operand.hbm [shape: f32[2,40,128], index: 0, kind: input, shape index: {}]   ;;  %s592_s1 = inlined_call_operand.vmem [shape: f32[2,40,128], index: 1, kind: output, shape index: {}]  }
   0x1   :  { %8 = vsyncpa [#allocation3 + $0x1], 0  ;;  %s473_s6 = smov 0   ;;  %s475_s7 = smov 0  }
   0x2   :  { %s477_s8 = smov 0   ;;  %s479_s9 = smov 0  }
   0x3 LB: > { %s492_s10 = sadd.s32 4294967295, %s458_s9   ;;  %s495_s11 = sadd.s32 1, %s458_s9   ;;  %s458_s9 = sphi %s479_s9, %s598_s9   ;;  %s454_s8 = sphi %s477_s8, %s597_s8   ;;  %s450_s7 = sphi %s475_s7, %s596_s7   ;;  %s446_s6 = sphi %s473_s6, %s595_s6  }
   0x4   : > { %s18_s12 = ssub.s32 %s458_s9, %s495_s11  ;;  %s21_s13 = sadd.s32 1, %s454_s8 }
   0x5   : > { %p19_p0 = scmp.eq.s32.totalorder %s18_s12, 0  ;;  %p28_p1 = scmp.ne.s32.totalorder %s454_s8, %s450_s7 }
   0x6   : > { %p29_p2 = scmp.eq.s32.totalorder %s458_s9, 0  ;;  %p34_p3 = scmp.ne.s32.totalorder %s450_s7, %s446_s6 }
   0x7   : > { %s505_s14 = scalar_select %p19_p0, %s454_s8, %s21_s13  }
   0x8   : > { %p30_p4 = por %p29_p2, %p28_p1  ;;  %p35_p5 = scmp.eq.s32.totalorder %s492_s10, 0 }
   0x9   : > { %p346_p6 = scmp.lt.s32.totalorder %s458_s9, 2  ;;  %s84_s16 = sand.u32 1, %s454_s8  }
   0xa   : > { %p509_p7 = por %p35_p5, %p34_p3  ;;  %s336_s17 = smul.u32 40, %s84_s16 }
   0xb   : > { %s337_s18 = smul.u32 40, %s458_s9  ;;  %p515_p8 = pnand %p346_p6, %p30_p4 }
   0xc   : > { %s88_s23 = scalar_lea.vmem [#allocation2], %s336_s17  ;;  %p332_p9 = scmp.ge.s32.totalorder %s458_s9, 1 }
   0xd   : > { %s93_s22 = scalar_lea.hbm %s591_s0, %s337_s18  ;;  %s96_s24 = sshll.u32 %s88_s23, 4  ;;  %s97_s24 = int_to_ptr.vmem [resolvable:$true] %s96_s24 }
   0xe   : > { %s94_s25 = sshll.u32 %s93_s22, 4  ;;  %s85_s26 = scalar_lea.sflag [#allocation3], %s84_s16  ;;  %s95_s25 = int_to_ptr.hbm [resolvable:$true] %s94_s25 }
   0xf   : > { %s394_s27 = sshra.s32 %s95_s25, 4  ;;  %p398_p11 = pneg %p515_p8  ;;  %s395_s27 = int_to_ptr.hbm [resolvable:$true] %s394_s27 }
  0x10   : > { %s396_s28 = scalar_lea.hbm %s395_s27, 40  ;;  %s401_s2 = scalar_lea.hbm %s591_s0, 80 }
  0x11   : > { %p397_p10 = scmp.ne.s32.totalorder %s395_s27, %s396_s28  ;;  %p402_p0 = scmp.lt.s32.totalorder %s395_s27, %s591_s0 }
  0x12   : > { %p403_p1 = scmp.lt.s32.totalorder %s401_s2, %s396_s28 }
  0x13   : > { %p399_p12 = pnand %p398_p11, %p397_p10 }
  0x14   : > { %p404_p2 = por %p403_p1, %p402_p0 }
  0x15   : > { %p400_p13 = pneg %p399_p12 }
  0x17   : > { %p405_p3 = pnand %p404_p2, %p400_p13 }
  0x19   : > { %408 = shalt.err (!%p405_p3)
}
  0x1a   : > { %s460_s5 = smov 128   ;;  %s461_s6 = smov 8  }
  0x1b   : > { %345 = dma.hbm_to_vmem [thread:$0]  (!%p515_p8), %s95_s25, 640, %s97_s24, %s85_s26, %s460_s5, %s460_s5, %s461_s6  }
  0x1c   : > { %p104_p4 = scmp.lt.s32.totalorder %s458_s9, 3 }
  0x1e   : > { %p105_p5 = pnand %p332_p9, %p104_p4 }
  0x1f   : > { %s110_s12 = sand.u32 (!%p105_p5), 1, %s450_s7  }
  0x20   : > { %108 = sbr.rel (%p105_p5) target bundleno = 320 (0x140), region = 24  ;;  %s111_s16 = scalar_lea.sflag (!%p105_p5), [#allocation3], %s110_s12 }
  0x21   : > { %s338_s13 = smul.u32 (!%p105_p5), 40, %s110_s12 }
  0x23   : > { %s114_s17 = scalar_lea.vmem (!%p105_p5), [#allocation2], %s338_s13 }
  0x25   : > { %441 = dma.done.wait (%p509_p7), %s111_s16, 640  }
  0x26   : > { %443 = vsyncadd (%p509_p7), %s111_s16, 4294966656  ;;  %v141_v0 = vld [vmem:[%s114_s17 + $0x10] sm:$0xff]  ;;  %v139_v1 = vld [vmem:[%s114_s17] sm:$0xff]  ;;  %v462_v10 = vmov 128.0   ;;  %p134_p6 = scmp.lt.s32.totalorder %s492_s10, 1 }
  0x27   : > { %v146_v2 = vadd.f32 1e-06, %v141_v0  ;;  %v144_v3 = vadd.f32 1e-06, %v139_v1  ;;  %v143_v4 = vld [vmem:[%s114_s17 + $0x20] sm:$0xff]  ;;  %v142_v6 = vld [vmem:[%s114_s17 + $0x18] sm:$0xff]  ;;  %382 = vrcp.f32 %v462_v10 }
  0x28   : > { %v148_v5 = vadd.f32 1e-06, %v143_v4  ;;  %v140_v7 = vld [vmem:[%s114_s17 + $0x8] sm:$0xff]  ;;  %v147_v8 = vadd.f32 1e-06, %v142_v6  ;;  %s600_s10 = smov (!%p134_p6, %s492_s10), 1 }
  0x29   : > { %153 = vadd.xlane.f32.xlu1 %v146_v2  ;;  %149 = vadd.xlane.f32.xlu0 %v144_v3  ;;  %v145_v9 = vadd.f32 1e-06, %v140_v7  ;;  %s339_s9 = smul.u32 40, %s600_s10 }
  0x2a   : > { %157 = vadd.xlane.f32.xlu2 %v148_v5 }
  0x2b   : > { %s566_s19 = scalar_lea.vmem %s592_s1, %s339_s9 }
  0x2d   : > { %v383_v11 = vpop.eup %382 }
  0x2e   : > { %v160_v12 = vmul.f32 128.0, %v383_v11  ;;  %vm164_vm0 = vweird.f32 %v383_v11 }
  0x30   : > { %v161_v13 = vsub.f32 1.0, %v160_v12 }
  0x31   : > { %155 = vadd.xlane.f32.xlu1 %v147_v8  ;;  %151 = vadd.xlane.f32.xlu0 %v145_v9 }
  0x32   : > { %v162_v14 = vmul.f32 %v383_v11, %v161_v13 }
  0x34   : > { %v163_v15 = vadd.f32 %v383_v11, %v162_v14 }
  0x36   : > { %v165_v16 = vsel %vm164_vm0, %v383_v11, %v163_v15 }
  0x9c   : > { %v154_v17 = vpop.xlane.xlu1 %153  ;;  %v150_v18 = vpop.xlane.xlu0 %149 }
  0x9d   : > { %v168_v19 = vmul.f32 %v165_v16, %v154_v17  ;;  %v166_v20 = vmul.f32 %v165_v16, %v150_v18  ;;  %v158_v25 = vpop.xlane.xlu2 %157 }
  0x9e   : > { %v170_v32 = vmul.f32 %v165_v16, %v158_v25 }
  0x9f   : > { %v541_v21 = vsub.f32 %v146_v2, %v168_v19  ;;  %v543_v22 = vsub.f32 %v144_v3, %v166_v20 }
  0xa0   : > { %v557_v35 = vsub.f32 %v148_v5, %v170_v32 }
  0xa1   : > { %v178_v23 = vmul.f32 %v541_v21, %v541_v21  ;;  %v176_v24 = vmul.f32 %v543_v22, %v543_v22 }
  0xa2   : > { %v180_v36 = vmul.f32 %v557_v35, %v557_v35 }
  0xa3   : > { %185 = vadd.xlane.f32.xlu1 %v178_v23  ;;  %181 = vadd.xlane.f32.xlu2 %v176_v24 }
  0xa4   : > { %v156_v26 = vpop.xlane.xlu1 %155  ;;  %v152_v27 = vpop.xlane.xlu0 %151 }
  0xa5   : > { %v169_v28 = vmul.f32 %v165_v16, %v156_v26  ;;  %v167_v29 = vmul.f32 %v165_v16, %v152_v27 }
  0xa7   : > { %v549_v30 = vsub.f32 %v147_v8, %v169_v28  ;;  %v551_v31 = vsub.f32 %v145_v9, %v167_v29 }
  0xa9   : > { %v179_v33 = vmul.f32 %v549_v30, %v549_v30  ;;  %v177_v34 = vmul.f32 %v551_v31, %v551_v31 }
  0xab   : > { %187 = vadd.xlane.f32.xlu2 %v179_v33  ;;  %183 = vadd.xlane.f32.xlu0 %v177_v34 }
  0xb3   : > { %189 = vadd.xlane.f32.xlu0 %v180_v36 }
 0x116   : > { %v186_v37 = vpop.xlane.xlu1 %185  ;;  %v182_v38 = vpop.xlane.xlu2 %181 }
 0x117   : > { %v193_v39 = vmul.f32 %v186_v37, %v165_v16  ;;  %v191_v40 = vmul.f32 %v182_v38, %v165_v16 }
 0x119   : > { %v198_v41 = vadd.f32 1e-05, %v193_v39  ;;  %v196_v42 = vadd.f32 1e-05, %v191_v40 }
 0x11b   : > { %384 = vrsqrt.f32 %v198_v41  ;;  %vm227_vm1 = vweird.f32 %v198_v41  ;;  %vm207_vm5 = vweird.f32 %v196_v42 }
 0x11c   : > { %386 = vrsqrt.f32 %v196_v42 }
 0x11e   : > { %v188_v43 = vpop.xlane.xlu2 %187  ;;  %v184_v44 = vpop.xlane.xlu0 %183 }
 0x11f   : > { %v194_v45 = vmul.f32 %v188_v43, %v165_v16  ;;  %v192_v46 = vmul.f32 %v184_v44, %v165_v16 }
 0x121   : > { %v385_v47 = vpop.eup %384  ;;  %v199_v48 = vadd.f32 1e-05, %v194_v45  ;;  %v197_v49 = vadd.f32 1e-05, %v192_v46 }
 0x122   : > { %v387_v50 = vpop.eup %386  ;;  %v222_v51 = vmul.f32 %v385_v47, %v198_v41  ;;  %vm228_vm2 = vweird.f32 %v385_v47 }
 0x123   : > { %v202_v52 = vmul.f32 %v387_v50, %v196_v42  ;;  %388 = vrsqrt.f32 %v199_v48  ;;  %vm208_vm3 = vweird.f32 %v387_v50  ;;  %vm229_vm4 = vmor %vm227_vm1, %vm228_vm2  ;;  %vm237_vm7 = vweird.f32 %v199_v48 }
 0x124   : > { %v223_v53 = vmul.f32 %v385_v47, %v222_v51  ;;  %390 = vrsqrt.f32 %v197_v49  ;;  %vm209_vm6 = vmor %vm207_vm5, %vm208_vm3  ;;  %vm217_vm11 = vweird.f32 %v197_v49 }
 0x125   : > { %v203_v54 = vmul.f32 %v387_v50, %v202_v52 }
 0x126   : > { %v224_v55 = vmul.f32 0.5, %v223_v53  ;;  %v190_v56 = vpop.xlane.xlu0 %189 }
 0x127   : > { %v204_v57 = vmul.f32 0.5, %v203_v54  ;;  %v195_v58 = vmul.f32 %v190_v56, %v165_v16 }
 0x128   : > { %v225_v59 = vsub.f32 1.5, %v224_v55 }
 0x129   : > { %v389_v60 = vpop.eup %388  ;;  %v205_v61 = vsub.f32 1.5, %v204_v57  ;;  %v200_v62 = vadd.f32 1e-05, %v195_v58 }
 0x12a   : > { %v391_v63 = vpop.eup %390  ;;  %v226_v0 = vmul.f32 %v385_v47, %v225_v59  ;;  %v232_v1 = vmul.f32 %v389_v60, %v199_v48  ;;  %vm238_vm8 = vweird.f32 %v389_v60 }
 0x12b   : > { %v206_v2 = vmul.f32 %v387_v50, %v205_v61  ;;  %v212_v3 = vmul.f32 %v391_v63, %v197_v49  ;;  %392 = vrsqrt.f32 %v200_v62  ;;  %vm218_vm9 = vweird.f32 %v391_v63  ;;  %vm239_vm10 = vmor %vm237_vm7, %vm238_vm8 }
 0x12c   : > { %v230_v4 = vsel %vm229_vm4, %v385_v47, %v226_v0  ;;  %v233_v5 = vmul.f32 %v389_v60, %v232_v1  ;;  %vm219_vm12 = vmor %vm217_vm11, %vm218_vm9  ;;  %vm247_vm14 = vweird.f32 %v200_v62 }
 0x12d   : > { %v253_v6 = vmul.f32 %v230_v4, %v541_v21  ;;  %v210_v7 = vsel %vm209_vm6, %v387_v50, %v206_v2  ;;  %v213_v8 = vmul.f32 %v391_v63, %v212_v3 }
 0x12e   : > { %v251_v9 = vmul.f32 %v210_v7, %v543_v22  ;;  %v234_v10 = vmul.f32 0.5, %v233_v5 }
 0x12f   : > { %258 = vst [vmem:[%s566_s19 + $0x10] sm:$0xff] %v253_v6  ;;  %v214_v11 = vmul.f32 0.5, %v213_v8 }
 0x130   : > { %256 = vst [vmem:[%s566_s19] sm:$0xff] %v251_v9  ;;  %v235_v12 = vsub.f32 1.5, %v234_v10 }
 0x131   : > { %v393_v13 = vpop.eup %392  ;;  %v215_v14 = vsub.f32 1.5, %v214_v11 }
 0x132   : > { %v236_v15 = vmul.f32 %v389_v60, %v235_v12  ;;  %v242_v16 = vmul.f32 %v393_v13, %v200_v62  ;;  %vm248_vm13 = vweird.f32 %v393_v13 }
 0x133   : > { %v216_v17 = vmul.f32 %v391_v63, %v215_v14  ;;  %vm249_vm15 = vmor %vm247_vm14, %vm248_vm13 }
 0x134   : > { %v240_v18 = vsel %vm239_vm10, %v389_v60, %v236_v15  ;;  %v243_v19 = vmul.f32 %v393_v13, %v242_v16 }
 0x135   : > { %v254_v20 = vmul.f32 %v240_v18, %v549_v30  ;;  %v220_v21 = vsel %vm219_vm12, %v391_v63, %v216_v17 }
 0x136   : > { %v252_v22 = vmul.f32 %v220_v21, %v551_v31  ;;  %v244_v23 = vmul.f32 0.5, %v243_v19 }
 0x137   : > { %259 = vst [vmem:[%s566_s19 + $0x18] sm:$0xff] %v254_v20 }
 0x138   : > { %257 = vst [vmem:[%s566_s19 + $0x8] sm:$0xff] %v252_v22  ;;  %v245_v24 = vsub.f32 1.5, %v244_v23 }
 0x13a   : > { %v246_v25 = vmul.f32 %v393_v13, %v245_v24 }
 0x13c   : > { %v250_v26 = vsel %vm249_vm15, %v393_v13, %v246_v25 }
 0x13d   : > { %v255_v27 = vmul.f32 %v250_v26, %v557_v35 }
 0x13f   : > { %260 = vst [vmem:[%s566_s19 + $0x20] sm:$0xff] %v255_v27 }
 0x140 PF: > { %p11_p7 = scmp.ge.s32.totalorder %s495_s11, 4   ;;  %s595_s6 = smov %s450_s7 }
 0x141   : > { %s596_s7 = smov %s454_s8  ;;  %s597_s8 = smov %s505_s14 }
 0x142   : > { %s598_s9 = smov %s495_s11  ;;  %13 = sbr.rel (!%p11_p7) target bundleno = 3 (0x3), region = 64 }
 0x147   :  { %282 = vsyncpa [#allocation3], 1 }
 0x148   :  { %284 = vsyncpa [#allocation3 + $0x1], 1 }

// kernel: model_forward.14
= control target key start
LH: loop header
LB: loop body
LE: loop exit
PB: predicated region body
PF: predicated region fallthrough
CT: control target
= control target key end

     0   :  { %9 = vsyncpa [#allocation3], 0  ;;  %s1013_s15 = smov 0   ;;  %s1231_s0 = inlined_call_operand.vmem [shape: f32[2,64,130], index: 0, kind: input, shape index: {}]   ;;  %s1232_s1 = inlined_call_operand.hbm [shape: f32[3,64,64], index: 1, kind: input, shape index: {}]   ;;  %s1233_s2 = inlined_call_operand.vmem [shape: f32[64,1], index: 2, kind: input, shape index: {}]   ;;  %s1234_s3 = inlined_call_operand.vmem [shape: f32[64,1], index: 3, kind: input, shape index: {}]   ;;  %s1235_s4 = inlined_call_operand.vmem [shape: f32[2,64,128], index: 4, kind: output, shape index: {}]  }
   0x1 LB: > { %s146_s18 = sshll.u32 %s1232_s1, 4  ;;  %s770_s19 = sadd.s32 4294967295, %s980_s15   ;;  %s980_s15 = sphi %s1013_s15, %s15_s15   ;;  %s147_s18 = int_to_ptr.hbm [resolvable:$true] %s146_s18 }
   0x2   : > { %p772_p0 = scmp.ge.s32.totalorder %s980_s15, 1  ;;  %p135_p1 = scmp.lt.s32.totalorder %s980_s15, 3 }
   0x3   : > { %p841_p2 = scmp.eq.s32.totalorder %s770_s19, 0  ;;  %s982_s20 = smov [#allocation2]  }
   0x4   : > { %p136_p3 = pnand %p772_p0, %p135_p1  ;;  %s148_s21 = sshll.u32 %s982_s20, 4  ;;  %s149_s21 = int_to_ptr.vmem [resolvable:$true] %s148_s21 }
   0x5   : > { %s983_s22 = smov 128   ;;  %s984_s23 = smov 8  }
   0x6   : > { %p837_p4 = pneg %p136_p3  ;;  %178 = sbr.rel (%p136_p3) target bundleno = 360 (0x168), region = 36 }
   0x8   : > { %p838_p5 = pnand %p841_p2, %p837_p4 }
   0xa   : > { %840 = dma.hbm_to_vmem [thread:$0]  (!%p838_p5), %s147_s18, 3072, %s149_s21, [#allocation3], %s983_s22, %s983_s22, %s984_s23  }
   0xb   : > { %975 = dma.done.wait (%p841_p2), [#allocation3], 3072  }
   0xc   : > { %977 = vsyncadd (%p841_p2), [#allocation3], 4294964224  ;;  %p205_p6 = scmp.lt.s32.totalorder %s770_s19, 1  ;;  %s985_s28 = smov 127   ;;  %v987_v25 = vmov 0   ;;  %v575_v26 = vld [vmem:[%s1233_s2] sm:$0xff] }
   0xd   : > { %s986_s29 = smov 126   ;;  %937 = vset.pattern.permute.xlu1 %v987_v25  ;;  %938 = vset.pattern.permute.xlu2 %v987_v25  ;;  %vm296_vm0 = vcmask 1039360   ;;  %v578_v34 = vld [vmem:[%s1233_s2 + $0x18] sm:$0xff]  ;;  %vm485_vm1 = vcmask 1031168   ;;  %v580_v49 = vld [vmem:[%s1233_s2 + $0x28] sm:$0xff]  ;;  %vm313_vm2 = vcmask 523264  }
   0xe   : > { %s1237_s19 = smov (!%p205_p6, %s770_s19), 1  ;;  %939 = vset.pattern.permute.xlu0 %v987_v25  ;;  %v231_v59 = vld [vmem:[#allocation2] sm:$0xff] }
   0xf   : > { %s807_s24 = sshll.u32 %s1237_s19, 7  ;;  %v631_v63 = vld [vmem:[%s1234_s3] sm:$0xff]  ;;  %s808_s12 = sshll.u32 %s1237_s19, 6 }
  0x10   : > { %s1030_s27 = scalar_lea.vmem %s1231_s0, %s807_s24  ;;  %s1216_s16 = scalar_lea.vmem %s1235_s4, %s808_s12 }
  0x11   : > { %v1033_v0 = vld [vmem:[%s1030_s27 + $0x70] sm:$0xff]  ;;  %v230_v1 = vld [vmem:[%s1030_s27 + $0x78] sm:$0xff]  ;;  %v1037_v2 = vld [vmem:[%s1030_s27 + $0x60] sm:$0xff] }
  0x12   : > { %v857_v3 = vpack.i.bf16 %v230_v1, %v1033_v0  ;;  %v228_v4 = vld [vmem:[%s1030_s27 + $0x68] sm:$0xff]  ;;  %411 = vmatpush.msra.mxu1 %v1033_v0  ;;  %v1044_v6 = vld [vmem:[%s1030_s27 + $0x50] sm:$0xff]  ;;  %v226_v7 = vld [vmem:[%s1030_s27 + $0x58] sm:$0xff] }
  0x13   : > { %v867_v5 = vpack.i.bf16 %v228_v4, %v1037_v2  ;;  %v877_v8 = vpack.i.bf16 %v226_v7, %v1044_v6  ;;  %v1053_v9 = vld [vmem:[%s1030_s27 + $0x40] sm:$0xff]  ;;  %v1058_v10 = vld [vmem:[%s1030_s27 + $0x30] sm:$0xff]  ;;  %v224_v12 = vld [vmem:[%s1030_s27 + $0x48] sm:$0xff] }
  0x14   : > { %858 = vrot.lane.b32.xlu0 %v857_v3, %s985_s28  ;;  %412 = vmatpush.msra.mxu1 %v1037_v2  ;;  %v1062_v11 = vld [vmem:[%s1030_s27 + $0x20] sm:$0xff]  ;;  %v1067_v13 = vld [vmem:[%s1030_s27 + $0x10] sm:$0xff]  ;;  %v887_v15 = vpack.i.bf16 %v224_v12, %v1053_v9  ;;  %v222_v16 = vld [vmem:[%s1030_s27 + $0x38] sm:$0xff] }
  0x15   : > { %868 = vrot.lane.b32.xlu1 %v867_v5, %s985_s28  ;;  %878 = vrot.lane.b32.xlu2 %v877_v8, %s985_s28  ;;  %v1071_v14 = vld [vmem:[%s1030_s27] sm:$0xff]  ;;  %v897_v17 = vpack.i.bf16 %v222_v16, %v1058_v10  ;;  %v220_v18 = vld [vmem:[%s1030_s27 + $0x28] sm:$0xff] }
  0x16   : > { %413 = vmatpush.msra.mxu1 %v1044_v6  ;;  %v907_v19 = vpack.i.bf16 %v220_v18, %v1062_v11  ;;  %v218_v20 = vld [vmem:[%s1030_s27 + $0x18] sm:$0xff]  ;;  %v216_v22 = vld [vmem:[%s1030_s27 + $0x8] sm:$0xff] }
  0x17   : > { %v917_v21 = vpack.i.bf16 %v218_v20, %v1067_v13  ;;  %v927_v23 = vpack.i.bf16 %v216_v22, %v1071_v14  ;;  %v576_v1 = vld [vmem:[%s1233_s2 + $0x8] sm:$0xff]  ;;  %v577_v22 = vld [vmem:[%s1233_s2 + $0x10] sm:$0xff] }
  0x18   : > { %414 = vmatpush.msra.mxu1 %v1053_v9  ;;  %v232_v18 = vld [vmem:[#allocation2 + $0x8] sm:$0xff] }
  0x1a   : > { %415 = vmatpush.msra.mxu1 %v1058_v10 }
  0x1c   : > { %863 = vrot.lane.b32.xlu0 %v857_v3, %s986_s29  ;;  %416 = vmatpush.msra.mxu1 %v1062_v11 }
  0x1d   : > { %873 = vrot.lane.b32.xlu1 %v867_v5, %s986_s29  ;;  %883 = vrot.lane.b32.xlu2 %v877_v8, %s986_s29 }
  0x1e   : > { %417 = vmatpush.msra.mxu1 %v1067_v13 }
  0x20   : > { %418 = vmatpush.msra.mxu1 %v1071_v14 }
  0x21   : > { %789 = vmatmul.msk.f32.vlgmr.msra.gmra.mxu1 %vm313_vm2, %v231_v59  ;;  %v447_v59 = vld [vmem:[#allocation2 + $0x90] sm:$0xff] }
  0x24   : > { %888 = vrot.lane.b32.xlu0 %v887_v15, %s985_s28 }
  0x25   : > { %893 = vrot.lane.b32.xlu1 %v887_v15, %s986_s29  ;;  %898 = vrot.lane.b32.xlu2 %v897_v17, %s985_s28 }
  0x29   : > { %790 = vmatmul.msk.f32.gmra.mxu1 %vm313_vm2, %v232_v18 }
  0x2c   : > { %903 = vrot.lane.b32.xlu0 %v897_v17, %s986_s29 }
  0x2d   : > { %908 = vrot.lane.b32.xlu1 %v907_v19, %s985_s28  ;;  %913 = vrot.lane.b32.xlu2 %v907_v19, %s986_s29  ;;  %v634_v19 = vld [vmem:[%s1234_s3 + $0x18] sm:$0xff] }
  0x34   : > { %918 = vrot.lane.b32.xlu0 %v917_v21, %s985_s28 }
  0x35   : > { %923 = vrot.lane.b32.xlu1 %v917_v21, %s986_s29  ;;  %928 = vrot.lane.b32.xlu2 %v927_v23, %s985_s28 }
  0x3c   : > { %933 = vrot.lane.b32.xlu0 %v927_v23, %s986_s29  ;;  %v579_v23 = vld [vmem:[%s1233_s2 + $0x20] sm:$0xff] }
  0x3d   : > { %585 = vperm.xlu1 %937, %v575_v26   ;;  %590 = vperm.xlu2 %938, %v576_v1   ;;  %v450_v1 = vld [vmem:[#allocation2 + $0xa8] sm:$0xff] }
  0x44   : > { %595 = vperm.xlu0 %939, %v577_v22  }
  0x45   : > { %600 = vperm.xlu1 %937, %v578_v34   ;;  %605 = vperm.xlu2 %938, %v579_v23   ;;  %v233_v34 = vld [vmem:[#allocation2 + $0x10] sm:$0xff] }
  0x46   : > { %791 = vmatmul.msk.f32.gmra.mxu1 %vm313_vm2, %v233_v34 }
  0x4d   : > { %610 = vperm.xlu1 %937, %v580_v49  }
  0x55   : > { %641 = vperm.xlu1 %937, %v631_v63   ;;  %v452_v63 = vld [vmem:[#allocation2 + $0xb8] sm:$0xff] }
  0x5d   : > { %656 = vperm.xlu1 %937, %v634_v19  }
  0x6f   : > { %v879_v24 = vpop.permute.xlu2 %878 }
  0x70   : > { %v881_v31 = vunpack.i.h.bf16 %v879_v24  ;;  %v880_v32 = vunpack.i.l.bf16 %v879_v24 }
  0x72   : > { %v302_v39 = vsel %vm296_vm0, %v880_v32, %v881_v31 }
  0x77   : > { %v884_v27 = vpop.permute.xlu2 %883 }
  0x78   : > { %v886_v44 = vunpack.i.h.bf16 %v884_v27  ;;  %v885_v45 = vunpack.i.l.bf16 %v884_v27 }
  0x7a   : > { %v1108_v52 = vsel %vm485_vm1, %v885_v45, %v886_v44  ;;  %v240_v44 = vld [vmem:[#allocation2 + $0x40] sm:$0xff] }
  0x7f   : > { %v899_v41 = vpop.permute.xlu2 %898 }
  0x80   : > { %v901_v53 = vunpack.i.h.bf16 %v899_v41  ;;  %v900_v54 = vunpack.i.l.bf16 %v899_v41 }
  0x82   : > { %v300_v4 = vsel %vm296_vm0, %v900_v54, %v901_v53  ;;  %v445_v53 = vld [vmem:[#allocation2 + $0x80] sm:$0xff]  ;;  %v632_v54 = vld [vmem:[%s1234_s3 + $0x8] sm:$0xff] }
  0x86   : > { %v859_v28 = vpop.permute.xlu0 %858 }
  0x87   : > { %v861_v29 = vunpack.i.h.bf16 %v859_v28  ;;  %v860_v30 = vunpack.i.l.bf16 %v859_v28  ;;  %v869_v33 = vpop.permute.xlu1 %868  ;;  %v914_v62 = vpop.permute.xlu2 %913 }
  0x88   : > { %v871_v35 = vunpack.i.h.bf16 %v869_v33  ;;  %v870_v36 = vunpack.i.l.bf16 %v869_v33  ;;  %v916_v7 = vunpack.i.h.bf16 %v914_v62  ;;  %v915_v8 = vunpack.i.l.bf16 %v914_v62  ;;  %v245_v62 = vld [vmem:[#allocation2 + $0x68] sm:$0xff] }
  0x89   : > { %v304_v37 = vsel %vm296_vm0, %v860_v30, %v861_v29 }
  0x8a   : > { %346 = vmatpush.msra.mxu0 %v304_v37  ;;  %809 = vmatpush.msra.mxu3 %v304_v37  ;;  %v303_v38 = vsel %vm296_vm0, %v870_v36, %v871_v35  ;;  %v1139_v25 = vsel %vm485_vm1, %v915_v8, %v916_v7  ;;  %v637_v35 = vld [vmem:[%s1234_s3 + $0x30] sm:$0xff] }
  0x8b   : > { %671 = vperm.xlu1 %937, %v637_v35  }
  0x8c   : > { %347 = vmatpush.msra.mxu0 %v303_v38  ;;  %810 = vmatpush.msra.mxu3 %v303_v38  ;;  %v582_v38 = vld [vmem:[%s1233_s2 + $0x38] sm:$0xff] }
  0x8d   : > { %620 = vperm.xlu0 %939, %v582_v38  }
  0x8e   : > { %v864_v40 = vpop.permute.xlu0 %863  ;;  %348 = vmatpush.msra.mxu0 %v302_v39  ;;  %811 = vmatpush.msra.mxu3 %v302_v39  ;;  %v581_v39 = vld [vmem:[%s1233_s2 + $0x30] sm:$0xff] }
  0x8f   : > { %v866_v42 = vunpack.i.h.bf16 %v864_v40  ;;  %v865_v43 = vunpack.i.l.bf16 %v864_v40  ;;  %v874_v46 = vpop.permute.xlu1 %873  ;;  %v929_v27 = vpop.permute.xlu2 %928  ;;  %615 = vperm.xlu2 %938, %v581_v39  }
  0x90   : > { %v876_v47 = vunpack.i.h.bf16 %v874_v46  ;;  %v875_v48 = vunpack.i.l.bf16 %v874_v46  ;;  %v931_v28 = vunpack.i.h.bf16 %v929_v27  ;;  %v930_v29 = vunpack.i.l.bf16 %v929_v27  ;;  %v234_v46 = vld [vmem:[#allocation2 + $0x18] sm:$0xff] }
  0x91   : > { %v1101_v50 = vsel %vm485_vm1, %v865_v43, %v866_v42  ;;  %v246_v42 = vld [vmem:[#allocation2 + $0x70] sm:$0xff]  ;;  %792 = vmatmul.msk.f32.gmra.mxu1 %vm313_vm2, %v234_v46 }
  0x92   : > { %534 = vmatpush.msra.mxu2 %v1101_v50  ;;  %v1105_v51 = vsel %vm485_vm1, %v875_v48, %v876_v47  ;;  %v297_v41 = vsel %vm296_vm0, %v930_v29, %v931_v28  ;;  %v633_v47 = vld [vmem:[%s1234_s3 + $0x10] sm:$0xff] }
  0x94   : > { %535 = vmatpush.msra.mxu2 %v1105_v51 }
  0x95   : > { %651 = vperm.xlu0 %939, %v633_v47  }
  0x96   : > { %v889_v55 = vpop.permute.xlu0 %888  ;;  %536 = vmatpush.msra.mxu2 %v1108_v52 }
  0x97   : > { %v891_v56 = vunpack.i.h.bf16 %v889_v55  ;;  %v890_v57 = vunpack.i.l.bf16 %v889_v55  ;;  %v894_v58 = vpop.permute.xlu1 %893  ;;  %646 = vperm.xlu2 %938, %v632_v54  }
  0x98   : > { %v896_v60 = vunpack.i.h.bf16 %v894_v58  ;;  %v895_v61 = vunpack.i.l.bf16 %v894_v58  ;;  %v242_v58 = vld [vmem:[#allocation2 + $0x50] sm:$0xff] }
  0x99   : > { %v301_v3 = vsel %vm296_vm0, %v890_v57, %v891_v56  ;;  %v241_v56 = vld [vmem:[#allocation2 + $0x48] sm:$0xff] }
  0x9a   : > { %349 = vmatpush.msra.mxu0 %v301_v3  ;;  %812 = vmatpush.msra.mxu3 %v301_v3  ;;  %v1122_v5 = vsel %vm485_vm1, %v895_v61, %v896_v60  ;;  %v636_v57 = vld [vmem:[%s1234_s3 + $0x28] sm:$0xff]  ;;  %v243_v60 = vld [vmem:[#allocation2 + $0x58] sm:$0xff]  ;;  %v449_v61 = vld [vmem:[#allocation2 + $0xa0] sm:$0xff] }
  0x9b   : > { %537 = vmatpush.msra.mxu2 %v1122_v5 }
  0x9c   : > { %350 = vmatpush.msra.mxu0 %v300_v4  ;;  %813 = vmatpush.msra.mxu3 %v300_v4  ;;  %v591_v4 = vpop.permute.xlu2 %590 }
  0x9d   : > { %666 = vperm.xlu0 %939, %v636_v57  }
  0x9e   : > { %v904_v12 = vpop.permute.xlu0 %903 }
  0x9f   : > { %v906_v15 = vunpack.i.h.bf16 %v904_v12  ;;  %v905_v16 = vunpack.i.l.bf16 %v904_v12  ;;  %v909_v17 = vpop.permute.xlu1 %908 }
  0xa0   : > { %v911_v20 = vunpack.i.h.bf16 %v909_v17  ;;  %v910_v21 = vunpack.i.l.bf16 %v909_v17 }
  0xa1   : > { %v1136_v24 = vsel %vm485_vm1, %v905_v16, %v906_v15 }
  0xa2   : > { %538 = vmatpush.msra.mxu2 %v1136_v24  ;;  %v299_v26 = vsel %vm296_vm0, %v910_v21, %v911_v20 }
  0xa3   : > { %351 = vmatpush.msra.mxu0 %v299_v26  ;;  %814 = vmatpush.msra.mxu3 %v299_v26 }
  0xa4   : > { %539 = vmatpush.msra.mxu2 %v1139_v25  ;;  %v1208_v12 = vpop.permute.xlu2 %605 }
  0xa6   : > { %v919_v30 = vpop.permute.xlu0 %918 }
  0xa7   : > { %v921_v31 = vunpack.i.h.bf16 %v919_v30  ;;  %v920_v32 = vunpack.i.l.bf16 %v919_v30  ;;  %v924_v33 = vpop.permute.xlu1 %923 }
  0xa8   : > { %v926_v36 = vunpack.i.h.bf16 %v924_v33  ;;  %v925_v37 = vunpack.i.l.bf16 %v924_v33 }
  0xa9   : > { %v298_v40 = vsel %vm296_vm0, %v920_v32, %v921_v31 }
  0xaa   : > { %352 = vmatpush.msra.mxu0 %v298_v40  ;;  %815 = vmatpush.msra.mxu3 %v298_v40  ;;  %v487_v43 = vsel %vm485_vm1, %v925_v37, %v926_v36 }
  0xab   : > { %540 = vmatpush.msra.mxu2 %v487_v43 }
  0xac   : > { %816 = vmatpush.msra.mxu3 %v297_v41  ;;  %353 = vmatpush.msra.mxu0 %v297_v41 }
  0xad   : > { %787 = vmatmul.msk.f32.vlgmr.msra.gmra.mxu3 %vm313_vm2, %v246_v42  ;;  %781 = vmatmul.msk.f32.vlgmr.msra.gmra.mxu0 %vm313_vm2, %v240_v44 }
  0xae   : > { %817 = vmatpush.msrb.mxu3 %v1033_v0  ;;  %v934_v45 = vpop.permute.xlu0 %933  ;;  %v247_v0 = vld [vmem:[#allocation2 + $0x78] sm:$0xff] }
  0xaf   : > { %v936_v48 = vunpack.i.h.bf16 %v934_v45  ;;  %v935_v49 = vunpack.i.l.bf16 %v934_v45  ;;  %v586_v3 = vpop.permute.xlu1 %585 }
  0xb0   : > { %818 = vmatpush.msrb.mxu3 %v1037_v2  ;;  %v235_v2 = vld [vmem:[#allocation2 + $0x20] sm:$0xff] }
  0xb1   : > { %v486_v55 = vsel %vm485_vm1, %v935_v49, %v936_v48  ;;  %793 = vmatmul.msk.f32.gmra.mxu1 %vm313_vm2, %v235_v2 }
  0xb2   : > { %819 = vmatpush.msrb.mxu3 %v1044_v6  ;;  %541 = vmatpush.msra.mxu2 %v486_v55  ;;  %v446_v6 = vld [vmem:[#allocation2 + $0x88] sm:$0xff] }
  0xb3   : > { %797 = vmatmul.msk.f32.vlgmr.msra.gmra.mxu2 %vm313_vm2, %v445_v53 }
  0xb4   : > { %820 = vmatpush.msrb.mxu3 %v1053_v9  ;;  %v635_v9 = vld [vmem:[%s1234_s3 + $0x20] sm:$0xff] }
  0xb5   : > { %788 = vmatmul.msk.f32.gmra.mxu3 %vm313_vm2, %v247_v0  ;;  %782 = vmatmul.msk.f32.gmra.mxu0 %vm313_vm2, %v241_v56 }
  0xb6   : > { %821 = vmatpush.msrb.mxu3 %v1058_v10  ;;  %v237_v10 = vld [vmem:[#allocation2 + $0x30] sm:$0xff]  ;;  %661 = vperm.xlu2 %938, %v635_v9   ;;  %v596_v20 = vpop.permute.xlu0 %595 }
  0xb7   : > { %v601_v7 = vpop.permute.xlu1 %600 }
  0xb8   : > { %822 = vmatpush.msrb.mxu3 %v1062_v11  ;;  %v236_v11 = vld [vmem:[#allocation2 + $0x28] sm:$0xff] }
  0xb9   : > { %794 = vmatmul.msk.f32.gmra.mxu1 %vm313_vm2, %v236_v11 }
  0xba   : > { %823 = vmatpush.msrb.mxu3 %v1067_v13  ;;  %v638_v13 = vld [vmem:[%s1234_s3 + $0x38] sm:$0xff] }
  0xbb   : > { %798 = vmatmul.msk.f32.gmra.mxu2 %vm313_vm2, %v446_v6 }
  0xbc   : > { %824 = vmatpush.msrb.mxu3 %v1071_v14  ;;  %v238_v14 = vld [vmem:[#allocation2 + $0x38] sm:$0xff] }
  0xbd   : > { %783 = vmatmul.msk.f32.gmra.mxu0 %vm313_vm2, %v242_v58  ;;  %795 = vmatmul.msk.f32.vlgmr.msrb.gmra.mxu3 %vm313_vm2, %v237_v10 }
  0xbe   : > { %825 = vmatpush.msra.mxu3 %v1101_v50  ;;  %676 = vperm.xlu2 %938, %v638_v13   ;;  %v448_v50 = vld [vmem:[#allocation2 + $0x98] sm:$0xff] }
  0xbf   : > { %v1210_v16 = vpop.permute.xlu1 %610 }
  0xc0   : > { %826 = vmatpush.msra.mxu3 %v1105_v51  ;;  %v244_v51 = vld [vmem:[#allocation2 + $0x60] sm:$0xff] }
  0xc2   : > { %827 = vmatpush.msra.mxu3 %v1108_v52  ;;  %v451_v52 = vld [vmem:[#allocation2 + $0xb0] sm:$0xff] }
  0xc3   : > { %799 = vmatmul.msk.f32.gmra.mxu2 %vm313_vm2, %v447_v59 }
  0xc4   : > { %828 = vmatpush.msra.mxu3 %v1122_v5  ;;  %v420_v5 = vpop.f32.mrf.mxu1 }
  0xc5   : > { %784 = vmatmul.msk.f32.gmra.mxu0 %vm313_vm2, %v243_v60  ;;  %796 = vmatmul.msk.f32.gmra.mxu3 %vm313_vm2, %v238_v14 }
  0xc6   : > { %829 = vmatpush.msra.mxu3 %v1136_v24 }
  0xc7   : > { %v642_v27 = vpop.permute.xlu1 %641 }
  0xc8   : > { %830 = vmatpush.msra.mxu3 %v1139_v25 }
  0xca   : > { %831 = vmatpush.msra.mxu3 %v487_v43 }
  0xcb   : > { %800 = vmatmul.msk.f32.gmra.mxu2 %vm313_vm2, %v448_v50 }
  0xcc   : > { %832 = vmatpush.msra.mxu3 %v486_v55  ;;  %v423_v15 = vpop.f32.mrf.mxu1 }
  0xcd   : > { %785 = vmatmul.msk.f32.gmra.mxu0 %vm313_vm2, %v244_v51  ;;  %803 = vmatmul.msk.f32.vlgmr.msra.gmra.mxu3 %vm313_vm2, %v451_v52 }
  0xcf   : > { %v657_v48 = vpop.permute.xlu1 %656 }
  0xd3   : > { %801 = vmatmul.msk.f32.gmra.mxu2 %vm313_vm2, %v449_v61 }
  0xd4   : > { %v426_v26 = vpop.f32.mrf.mxu1 }
  0xd5   : > { %786 = vmatmul.msk.f32.gmra.mxu0 %vm313_vm2, %v245_v62  ;;  %804 = vmatmul.msk.f32.gmra.mxu3 %vm313_vm2, %v452_v63 }
  0xdb   : > { %802 = vmatmul.msk.f32.gmra.mxu2 %vm313_vm2, %v450_v1 }
  0xe9   : > { %v616_v23 = vpop.permute.xlu2 %615 }
  0xf1   : > { %v647_v37 = vpop.permute.xlu2 %646 }
  0xfd   : > { %v672_v60 = vpop.permute.xlu1 %671 }
  0xff   : > { %v621_v34 = vpop.permute.xlu0 %620 }
 0x107   : > { %v652_v47 = vpop.permute.xlu0 %651 }
 0x10e   : > { %v429_v40 = vpop.f32.mrf.mxu1 }
 0x110   : > { %v662_v10 = vpop.permute.xlu2 %661 }
 0x12a   : > { %v355_v8 = vpop.f32.mrf.mxu0 }
 0x12b   : > { %v421_v19 = vadd.f32 %v420_v5, %v355_v8 }
 0x12e   : > { %v432_v55 = vpop.f32.mrf.mxu1 }
 0x130   : > { %v373_v17 = vpop.f32.mrf.mxu3 }
 0x132   : > { %v358_v18 = vpop.f32.mrf.mxu0 }
 0x133   : > { %v424_v30 = vadd.f32 %v423_v15, %v358_v18 }
 0x136   : > { %v543_v21 = vpop.f32.mrf.mxu2  ;;  %v435_v1 = vpop.f32.mrf.mxu1 }
 0x137   : > { %v567_v22 = vadd.f32 %v543_v21, %v421_v19 }
 0x138   : > { %v376_v24 = vpop.f32.mrf.mxu3 }
 0x139   : > { %v623_v25 = vmul.f32 %v586_v3, %v567_v22 }
 0x13a   : > { %v361_v28 = vpop.f32.mrf.mxu0 }
 0x13b   : > { %v679_v29 = vadd.f32 %v642_v27, %v623_v25  ;;  %v427_v39 = vadd.f32 %v426_v26, %v361_v28 }
 0x13d   : > { %v687_v31 = vmax.f32 %v679_v29, 0.0 }
 0x13e   : > { %v546_v32 = vpop.f32.mrf.mxu2 }
 0x13f   : > { %695 = vst [vmem:[%s1216_s16] sm:$0xff] %v687_v31  ;;  %v568_v33 = vadd.f32 %v546_v32, %v424_v30 }
 0x140   : > { %v438_v36 = vpop.f32.mrf.mxu3 }
 0x141   : > { %v624_v35 = vmul.f32 %v591_v4, %v568_v33  ;;  %v439_v57 = vadd.f32 %v438_v36, %v373_v17  ;;  %v677_v17 = vpop.permute.xlu2 %676 }
 0x142   : > { %v364_v41 = vpop.f32.mrf.mxu0 }
 0x143   : > { %v680_v38 = vadd.f32 %v647_v37, %v624_v35  ;;  %v430_v53 = vadd.f32 %v429_v40, %v364_v41 }
 0x145   : > { %v688_v42 = vmax.f32 %v680_v38, 0.0 }
 0x146   : > { %v549_v43 = vpop.f32.mrf.mxu2 }
 0x147   : > { %696 = vst [vmem:[%s1216_s16 + $0x8] sm:$0xff] %v688_v42  ;;  %v569_v44 = vadd.f32 %v549_v43, %v427_v39 }
 0x148   : > { %v441_v46 = vpop.f32.mrf.mxu3 }
 0x149   : > { %v625_v45 = vmul.f32 %v596_v20, %v569_v44  ;;  %v442_v61 = vadd.f32 %v441_v46, %v376_v24  ;;  %v667_v24 = vpop.permute.xlu0 %666 }
 0x14a   : > { %v367_v56 = vpop.f32.mrf.mxu0 }
 0x14b   : > { %v681_v49 = vadd.f32 %v652_v47, %v625_v45  ;;  %v433_v59 = vadd.f32 %v432_v55, %v367_v56 }
 0x14d   : > { %v689_v54 = vmax.f32 %v681_v49, 0.0 }
 0x14e   : > { %v552_v0 = vpop.f32.mrf.mxu2 }
 0x14f   : > { %697 = vst [vmem:[%s1216_s16 + $0x10] sm:$0xff] %v689_v54  ;;  %v570_v2 = vadd.f32 %v552_v0, %v430_v53 }
 0x150   : > { %v561_v9 = vpop.f32.mrf.mxu3 }
 0x151   : > { %v626_v6 = vmul.f32 %v601_v7, %v570_v2  ;;  %v573_v58 = vadd.f32 %v561_v9, %v439_v57 }
 0x152   : > { %v370_v63 = vpop.f32.mrf.mxu0 }
 0x153   : > { %v682_v11 = vadd.f32 %v657_v48, %v626_v6  ;;  %v629_v13 = vmul.f32 %v616_v23, %v573_v58  ;;  %v436_v8 = vadd.f32 %v435_v1, %v370_v63 }
 0x155   : > { %v690_v14 = vmax.f32 %v682_v11, 0.0  ;;  %v685_v50 = vadd.f32 %v672_v60, %v629_v13 }
 0x156   : > { %v555_v51 = vpop.f32.mrf.mxu2 }
 0x157   : > { %698 = vst [vmem:[%s1216_s16 + $0x18] sm:$0xff] %v690_v14  ;;  %v571_v52 = vadd.f32 %v555_v51, %v433_v59  ;;  %v693_v62 = vmax.f32 %v685_v50, 0.0 }
 0x158   : > { %v564_v4 = vpop.f32.mrf.mxu3 }
 0x159   : > { %v627_v3 = vmul.f32 %v1208_v12, %v571_v52  ;;  %701 = vst [vmem:[%s1216_s16 + $0x30] sm:$0xff] %v693_v62  ;;  %v574_v5 = vadd.f32 %v564_v4, %v442_v61 }
 0x15b   : > { %v683_v7 = vadd.f32 %v662_v10, %v627_v3  ;;  %v630_v15 = vmul.f32 %v621_v34, %v574_v5 }
 0x15d   : > { %v691_v18 = vmax.f32 %v683_v7, 0.0  ;;  %v686_v19 = vadd.f32 %v677_v17, %v630_v15 }
 0x15e   : > { %v558_v20 = vpop.f32.mrf.mxu2 }
 0x15f   : > { %699 = vst [vmem:[%s1216_s16 + $0x20] sm:$0xff] %v691_v18  ;;  %v572_v21 = vadd.f32 %v558_v20, %v436_v8  ;;  %v694_v22 = vmax.f32 %v686_v19, 0.0 }
 0x161   : > { %v628_v23 = vmul.f32 %v1210_v16, %v572_v21  ;;  %702 = vst [vmem:[%s1216_s16 + $0x38] sm:$0xff] %v694_v22 }
 0x163   : > { %v684_v12 = vadd.f32 %v667_v24, %v628_v23 }
 0x165   : > { %v692_v25 = vmax.f32 %v684_v12, 0.0 }
 0x167   : > { %700 = vst [vmem:[%s1216_s16 + $0x28] sm:$0xff] %v692_v25 }
 0x168 PF: > { %s15_s15 = sadd.s32 1, %s980_s15  }
 0x169   : > { %p12_p7 = scmp.ge.s32.totalorder %s15_s15, 4  }
 0x16b   :  { %14 = sbr.rel (!%p12_p7) target bundleno = 1 (0x1), region = 73 }
 0x170   :  { %724 = vsyncpa [#allocation3], 1 }
 0x171   :  { %726 = vsyncpa [#allocation3 + $0x1], 1 }

// kernel: model_forward.13
= control target key start
LH: loop header
LB: loop body
LE: loop exit
PB: predicated region body
PF: predicated region fallthrough
CT: control target
= control target key end

     0   :  { %s860_s15 = smov 0   ;;  %s1076_s0 = inlined_call_operand.vmem [shape: f32[2,40,130], index: 0, kind: input, shape index: {}]   ;;  %s1077_s1 = inlined_call_operand.vmem [shape: f32[3,64,40], index: 1, kind: input, shape index: {}]   ;;  %s1078_s2 = inlined_call_operand.vmem [shape: f32[64,1], index: 2, kind: input, shape index: {}]   ;;  %s1079_s3 = inlined_call_operand.vmem [shape: f32[64,1], index: 3, kind: input, shape index: {}]   ;;  %s1080_s4 = inlined_call_operand.vmem [shape: f32[2,64,128], index: 4, kind: output, shape index: {}]  }
   0x1 LB: > { %s693_s16 = sadd.s32 4294967295, %s830_s15   ;;  %p697_p0 = scmp.ge.s32.totalorder %s830_s15, 1  ;;  %s830_s15 = sphi %s860_s15, %s14_s15  }
   0x2   : > { %p162_p1 = scmp.lt.s32.totalorder %s830_s15, 3 }
   0x4   : > { %p163_p2 = pnand %p697_p0, %p162_p1 }
   0x5   : > { %p188_p3 = scmp.lt.s32.totalorder (!%p163_p2), %s693_s16, 1  ;;  %s832_s21 = smov (!%p163_p2), 127  }
   0x6   : > { %166 = sbr.rel (%p163_p2) target bundleno = 342 (0x156), region = 36  ;;  %s833_s22 = smov (!%p163_p2), 126  }
   0xb   : > { %s1082_s16 = smov (!%p188_p3, %s693_s16), 1  ;;  %v834_v15 = vmov 0   ;;  %v510_v16 = vld [vmem:[%s1078_s2] sm:$0xff]  ;;  %v513_v17 = vld [vmem:[%s1078_s2 + $0x18] sm:$0xff]  ;;  %v515_v19 = vld [vmem:[%s1078_s2 + $0x28] sm:$0xff]  ;;  %vm255_vm0 = vcmask 1039360  }
   0xc   : > { %s759_s17 = smul.u32 80, %s1082_s16  ;;  %821 = vset.pattern.permute.xlu1 %v834_v15  ;;  %822 = vset.pattern.permute.xlu2 %v834_v15  ;;  %vm266_vm1 = vcmask 326656   ;;  %v208_v26 = vld [vmem:[%s1077_s1] sm:$0xff]  ;;  %v511_v31 = vld [vmem:[%s1078_s2 + $0x8] sm:$0xff]  ;;  %vm426_vm2 = vcmask 1031168   ;;  %v569_v42 = vld [vmem:[%s1079_s3 + $0x18] sm:$0xff] }
   0xd   : > { %823 = vset.pattern.permute.xlu0 %v834_v15  ;;  %v566_v27 = vld [vmem:[%s1079_s3] sm:$0xff]  ;;  %v209_v41 = vld [vmem:[%s1077_s1 + $0x8] sm:$0xff]  ;;  %v512_v45 = vld [vmem:[%s1078_s2 + $0x10] sm:$0xff]  ;;  %s743_s5 = sshll.u32 %s1082_s16, 6 }
   0xe   : > { %s192_s20 = scalar_lea.vmem %s1076_s0, %s759_s17  ;;  %v514_v46 = vld [vmem:[%s1078_s2 + $0x20] sm:$0xff]  ;;  %v210_v54 = vld [vmem:[%s1077_s1 + $0x10] sm:$0xff]  ;;  %v517_v59 = vld [vmem:[%s1078_s2 + $0x38] sm:$0xff]  ;;  %s1061_s8 = scalar_lea.vmem %s1080_s4, %s743_s5 }
   0xf   : > { %v874_v0 = vld [vmem:[%s192_s20 + $0x40] sm:$0xff]  ;;  %v207_v1 = vld [vmem:[%s192_s20 + $0x48] sm:$0xff]  ;;  %v876_v2 = vld [vmem:[%s192_s20 + $0x30] sm:$0xff] }
  0x10   : > { %v771_v3 = vpack.i.bf16 %v207_v1, %v874_v0  ;;  %v205_v4 = vld [vmem:[%s192_s20 + $0x38] sm:$0xff]  ;;  %367 = vmatpush.msra.mxu1 %v874_v0  ;;  %v881_v6 = vld [vmem:[%s192_s20 + $0x20] sm:$0xff]  ;;  %v203_v7 = vld [vmem:[%s192_s20 + $0x28] sm:$0xff] }
  0x11   : > { %v781_v5 = vpack.i.bf16 %v205_v4, %v876_v2  ;;  %v791_v8 = vpack.i.bf16 %v203_v7, %v881_v6  ;;  %v886_v9 = vld [vmem:[%s192_s20 + $0x10] sm:$0xff]  ;;  %v889_v10 = vld [vmem:[%s192_s20] sm:$0xff]  ;;  %v201_v11 = vld [vmem:[%s192_s20 + $0x18] sm:$0xff] }
  0x12   : > { %772 = vrot.lane.b32.xlu0 %v771_v3, %s832_s21  ;;  %368 = vmatpush.msra.mxu1 %v876_v2  ;;  %v801_v12 = vpack.i.bf16 %v201_v11, %v886_v9  ;;  %v199_v13 = vld [vmem:[%s192_s20 + $0x8] sm:$0xff]  ;;  %v572_v55 = vld [vmem:[%s1079_s3 + $0x30] sm:$0xff] }
  0x13   : > { %782 = vrot.lane.b32.xlu1 %v781_v5, %s832_s21  ;;  %792 = vrot.lane.b32.xlu2 %v791_v8, %s832_s21  ;;  %v811_v14 = vpack.i.bf16 %v199_v13, %v889_v10  ;;  %v516_v62 = vld [vmem:[%s1078_s2 + $0x30] sm:$0xff] }
  0x14   : > { %369 = vmatpush.msra.mxu1 %v881_v6  ;;  %v568_v11 = vld [vmem:[%s1079_s3 + $0x10] sm:$0xff] }
  0x16   : > { %370 = vmatpush.msra.mxu1 %v886_v9 }
  0x18   : > { %371 = vmatpush.msra.mxu1 %v889_v10 }
  0x19   : > { %717 = vmatmul.msk.f32.vlgmr.msra.gmra.mxu1 %vm266_vm1, %v208_v26  ;;  %v705_v26 = vld [vmem:[%s1077_s1 + $0x60] sm:$0xff] }
  0x1a   : > { %777 = vrot.lane.b32.xlu0 %v771_v3, %s833_s22  ;;  %v707_v3 = vld [vmem:[%s1077_s1 + $0x70] sm:$0xff] }
  0x1b   : > { %787 = vrot.lane.b32.xlu1 %v781_v5, %s833_s22  ;;  %797 = vrot.lane.b32.xlu2 %v791_v8, %s833_s22  ;;  %v701_v5 = vld [vmem:[%s1077_s1 + $0x40] sm:$0xff]  ;;  %v211_v8 = vld [vmem:[%s1077_s1 + $0x18] sm:$0xff] }
  0x21   : > { %718 = vmatmul.msk.f32.gmra.mxu1 %vm266_vm1, %v209_v41 }
  0x22   : > { %802 = vrot.lane.b32.xlu0 %v801_v12, %s832_s21 }
  0x23   : > { %807 = vrot.lane.b32.xlu1 %v801_v12, %s833_s22  ;;  %812 = vrot.lane.b32.xlu2 %v811_v14, %s832_s21 }
  0x29   : > { %719 = vmatmul.msk.f32.gmra.mxu1 %vm266_vm1, %v210_v54 }
  0x2a   : > { %817 = vrot.lane.b32.xlu0 %v811_v14, %s833_s22  ;;  %v725_v14 = vld [vmem:[%s1077_s1 + $0x80] sm:$0xff] }
  0x2b   : > { %520 = vperm.xlu1 %821, %v510_v16   ;;  %525 = vperm.xlu2 %822, %v511_v31   ;;  %v702_v16 = vld [vmem:[%s1077_s1 + $0x48] sm:$0xff] }
  0x2c   : > { %v730_v31 = vld [vmem:[%s1077_s1 + $0xa8] sm:$0xff] }
  0x31   : > { %720 = vmatmul.msk.f32.gmra.mxu1 %vm266_vm1, %v211_v8 }
  0x32   : > { %530 = vperm.xlu0 %823, %v512_v45  }
  0x33   : > { %535 = vperm.xlu1 %821, %v513_v17   ;;  %540 = vperm.xlu2 %822, %v514_v46   ;;  %v571_v17 = vld [vmem:[%s1079_s3 + $0x28] sm:$0xff] }
  0x3a   : > { %555 = vperm.xlu0 %823, %v517_v59  }
  0x3b   : > { %545 = vperm.xlu1 %821, %v515_v19   ;;  %550 = vperm.xlu2 %822, %v516_v62   ;;  %v214_v19 = vld [vmem:[%s1077_s1 + $0x30] sm:$0xff] }
  0x42   : > { %586 = vperm.xlu0 %823, %v568_v11  }
  0x43   : > { %576 = vperm.xlu1 %821, %v566_v27   ;;  %v731_v27 = vld [vmem:[%s1077_s1 + $0xb0] sm:$0xff] }
  0x4a   : > { %601 = vperm.xlu0 %823, %v571_v17  }
  0x4b   : > { %591 = vperm.xlu1 %821, %v569_v42  }
  0x53   : > { %606 = vperm.xlu1 %821, %v572_v55  }
  0x6d   : > { %v793_v18 = vpop.permute.xlu2 %792 }
  0x6e   : > { %v795_v21 = vunpack.i.h.bf16 %v793_v18  ;;  %v794_v24 = vunpack.i.l.bf16 %v793_v18  ;;  %v726_v18 = vld [vmem:[%s1077_s1 + $0x88] sm:$0xff] }
  0x70   : > { %v258_v34 = vsel %vm255_vm0, %v794_v24, %v795_v21  ;;  %v727_v21 = vld [vmem:[%s1077_s1 + $0x90] sm:$0xff]  ;;  %v215_v24 = vld [vmem:[%s1077_s1 + $0x38] sm:$0xff] }
  0x75   : > { %v798_v30 = vpop.permute.xlu2 %797 }
  0x76   : > { %v800_v38 = vunpack.i.h.bf16 %v798_v30  ;;  %v799_v39 = vunpack.i.l.bf16 %v798_v30  ;;  %v732_v30 = vld [vmem:[%s1077_s1 + $0xb8] sm:$0xff] }
  0x78   : > { %v429_v50 = vsel %vm426_vm2, %v799_v39, %v800_v38 }
  0x7d   : > { %v813_v49 = vpop.permute.xlu2 %812 }
  0x7e   : > { %v815_v51 = vunpack.i.h.bf16 %v813_v49  ;;  %v814_v52 = vunpack.i.l.bf16 %v813_v49 }
  0x80   : > { %v256_v1 = vsel %vm255_vm0, %v814_v52, %v815_v51 }
  0x84   : > { %v773_v20 = vpop.permute.xlu0 %772 }
  0x85   : > { %v775_v22 = vunpack.i.h.bf16 %v773_v20  ;;  %v774_v23 = vunpack.i.l.bf16 %v773_v20  ;;  %v783_v25 = vpop.permute.xlu1 %782  ;;  %v213_v20 = vld [vmem:[%s1077_s1 + $0x28] sm:$0xff] }
  0x86   : > { %v785_v28 = vunpack.i.h.bf16 %v783_v25  ;;  %v784_v29 = vunpack.i.l.bf16 %v783_v25  ;;  %v728_v25 = vld [vmem:[%s1077_s1 + $0x98] sm:$0xff] }
  0x87   : > { %v260_v32 = vsel %vm255_vm0, %v774_v23, %v775_v22  ;;  %v573_v22 = vld [vmem:[%s1079_s3 + $0x38] sm:$0xff] }
  0x88   : > { %302 = vmatpush.msra.mxu0 %v260_v32  ;;  %744 = vmatpush.msra.mxu3 %v260_v32  ;;  %v259_v33 = vsel %vm255_vm0, %v784_v29, %v785_v28  ;;  %v704_v23 = vld [vmem:[%s1077_s1 + $0x58] sm:$0xff]  ;;  %v729_v28 = vld [vmem:[%s1077_s1 + $0xa0] sm:$0xff]  ;;  %v706_v29 = vld [vmem:[%s1077_s1 + $0x68] sm:$0xff] }
  0x8a   : > { %303 = vmatpush.msra.mxu0 %v259_v33  ;;  %745 = vmatpush.msra.mxu3 %v259_v33  ;;  %v526_v33 = vpop.permute.xlu2 %525 }
  0x8c   : > { %v778_v35 = vpop.permute.xlu0 %777  ;;  %304 = vmatpush.msra.mxu0 %v258_v34  ;;  %746 = vmatpush.msra.mxu3 %v258_v34 }
  0x8d   : > { %v780_v36 = vunpack.i.h.bf16 %v778_v35  ;;  %v779_v37 = vunpack.i.l.bf16 %v778_v35  ;;  %v788_v40 = vpop.permute.xlu1 %787 }
  0x8e   : > { %v790_v43 = vunpack.i.h.bf16 %v788_v40  ;;  %v789_v44 = vunpack.i.l.bf16 %v788_v40 }
  0x8f   : > { %v431_v47 = vsel %vm426_vm2, %v779_v37, %v780_v36 }
  0x90   : > { %472 = vmatpush.msra.mxu2 %v431_v47  ;;  %v430_v48 = vsel %vm426_vm2, %v789_v44, %v790_v43 }
  0x92   : > { %473 = vmatpush.msra.mxu2 %v430_v48  ;;  %v1053_v37 = vpop.permute.xlu2 %540 }
  0x94   : > { %v803_v53 = vpop.permute.xlu0 %802  ;;  %474 = vmatpush.msra.mxu2 %v429_v50 }
  0x95   : > { %v805_v56 = vunpack.i.h.bf16 %v803_v53  ;;  %v804_v57 = vunpack.i.l.bf16 %v803_v53  ;;  %v808_v58 = vpop.permute.xlu1 %807 }
  0x96   : > { %v810_v60 = vunpack.i.h.bf16 %v808_v58  ;;  %v809_v61 = vunpack.i.l.bf16 %v808_v58  ;;  %v373_v34 = vpop.f32.mrf.mxu1 }
  0x97   : > { %v257_v63 = vsel %vm255_vm0, %v804_v57, %v805_v56 }
  0x98   : > { %305 = vmatpush.msra.mxu0 %v257_v63  ;;  %747 = vmatpush.msra.mxu3 %v257_v63  ;;  %v428_v4 = vsel %vm426_vm2, %v809_v61, %v810_v60 }
  0x99   : > { %475 = vmatpush.msra.mxu2 %v428_v4 }
  0x9a   : > { %748 = vmatpush.msra.mxu3 %v256_v1  ;;  %306 = vmatpush.msra.mxu0 %v256_v1  ;;  %v551_v46 = vpop.permute.xlu2 %550 }
  0x9b   : > { %715 = vmatmul.msk.f32.vlgmr.msra.gmra.mxu3 %vm266_vm1, %v707_v3  ;;  %709 = vmatmul.msk.f32.vlgmr.msra.gmra.mxu0 %vm266_vm1, %v701_v5 }
  0x9c   : > { %749 = vmatpush.msrb.mxu3 %v874_v0  ;;  %v818_v7 = vpop.permute.xlu0 %817  ;;  %v567_v0 = vld [vmem:[%s1079_s3 + $0x8] sm:$0xff] }
  0x9d   : > { %v820_v12 = vunpack.i.h.bf16 %v818_v7  ;;  %v819_v13 = vunpack.i.l.bf16 %v818_v7  ;;  %581 = vperm.xlu2 %822, %v567_v0   ;;  %v521_v32 = vpop.permute.xlu1 %520 }
  0x9e   : > { %750 = vmatpush.msrb.mxu3 %v876_v2  ;;  %v708_v2 = vld [vmem:[%s1077_s1 + $0x78] sm:$0xff]  ;;  %v376_v38 = vpop.f32.mrf.mxu1 }
  0x9f   : > { %v427_v15 = vsel %vm426_vm2, %v819_v13, %v820_v12 }
  0xa0   : > { %751 = vmatpush.msrb.mxu3 %v881_v6  ;;  %476 = vmatpush.msra.mxu2 %v427_v15  ;;  %v212_v6 = vld [vmem:[%s1077_s1 + $0x20] sm:$0xff] }
  0xa1   : > { %733 = vmatmul.msk.f32.vlgmr.msra.gmra.mxu2 %vm266_vm1, %v725_v14  ;;  %721 = vmatmul.msk.f32.gmra.mxu1 %vm266_vm1, %v212_v6 }
  0xa2   : > { %752 = vmatpush.msrb.mxu3 %v886_v9  ;;  %v570_v9 = vld [vmem:[%s1079_s3 + $0x20] sm:$0xff] }
  0xa3   : > { %716 = vmatmul.msk.f32.gmra.mxu3 %vm266_vm1, %v708_v2  ;;  %710 = vmatmul.msk.f32.gmra.mxu0 %vm266_vm1, %v702_v16 }
  0xa4   : > { %753 = vmatpush.msrb.mxu3 %v889_v10  ;;  %v703_v10 = vld [vmem:[%s1077_s1 + $0x50] sm:$0xff]  ;;  %v531_v43 = vpop.permute.xlu0 %530 }
  0xa5   : > { %596 = vperm.xlu2 %822, %v570_v9   ;;  %v536_v35 = vpop.permute.xlu1 %535 }
  0xa6   : > { %754 = vmatpush.msra.mxu3 %v431_v47  ;;  %v379_v49 = vpop.f32.mrf.mxu1 }
  0xa8   : > { %755 = vmatpush.msra.mxu3 %v430_v48 }
  0xa9   : > { %734 = vmatmul.msk.f32.gmra.mxu2 %vm266_vm1, %v726_v18  ;;  %722 = vmatmul.msk.f32.gmra.mxu1 %vm266_vm1, %v213_v20 }
  0xaa   : > { %756 = vmatpush.msra.mxu3 %v429_v50 }
  0xab   : > { %711 = vmatmul.msk.f32.gmra.mxu0 %vm266_vm1, %v703_v10  ;;  %723 = vmatmul.msk.f32.vlgmr.msrb.gmra.mxu3 %vm266_vm1, %v214_v19 }
  0xac   : > { %757 = vmatpush.msra.mxu3 %v428_v4  ;;  %v556_v57 = vpop.permute.xlu0 %555 }
  0xad   : > { %611 = vperm.xlu2 %822, %v573_v22   ;;  %v1055_v39 = vpop.permute.xlu1 %545 }
  0xae   : > { %758 = vmatpush.msra.mxu3 %v427_v15  ;;  %v382_v63 = vpop.f32.mrf.mxu1 }
  0xb1   : > { %735 = vmatmul.msk.f32.gmra.mxu2 %vm266_vm1, %v727_v21 }
  0xb3   : > { %712 = vmatmul.msk.f32.gmra.mxu0 %vm266_vm1, %v704_v23  ;;  %724 = vmatmul.msk.f32.gmra.mxu3 %vm266_vm1, %v215_v24 }
  0xb4   : > { %v587_v11 = vpop.permute.xlu0 %586 }
  0xb5   : > { %v577_v50 = vpop.permute.xlu1 %576 }
  0xb9   : > { %736 = vmatmul.msk.f32.gmra.mxu2 %vm266_vm1, %v728_v25 }
  0xbb   : > { %713 = vmatmul.msk.f32.gmra.mxu0 %vm266_vm1, %v705_v26  ;;  %739 = vmatmul.msk.f32.vlgmr.msra.gmra.mxu3 %vm266_vm1, %v731_v27 }
  0xbd   : > { %v592_v12 = vpop.permute.xlu1 %591 }
  0xc1   : > { %737 = vmatmul.msk.f32.gmra.mxu2 %vm266_vm1, %v729_v28 }
  0xc3   : > { %714 = vmatmul.msk.f32.gmra.mxu0 %vm266_vm1, %v706_v29  ;;  %740 = vmatmul.msk.f32.gmra.mxu3 %vm266_vm1, %v732_v30 }
  0xc5   : > { %v607_v23 = vpop.permute.xlu1 %606 }
  0xc9   : > { %738 = vmatmul.msk.f32.gmra.mxu2 %vm266_vm1, %v730_v31 }
  0xf7   : > { %v582_v60 = vpop.permute.xlu2 %581 }
  0xff   : > { %v597_v19 = vpop.permute.xlu2 %596 }
 0x118   : > { %v308_v36 = vpop.f32.mrf.mxu0 }
 0x119   : > { %v374_v42 = vadd.f32 %v373_v34, %v308_v36 }
 0x11e   : > { %v326_v40 = vpop.f32.mrf.mxu3  ;;  %v385_v15 = vpop.f32.mrf.mxu1 }
 0x120   : > { %v311_v41 = vpop.f32.mrf.mxu0 }
 0x121   : > { %v377_v53 = vadd.f32 %v376_v38, %v311_v41 }
 0x124   : > { %v478_v44 = vpop.f32.mrf.mxu2 }
 0x125   : > { %v502_v45 = vadd.f32 %v478_v44, %v374_v42 }
 0x126   : > { %v329_v47 = vpop.f32.mrf.mxu3  ;;  %v388_v31 = vpop.f32.mrf.mxu1 }
 0x127   : > { %v558_v48 = vmul.f32 %v521_v32, %v502_v45 }
 0x128   : > { %v314_v51 = vpop.f32.mrf.mxu0 }
 0x129   : > { %v614_v52 = vadd.f32 %v577_v50, %v558_v48  ;;  %v380_v62 = vadd.f32 %v379_v49, %v314_v51 }
 0x12b   : > { %v622_v54 = vmax.f32 %v614_v52, 0.0 }
 0x12c   : > { %v481_v55 = vpop.f32.mrf.mxu2 }
 0x12d   : > { %630 = vst [vmem:[%s1061_s8] sm:$0xff] %v622_v54  ;;  %v503_v56 = vadd.f32 %v481_v55, %v377_v53 }
 0x12e   : > { %v391_v59 = vpop.f32.mrf.mxu3 }
 0x12f   : > { %v559_v58 = vmul.f32 %v526_v33, %v503_v56  ;;  %v392_v17 = vadd.f32 %v391_v59, %v326_v40  ;;  %v612_v40 = vpop.permute.xlu2 %611 }
 0x130   : > { %v317_v1 = vpop.f32.mrf.mxu0 }
 0x131   : > { %v615_v61 = vadd.f32 %v582_v60, %v559_v58  ;;  %v383_v14 = vadd.f32 %v382_v63, %v317_v1 }
 0x133   : > { %v623_v3 = vmax.f32 %v615_v61, 0.0 }
 0x134   : > { %v484_v4 = vpop.f32.mrf.mxu2 }
 0x135   : > { %631 = vst [vmem:[%s1061_s8 + $0x8] sm:$0xff] %v623_v3  ;;  %v504_v5 = vadd.f32 %v484_v4, %v380_v62 }
 0x136   : > { %v394_v8 = vpop.f32.mrf.mxu3 }
 0x137   : > { %v560_v7 = vmul.f32 %v531_v43, %v504_v5  ;;  %v395_v28 = vadd.f32 %v394_v8, %v329_v47  ;;  %v602_v47 = vpop.permute.xlu0 %601 }
 0x138   : > { %v320_v16 = vpop.f32.mrf.mxu0 }
 0x139   : > { %v616_v13 = vadd.f32 %v587_v11, %v560_v7  ;;  %v386_v21 = vadd.f32 %v385_v15, %v320_v16 }
 0x13b   : > { %v624_v0 = vmax.f32 %v616_v13, 0.0 }
 0x13c   : > { %v487_v2 = vpop.f32.mrf.mxu2 }
 0x13d   : > { %632 = vst [vmem:[%s1061_s8 + $0x10] sm:$0xff] %v624_v0  ;;  %v505_v6 = vadd.f32 %v487_v2, %v383_v14 }
 0x13e   : > { %v496_v9 = vpop.f32.mrf.mxu3 }
 0x13f   : > { %v561_v18 = vmul.f32 %v536_v35, %v505_v6  ;;  %v508_v10 = vadd.f32 %v496_v9, %v392_v17 }
 0x140   : > { %v323_v30 = vpop.f32.mrf.mxu0 }
 0x141   : > { %v617_v20 = vadd.f32 %v592_v12, %v561_v18  ;;  %v564_v22 = vmul.f32 %v551_v46, %v508_v10  ;;  %v389_v36 = vadd.f32 %v388_v31, %v323_v30 }
 0x143   : > { %v625_v24 = vmax.f32 %v617_v20, 0.0  ;;  %v620_v25 = vadd.f32 %v607_v23, %v564_v22 }
 0x144   : > { %v490_v26 = vpop.f32.mrf.mxu2 }
 0x145   : > { %633 = vst [vmem:[%s1061_s8 + $0x18] sm:$0xff] %v625_v24  ;;  %v506_v27 = vadd.f32 %v490_v26, %v386_v21  ;;  %v628_v29 = vmax.f32 %v620_v25, 0.0 }
 0x146   : > { %v499_v33 = vpop.f32.mrf.mxu3 }
 0x147   : > { %v562_v32 = vmul.f32 %v1053_v37, %v506_v27  ;;  %636 = vst [vmem:[%s1061_s8 + $0x30] sm:$0xff] %v628_v29  ;;  %v509_v34 = vadd.f32 %v499_v33, %v395_v28 }
 0x149   : > { %v618_v35 = vadd.f32 %v597_v19, %v562_v32  ;;  %v565_v38 = vmul.f32 %v556_v57, %v509_v34 }
 0x14b   : > { %v626_v41 = vmax.f32 %v618_v35, 0.0  ;;  %v621_v42 = vadd.f32 %v612_v40, %v565_v38 }
 0x14c   : > { %v493_v43 = vpop.f32.mrf.mxu2 }
 0x14d   : > { %634 = vst [vmem:[%s1061_s8 + $0x20] sm:$0xff] %v626_v41  ;;  %v507_v44 = vadd.f32 %v493_v43, %v389_v36  ;;  %v629_v45 = vmax.f32 %v621_v42, 0.0 }
 0x14f   : > { %v563_v46 = vmul.f32 %v1055_v39, %v507_v44  ;;  %637 = vst [vmem:[%s1061_s8 + $0x38] sm:$0xff] %v629_v45 }
 0x151   : > { %v619_v37 = vadd.f32 %v602_v47, %v563_v46 }
 0x153   : > { %v627_v48 = vmax.f32 %v619_v37, 0.0 }
 0x155   : > { %635 = vst [vmem:[%s1061_s8 + $0x28] sm:$0xff] %v627_v48 }
 0x156 PF: > { %s14_s15 = sadd.s32 1, %s830_s15  }
 0x157   : > { %p11_p4 = scmp.ge.s32.totalorder %s14_s15, 4  }
 0x159   :  { %13 = sbr.rel (!%p11_p4) target bundleno = 1 (0x1), region = 68 }

// kernel: model_forward.18
= control target key start
LH: loop header
LB: loop body
LE: loop exit
PB: predicated region body
PF: predicated region fallthrough
CT: control target
= control target key end

     0   :  { %s1342_s15 = smov 0   ;;  %s2444_s0 = inlined_call_operand.vmem [shape: f32[128,2,64], index: 0, kind: input, shape index: {}]   ;;  %s2445_s1 = inlined_call_operand.vmem [shape: f32[64,1024], index: 1, kind: input, shape index: {}]   ;;  %s2446_s2 = inlined_call_operand.vmem [shape: f32[256,1024], index: 2, kind: input, shape index: {}]   ;;  %s2447_s3 = inlined_call_operand.vmem [shape: f32[1,1024], index: 3, kind: input, shape index: {}]   ;;  %s2448_s4 = inlined_call_operand.vmem [shape: f32[128,2,256], index: 4, kind: output, shape index: {}]  }
   0x1 LB: > { %s1241_s16 = sadd.s32 4294967295, %s1314_s15   ;;  %p1245_p0 = scmp.ge.s32.totalorder %s1314_s15, 1  ;;  %s1314_s15 = sphi %s1342_s15, %s14_s15  }
   0x2   : > { %p161_p1 = scmp.lt.s32.totalorder %s1314_s15, 129 }
   0x4   : > { %p162_p2 = pnand %p1245_p0, %p161_p1 }
   0x5   : > { %p186_p3 = scmp.lt.s32.totalorder (!%p162_p2), %s1241_s16, 127  ;;  %p1249_p4 = scmp.ne.s32.totalorder (!%p162_p2), %s1241_s16, 0 }
   0x6   : > { %165 = sbr.rel (%p162_p2) target bundleno = 364 (0x16c), region = 36 }
   0xb   : > { %s187_s17 = scalar_select %p186_p3, %s1241_s16, 127 }
   0xc   : > { %198 = sbr.rel (%p1249_p4) target bundleno = 20 (0x14), region = 40 }
   0xd   : > { %s1246_s18 = sshll.u32 %s187_s17, 1  ;;  %s1266_s19 = sshll.u32 %s187_s17, 2 }
   0xe   : > { %s1353_s22 = scalar_lea.vmem %s2444_s0, %s1246_s18  ;;  %s1358_s25 = scalar_lea.vmem %s2448_s4, %s1266_s19 }
  0x11   : > { %v1316_v0 = vmov 0.0  }
  0x12   : > { %199 = vst [vmem:[#allocation2] sm:$0xf] %v1316_v0 }
  0x13   : > { %200 = vst [vmem:[#allocation3] sm:$0xf] %v1316_v0 }
  0x14 PF: > { %v387_v1 = vld [vmem:[%s2446_s2 + $0x3c0] sm:$0xff]  ;;  %v388_v3 = vld [vmem:[%s2446_s2 + $0x3c8] sm:$0xff]  ;;  %vm849_vm0 = vcmask 523264  }
  0x15   : > { %v515_v2 = vld [vmem:[%s2446_s2 + $0x7c0] sm:$0xff]  ;;  %529 = vmatpush.msra.mxu0 %v387_v1  ;;  %v516_v4 = vld [vmem:[%s2446_s2 + $0x7c8] sm:$0xff]  ;;  %569 = vmatpush.msra.mxu2 %v388_v3  ;;  %v389_v1 = vld [vmem:[%s2446_s2 + $0x3d0] sm:$0xff] }
  0x16   : > { %549 = vmatpush.msra.mxu1 %v515_v2  ;;  %v379_v5 = vld [vmem:[%s2446_s2 + $0x380] sm:$0xff]  ;;  %589 = vmatpush.msra.mxu3 %v516_v4  ;;  %v380_v7 = vld [vmem:[%s2446_s2 + $0x388] sm:$0xff]  ;;  %v517_v2 = vld [vmem:[%s2446_s2 + $0x7d0] sm:$0xff] }
  0x17   : > { %v507_v6 = vld [vmem:[%s2446_s2 + $0x780] sm:$0xff]  ;;  %v508_v8 = vld [vmem:[%s2446_s2 + $0x788] sm:$0xff]  ;;  %530 = vmatpush.msra.mxu0 %v379_v5  ;;  %570 = vmatpush.msra.mxu2 %v380_v7  ;;  %v390_v3 = vld [vmem:[%s2446_s2 + $0x3d8] sm:$0xff] }
  0x18   : > { %v371_v9 = vld [vmem:[%s2446_s2 + $0x340] sm:$0xff]  ;;  %550 = vmatpush.msra.mxu1 %v507_v6  ;;  %v372_v11 = vld [vmem:[%s2446_s2 + $0x348] sm:$0xff]  ;;  %590 = vmatpush.msra.mxu3 %v508_v8  ;;  %v518_v4 = vld [vmem:[%s2446_s2 + $0x7d8] sm:$0xff] }
  0x19   : > { %v499_v10 = vld [vmem:[%s2446_s2 + $0x740] sm:$0xff]  ;;  %v500_v12 = vld [vmem:[%s2446_s2 + $0x748] sm:$0xff]  ;;  %531 = vmatpush.msra.mxu0 %v371_v9  ;;  %571 = vmatpush.msra.mxu2 %v372_v11  ;;  %v381_v5 = vld [vmem:[%s2446_s2 + $0x390] sm:$0xff] }
  0x1a   : > { %v363_v13 = vld [vmem:[%s2446_s2 + $0x300] sm:$0xff]  ;;  %551 = vmatpush.msra.mxu1 %v499_v10  ;;  %v364_v15 = vld [vmem:[%s2446_s2 + $0x308] sm:$0xff]  ;;  %591 = vmatpush.msra.mxu3 %v500_v12  ;;  %v509_v6 = vld [vmem:[%s2446_s2 + $0x790] sm:$0xff] }
  0x1b   : > { %v491_v14 = vld [vmem:[%s2446_s2 + $0x700] sm:$0xff]  ;;  %v492_v16 = vld [vmem:[%s2446_s2 + $0x708] sm:$0xff]  ;;  %532 = vmatpush.msra.mxu0 %v363_v13  ;;  %572 = vmatpush.msra.mxu2 %v364_v15  ;;  %v382_v7 = vld [vmem:[%s2446_s2 + $0x398] sm:$0xff] }
  0x1c   : > { %v355_v17 = vld [vmem:[%s2446_s2 + $0x2c0] sm:$0xff]  ;;  %552 = vmatpush.msra.mxu1 %v491_v14  ;;  %v356_v19 = vld [vmem:[%s2446_s2 + $0x2c8] sm:$0xff]  ;;  %592 = vmatpush.msra.mxu3 %v492_v16  ;;  %v510_v8 = vld [vmem:[%s2446_s2 + $0x798] sm:$0xff] }
  0x1d   : > { %v483_v18 = vld [vmem:[%s2446_s2 + $0x6c0] sm:$0xff]  ;;  %v484_v20 = vld [vmem:[%s2446_s2 + $0x6c8] sm:$0xff]  ;;  %533 = vmatpush.msra.mxu0 %v355_v17  ;;  %573 = vmatpush.msra.mxu2 %v356_v19  ;;  %v373_v9 = vld [vmem:[%s2446_s2 + $0x350] sm:$0xff] }
  0x1e   : > { %v347_v21 = vld [vmem:[%s2446_s2 + $0x280] sm:$0xff]  ;;  %553 = vmatpush.msra.mxu1 %v483_v18  ;;  %v348_v23 = vld [vmem:[%s2446_s2 + $0x288] sm:$0xff]  ;;  %593 = vmatpush.msra.mxu3 %v484_v20  ;;  %v501_v10 = vld [vmem:[%s2446_s2 + $0x750] sm:$0xff] }
  0x1f   : > { %v475_v22 = vld [vmem:[%s2446_s2 + $0x680] sm:$0xff]  ;;  %v476_v24 = vld [vmem:[%s2446_s2 + $0x688] sm:$0xff]  ;;  %534 = vmatpush.msra.mxu0 %v347_v21  ;;  %574 = vmatpush.msra.mxu2 %v348_v23  ;;  %v374_v11 = vld [vmem:[%s2446_s2 + $0x358] sm:$0xff] }
  0x20   : > { %v339_v25 = vld [vmem:[%s2446_s2 + $0x240] sm:$0xff]  ;;  %554 = vmatpush.msra.mxu1 %v475_v22  ;;  %v340_v27 = vld [vmem:[%s2446_s2 + $0x248] sm:$0xff]  ;;  %594 = vmatpush.msra.mxu3 %v476_v24  ;;  %v502_v12 = vld [vmem:[%s2446_s2 + $0x758] sm:$0xff] }
  0x21   : > { %v467_v26 = vld [vmem:[%s2446_s2 + $0x640] sm:$0xff]  ;;  %v468_v28 = vld [vmem:[%s2446_s2 + $0x648] sm:$0xff]  ;;  %535 = vmatpush.msra.mxu0 %v339_v25  ;;  %575 = vmatpush.msra.mxu2 %v340_v27  ;;  %v365_v13 = vld [vmem:[%s2446_s2 + $0x310] sm:$0xff] }
  0x22   : > { %v331_v29 = vld [vmem:[%s2446_s2 + $0x200] sm:$0xff]  ;;  %555 = vmatpush.msra.mxu1 %v467_v26  ;;  %v332_v31 = vld [vmem:[%s2446_s2 + $0x208] sm:$0xff]  ;;  %595 = vmatpush.msra.mxu3 %v468_v28  ;;  %v493_v14 = vld [vmem:[%s2446_s2 + $0x710] sm:$0xff] }
  0x23   : > { %v459_v30 = vld [vmem:[%s2446_s2 + $0x600] sm:$0xff]  ;;  %v460_v32 = vld [vmem:[%s2446_s2 + $0x608] sm:$0xff]  ;;  %536 = vmatpush.msra.mxu0 %v331_v29  ;;  %576 = vmatpush.msra.mxu2 %v332_v31  ;;  %v366_v15 = vld [vmem:[%s2446_s2 + $0x318] sm:$0xff] }
  0x24   : > { %v323_v33 = vld [vmem:[%s2446_s2 + $0x1c0] sm:$0xff]  ;;  %556 = vmatpush.msra.mxu1 %v459_v30  ;;  %v324_v35 = vld [vmem:[%s2446_s2 + $0x1c8] sm:$0xff]  ;;  %596 = vmatpush.msra.mxu3 %v460_v32  ;;  %v494_v16 = vld [vmem:[%s2446_s2 + $0x718] sm:$0xff] }
  0x25   : > { %v451_v34 = vld [vmem:[%s2446_s2 + $0x5c0] sm:$0xff]  ;;  %v452_v36 = vld [vmem:[%s2446_s2 + $0x5c8] sm:$0xff]  ;;  %537 = vmatpush.msra.mxu0 %v323_v33  ;;  %577 = vmatpush.msra.mxu2 %v324_v35  ;;  %v357_v17 = vld [vmem:[%s2446_s2 + $0x2d0] sm:$0xff] }
  0x26   : > { %v315_v37 = vld [vmem:[%s2446_s2 + $0x180] sm:$0xff]  ;;  %557 = vmatpush.msra.mxu1 %v451_v34  ;;  %v316_v39 = vld [vmem:[%s2446_s2 + $0x188] sm:$0xff]  ;;  %597 = vmatpush.msra.mxu3 %v452_v36  ;;  %v485_v18 = vld [vmem:[%s2446_s2 + $0x6d0] sm:$0xff] }
  0x27   : > { %v443_v38 = vld [vmem:[%s2446_s2 + $0x580] sm:$0xff]  ;;  %v444_v40 = vld [vmem:[%s2446_s2 + $0x588] sm:$0xff]  ;;  %538 = vmatpush.msra.mxu0 %v315_v37  ;;  %578 = vmatpush.msra.mxu2 %v316_v39  ;;  %v358_v19 = vld [vmem:[%s2446_s2 + $0x2d8] sm:$0xff] }
  0x28   : > { %v307_v41 = vld [vmem:[%s2446_s2 + $0x140] sm:$0xff]  ;;  %558 = vmatpush.msra.mxu1 %v443_v38  ;;  %v308_v43 = vld [vmem:[%s2446_s2 + $0x148] sm:$0xff]  ;;  %598 = vmatpush.msra.mxu3 %v444_v40  ;;  %v486_v20 = vld [vmem:[%s2446_s2 + $0x6d8] sm:$0xff] }
  0x29   : > { %v435_v42 = vld [vmem:[%s2446_s2 + $0x540] sm:$0xff]  ;;  %v436_v44 = vld [vmem:[%s2446_s2 + $0x548] sm:$0xff]  ;;  %539 = vmatpush.msra.mxu0 %v307_v41  ;;  %579 = vmatpush.msra.mxu2 %v308_v43  ;;  %v349_v21 = vld [vmem:[%s2446_s2 + $0x290] sm:$0xff] }
  0x2a   : > { %v299_v45 = vld [vmem:[%s2446_s2 + $0x100] sm:$0xff]  ;;  %559 = vmatpush.msra.mxu1 %v435_v42  ;;  %v300_v47 = vld [vmem:[%s2446_s2 + $0x108] sm:$0xff]  ;;  %599 = vmatpush.msra.mxu3 %v436_v44  ;;  %v477_v22 = vld [vmem:[%s2446_s2 + $0x690] sm:$0xff] }
  0x2b   : > { %v427_v46 = vld [vmem:[%s2446_s2 + $0x500] sm:$0xff]  ;;  %v428_v48 = vld [vmem:[%s2446_s2 + $0x508] sm:$0xff]  ;;  %540 = vmatpush.msra.mxu0 %v299_v45  ;;  %580 = vmatpush.msra.mxu2 %v300_v47  ;;  %v350_v23 = vld [vmem:[%s2446_s2 + $0x298] sm:$0xff] }
  0x2c   : > { %v291_v49 = vld [vmem:[%s2446_s2 + $0xc0] sm:$0xff]  ;;  %560 = vmatpush.msra.mxu1 %v427_v46  ;;  %v292_v51 = vld [vmem:[%s2446_s2 + $0xc8] sm:$0xff]  ;;  %600 = vmatpush.msra.mxu3 %v428_v48  ;;  %v478_v24 = vld [vmem:[%s2446_s2 + $0x698] sm:$0xff] }
  0x2d   : > { %v419_v50 = vld [vmem:[%s2446_s2 + $0x4c0] sm:$0xff]  ;;  %v420_v52 = vld [vmem:[%s2446_s2 + $0x4c8] sm:$0xff]  ;;  %541 = vmatpush.msra.mxu0 %v291_v49  ;;  %581 = vmatpush.msra.mxu2 %v292_v51  ;;  %v341_v25 = vld [vmem:[%s2446_s2 + $0x250] sm:$0xff] }
  0x2e   : > { %v283_v53 = vld [vmem:[%s2446_s2 + $0x80] sm:$0xff]  ;;  %561 = vmatpush.msra.mxu1 %v419_v50  ;;  %v284_v55 = vld [vmem:[%s2446_s2 + $0x88] sm:$0xff]  ;;  %601 = vmatpush.msra.mxu3 %v420_v52  ;;  %v469_v26 = vld [vmem:[%s2446_s2 + $0x650] sm:$0xff] }
  0x2f   : > { %v411_v54 = vld [vmem:[%s2446_s2 + $0x480] sm:$0xff]  ;;  %v412_v56 = vld [vmem:[%s2446_s2 + $0x488] sm:$0xff]  ;;  %542 = vmatpush.msra.mxu0 %v283_v53  ;;  %582 = vmatpush.msra.mxu2 %v284_v55  ;;  %v342_v28 = vld [vmem:[%s2446_s2 + $0x258] sm:$0xff] }
  0x30   : > { %v275_v57 = vld [vmem:[%s2446_s2 + $0x40] sm:$0xff]  ;;  %562 = vmatpush.msra.mxu1 %v411_v54  ;;  %v276_v59 = vld [vmem:[%s2446_s2 + $0x48] sm:$0xff]  ;;  %602 = vmatpush.msra.mxu3 %v412_v56  ;;  %v470_v29 = vld [vmem:[%s2446_s2 + $0x658] sm:$0xff] }
  0x31   : > { %v403_v58 = vld [vmem:[%s2446_s2 + $0x440] sm:$0xff]  ;;  %v404_v60 = vld [vmem:[%s2446_s2 + $0x448] sm:$0xff]  ;;  %543 = vmatpush.msra.mxu0 %v275_v57  ;;  %583 = vmatpush.msra.mxu2 %v276_v59  ;;  %v333_v30 = vld [vmem:[%s2446_s2 + $0x210] sm:$0xff] }
  0x32   : > { %v267_v61 = vld [vmem:[%s2446_s2] sm:$0xff]  ;;  %563 = vmatpush.msra.mxu1 %v403_v58  ;;  %v268_v63 = vld [vmem:[%s2446_s2 + $0x8] sm:$0xff]  ;;  %603 = vmatpush.msra.mxu3 %v404_v60  ;;  %v461_v31 = vld [vmem:[%s2446_s2 + $0x610] sm:$0xff] }
  0x33   : > { %v395_v62 = vld [vmem:[%s2446_s2 + $0x400] sm:$0xff]  ;;  %v396_v0 = vld [vmem:[%s2446_s2 + $0x408] sm:$0xff]  ;;  %544 = vmatpush.msra.mxu0 %v267_v61  ;;  %584 = vmatpush.msra.mxu2 %v268_v63  ;;  %v334_v32 = vld [vmem:[%s2446_s2 + $0x218] sm:$0xff] }
  0x34   : > { %564 = vmatpush.msra.mxu1 %v395_v62  ;;  %604 = vmatpush.msra.mxu3 %v396_v0  ;;  %v266_v27 = vld [vmem:[#allocation2] sm:$0xf]  ;;  %v462_v33 = vld [vmem:[%s2446_s2 + $0x618] sm:$0xff]  ;;  %v325_v34 = vld [vmem:[%s2446_s2 + $0x1d0] sm:$0xff] }
  0x35   : > { %609 = vmatpush.msrb.mxu0 %v389_v1  ;;  %649 = vmatpush.msrb.mxu2 %v390_v3  ;;  %524 = vst [vmem:[#allocation1] ss:$4 sm:$0xff] %v266_v27  ;;  %v453_v35 = vld [vmem:[%s2446_s2 + $0x5d0] sm:$0xff]  ;;  %v326_v36 = vld [vmem:[%s2446_s2 + $0x1d8] sm:$0xff]  ;;  %v1155_v41 = vld [vmem:[#allocation3] sm:$0xf] }
  0x36   : > { %629 = vmatpush.msrb.mxu1 %v517_v2  ;;  %669 = vmatpush.msrb.mxu3 %v518_v4  ;;  %v454_v37 = vld [vmem:[%s2446_s2 + $0x5d8] sm:$0xff]  ;;  %v317_v38 = vld [vmem:[%s2446_s2 + $0x190] sm:$0xff]  ;;  %v352_v27 = vld [vmem:[%s2446_s2 + $0x2a8] sm:$0xff] }
  0x37   : > { %610 = vmatpush.msrb.mxu0 %v381_v5  ;;  %650 = vmatpush.msrb.mxu2 %v382_v7  ;;  %v445_v39 = vld [vmem:[%s2446_s2 + $0x590] sm:$0xff]  ;;  %v318_v40 = vld [vmem:[%s2446_s2 + $0x198] sm:$0xff]  ;;  %v391_v5 = vld [vmem:[%s2446_s2 + $0x3e0] sm:$0xff] }
  0x38   : > { %630 = vmatpush.msrb.mxu1 %v509_v6  ;;  %670 = vmatpush.msrb.mxu3 %v510_v8  ;;  %v446_v42 = vld [vmem:[%s2446_s2 + $0x598] sm:$0xff]  ;;  %v309_v43 = vld [vmem:[%s2446_s2 + $0x150] sm:$0xff]  ;;  %v519_v6 = vld [vmem:[%s2446_s2 + $0x7e0] sm:$0xff] }
  0x39   : > { %611 = vmatpush.msrb.mxu0 %v373_v9  ;;  %651 = vmatpush.msrb.mxu2 %v374_v11  ;;  %v437_v44 = vld [vmem:[%s2446_s2 + $0x550] sm:$0xff]  ;;  %v310_v47 = vld [vmem:[%s2446_s2 + $0x158] sm:$0xff]  ;;  %v392_v7 = vld [vmem:[%s2446_s2 + $0x3e8] sm:$0xff] }
  0x3a   : > { %631 = vmatpush.msrb.mxu1 %v501_v10  ;;  %671 = vmatpush.msrb.mxu3 %v502_v12  ;;  %v438_v48 = vld [vmem:[%s2446_s2 + $0x558] sm:$0xff]  ;;  %v301_v49 = vld [vmem:[%s2446_s2 + $0x110] sm:$0xff]  ;;  %v520_v8 = vld [vmem:[%s2446_s2 + $0x7e8] sm:$0xff] }
  0x3b   : > { %612 = vmatpush.msrb.mxu0 %v365_v13  ;;  %652 = vmatpush.msrb.mxu2 %v366_v15  ;;  %v429_v50 = vld [vmem:[%s2446_s2 + $0x510] sm:$0xff]  ;;  %v302_v51 = vld [vmem:[%s2446_s2 + $0x118] sm:$0xff]  ;;  %v383_v9 = vld [vmem:[%s2446_s2 + $0x3a0] sm:$0xff] }
  0x3c   : > { %632 = vmatpush.msrb.mxu1 %v493_v14  ;;  %672 = vmatpush.msrb.mxu3 %v494_v16  ;;  %v1678_v45 = vld.sshfl [vmem:[#allocation1] sm:$0xff pattern:$0x73625140]  ;;  %v1680_v46 = vld.sshfl [vmem:[#allocation1 + $0x8] sm:$0xff pattern:$0x73625140] }
  0x3d   : > { %613 = vmatpush.msrb.mxu0 %v357_v17  ;;  %653 = vmatpush.msrb.mxu2 %v358_v19  ;;  %1157 = vst [vmem:[#allocation1] ss:$4 sm:$0xff] %v1155_v41  ;;  %v430_v52 = vld [vmem:[%s2446_s2 + $0x518] sm:$0xff]  ;;  %v293_v53 = vld [vmem:[%s2446_s2 + $0xd0] sm:$0xff]  ;;  %v511_v10 = vld [vmem:[%s2446_s2 + $0x7a0] sm:$0xff] }
  0x3e   : > { %633 = vmatpush.msrb.mxu1 %v485_v18  ;;  %673 = vmatpush.msrb.mxu3 %v486_v20  ;;  %v421_v54 = vld [vmem:[%s2446_s2 + $0x4d0] sm:$0xff]  ;;  %v294_v55 = vld [vmem:[%s2446_s2 + $0xd8] sm:$0xff]  ;;  %v384_v11 = vld [vmem:[%s2446_s2 + $0x3a8] sm:$0xff] }
  0x3f   : > { %614 = vmatpush.msrb.mxu0 %v349_v21  ;;  %654 = vmatpush.msrb.mxu2 %v350_v23  ;;  %v422_v56 = vld [vmem:[%s2446_s2 + $0x4d8] sm:$0xff]  ;;  %v285_v57 = vld [vmem:[%s2446_s2 + $0x90] sm:$0xff]  ;;  %v512_v12 = vld [vmem:[%s2446_s2 + $0x7a8] sm:$0xff] }
  0x40   : > { %634 = vmatpush.msrb.mxu1 %v477_v22  ;;  %674 = vmatpush.msrb.mxu3 %v478_v24  ;;  %v413_v58 = vld [vmem:[%s2446_s2 + $0x490] sm:$0xff]  ;;  %v286_v59 = vld [vmem:[%s2446_s2 + $0x98] sm:$0xff]  ;;  %v375_v13 = vld [vmem:[%s2446_s2 + $0x360] sm:$0xff] }
  0x41   : > { %615 = vmatpush.msrb.mxu0 %v341_v25  ;;  %655 = vmatpush.msrb.mxu2 %v342_v28  ;;  %v414_v60 = vld [vmem:[%s2446_s2 + $0x498] sm:$0xff]  ;;  %v277_v61 = vld [vmem:[%s2446_s2 + $0x50] sm:$0xff]  ;;  %v503_v14 = vld [vmem:[%s2446_s2 + $0x760] sm:$0xff] }
  0x42   : > { %635 = vmatpush.msrb.mxu1 %v469_v26  ;;  %675 = vmatpush.msrb.mxu3 %v470_v29  ;;  %v405_v62 = vld [vmem:[%s2446_s2 + $0x450] sm:$0xff]  ;;  %v278_v63 = vld [vmem:[%s2446_s2 + $0x58] sm:$0xff]  ;;  %v376_v15 = vld [vmem:[%s2446_s2 + $0x368] sm:$0xff] }
  0x43   : > { %616 = vmatpush.msrb.mxu0 %v333_v30  ;;  %656 = vmatpush.msrb.mxu2 %v334_v32  ;;  %v406_v0 = vld [vmem:[%s2446_s2 + $0x458] sm:$0xff]  ;;  %v269_v1 = vld [vmem:[%s2446_s2 + $0x10] sm:$0xff]  ;;  %v504_v16 = vld [vmem:[%s2446_s2 + $0x768] sm:$0xff] }
  0x44   : > { %636 = vmatpush.msrb.mxu1 %v461_v31  ;;  %676 = vmatpush.msrb.mxu3 %v462_v33  ;;  %v397_v2 = vld [vmem:[%s2446_s2 + $0x410] sm:$0xff]  ;;  %v270_v3 = vld [vmem:[%s2446_s2 + $0x18] sm:$0xff]  ;;  %v367_v17 = vld [vmem:[%s2446_s2 + $0x320] sm:$0xff] }
  0x45   : > { %617 = vmatpush.msrb.mxu0 %v325_v34  ;;  %657 = vmatpush.msrb.mxu2 %v326_v36  ;;  %v398_v4 = vld [vmem:[%s2446_s2 + $0x418] sm:$0xff]  ;;  %v495_v18 = vld [vmem:[%s2446_s2 + $0x720] sm:$0xff]  ;;  %v368_v19 = vld [vmem:[%s2446_s2 + $0x328] sm:$0xff] }
  0x46   : > { %637 = vmatpush.msrb.mxu1 %v453_v35  ;;  %677 = vmatpush.msrb.mxu3 %v454_v37  ;;  %v496_v20 = vld [vmem:[%s2446_s2 + $0x728] sm:$0xff]  ;;  %v359_v21 = vld [vmem:[%s2446_s2 + $0x2e0] sm:$0xff] }
  0x47   : > { %618 = vmatpush.msrb.mxu0 %v317_v38  ;;  %658 = vmatpush.msrb.mxu2 %v318_v40  ;;  %v487_v22 = vld [vmem:[%s2446_s2 + $0x6e0] sm:$0xff]  ;;  %v360_v23 = vld [vmem:[%s2446_s2 + $0x2e8] sm:$0xff] }
  0x48   : > { %638 = vmatpush.msrb.mxu1 %v445_v39  ;;  %678 = vmatpush.msrb.mxu3 %v446_v42  ;;  %v488_v24 = vld [vmem:[%s2446_s2 + $0x6e8] sm:$0xff]  ;;  %v351_v25 = vld [vmem:[%s2446_s2 + $0x2a0] sm:$0xff] }
  0x49   : > { %619 = vmatpush.msrb.mxu0 %v309_v43  ;;  %659 = vmatpush.msrb.mxu2 %v310_v47  ;;  %v479_v26 = vld [vmem:[%s2446_s2 + $0x6a0] sm:$0xff]  ;;  %v480_v28 = vld [vmem:[%s2446_s2 + $0x6a8] sm:$0xff] }
  0x4a   : > { %639 = vmatpush.msrb.mxu1 %v437_v44  ;;  %679 = vmatpush.msrb.mxu3 %v438_v48  ;;  %v343_v29 = vld [vmem:[%s2446_s2 + $0x260] sm:$0xff]  ;;  %v344_v31 = vld [vmem:[%s2446_s2 + $0x268] sm:$0xff] }
  0x4b   : > { %620 = vmatpush.msrb.mxu0 %v301_v49  ;;  %660 = vmatpush.msrb.mxu2 %v302_v51  ;;  %v471_v30 = vld [vmem:[%s2446_s2 + $0x660] sm:$0xff]  ;;  %v472_v32 = vld [vmem:[%s2446_s2 + $0x668] sm:$0xff] }
  0x4c   : > { %640 = vmatpush.msrb.mxu1 %v429_v50  ;;  %680 = vmatpush.msrb.mxu3 %v430_v52  ;;  %v335_v33 = vld [vmem:[%s2446_s2 + $0x220] sm:$0xff]  ;;  %v336_v35 = vld [vmem:[%s2446_s2 + $0x228] sm:$0xff] }
  0x4d   : > { %621 = vmatpush.msrb.mxu0 %v293_v53  ;;  %661 = vmatpush.msrb.mxu2 %v294_v55  ;;  %v463_v34 = vld [vmem:[%s2446_s2 + $0x620] sm:$0xff]  ;;  %v464_v36 = vld [vmem:[%s2446_s2 + $0x628] sm:$0xff] }
  0x4e   : > { %641 = vmatpush.msrb.mxu1 %v421_v54  ;;  %681 = vmatpush.msrb.mxu3 %v422_v56  ;;  %v327_v37 = vld [vmem:[%s2446_s2 + $0x1e0] sm:$0xff]  ;;  %v328_v39 = vld [vmem:[%s2446_s2 + $0x1e8] sm:$0xff] }
  0x4f   : > { %622 = vmatpush.msrb.mxu0 %v285_v57  ;;  %662 = vmatpush.msrb.mxu2 %v286_v59  ;;  %v455_v38 = vld [vmem:[%s2446_s2 + $0x5e0] sm:$0xff]  ;;  %v456_v40 = vld [vmem:[%s2446_s2 + $0x5e8] sm:$0xff] }
  0x50   : > { %642 = vmatpush.msrb.mxu1 %v413_v58  ;;  %682 = vmatpush.msrb.mxu3 %v414_v60  ;;  %v319_v41 = vld [vmem:[%s2446_s2 + $0x1a0] sm:$0xff]  ;;  %v320_v43 = vld [vmem:[%s2446_s2 + $0x1a8] sm:$0xff] }
  0x51   : > { %623 = vmatpush.msrb.mxu0 %v277_v61  ;;  %663 = vmatpush.msrb.mxu2 %v278_v63  ;;  %v447_v42 = vld [vmem:[%s2446_s2 + $0x5a0] sm:$0xff]  ;;  %v448_v44 = vld [vmem:[%s2446_s2 + $0x5a8] sm:$0xff] }
  0x52   : > { %643 = vmatpush.msrb.mxu1 %v405_v62  ;;  %683 = vmatpush.msrb.mxu3 %v406_v0  ;;  %v311_v47 = vld [vmem:[%s2446_s2 + $0x160] sm:$0xff]  ;;  %v312_v49 = vld [vmem:[%s2446_s2 + $0x168] sm:$0xff] }
  0x53   : > { %624 = vmatpush.msrb.mxu0 %v269_v1  ;;  %664 = vmatpush.msrb.mxu2 %v270_v3  ;;  %v439_v48 = vld [vmem:[%s2446_s2 + $0x560] sm:$0xff]  ;;  %v440_v50 = vld [vmem:[%s2446_s2 + $0x568] sm:$0xff] }
  0x54   : > { %644 = vmatpush.msrb.mxu1 %v397_v2  ;;  %684 = vmatpush.msrb.mxu3 %v398_v4  ;;  %v303_v51 = vld [vmem:[%s2446_s2 + $0x120] sm:$0xff]  ;;  %v304_v53 = vld [vmem:[%s2446_s2 + $0x128] sm:$0xff] }
  0x55   : > { %545 = vmatmul.f32.vlgmr.msra.gmra.mxu0 %v1678_v45  ;;  %565 = vmatmul.f32.vlgmr.msra.gmra.mxu1 %v1680_v46  ;;  %v431_v52 = vld [vmem:[%s2446_s2 + $0x520] sm:$0xff]  ;;  %v432_v54 = vld [vmem:[%s2446_s2 + $0x528] sm:$0xff] }
  0x56   : > { %585 = vmatmul.f32.vlgmr.msra.gmra.mxu2 %v1678_v45  ;;  %605 = vmatmul.f32.vlgmr.msra.gmra.mxu3 %v1680_v46  ;;  %v295_v55 = vld [vmem:[%s2446_s2 + $0xe0] sm:$0xff]  ;;  %v296_v57 = vld [vmem:[%s2446_s2 + $0xe8] sm:$0xff] }
  0x57   : > { %689 = vmatpush.msra.mxu0 %v391_v5  ;;  %709 = vmatpush.msra.mxu1 %v519_v6  ;;  %v423_v56 = vld [vmem:[%s2446_s2 + $0x4e0] sm:$0xff]  ;;  %v424_v58 = vld [vmem:[%s2446_s2 + $0x4e8] sm:$0xff] }
  0x58   : > { %729 = vmatpush.msra.mxu2 %v392_v7  ;;  %749 = vmatpush.msra.mxu3 %v520_v8  ;;  %v287_v59 = vld [vmem:[%s2446_s2 + $0xa0] sm:$0xff]  ;;  %v288_v61 = vld [vmem:[%s2446_s2 + $0xa8] sm:$0xff]  ;;  %v393_v7 = vld [vmem:[%s2446_s2 + $0x3f0] sm:$0xff] }
  0x59   : > { %690 = vmatpush.msra.mxu0 %v383_v9  ;;  %710 = vmatpush.msra.mxu1 %v511_v10  ;;  %v415_v60 = vld [vmem:[%s2446_s2 + $0x4a0] sm:$0xff]  ;;  %v416_v62 = vld [vmem:[%s2446_s2 + $0x4a8] sm:$0xff]  ;;  %v521_v8 = vld [vmem:[%s2446_s2 + $0x7f0] sm:$0xff] }
  0x5a   : > { %730 = vmatpush.msra.mxu2 %v384_v11  ;;  %750 = vmatpush.msra.mxu3 %v512_v12  ;;  %v279_v63 = vld [vmem:[%s2446_s2 + $0x60] sm:$0xff]  ;;  %v280_v1 = vld [vmem:[%s2446_s2 + $0x68] sm:$0xff]  ;;  %v394_v9 = vld [vmem:[%s2446_s2 + $0x3f8] sm:$0xff] }
  0x5b   : > { %691 = vmatpush.msra.mxu0 %v375_v13  ;;  %711 = vmatpush.msra.mxu1 %v503_v14  ;;  %v407_v0 = vld [vmem:[%s2446_s2 + $0x460] sm:$0xff]  ;;  %v408_v2 = vld [vmem:[%s2446_s2 + $0x468] sm:$0xff]  ;;  %v522_v10 = vld [vmem:[%s2446_s2 + $0x7f8] sm:$0xff] }
  0x5c   : > { %731 = vmatpush.msra.mxu2 %v376_v15  ;;  %751 = vmatpush.msra.mxu3 %v504_v16  ;;  %v271_v3 = vld [vmem:[%s2446_s2 + $0x20] sm:$0xff]  ;;  %v272_v5 = vld [vmem:[%s2446_s2 + $0x28] sm:$0xff]  ;;  %v385_v11 = vld [vmem:[%s2446_s2 + $0x3b0] sm:$0xff] }
  0x5d   : > { %692 = vmatpush.msra.mxu0 %v367_v17  ;;  %712 = vmatpush.msra.mxu1 %v495_v18  ;;  %v399_v4 = vld [vmem:[%s2446_s2 + $0x420] sm:$0xff]  ;;  %v400_v6 = vld [vmem:[%s2446_s2 + $0x428] sm:$0xff]  ;;  %v513_v12 = vld [vmem:[%s2446_s2 + $0x7b0] sm:$0xff] }
  0x5e   : > { %732 = vmatpush.msra.mxu2 %v368_v19  ;;  %752 = vmatpush.msra.mxu3 %v496_v20  ;;  %v386_v13 = vld [vmem:[%s2446_s2 + $0x3b8] sm:$0xff]  ;;  %v377_v15 = vld [vmem:[%s2446_s2 + $0x370] sm:$0xff] }
  0x5f   : > { %693 = vmatpush.msra.mxu0 %v359_v21  ;;  %713 = vmatpush.msra.mxu1 %v487_v22  ;;  %v514_v14 = vld [vmem:[%s2446_s2 + $0x7b8] sm:$0xff]  ;;  %v505_v16 = vld [vmem:[%s2446_s2 + $0x770] sm:$0xff] }
  0x60   : > { %733 = vmatpush.msra.mxu2 %v360_v23  ;;  %753 = vmatpush.msra.mxu3 %v488_v24  ;;  %v378_v17 = vld [vmem:[%s2446_s2 + $0x378] sm:$0xff]  ;;  %v369_v19 = vld [vmem:[%s2446_s2 + $0x330] sm:$0xff] }
  0x61   : > { %694 = vmatpush.msra.mxu0 %v351_v25  ;;  %714 = vmatpush.msra.mxu1 %v479_v26  ;;  %v506_v18 = vld [vmem:[%s2446_s2 + $0x778] sm:$0xff]  ;;  %v497_v20 = vld [vmem:[%s2446_s2 + $0x730] sm:$0xff] }
  0x62   : > { %734 = vmatpush.msra.mxu2 %v352_v27  ;;  %754 = vmatpush.msra.mxu3 %v480_v28  ;;  %v370_v21 = vld [vmem:[%s2446_s2 + $0x338] sm:$0xff]  ;;  %v361_v23 = vld [vmem:[%s2446_s2 + $0x2f0] sm:$0xff] }
  0x63   : > { %695 = vmatpush.msra.mxu0 %v343_v29  ;;  %715 = vmatpush.msra.mxu1 %v471_v30  ;;  %v498_v22 = vld [vmem:[%s2446_s2 + $0x738] sm:$0xff]  ;;  %v489_v24 = vld [vmem:[%s2446_s2 + $0x6f0] sm:$0xff] }
  0x64   : > { %735 = vmatpush.msra.mxu2 %v344_v31  ;;  %755 = vmatpush.msra.mxu3 %v472_v32  ;;  %v362_v25 = vld [vmem:[%s2446_s2 + $0x2f8] sm:$0xff]  ;;  %v353_v27 = vld [vmem:[%s2446_s2 + $0x2b0] sm:$0xff] }
  0x65   : > { %696 = vmatpush.msra.mxu0 %v335_v33  ;;  %716 = vmatpush.msra.mxu1 %v463_v34  ;;  %v490_v26 = vld [vmem:[%s2446_s2 + $0x6f8] sm:$0xff]  ;;  %v481_v28 = vld [vmem:[%s2446_s2 + $0x6b0] sm:$0xff] }
  0x66   : > { %736 = vmatpush.msra.mxu2 %v336_v35  ;;  %756 = vmatpush.msra.mxu3 %v464_v36  ;;  %v354_v29 = vld [vmem:[%s2446_s2 + $0x2b8] sm:$0xff]  ;;  %v345_v31 = vld [vmem:[%s2446_s2 + $0x270] sm:$0xff] }
  0x67   : > { %697 = vmatpush.msra.mxu0 %v327_v37  ;;  %717 = vmatpush.msra.mxu1 %v455_v38  ;;  %v482_v30 = vld [vmem:[%s2446_s2 + $0x6b8] sm:$0xff]  ;;  %v473_v32 = vld [vmem:[%s2446_s2 + $0x670] sm:$0xff] }
  0x68   : > { %737 = vmatpush.msra.mxu2 %v328_v39  ;;  %757 = vmatpush.msra.mxu3 %v456_v40  ;;  %v346_v33 = vld [vmem:[%s2446_s2 + $0x278] sm:$0xff]  ;;  %v337_v35 = vld [vmem:[%s2446_s2 + $0x230] sm:$0xff] }
  0x69   : > { %698 = vmatpush.msra.mxu0 %v319_v41  ;;  %718 = vmatpush.msra.mxu1 %v447_v42  ;;  %v474_v34 = vld [vmem:[%s2446_s2 + $0x678] sm:$0xff]  ;;  %v465_v36 = vld [vmem:[%s2446_s2 + $0x630] sm:$0xff] }
  0x6a   : > { %738 = vmatpush.msra.mxu2 %v320_v43  ;;  %758 = vmatpush.msra.mxu3 %v448_v44  ;;  %v338_v37 = vld [vmem:[%s2446_s2 + $0x238] sm:$0xff]  ;;  %v329_v39 = vld [vmem:[%s2446_s2 + $0x1f0] sm:$0xff] }
  0x6b   : > { %699 = vmatpush.msra.mxu0 %v311_v47  ;;  %719 = vmatpush.msra.mxu1 %v439_v48  ;;  %v466_v38 = vld [vmem:[%s2446_s2 + $0x638] sm:$0xff]  ;;  %v457_v40 = vld [vmem:[%s2446_s2 + $0x5f0] sm:$0xff] }
  0x6c   : > { %739 = vmatpush.msra.mxu2 %v312_v49  ;;  %759 = vmatpush.msra.mxu3 %v440_v50  ;;  %v330_v41 = vld [vmem:[%s2446_s2 + $0x1f8] sm:$0xff]  ;;  %v321_v43 = vld [vmem:[%s2446_s2 + $0x1b0] sm:$0xff] }
  0x6d   : > { %700 = vmatpush.msra.mxu0 %v303_v51  ;;  %720 = vmatpush.msra.mxu1 %v431_v52  ;;  %v458_v42 = vld [vmem:[%s2446_s2 + $0x5f8] sm:$0xff]  ;;  %v449_v44 = vld [vmem:[%s2446_s2 + $0x5b0] sm:$0xff] }
  0x6e   : > { %740 = vmatpush.msra.mxu2 %v304_v53  ;;  %760 = vmatpush.msra.mxu3 %v432_v54  ;;  %v322_v47 = vld [vmem:[%s2446_s2 + $0x1b8] sm:$0xff]  ;;  %v313_v49 = vld [vmem:[%s2446_s2 + $0x170] sm:$0xff] }
  0x6f   : > { %701 = vmatpush.msra.mxu0 %v295_v55  ;;  %721 = vmatpush.msra.mxu1 %v423_v56  ;;  %v450_v48 = vld [vmem:[%s2446_s2 + $0x5b8] sm:$0xff]  ;;  %v441_v50 = vld [vmem:[%s2446_s2 + $0x570] sm:$0xff] }
  0x70   : > { %741 = vmatpush.msra.mxu2 %v296_v57  ;;  %761 = vmatpush.msra.mxu3 %v424_v58  ;;  %v314_v51 = vld [vmem:[%s2446_s2 + $0x178] sm:$0xff]  ;;  %v305_v53 = vld [vmem:[%s2446_s2 + $0x130] sm:$0xff] }
  0x71   : > { %702 = vmatpush.msra.mxu0 %v287_v59  ;;  %722 = vmatpush.msra.mxu1 %v415_v60  ;;  %v442_v52 = vld [vmem:[%s2446_s2 + $0x578] sm:$0xff]  ;;  %v433_v54 = vld [vmem:[%s2446_s2 + $0x530] sm:$0xff] }
  0x72   : > { %742 = vmatpush.msra.mxu2 %v288_v61  ;;  %762 = vmatpush.msra.mxu3 %v416_v62  ;;  %v306_v55 = vld [vmem:[%s2446_s2 + $0x138] sm:$0xff]  ;;  %v297_v57 = vld [vmem:[%s2446_s2 + $0xf0] sm:$0xff] }
  0x73   : > { %703 = vmatpush.msra.mxu0 %v279_v63  ;;  %723 = vmatpush.msra.mxu1 %v407_v0  ;;  %v434_v56 = vld [vmem:[%s2446_s2 + $0x538] sm:$0xff]  ;;  %v425_v58 = vld [vmem:[%s2446_s2 + $0x4f0] sm:$0xff] }
  0x74   : > { %743 = vmatpush.msra.mxu2 %v280_v1  ;;  %763 = vmatpush.msra.mxu3 %v408_v2  ;;  %v298_v59 = vld [vmem:[%s2446_s2 + $0xf8] sm:$0xff]  ;;  %v289_v61 = vld [vmem:[%s2446_s2 + $0xb0] sm:$0xff] }
  0x75   : > { %704 = vmatpush.msra.mxu0 %v271_v3  ;;  %724 = vmatpush.msra.mxu1 %v399_v4  ;;  %v426_v60 = vld [vmem:[%s2446_s2 + $0x4f8] sm:$0xff]  ;;  %v417_v62 = vld [vmem:[%s2446_s2 + $0x4b0] sm:$0xff] }
  0x76   : > { %744 = vmatpush.msra.mxu2 %v272_v5  ;;  %764 = vmatpush.msra.mxu3 %v400_v6  ;;  %v290_v63 = vld [vmem:[%s2446_s2 + $0xb8] sm:$0xff]  ;;  %v281_v1 = vld [vmem:[%s2446_s2 + $0x70] sm:$0xff] }
  0x77   : > { %625 = vmatmul.f32.vlgmr.msrb.gmra.mxu0 %v1678_v45  ;;  %645 = vmatmul.f32.vlgmr.msrb.gmra.mxu1 %v1680_v46  ;;  %v418_v0 = vld [vmem:[%s2446_s2 + $0x4b8] sm:$0xff]  ;;  %v409_v2 = vld [vmem:[%s2446_s2 + $0x470] sm:$0xff] }
  0x78   : > { %665 = vmatmul.f32.vlgmr.msrb.gmra.mxu2 %v1678_v45  ;;  %685 = vmatmul.f32.vlgmr.msrb.gmra.mxu3 %v1680_v46  ;;  %v282_v3 = vld [vmem:[%s2446_s2 + $0x78] sm:$0xff]  ;;  %v273_v5 = vld [vmem:[%s2446_s2 + $0x30] sm:$0xff] }
  0x79   : > { %769 = vmatpush.msrb.mxu0 %v393_v7  ;;  %789 = vmatpush.msrb.mxu1 %v521_v8  ;;  %v410_v4 = vld [vmem:[%s2446_s2 + $0x478] sm:$0xff]  ;;  %v401_v6 = vld [vmem:[%s2446_s2 + $0x430] sm:$0xff] }
  0x7a   : > { %809 = vmatpush.msrb.mxu2 %v394_v9  ;;  %829 = vmatpush.msrb.mxu3 %v522_v10  ;;  %v274_v7 = vld [vmem:[%s2446_s2 + $0x38] sm:$0xff]  ;;  %v258_v9 = vld [vmem:[%s2445_s1 + $0x1c0] sm:$0xff]  ;;  %v259_v10 = vld [vmem:[%s2445_s1 + $0x1c8] sm:$0xff] }
  0x7b   : > { %770 = vmatpush.msrb.mxu0 %v385_v11  ;;  %790 = vmatpush.msrb.mxu1 %v513_v12  ;;  %v402_v8 = vld [vmem:[%s2446_s2 + $0x438] sm:$0xff]  ;;  %v260_v11 = vld [vmem:[%s2445_s1 + $0x1d0] sm:$0xff] }
  0x7c   : > { %810 = vmatpush.msrb.mxu2 %v386_v13  ;;  %830 = vmatpush.msrb.mxu3 %v514_v14  ;;  %v261_v12 = vld [vmem:[%s2445_s1 + $0x1d8] sm:$0xff]  ;;  %v250_v13 = vld [vmem:[%s2445_s1 + $0x180] sm:$0xff]  ;;  %v251_v14 = vld [vmem:[%s2445_s1 + $0x188] sm:$0xff] }
  0x7d   : > { %771 = vmatpush.msrb.mxu0 %v377_v15  ;;  %791 = vmatpush.msrb.mxu1 %v505_v16  ;;  %v252_v15 = vld [vmem:[%s2445_s1 + $0x190] sm:$0xff]  ;;  %v253_v16 = vld [vmem:[%s2445_s1 + $0x198] sm:$0xff] }
  0x7e   : > { %811 = vmatpush.msrb.mxu2 %v378_v17  ;;  %831 = vmatpush.msrb.mxu3 %v506_v18  ;;  %v242_v17 = vld [vmem:[%s2445_s1 + $0x140] sm:$0xff]  ;;  %v243_v18 = vld [vmem:[%s2445_s1 + $0x148] sm:$0xff] }
  0x7f   : > { %772 = vmatpush.msrb.mxu0 %v369_v19  ;;  %792 = vmatpush.msrb.mxu1 %v497_v20  ;;  %v244_v19 = vld [vmem:[%s2445_s1 + $0x150] sm:$0xff]  ;;  %v245_v20 = vld [vmem:[%s2445_s1 + $0x158] sm:$0xff] }
  0x80   : > { %812 = vmatpush.msrb.mxu2 %v370_v21  ;;  %832 = vmatpush.msrb.mxu3 %v498_v22  ;;  %v234_v21 = vld [vmem:[%s2445_s1 + $0x100] sm:$0xff]  ;;  %v235_v22 = vld [vmem:[%s2445_s1 + $0x108] sm:$0xff] }
  0x81   : > { %773 = vmatpush.msrb.mxu0 %v361_v23  ;;  %793 = vmatpush.msrb.mxu1 %v489_v24  ;;  %v236_v23 = vld [vmem:[%s2445_s1 + $0x110] sm:$0xff]  ;;  %v237_v24 = vld [vmem:[%s2445_s1 + $0x118] sm:$0xff] }
  0x82   : > { %813 = vmatpush.msrb.mxu2 %v362_v25  ;;  %833 = vmatpush.msrb.mxu3 %v490_v26  ;;  %v226_v25 = vld [vmem:[%s2445_s1 + $0xc0] sm:$0xff]  ;;  %v227_v26 = vld [vmem:[%s2445_s1 + $0xc8] sm:$0xff] }
  0x83   : > { %774 = vmatpush.msrb.mxu0 %v353_v27  ;;  %794 = vmatpush.msrb.mxu1 %v481_v28  ;;  %v228_v27 = vld [vmem:[%s2445_s1 + $0xd0] sm:$0xff]  ;;  %v229_v28 = vld [vmem:[%s2445_s1 + $0xd8] sm:$0xff] }
  0x84   : > { %814 = vmatpush.msrb.mxu2 %v354_v29  ;;  %834 = vmatpush.msrb.mxu3 %v482_v30  ;;  %v218_v29 = vld [vmem:[%s2445_s1 + $0x80] sm:$0xff]  ;;  %v219_v30 = vld [vmem:[%s2445_s1 + $0x88] sm:$0xff] }
  0x85   : > { %775 = vmatpush.msrb.mxu0 %v345_v31  ;;  %795 = vmatpush.msrb.mxu1 %v473_v32  ;;  %v220_v31 = vld [vmem:[%s2445_s1 + $0x90] sm:$0xff]  ;;  %v211_v32 = vld [vmem:[%s2445_s1 + $0x48] sm:$0xff] }
  0x86   : > { %815 = vmatpush.msrb.mxu2 %v346_v33  ;;  %835 = vmatpush.msrb.mxu3 %v474_v34  ;;  %v212_v33 = vld [vmem:[%s2445_s1 + $0x50] sm:$0xff]  ;;  %v213_v34 = vld [vmem:[%s2445_s1 + $0x58] sm:$0xff] }
  0x87   : > { %776 = vmatpush.msrb.mxu0 %v337_v35  ;;  %796 = vmatpush.msrb.mxu1 %v465_v36  ;;  %v202_v35 = vld [vmem:[%s2445_s1] sm:$0xff]  ;;  %v203_v36 = vld [vmem:[%s2445_s1 + $0x8] sm:$0xff] }
  0x88   : > { %816 = vmatpush.msrb.mxu2 %v338_v37  ;;  %836 = vmatpush.msrb.mxu3 %v466_v38  ;;  %v204_v37 = vld [vmem:[%s2445_s1 + $0x10] sm:$0xff]  ;;  %v205_v38 = vld [vmem:[%s2445_s1 + $0x18] sm:$0xff] }
  0x89   : > { %777 = vmatpush.msrb.mxu0 %v329_v39  ;;  %797 = vmatpush.msrb.mxu1 %v457_v40  ;;  %v2245_v39 = vld [vmem:[%s1353_s22] sm:$0x3] }
  0x8a   : > { %817 = vmatpush.msrb.mxu2 %v330_v41  ;;  %837 = vmatpush.msrb.mxu3 %v458_v42  ;;  %v262_v40 = vld [vmem:[%s2445_s1 + $0x1e0] sm:$0xff]  ;;  %v263_v41 = vld [vmem:[%s2445_s1 + $0x1e8] sm:$0xff]  ;;  %v264_v42 = vld [vmem:[%s2445_s1 + $0x1f0] sm:$0xff] }
  0x8b   : > { %778 = vmatpush.msrb.mxu0 %v321_v43  ;;  %798 = vmatpush.msrb.mxu1 %v449_v44  ;;  %v265_v43 = vld [vmem:[%s2445_s1 + $0x1f8] sm:$0xff]  ;;  %v254_v44 = vld [vmem:[%s2445_s1 + $0x1a0] sm:$0xff] }
  0x8c   : > { %818 = vmatpush.msrb.mxu2 %v322_v47  ;;  %838 = vmatpush.msrb.mxu3 %v450_v48  ;;  %v255_v47 = vld [vmem:[%s2445_s1 + $0x1a8] sm:$0xff]  ;;  %v256_v48 = vld [vmem:[%s2445_s1 + $0x1b0] sm:$0xff] }
  0x8d   : > { %779 = vmatpush.msrb.mxu0 %v313_v49  ;;  %799 = vmatpush.msrb.mxu1 %v441_v50  ;;  %v257_v49 = vld [vmem:[%s2445_s1 + $0x1b8] sm:$0xff]  ;;  %v246_v50 = vld [vmem:[%s2445_s1 + $0x160] sm:$0xff] }
  0x8e   : > { %819 = vmatpush.msrb.mxu2 %v314_v51  ;;  %839 = vmatpush.msrb.mxu3 %v442_v52  ;;  %v247_v51 = vld [vmem:[%s2445_s1 + $0x168] sm:$0xff]  ;;  %v248_v52 = vld [vmem:[%s2445_s1 + $0x170] sm:$0xff] }
  0x8f   : > { %780 = vmatpush.msrb.mxu0 %v305_v53  ;;  %800 = vmatpush.msrb.mxu1 %v433_v54  ;;  %v249_v53 = vld [vmem:[%s2445_s1 + $0x178] sm:$0xff]  ;;  %v238_v54 = vld [vmem:[%s2445_s1 + $0x120] sm:$0xff] }
  0x90   : > { %820 = vmatpush.msrb.mxu2 %v306_v55  ;;  %840 = vmatpush.msrb.mxu3 %v434_v56  ;;  %v239_v55 = vld [vmem:[%s2445_s1 + $0x128] sm:$0xff]  ;;  %v240_v56 = vld [vmem:[%s2445_s1 + $0x130] sm:$0xff] }
  0x91   : > { %781 = vmatpush.msrb.mxu0 %v297_v57  ;;  %801 = vmatpush.msrb.mxu1 %v425_v58  ;;  %v241_v57 = vld [vmem:[%s2445_s1 + $0x138] sm:$0xff]  ;;  %v230_v58 = vld [vmem:[%s2445_s1 + $0xe0] sm:$0xff] }
  0x92   : > { %821 = vmatpush.msrb.mxu2 %v298_v59  ;;  %841 = vmatpush.msrb.mxu3 %v426_v60  ;;  %v231_v59 = vld [vmem:[%s2445_s1 + $0xe8] sm:$0xff]  ;;  %v232_v60 = vld [vmem:[%s2445_s1 + $0xf0] sm:$0xff] }
  0x93   : > { %782 = vmatpush.msrb.mxu0 %v289_v61  ;;  %802 = vmatpush.msrb.mxu1 %v417_v62  ;;  %v233_v61 = vld [vmem:[%s2445_s1 + $0xf8] sm:$0xff]  ;;  %v222_v62 = vld [vmem:[%s2445_s1 + $0xa0] sm:$0xff] }
  0x94   : > { %822 = vmatpush.msrb.mxu2 %v290_v63  ;;  %842 = vmatpush.msrb.mxu3 %v418_v0  ;;  %v223_v63 = vld [vmem:[%s2445_s1 + $0xa8] sm:$0xff]  ;;  %v224_v0 = vld [vmem:[%s2445_s1 + $0xb0] sm:$0xff] }
  0x95   : > { %783 = vmatpush.msrb.mxu0 %v281_v1  ;;  %803 = vmatpush.msrb.mxu1 %v409_v2  ;;  %v225_v1 = vld [vmem:[%s2445_s1 + $0xb8] sm:$0xff]  ;;  %v214_v2 = vld [vmem:[%s2445_s1 + $0x60] sm:$0xff] }
  0x96   : > { %823 = vmatpush.msrb.mxu2 %v282_v3  ;;  %843 = vmatpush.msrb.mxu3 %v410_v4  ;;  %v215_v3 = vld [vmem:[%s2445_s1 + $0x68] sm:$0xff]  ;;  %v216_v4 = vld [vmem:[%s2445_s1 + $0x70] sm:$0xff] }
  0x97   : > { %705 = vmatmul.f32.vlgmr.msra.gmra.mxu0 %v1678_v45  ;;  %725 = vmatmul.f32.vlgmr.msra.gmra.mxu1 %v1680_v46 }
  0x98   : > { %745 = vmatmul.f32.vlgmr.msra.gmra.mxu2 %v1678_v45  ;;  %765 = vmatmul.f32.vlgmr.msra.gmra.mxu3 %v1680_v46 }
  0x99   : > { %784 = vmatpush.msrb.mxu0 %v273_v5  ;;  %804 = vmatpush.msrb.mxu1 %v401_v6  ;;  %v217_v5 = vld [vmem:[%s2445_s1 + $0x78] sm:$0xff]  ;;  %v206_v6 = vld [vmem:[%s2445_s1 + $0x20] sm:$0xff] }
  0x9a   : > { %824 = vmatpush.msrb.mxu2 %v274_v7  ;;  %844 = vmatpush.msrb.mxu3 %v402_v8  ;;  %v207_v7 = vld [vmem:[%s2445_s1 + $0x28] sm:$0xff]  ;;  %v208_v8 = vld [vmem:[%s2445_s1 + $0x30] sm:$0xff] }
  0x9b   : > { %861 = vmatpush.msra.mxu0 %v258_v9  ;;  %881 = vmatpush.msra.mxu1 %v259_v10  ;;  %v209_v9 = vld [vmem:[%s2445_s1 + $0x38] sm:$0xff] }
  0x9c   : > { %901 = vmatpush.msra.mxu2 %v260_v11  ;;  %921 = vmatpush.msra.mxu3 %v261_v12 }
  0x9d   : > { %862 = vmatpush.msra.mxu0 %v250_v13  ;;  %882 = vmatpush.msra.mxu1 %v251_v14 }
  0x9e   : > { %902 = vmatpush.msra.mxu2 %v252_v15  ;;  %922 = vmatpush.msra.mxu3 %v253_v16 }
  0x9f   : > { %863 = vmatpush.msra.mxu0 %v242_v17  ;;  %883 = vmatpush.msra.mxu1 %v243_v18 }
  0xa0   : > { %903 = vmatpush.msra.mxu2 %v244_v19  ;;  %923 = vmatpush.msra.mxu3 %v245_v20 }
  0xa1   : > { %864 = vmatpush.msra.mxu0 %v234_v21  ;;  %884 = vmatpush.msra.mxu1 %v235_v22 }
  0xa2   : > { %904 = vmatpush.msra.mxu2 %v236_v23  ;;  %924 = vmatpush.msra.mxu3 %v237_v24  ;;  %v2362_v24 = vld [vmem:[%s2447_s3] sm:$0xff] }
  0xa3   : > { %785 = vmatmul.f32.vlgmr.msrb.gmra.mxu0 %v1678_v45  ;;  %805 = vmatmul.f32.vlgmr.msrb.gmra.mxu1 %v1680_v46 }
  0xa4   : > { %825 = vmatmul.f32.vlgmr.msrb.gmra.mxu2 %v1678_v45  ;;  %845 = vmatmul.f32.vlgmr.msrb.gmra.mxu3 %v1680_v46  ;;  %v221_v45 = vld [vmem:[%s2445_s1 + $0x98] sm:$0xff]  ;;  %v210_v46 = vld [vmem:[%s2445_s1 + $0x40] sm:$0xff] }
  0xa5   : > { %865 = vmatpush.msra.mxu0 %v226_v25  ;;  %885 = vmatpush.msra.mxu1 %v227_v26 }
  0xa6   : > { %905 = vmatpush.msra.mxu2 %v228_v27  ;;  %925 = vmatpush.msra.mxu3 %v229_v28 }
  0xa7   : > { %866 = vmatpush.msra.mxu0 %v218_v29  ;;  %886 = vmatpush.msra.mxu1 %v219_v30  ;;  %v1015_v29 = vperm.slane %v2362_v24, 0  ;;  %v1016_v30 = vperm.slane %v2362_v24, 1 }
  0xa8   : > { %906 = vmatpush.msra.mxu2 %v220_v31  ;;  %926 = vmatpush.msra.mxu3 %v221_v45 }
  0xa9   : > { %867 = vmatpush.msra.mxu0 %v210_v46  ;;  %887 = vmatpush.msra.mxu1 %v211_v32 }
  0xaa   : > { %907 = vmatpush.msra.mxu2 %v212_v33  ;;  %927 = vmatpush.msra.mxu3 %v213_v34 }
  0xab   : > { %868 = vmatpush.msra.mxu0 %v202_v35  ;;  %888 = vmatpush.msra.mxu1 %v203_v36 }
  0xac   : > { %908 = vmatpush.msra.mxu2 %v204_v37  ;;  %928 = vmatpush.msra.mxu3 %v205_v38 }
  0xad   : > { %1250 = vmatmul.msk.f32.vlgmr.msra.gmra.mxu0 %vm849_vm0, %v2245_v39  ;;  %1251 = vmatmul.msk.f32.vlgmr.msra.gmra.mxu1 %vm849_vm0, %v2245_v39 }
  0xae   : > { %1252 = vmatmul.msk.f32.vlgmr.msra.gmra.mxu2 %vm849_vm0, %v2245_v39  ;;  %1253 = vmatmul.msk.f32.vlgmr.msra.gmra.mxu3 %vm849_vm0, %v2245_v39 }
  0xaf   : > { %941 = vmatpush.msrb.mxu0 %v262_v40  ;;  %961 = vmatpush.msrb.mxu1 %v263_v41  ;;  %v1018_v40 = vperm.slane %v2362_v24, 3 }
  0xb0   : > { %981 = vmatpush.msrb.mxu2 %v264_v42  ;;  %1001 = vmatpush.msrb.mxu3 %v265_v43 }
  0xb1   : > { %942 = vmatpush.msrb.mxu0 %v254_v44  ;;  %962 = vmatpush.msrb.mxu1 %v255_v47 }
  0xb2   : > { %982 = vmatpush.msrb.mxu2 %v256_v48  ;;  %1002 = vmatpush.msrb.mxu3 %v257_v49 }
  0xb3   : > { %943 = vmatpush.msrb.mxu0 %v246_v50  ;;  %963 = vmatpush.msrb.mxu1 %v247_v51 }
  0xb4   : > { %983 = vmatpush.msrb.mxu2 %v248_v52  ;;  %1003 = vmatpush.msrb.mxu3 %v249_v53 }
  0xb5   : > { %944 = vmatpush.msrb.mxu0 %v238_v54  ;;  %964 = vmatpush.msrb.mxu1 %v239_v55 }
  0xb6   : > { %984 = vmatpush.msrb.mxu2 %v240_v56  ;;  %1004 = vmatpush.msrb.mxu3 %v241_v57 }
  0xb7   : > { %945 = vmatpush.msrb.mxu0 %v230_v58  ;;  %965 = vmatpush.msrb.mxu1 %v231_v59 }
  0xb8   : > { %985 = vmatpush.msrb.mxu2 %v232_v60  ;;  %1005 = vmatpush.msrb.mxu3 %v233_v61 }
  0xb9   : > { %946 = vmatpush.msrb.mxu0 %v222_v62  ;;  %966 = vmatpush.msrb.mxu1 %v223_v63 }
  0xba   : > { %986 = vmatpush.msrb.mxu2 %v224_v0  ;;  %1006 = vmatpush.msrb.mxu3 %v225_v1 }
  0xbb   : > { %947 = vmatpush.msrb.mxu0 %v214_v2  ;;  %967 = vmatpush.msrb.mxu1 %v215_v3  ;;  %v1019_v2 = vperm.slane %v2362_v24, 4  ;;  %v1020_v3 = vperm.slane %v2362_v24, 5 }
  0xbc   : > { %987 = vmatpush.msrb.mxu2 %v216_v4  ;;  %1007 = vmatpush.msrb.mxu3 %v217_v5 }
  0xbd   : > { %948 = vmatpush.msrb.mxu0 %v206_v6  ;;  %968 = vmatpush.msrb.mxu1 %v207_v7 }
  0xbe   : > { %988 = vmatpush.msrb.mxu2 %v208_v8  ;;  %1008 = vmatpush.msrb.mxu3 %v209_v9 }
  0xbf   : > { %1254 = vmatmul.msk.f32.vlgmr.msrb.gmra.mxu0 %vm849_vm0, %v2245_v39  ;;  %1255 = vmatmul.msk.f32.vlgmr.msrb.gmra.mxu1 %vm849_vm0, %v2245_v39 }
  0xc0   : > { %1256 = vmatmul.msk.f32.vlgmr.msrb.gmra.mxu2 %vm849_vm0, %v2245_v39  ;;  %1257 = vmatmul.msk.f32.vlgmr.msrb.gmra.mxu3 %vm849_vm0, %v2245_v39  ;;  %v1017_v39 = vperm.slane %v2362_v24, 2 }
  0xd2   : > { %v546_v10 = vpop.f32.mrf.mxu0  ;;  %v566_v11 = vpop.f32.mrf.mxu1 }
  0xd3   : > { %v567_v28 = vadd.f32 %v566_v11, %v546_v10 }
  0xd9   : > { %v586_v12 = vpop.f32.mrf.mxu2  ;;  %v606_v13 = vpop.f32.mrf.mxu3 }
  0xda   : > { %v607_v27 = vadd.f32 %v606_v13, %v586_v12 }
  0xf4   : > { %v626_v14 = vpop.f32.mrf.mxu0  ;;  %v646_v15 = vpop.f32.mrf.mxu1 }
  0xf5   : > { %v647_v38 = vadd.f32 %v646_v15, %v626_v14  ;;  %v1021_v15 = vperm.slane %v2362_v24, 6 }
  0xfb   : > { %v666_v16 = vpop.f32.mrf.mxu2  ;;  %v686_v17 = vpop.f32.mrf.mxu3 }
  0xfc   : > { %v687_v37 = vadd.f32 %v686_v17, %v666_v16  ;;  %v1022_v16 = vperm.slane %v2362_v24, 7 }
 0x114   : > { %v706_v18 = vpop.f32.mrf.mxu0  ;;  %v726_v19 = vpop.f32.mrf.mxu1 }
 0x115   : > { %v727_v59 = vadd.f32 %v726_v19, %v706_v18 }
 0x11b   : > { %v746_v20 = vpop.f32.mrf.mxu2  ;;  %v766_v21 = vpop.f32.mrf.mxu3 }
 0x11c   : > { %v767_v60 = vadd.f32 %v766_v21, %v746_v20 }
 0x120   : > { %v786_v22 = vpop.f32.mrf.mxu0  ;;  %v806_v23 = vpop.f32.mrf.mxu1 }
 0x121   : > { %v807_v4 = vadd.f32 %v806_v23, %v786_v22 }
 0x127   : > { %v826_v25 = vpop.f32.mrf.mxu2  ;;  %v846_v26 = vpop.f32.mrf.mxu3 }
 0x128   : > { %v847_v13 = vadd.f32 %v846_v26, %v826_v25 }
 0x12a   : > { %v870_v31 = vpop.f32.mrf.mxu0  ;;  %v890_v45 = vpop.f32.mrf.mxu1 }
 0x12b   : > { %v871_v46 = vadd.f32 %v870_v31, %v567_v28  ;;  %v891_v32 = vadd.f32 %v890_v45, %v607_v27 }
 0x12d   : > { %v1031_v33 = vadd.f32 %v1015_v29, %v871_v46  ;;  %v1032_v34 = vadd.f32 %v1016_v30, %v891_v32 }
 0x12f   : > { %v1258_v35 = vmul.f32 -1.442695, %v1031_v33  ;;  %v1259_v36 = vmul.f32 -1.442695, %v1032_v34 }
 0x131   : > { %1276 = vpow2.f32 %v1258_v35  ;;  %v910_v41 = vpop.f32.mrf.mxu2  ;;  %v930_v42 = vpop.f32.mrf.mxu3 }
 0x132   : > { %1278 = vpow2.f32 %v1259_v36  ;;  %v911_v43 = vadd.f32 %v910_v41, %v647_v38  ;;  %v931_v44 = vadd.f32 %v930_v42, %v687_v37 }
 0x134   : > { %v1033_v47 = vadd.f32 %v1017_v39, %v911_v43  ;;  %v1034_v48 = vadd.f32 %v1018_v40, %v931_v44 }
 0x136   : > { %v1260_v49 = vmul.f32 -1.442695, %v1033_v47  ;;  %v1261_v50 = vmul.f32 -1.442695, %v1034_v48 }
 0x137   : > { %v1277_v51 = vpop.eup %1276 }
 0x138   : > { %v1279_v52 = vpop.eup %1278  ;;  %v2368_v53 = vadd.f32 1.0, %v1277_v51  ;;  %1280 = vpow2.f32 %v1260_v49 }
 0x139   : > { %v2370_v54 = vadd.f32 1.0, %v1279_v52  ;;  %1282 = vpow2.f32 %v1261_v50  ;;  %v1158_v52 = vld.sshfl [vmem:[#allocation1] sm:$0xff pattern:$0x73625140] }
 0x13a   : > { %1284 = vrcp.f32 %v2368_v53  ;;  %v1058_v6 = vand.u32 2147483648, %v2368_v53  ;;  %vm1052_vm1 = vweird.f32 %v2368_v53  ;;  %v1056_v17 = vand.u32 2147483647, %v2368_v53 }
 0x13b   : > { %1286 = vrcp.f32 %v2370_v54  ;;  %v1071_v10 = vand.u32 2147483647, %v2370_v54  ;;  %vm1067_vm2 = vweird.f32 %v2370_v54  ;;  %v1073_v18 = vand.u32 2147483648, %v2370_v54 }
 0x13c   : > { %v950_v62 = vpop.f32.mrf.mxu0  ;;  %v970_v63 = vpop.f32.mrf.mxu1  ;;  %v1059_v19 = vor.u32 1.1754944e-38, %v1058_v6  ;;  %vm1057_vm15 = vcmp.eq.f32.partialorder %v1056_v17, 8.507059e+37 }
 0x13d   : > { %v951_v8 = vadd.f32 %v950_v62, %v727_v59  ;;  %v971_v9 = vadd.f32 %v970_v63, %v767_v60  ;;  %vm2400_vm3 = vcmp.eq.f32.partialorder %v1071_v10, 8.507059e+37  ;;  %v1074_v49 = vor.u32 1.1754944e-38, %v1073_v18 }
 0x13e   : > { %v1281_v55 = vpop.eup %1280 }
 0x13f   : > { %v1283_v56 = vpop.eup %1282  ;;  %v2374_v57 = vadd.f32 1.0, %v1281_v55  ;;  %v1035_v25 = vadd.f32 %v1019_v2, %v951_v8  ;;  %v1036_v27 = vadd.f32 %v1020_v3, %v971_v9 }
 0x140   : > { %v2376_v58 = vpop.eup %1284  ;;  %v2378_v61 = vadd.f32 1.0, %v1283_v56 }
 0x141   : > { %v2380_v0 = vpop.eup %1286  ;;  %v1048_v1 = vmul.f32 %v2376_v58, %v2368_v53  ;;  %1288 = vrcp.f32 %v2374_v57  ;;  %v1096_v30 = vand.u32 2147483648, %v2374_v57  ;;  %vm1053_vm5 = vweird.f32 %v2376_v58 }
 0x142   : > { %v1063_v5 = vmul.f32 %v2380_v0, %v2370_v54  ;;  %1290 = vrcp.f32 %v2378_v61  ;;  %v1111_v31 = vand.u32 2147483648, %v2378_v61  ;;  %vm1068_vm4 = vweird.f32 %v2380_v0  ;;  %vm2428_vm10 = vmor %vm1052_vm1, %vm1053_vm5 }
 0x143   : > { %v1049_v7 = vsub.f32 1.0, %v1048_v1  ;;  %v990_v11 = vpop.f32.mrf.mxu2  ;;  %v1010_v12 = vpop.f32.mrf.mxu3  ;;  %v1094_v35 = vand.u32 2147483647, %v2374_v57  ;;  %1292 = vtanh.f32 %v1036_v27  ;;  %vm2415_vm7 = vmor %vm1067_vm2, %vm1068_vm4  ;;  %v1109_v42 = vand.u32 2147483647, %v2378_v61 }
 0x144   : > { %v1064_v14 = vsub.f32 1.0, %v1063_v5  ;;  %v991_v21 = vadd.f32 %v990_v11, %v807_v4  ;;  %v1011_v22 = vadd.f32 %v1010_v12, %v847_v13  ;;  %vm1090_vm9 = vweird.f32 %v2374_v57 }
 0x145   : > { %v1050_v26 = vmul.f32 %v2376_v58, %v1049_v7  ;;  %v1097_v50 = vor.u32 1.1754944e-38, %v1096_v30  ;;  %vm1105_vm12 = vweird.f32 %v2378_v61  ;;  %v1112_v55 = vor.u32 1.1754944e-38, %v1111_v31 }
 0x146   : > { %v1065_v20 = vmul.f32 %v2380_v0, %v1064_v14  ;;  %v1037_v45 = vadd.f32 %v1021_v15, %v991_v21  ;;  %v1038_v33 = vadd.f32 %v1022_v16, %v1011_v22  ;;  %vm1095_vm14 = vcmp.eq.f32.partialorder %v1094_v35, 8.507059e+37 }
 0x147   : > { %v1289_v23 = vpop.eup %1288  ;;  %v1051_v38 = vadd.f32 %v2376_v58, %v1050_v26  ;;  %vm1110_vm0 = vcmp.eq.f32.partialorder %v1109_v42, 8.507059e+37  ;;  %vm1175_vm1 = vcmask 1041408  }
 0x148   : > { %v1291_v28 = vpop.eup %1290  ;;  %v1086_v29 = vmul.f32 %v1289_v23, %v2374_v57  ;;  %v1066_v32 = vadd.f32 %v2380_v0, %v1065_v20  ;;  %v1262_v36 = vmul.f32 -1.442695, %v1037_v45  ;;  %v1263_v39 = vmul.f32 -1.442695, %v1038_v33 }
 0x149   : > { %v1101_v46 = vmul.f32 %v1291_v28, %v2378_v61  ;;  %vm1091_vm6 = vweird.f32 %v1289_v23  ;;  %vm1106_vm8 = vweird.f32 %v1291_v28  ;;  %v1055_v51 = vsel %vm2428_vm10, %v2376_v58, %v1051_v38  ;;  %v1159_v57 = vld.sshfl [vmem:[#allocation1 + $0x8] sm:$0xff pattern:$0x73625140]  ;;  %v1293_v59 = vpop.eup %1292 }
 0x14a   : > { %v1087_v34 = vsub.f32 1.0, %v1086_v29  ;;  %1294 = vpow2.f32 %v1262_v36  ;;  %v1070_v44 = vsel %vm2415_vm7, %v2380_v0, %v1066_v32  ;;  %vm1092_vm11 = vmor %vm1090_vm9, %vm1091_vm6  ;;  %v1060_v63 = vsel %vm1057_vm15, %v1059_v19, %v1055_v51 }
 0x14b   : > { %v1102_v37 = vsub.f32 1.0, %v1101_v46  ;;  %1296 = vpow2.f32 %v1263_v39  ;;  %vm1107_vm13 = vmor %vm1105_vm12, %vm1106_vm8  ;;  %v1075_v56 = vsel %vm2400_vm3, %v1074_v49, %v1070_v44 }
 0x14c   : > { %v1088_v40 = vmul.f32 %v1289_v23, %v1087_v34  ;;  %1298 = vtanh.f32 %v1035_v25  ;;  %v1165_v3 = vmul.f32 %v1293_v59, %v1075_v56 }
 0x14d   : > { %v1103_v43 = vmul.f32 %v1291_v28, %v1102_v37 }
 0x14e   : > { %v1089_v48 = vadd.f32 %v1289_v23, %v1088_v40 }
 0x14f   : > { %v1104_v54 = vadd.f32 %v1291_v28, %v1103_v43 }
 0x150   : > { %v1093_v53 = vsel %vm1092_vm11, %v1289_v23, %v1089_v48  ;;  %v1295_v61 = vpop.eup %1294 }
 0x151   : > { %v1098_v60 = vsel %vm1095_vm14, %v1097_v50, %v1093_v53  ;;  %v1108_v62 = vsel %vm1107_vm13, %v1291_v28, %v1104_v54  ;;  %v1297_v1 = vpop.eup %1296  ;;  %v1123_v4 = vadd.f32 1.0, %v1295_v61 }
 0x152   : > { %v1113_v0 = vsel %vm1110_vm0, %v1112_v55, %v1108_v62  ;;  %v1162_v58 = vmul.f32 %v1158_v52, %v1098_v60  ;;  %v1299_v5 = vpop.eup %1298  ;;  %v1124_v6 = vadd.f32 1.0, %v1297_v1 }
 0x153   : > { %v1163_v2 = vmul.f32 %v1159_v57, %v1113_v0  ;;  %v1164_v7 = vmul.f32 %v1299_v5, %v1060_v63  ;;  %1300 = vrcp.f32 %v1123_v4  ;;  %vm1130_vm2 = vweird.f32 %v1123_v4 }
 0x154   : > { %1302 = vrcp.f32 %v1124_v6  ;;  %v1136_v20 = vand.u32 2147483648, %v1123_v4  ;;  %v1151_v21 = vand.u32 2147483648, %v1124_v6  ;;  %v1134_v22 = vand.u32 2147483647, %v1123_v4 }
 0x155   : > { %v1167_v8 = vadd.f32 %v1165_v3, %v1163_v2  ;;  %v1166_v9 = vadd.f32 %v1164_v7, %v1162_v58  ;;  %v1149_v25 = vand.u32 2147483647, %v1124_v6  ;;  %vm1145_vm6 = vweird.f32 %v1124_v6 }
 0x156   : > { %v1137_v24 = vor.u32 1.1754944e-38, %v1136_v20  ;;  %v1152_v28 = vor.u32 1.1754944e-38, %v1151_v21  ;;  %vm1135_vm8 = vcmp.eq.f32.partialorder %v1134_v22, 8.507059e+37 }
 0x157   : > { %v1174_v10 = vrot.slane %v1167_v8, 6  ;;  %1304 = vtanh.f32 %v1167_v8  ;;  %vm1150_vm9 = vcmp.eq.f32.partialorder %v1149_v25, 8.507059e+37 }
 0x158   : > { %1306 = vtanh.f32 %v1166_v9 }
 0x159   : > { %v1176_v11 = vsel %vm1175_vm1, %v1166_v9, %v1174_v10  ;;  %v1301_v12 = vpop.eup %1300 }
 0x15a   : > { %1178 = vst [vmem:[#allocation3] sm:$0xf] %v1176_v11  ;;  %v1126_v13 = vmul.f32 %v1301_v12, %v1123_v4  ;;  %v1303_v14 = vpop.eup %1302  ;;  %vm1131_vm3 = vweird.f32 %v1301_v12 }
 0x15b   : > { %v1141_v16 = vmul.f32 %v1303_v14, %v1124_v6  ;;  %vm1146_vm4 = vweird.f32 %v1303_v14  ;;  %vm1132_vm5 = vmor %vm1130_vm2, %vm1131_vm3 }
 0x15c   : > { %v1127_v15 = vsub.f32 1.0, %v1126_v13  ;;  %vm1147_vm7 = vmor %vm1145_vm6, %vm1146_vm4 }
 0x15d   : > { %v1142_v18 = vsub.f32 1.0, %v1141_v16  ;;  %v1305_v30 = vpop.eup %1304 }
 0x15e   : > { %v1128_v17 = vmul.f32 %v1301_v12, %v1127_v15  ;;  %v1307_v32 = vpop.eup %1306 }
 0x15f   : > { %v1143_v23 = vmul.f32 %v1303_v14, %v1142_v18 }
 0x160   : > { %v1129_v19 = vadd.f32 %v1301_v12, %v1128_v17 }
 0x161   : > { %v1144_v27 = vadd.f32 %v1303_v14, %v1143_v23 }
 0x162   : > { %v1133_v26 = vsel %vm1132_vm5, %v1301_v12, %v1129_v19 }
 0x163   : > { %v1148_v29 = vsel %vm1147_vm7, %v1303_v14, %v1144_v27  ;;  %v1138_v31 = vsel %vm1135_vm8, %v1137_v24, %v1133_v26 }
 0x164   : > { %v1153_v45 = vsel %vm1150_vm9, %v1152_v28, %v1148_v29  ;;  %v1170_v33 = vmul.f32 %v1307_v32, %v1138_v31 }
 0x165   : > { %v1171_v46 = vmul.f32 %v1305_v30, %v1153_v45 }
 0x167   : > { %v1181_v34 = vrot.slane %v1171_v46, 6 }
 0x169   : > { %v1182_v35 = vsel %vm1175_vm1, %v1170_v33, %v1181_v34 }
 0x16a   : > { %1184 = vst [vmem:[#allocation2] sm:$0xf] %v1182_v35 }
 0x16b   : > { %1185 = vst [vmem:[%s1358_s25] sm:$0xf] %v1182_v35 }
 0x16c PF: > { %s14_s15 = sadd.s32 1, %s1314_s15  }
 0x16d   : > { %p11_p5 = scmp.ge.s32.totalorder %s14_s15, 130  }
 0x16f   :  { %13 = sbr.rel (!%p11_p5) target bundleno = 1 (0x1), region = 70 }

// kernel: model_forward.23
= control target key start
LH: loop header
LB: loop body
LE: loop exit
PB: predicated region body
PF: predicated region fallthrough
CT: control target
= control target key end

     0   :  { %vm662_vm0 = vcmask 89088   ;;  %s2295_s1 = inlined_call_operand.vmem [shape: f32[512,11], index: 1, kind: input, shape index: {}]   ;;  %s2296_s0 = inlined_call_operand.vmem [shape: f32[256,512], index: 0, kind: input, shape index: {}]   ;;  %s2297_s2 = inlined_call_operand.vmem [shape: f32[1,11], index: 2, kind: input, shape index: {}]   ;;  %s2298_s3 = inlined_call_operand.vmem [shape: f32[256,11], index: 3, kind: output, shape index: {}]  }
   0x1   :  { %v189_v0 = vld [vmem:[%s2295_s1 + $0x178] sm:$0xff]  ;;  %v188_v2 = vld [vmem:[%s2295_s1 + $0x170] sm:$0xff]  ;;  %v187_v6 = vld [vmem:[%s2295_s1 + $0x168] sm:$0xff] }
   0x2   :  { %v157_v1 = vld [vmem:[%s2295_s1 + $0x78] sm:$0xff]  ;;  %436 = vmatpush.msra.mxu2 %v189_v0  ;;  %v156_v4 = vld [vmem:[%s2295_s1 + $0x70] sm:$0xff]  ;;  %v155_v8 = vld [vmem:[%s2295_s1 + $0x68] sm:$0xff] }
   0x3   :  { %210 = vmatpush.msra.mxu0 %v157_v1  ;;  %v205_v3 = vld [vmem:[%s2295_s1 + $0x1f8] sm:$0xff]  ;;  %v204_v7 = vld [vmem:[%s2295_s1 + $0x1f0] sm:$0xff]  ;;  %v203_v10 = vld [vmem:[%s2295_s1 + $0x1e8] sm:$0xff] }
   0x4   :  { %v173_v5 = vld [vmem:[%s2295_s1 + $0xf8] sm:$0xff]  ;;  %549 = vmatpush.msra.mxu3 %v205_v3  ;;  %437 = vmatpush.msra.mxu2 %v188_v2  ;;  %v172_v9 = vld [vmem:[%s2295_s1 + $0xf0] sm:$0xff]  ;;  %v186_v11 = vld [vmem:[%s2295_s1 + $0x160] sm:$0xff] }
   0x5   :  { %323 = vmatpush.msra.mxu1 %v173_v5  ;;  %211 = vmatpush.msra.mxu0 %v156_v4  ;;  %v154_v12 = vld [vmem:[%s2295_s1 + $0x60] sm:$0xff]  ;;  %v171_v13 = vld [vmem:[%s2295_s1 + $0xe8] sm:$0xff]  ;;  %v185_v16 = vld [vmem:[%s2295_s1 + $0x158] sm:$0xff] }
   0x6   :  { %550 = vmatpush.msra.mxu3 %v204_v7  ;;  %438 = vmatpush.msra.mxu2 %v187_v6  ;;  %v202_v14 = vld [vmem:[%s2295_s1 + $0x1e0] sm:$0xff]  ;;  %v153_v17 = vld [vmem:[%s2295_s1 + $0x58] sm:$0xff]  ;;  %v184_v20 = vld [vmem:[%s2295_s1 + $0x150] sm:$0xff] }
   0x7   :  { %324 = vmatpush.msra.mxu1 %v172_v9  ;;  %212 = vmatpush.msra.mxu0 %v155_v8  ;;  %v170_v15 = vld [vmem:[%s2295_s1 + $0xe0] sm:$0xff]  ;;  %v201_v18 = vld [vmem:[%s2295_s1 + $0x1d8] sm:$0xff]  ;;  %v152_v21 = vld [vmem:[%s2295_s1 + $0x50] sm:$0xff] }
   0x8   :  { %551 = vmatpush.msra.mxu3 %v203_v10  ;;  %439 = vmatpush.msra.mxu2 %v186_v11  ;;  %v169_v19 = vld [vmem:[%s2295_s1 + $0xd8] sm:$0xff]  ;;  %v200_v22 = vld [vmem:[%s2295_s1 + $0x1d0] sm:$0xff]  ;;  %v183_v24 = vld [vmem:[%s2295_s1 + $0x148] sm:$0xff] }
   0x9   :  { %325 = vmatpush.msra.mxu1 %v171_v13  ;;  %213 = vmatpush.msra.mxu0 %v154_v12  ;;  %v168_v23 = vld [vmem:[%s2295_s1 + $0xd0] sm:$0xff]  ;;  %v151_v25 = vld [vmem:[%s2295_s1 + $0x48] sm:$0xff]  ;;  %v182_v28 = vld [vmem:[%s2295_s1 + $0x140] sm:$0xff] }
   0xa   :  { %552 = vmatpush.msra.mxu3 %v202_v14  ;;  %440 = vmatpush.msra.mxu2 %v185_v16  ;;  %v199_v26 = vld [vmem:[%s2295_s1 + $0x1c8] sm:$0xff]  ;;  %v150_v29 = vld [vmem:[%s2295_s1 + $0x40] sm:$0xff]  ;;  %v181_v32 = vld [vmem:[%s2295_s1 + $0x138] sm:$0xff] }
   0xb   :  { %326 = vmatpush.msra.mxu1 %v170_v15  ;;  %214 = vmatpush.msra.mxu0 %v153_v17  ;;  %v167_v27 = vld [vmem:[%s2295_s1 + $0xc8] sm:$0xff]  ;;  %v198_v30 = vld [vmem:[%s2295_s1 + $0x1c0] sm:$0xff]  ;;  %v149_v33 = vld [vmem:[%s2295_s1 + $0x38] sm:$0xff] }
   0xc   :  { %553 = vmatpush.msra.mxu3 %v201_v18  ;;  %441 = vmatpush.msra.mxu2 %v184_v20  ;;  %v166_v31 = vld [vmem:[%s2295_s1 + $0xc0] sm:$0xff]  ;;  %v197_v34 = vld [vmem:[%s2295_s1 + $0x1b8] sm:$0xff]  ;;  %v180_v36 = vld [vmem:[%s2295_s1 + $0x130] sm:$0xff] }
   0xd   :  { %327 = vmatpush.msra.mxu1 %v169_v19  ;;  %215 = vmatpush.msra.mxu0 %v152_v21  ;;  %v165_v35 = vld [vmem:[%s2295_s1 + $0xb8] sm:$0xff]  ;;  %v148_v37 = vld [vmem:[%s2295_s1 + $0x30] sm:$0xff]  ;;  %v179_v40 = vld [vmem:[%s2295_s1 + $0x128] sm:$0xff] }
   0xe   :  { %554 = vmatpush.msra.mxu3 %v200_v22  ;;  %442 = vmatpush.msra.mxu2 %v183_v24  ;;  %v196_v38 = vld [vmem:[%s2295_s1 + $0x1b0] sm:$0xff]  ;;  %v147_v41 = vld [vmem:[%s2295_s1 + $0x28] sm:$0xff]  ;;  %v178_v44 = vld [vmem:[%s2295_s1 + $0x120] sm:$0xff] }
   0xf   :  { %328 = vmatpush.msra.mxu1 %v168_v23  ;;  %216 = vmatpush.msra.mxu0 %v151_v25  ;;  %v164_v39 = vld [vmem:[%s2295_s1 + $0xb0] sm:$0xff]  ;;  %v195_v42 = vld [vmem:[%s2295_s1 + $0x1a8] sm:$0xff]  ;;  %v146_v45 = vld [vmem:[%s2295_s1 + $0x20] sm:$0xff] }
  0x10   :  { %555 = vmatpush.msra.mxu3 %v199_v26  ;;  %443 = vmatpush.msra.mxu2 %v182_v28  ;;  %v163_v43 = vld [vmem:[%s2295_s1 + $0xa8] sm:$0xff]  ;;  %v194_v46 = vld [vmem:[%s2295_s1 + $0x1a0] sm:$0xff]  ;;  %v177_v48 = vld [vmem:[%s2295_s1 + $0x118] sm:$0xff] }
  0x11   :  { %329 = vmatpush.msra.mxu1 %v167_v27  ;;  %217 = vmatpush.msra.mxu0 %v150_v29  ;;  %v162_v47 = vld [vmem:[%s2295_s1 + $0xa0] sm:$0xff]  ;;  %v145_v49 = vld [vmem:[%s2295_s1 + $0x18] sm:$0xff]  ;;  %v176_v52 = vld [vmem:[%s2295_s1 + $0x110] sm:$0xff] }
  0x12   :  { %556 = vmatpush.msra.mxu3 %v198_v30  ;;  %444 = vmatpush.msra.mxu2 %v181_v32  ;;  %v193_v50 = vld [vmem:[%s2295_s1 + $0x198] sm:$0xff]  ;;  %v144_v53 = vld [vmem:[%s2295_s1 + $0x10] sm:$0xff]  ;;  %v175_v56 = vld [vmem:[%s2295_s1 + $0x108] sm:$0xff] }
  0x13   :  { %330 = vmatpush.msra.mxu1 %v166_v31  ;;  %218 = vmatpush.msra.mxu0 %v149_v33  ;;  %v161_v51 = vld [vmem:[%s2295_s1 + $0x98] sm:$0xff]  ;;  %v192_v54 = vld [vmem:[%s2295_s1 + $0x190] sm:$0xff]  ;;  %v143_v57 = vld [vmem:[%s2295_s1 + $0x8] sm:$0xff] }
  0x14   :  { %557 = vmatpush.msra.mxu3 %v197_v34  ;;  %445 = vmatpush.msra.mxu2 %v180_v36  ;;  %v160_v55 = vld [vmem:[%s2295_s1 + $0x90] sm:$0xff]  ;;  %v191_v58 = vld [vmem:[%s2295_s1 + $0x188] sm:$0xff]  ;;  %v174_v60 = vld [vmem:[%s2295_s1 + $0x100] sm:$0xff] }
  0x15   :  { %331 = vmatpush.msra.mxu1 %v165_v35  ;;  %219 = vmatpush.msra.mxu0 %v148_v37  ;;  %v159_v59 = vld [vmem:[%s2295_s1 + $0x88] sm:$0xff]  ;;  %v142_v61 = vld [vmem:[%s2295_s1] sm:$0xff]  ;;  %v16_v62 = vld [vmem:[%s2296_s0 + $0x10] sm:$0xff] }
  0x16   :  { %558 = vmatpush.msra.mxu3 %v196_v38  ;;  %446 = vmatpush.msra.mxu2 %v179_v40  ;;  %v190_v63 = vld [vmem:[%s2295_s1 + $0x180] sm:$0xff]  ;;  %v17_v1 = vld [vmem:[%s2296_s0 + $0x18] sm:$0xff]  ;;  %v15_v3 = vld [vmem:[%s2296_s0 + $0x8] sm:$0xff] }
  0x17   :  { %332 = vmatpush.msra.mxu1 %v164_v39  ;;  %220 = vmatpush.msra.mxu0 %v147_v41  ;;  %v14_v0 = vld [vmem:[%s2296_s0] sm:$0xff]  ;;  %v20_v4 = vld [vmem:[%s2296_s0 + $0x30] sm:$0xff]  ;;  %v21_v6 = vld [vmem:[%s2296_s0 + $0x38] sm:$0xff] }
  0x18   :  { %559 = vmatpush.msra.mxu3 %v195_v42  ;;  %447 = vmatpush.msra.mxu2 %v178_v44  ;;  %v158_v2 = vld [vmem:[%s2295_s1 + $0x80] sm:$0xff]  ;;  %v19_v7 = vld [vmem:[%s2296_s0 + $0x28] sm:$0xff]  ;;  %v24_v8 = vld [vmem:[%s2296_s0 + $0x50] sm:$0xff] }
  0x19   :  { %333 = vmatpush.msra.mxu1 %v163_v43  ;;  %221 = vmatpush.msra.mxu0 %v146_v45  ;;  %v18_v5 = vld [vmem:[%s2296_s0 + $0x20] sm:$0xff]  ;;  %v25_v10 = vld [vmem:[%s2296_s0 + $0x58] sm:$0xff]  ;;  %v23_v11 = vld [vmem:[%s2296_s0 + $0x48] sm:$0xff] }
  0x1a   :  { %560 = vmatpush.msra.mxu3 %v194_v46  ;;  %448 = vmatpush.msra.mxu2 %v177_v48  ;;  %v22_v9 = vld [vmem:[%s2296_s0 + $0x40] sm:$0xff]  ;;  %v28_v12 = vld [vmem:[%s2296_s0 + $0x70] sm:$0xff]  ;;  %v29_v14 = vld [vmem:[%s2296_s0 + $0x78] sm:$0xff] }
  0x1b   :  { %334 = vmatpush.msra.mxu1 %v162_v47  ;;  %222 = vmatpush.msra.mxu0 %v145_v49  ;;  %v26_v13 = vld [vmem:[%s2296_s0 + $0x60] sm:$0xff]  ;;  %v27_v15 = vld [vmem:[%s2296_s0 + $0x68] sm:$0xff]  ;;  %v32_v16 = vld [vmem:[%s2296_s0 + $0x90] sm:$0xff] }
  0x1c   :  { %561 = vmatpush.msra.mxu3 %v193_v50  ;;  %449 = vmatpush.msra.mxu2 %v176_v52  ;;  %v30_v17 = vld [vmem:[%s2296_s0 + $0x80] sm:$0xff]  ;;  %v33_v18 = vld [vmem:[%s2296_s0 + $0x98] sm:$0xff]  ;;  %v31_v19 = vld [vmem:[%s2296_s0 + $0x88] sm:$0xff] }
  0x1d   :  { %335 = vmatpush.msra.mxu1 %v161_v51  ;;  %223 = vmatpush.msra.mxu0 %v144_v53  ;;  %v36_v20 = vld [vmem:[%s2296_s0 + $0xb0] sm:$0xff]  ;;  %v34_v21 = vld [vmem:[%s2296_s0 + $0xa0] sm:$0xff]  ;;  %v37_v22 = vld [vmem:[%s2296_s0 + $0xb8] sm:$0xff] }
  0x1e   :  { %562 = vmatpush.msra.mxu3 %v192_v54  ;;  %450 = vmatpush.msra.mxu2 %v175_v56  ;;  %v35_v23 = vld [vmem:[%s2296_s0 + $0xa8] sm:$0xff]  ;;  %v40_v24 = vld [vmem:[%s2296_s0 + $0xd0] sm:$0xff]  ;;  %v38_v25 = vld [vmem:[%s2296_s0 + $0xc0] sm:$0xff] }
  0x1f   :  { %336 = vmatpush.msra.mxu1 %v160_v55  ;;  %224 = vmatpush.msra.mxu0 %v143_v57  ;;  %v41_v26 = vld [vmem:[%s2296_s0 + $0xd8] sm:$0xff]  ;;  %v39_v27 = vld [vmem:[%s2296_s0 + $0xc8] sm:$0xff]  ;;  %v44_v28 = vld [vmem:[%s2296_s0 + $0xf0] sm:$0xff] }
  0x20   :  { %563 = vmatpush.msra.mxu3 %v191_v58  ;;  %451 = vmatpush.msra.mxu2 %v174_v60  ;;  %v42_v29 = vld [vmem:[%s2296_s0 + $0xe0] sm:$0xff]  ;;  %v45_v30 = vld [vmem:[%s2296_s0 + $0xf8] sm:$0xff]  ;;  %v43_v31 = vld [vmem:[%s2296_s0 + $0xe8] sm:$0xff] }
  0x21   :  { %337 = vmatpush.msra.mxu1 %v159_v59  ;;  %225 = vmatpush.msra.mxu0 %v142_v61  ;;  %v48_v32 = vld [vmem:[%s2296_s0 + $0x110] sm:$0xff]  ;;  %v46_v33 = vld [vmem:[%s2296_s0 + $0x100] sm:$0xff]  ;;  %v49_v34 = vld [vmem:[%s2296_s0 + $0x118] sm:$0xff] }
  0x22   :  { %452 = vmatmul.f32.vlgmr.msra.gmra.mxu2 %v16_v62  ;;  %564 = vmatpush.msra.mxu3 %v190_v63  ;;  %v47_v35 = vld [vmem:[%s2296_s0 + $0x108] sm:$0xff]  ;;  %v52_v36 = vld [vmem:[%s2296_s0 + $0x130] sm:$0xff]  ;;  %v50_v37 = vld [vmem:[%s2296_s0 + $0x120] sm:$0xff] }
  0x23   :  { %226 = vmatmul.f32.vlgmr.msra.gmra.mxu0 %v14_v0  ;;  %565 = vmatmul.f32.vlgmr.msra.gmra.mxu3 %v17_v1  ;;  %v53_v38 = vld [vmem:[%s2296_s0 + $0x138] sm:$0xff]  ;;  %v51_v39 = vld [vmem:[%s2296_s0 + $0x128] sm:$0xff]  ;;  %v56_v40 = vld [vmem:[%s2296_s0 + $0x150] sm:$0xff] }
  0x24   :  { %338 = vmatpush.msra.mxu1 %v158_v2  ;;  %v54_v41 = vld [vmem:[%s2296_s0 + $0x140] sm:$0xff]  ;;  %v57_v42 = vld [vmem:[%s2296_s0 + $0x158] sm:$0xff]  ;;  %v55_v43 = vld [vmem:[%s2296_s0 + $0x148] sm:$0xff] }
  0x25   :  { %339 = vmatmul.f32.vlgmr.msra.gmra.mxu1 %v15_v3  ;;  %v60_v44 = vld [vmem:[%s2296_s0 + $0x170] sm:$0xff]  ;;  %v58_v45 = vld [vmem:[%s2296_s0 + $0x160] sm:$0xff]  ;;  %v61_v46 = vld [vmem:[%s2296_s0 + $0x178] sm:$0xff] }
  0x26   :  { %v59_v47 = vld [vmem:[%s2296_s0 + $0x168] sm:$0xff]  ;;  %v64_v48 = vld [vmem:[%s2296_s0 + $0x190] sm:$0xff]  ;;  %v62_v49 = vld [vmem:[%s2296_s0 + $0x180] sm:$0xff] }
  0x27   :  { %v65_v50 = vld [vmem:[%s2296_s0 + $0x198] sm:$0xff]  ;;  %v63_v51 = vld [vmem:[%s2296_s0 + $0x188] sm:$0xff]  ;;  %v68_v52 = vld [vmem:[%s2296_s0 + $0x1b0] sm:$0xff] }
  0x28   :  { %v66_v53 = vld [vmem:[%s2296_s0 + $0x1a0] sm:$0xff]  ;;  %v69_v54 = vld [vmem:[%s2296_s0 + $0x1b8] sm:$0xff]  ;;  %v67_v55 = vld [vmem:[%s2296_s0 + $0x1a8] sm:$0xff] }
  0x29   :  { %v72_v56 = vld [vmem:[%s2296_s0 + $0x1d0] sm:$0xff]  ;;  %v70_v57 = vld [vmem:[%s2296_s0 + $0x1c0] sm:$0xff]  ;;  %v73_v58 = vld [vmem:[%s2296_s0 + $0x1d8] sm:$0xff] }
  0x2a   :  { %455 = vmatmul.f32.gmra.mxu2 %v20_v4  ;;  %v71_v59 = vld [vmem:[%s2296_s0 + $0x1c8] sm:$0xff]  ;;  %v76_v60 = vld [vmem:[%s2296_s0 + $0x1f0] sm:$0xff]  ;;  %v74_v61 = vld [vmem:[%s2296_s0 + $0x1e0] sm:$0xff] }
  0x2b   :  { %229 = vmatmul.f32.gmra.mxu0 %v18_v5  ;;  %568 = vmatmul.f32.gmra.mxu3 %v21_v6  ;;  %v77_v62 = vld [vmem:[%s2296_s0 + $0x1f8] sm:$0xff]  ;;  %v75_v63 = vld [vmem:[%s2296_s0 + $0x1e8] sm:$0xff]  ;;  %v1620_v0 = vld [vmem:[%s2297_s2] ss:$0 sm:$0xff] }
  0x2c   :  { %v80_v1 = vld [vmem:[%s2296_s0 + $0x210] sm:$0xff]  ;;  %v78_v3 = vld [vmem:[%s2296_s0 + $0x200] sm:$0xff]  ;;  %v81_v4 = vld [vmem:[%s2296_s0 + $0x218] sm:$0xff] }
  0x2d   :  { %342 = vmatmul.f32.gmra.mxu1 %v19_v7  ;;  %v79_v7 = vld [vmem:[%s2296_s0 + $0x208] sm:$0xff] }
  0x32   :  { %458 = vmatmul.f32.gmra.mxu2 %v24_v8 }
  0x33   :  { %232 = vmatmul.f32.gmra.mxu0 %v22_v9  ;;  %571 = vmatmul.f32.gmra.mxu3 %v25_v10 }
  0x35   :  { %345 = vmatmul.f32.gmra.mxu1 %v23_v11 }
  0x3a   :  { %461 = vmatmul.f32.gmra.mxu2 %v28_v12  ;;  %v84_v12 = vld [vmem:[%s2296_s0 + $0x230] sm:$0xff] }
  0x3b   :  { %235 = vmatmul.f32.gmra.mxu0 %v26_v13  ;;  %574 = vmatmul.f32.gmra.mxu3 %v29_v14 }
  0x3d   :  { %348 = vmatmul.f32.gmra.mxu1 %v27_v15  ;;  %v82_v15 = vld [vmem:[%s2296_s0 + $0x220] sm:$0xff] }
  0x42   :  { %464 = vmatmul.f32.gmra.mxu2 %v32_v16 }
  0x43   :  { %238 = vmatmul.f32.gmra.mxu0 %v30_v17  ;;  %577 = vmatmul.f32.gmra.mxu3 %v33_v18  ;;  %v85_v17 = vld [vmem:[%s2296_s0 + $0x238] sm:$0xff] }
  0x45   :  { %351 = vmatmul.f32.gmra.mxu1 %v31_v19 }
  0x4a   :  { %467 = vmatmul.f32.gmra.mxu2 %v36_v20  ;;  %v83_v20 = vld [vmem:[%s2296_s0 + $0x228] sm:$0xff] }
  0x4b   :  { %241 = vmatmul.f32.gmra.mxu0 %v34_v21  ;;  %580 = vmatmul.f32.gmra.mxu3 %v37_v22 }
  0x4d   :  { %354 = vmatmul.f32.gmra.mxu1 %v35_v23 }
  0x52   :  { %470 = vmatmul.f32.gmra.mxu2 %v40_v24 }
  0x53   :  { %244 = vmatmul.f32.gmra.mxu0 %v38_v25  ;;  %583 = vmatmul.f32.gmra.mxu3 %v41_v26  ;;  %v88_v25 = vld [vmem:[%s2296_s0 + $0x250] sm:$0xff] }
  0x55   :  { %357 = vmatmul.f32.gmra.mxu1 %v39_v27 }
  0x5a   :  { %473 = vmatmul.f32.gmra.mxu2 %v44_v28  ;;  %v86_v28 = vld [vmem:[%s2296_s0 + $0x240] sm:$0xff] }
  0x5b   :  { %247 = vmatmul.f32.gmra.mxu0 %v42_v29  ;;  %586 = vmatmul.f32.gmra.mxu3 %v45_v30  ;;  %v89_v30 = vld [vmem:[%s2296_s0 + $0x258] sm:$0xff] }
  0x5d   :  { %360 = vmatmul.f32.gmra.mxu1 %v43_v31 }
  0x62   :  { %476 = vmatmul.f32.gmra.mxu2 %v48_v32 }
  0x63   :  { %250 = vmatmul.f32.gmra.mxu0 %v46_v33  ;;  %589 = vmatmul.f32.gmra.mxu3 %v49_v34  ;;  %v87_v33 = vld [vmem:[%s2296_s0 + $0x248] sm:$0xff] }
  0x65   :  { %363 = vmatmul.f32.gmra.mxu1 %v47_v35 }
  0x6a   :  { %479 = vmatmul.f32.gmra.mxu2 %v52_v36 }
  0x6b   :  { %253 = vmatmul.f32.gmra.mxu0 %v50_v37  ;;  %592 = vmatmul.f32.gmra.mxu3 %v53_v38  ;;  %v92_v38 = vld [vmem:[%s2296_s0 + $0x270] sm:$0xff] }
  0x6d   :  { %366 = vmatmul.f32.gmra.mxu1 %v51_v39 }
  0x72   :  { %482 = vmatmul.f32.gmra.mxu2 %v56_v40 }
  0x73   :  { %256 = vmatmul.f32.gmra.mxu0 %v54_v41  ;;  %595 = vmatmul.f32.gmra.mxu3 %v57_v42  ;;  %v90_v41 = vld [vmem:[%s2296_s0 + $0x260] sm:$0xff] }
  0x75   :  { %369 = vmatmul.f32.gmra.mxu1 %v55_v43  ;;  %v93_v43 = vld [vmem:[%s2296_s0 + $0x278] sm:$0xff] }
  0x7a   :  { %485 = vmatmul.f32.gmra.mxu2 %v60_v44 }
  0x7b   :  { %259 = vmatmul.f32.gmra.mxu0 %v58_v45  ;;  %598 = vmatmul.f32.gmra.mxu3 %v61_v46  ;;  %v91_v46 = vld [vmem:[%s2296_s0 + $0x268] sm:$0xff] }
  0x7d   :  { %372 = vmatmul.f32.gmra.mxu1 %v59_v47 }
  0x82   :  { %488 = vmatmul.f32.gmra.mxu2 %v64_v48 }
  0x83   :  { %262 = vmatmul.f32.gmra.mxu0 %v62_v49  ;;  %601 = vmatmul.f32.gmra.mxu3 %v65_v50 }
  0x85   :  { %375 = vmatmul.f32.gmra.mxu1 %v63_v51  ;;  %v96_v51 = vld [vmem:[%s2296_s0 + $0x290] sm:$0xff] }
  0x8a   :  { %491 = vmatmul.f32.gmra.mxu2 %v68_v52 }
  0x8b   :  { %265 = vmatmul.f32.gmra.mxu0 %v66_v53  ;;  %604 = vmatmul.f32.gmra.mxu3 %v69_v54  ;;  %v94_v54 = vld [vmem:[%s2296_s0 + $0x280] sm:$0xff] }
  0x8d   :  { %378 = vmatmul.f32.gmra.mxu1 %v67_v55 }
  0x92   :  { %494 = vmatmul.f32.gmra.mxu2 %v72_v56  ;;  %v97_v56 = vld [vmem:[%s2296_s0 + $0x298] sm:$0xff] }
  0x93   :  { %268 = vmatmul.f32.gmra.mxu0 %v70_v57  ;;  %607 = vmatmul.f32.gmra.mxu3 %v73_v58 }
  0x95   :  { %381 = vmatmul.f32.gmra.mxu1 %v71_v59  ;;  %v95_v59 = vld [vmem:[%s2296_s0 + $0x288] sm:$0xff] }
  0x9a   :  { %497 = vmatmul.f32.gmra.mxu2 %v76_v60 }
  0x9b   :  { %271 = vmatmul.f32.gmra.mxu0 %v74_v61  ;;  %610 = vmatmul.f32.gmra.mxu3 %v77_v62 }
  0x9d   :  { %384 = vmatmul.f32.gmra.mxu1 %v75_v63 }
  0xa0   :  { %v227_v2 = vpop.f32.mrf.mxu0 }
  0xa1   :  { %v228_v5 = vadd.f32 %v1620_v0, %v227_v2 }
  0xa2   :  { %500 = vmatmul.f32.gmra.mxu2 %v80_v1  ;;  %v340_v6 = vpop.f32.mrf.mxu1  ;;  %v100_v1 = vld [vmem:[%s2296_s0 + $0x2b0] sm:$0xff] }
  0xa3   :  { %v341_v8 = vadd.f32 %v340_v6, %v228_v5  ;;  %274 = vmatmul.f32.gmra.mxu0 %v78_v3  ;;  %613 = vmatmul.f32.gmra.mxu3 %v81_v4  ;;  %v98_v4 = vld [vmem:[%s2296_s0 + $0x2a0] sm:$0xff]  ;;  %v101_v6 = vld [vmem:[%s2296_s0 + $0x2b8] sm:$0xff] }
  0xa5   :  { %v453_v9 = vpop.f32.mrf.mxu2  ;;  %387 = vmatmul.f32.gmra.mxu1 %v79_v7 }
  0xa6   :  { %v454_v10 = vadd.f32 %v453_v9, %v341_v8  ;;  %v566_v11 = vpop.f32.mrf.mxu3  ;;  %v99_v9 = vld [vmem:[%s2296_s0 + $0x2a8] sm:$0xff] }
  0xa8   :  { %v230_v13 = vpop.f32.mrf.mxu0  ;;  %v1638_v14 = vadd.f32 %v566_v11, %v454_v10 }
  0xa9   :  { %v231_v16 = vadd.f32 %v1620_v0, %v230_v13 }
  0xaa   :  { %503 = vmatmul.f32.gmra.mxu2 %v84_v12  ;;  %v343_v18 = vpop.f32.mrf.mxu1  ;;  %v663_v19 = vsel %vm662_vm0, %v1638_v14, -inf }
  0xab   :  { %v344_v21 = vadd.f32 %v343_v18, %v231_v16  ;;  %664 = vmax.xlane.f32.xlu0 %v663_v19  ;;  %277 = vmatmul.f32.gmra.mxu0 %v82_v15  ;;  %v104_v15 = vld [vmem:[%s2296_s0 + $0x2d0] sm:$0xff]  ;;  %v102_v18 = vld [vmem:[%s2296_s0 + $0x2c0] sm:$0xff] }
  0xac   :  { %616 = vmatmul.f32.gmra.mxu3 %v85_v17 }
  0xad   :  { %v456_v22 = vpop.f32.mrf.mxu2  ;;  %390 = vmatmul.f32.gmra.mxu1 %v83_v20  ;;  %v105_v20 = vld [vmem:[%s2296_s0 + $0x2d8] sm:$0xff] }
  0xae   :  { %v457_v23 = vadd.f32 %v456_v22, %v344_v21  ;;  %v569_v24 = vpop.f32.mrf.mxu3 }
  0xb0   :  { %v1655_v26 = vadd.f32 %v569_v24, %v457_v23  ;;  %v233_v27 = vpop.f32.mrf.mxu0  ;;  %v103_v23 = vld [vmem:[%s2296_s0 + $0x2c8] sm:$0xff] }
  0xb1   :  { %v234_v29 = vadd.f32 %v1620_v0, %v233_v27 }
  0xb2   :  { %506 = vmatmul.f32.gmra.mxu2 %v88_v25  ;;  %v346_v31 = vpop.f32.mrf.mxu1  ;;  %v666_v32 = vsel %vm662_vm0, %v1655_v26, -inf }
  0xb3   :  { %v347_v34 = vadd.f32 %v346_v31, %v234_v29  ;;  %667 = vmax.xlane.f32.xlu0 %v666_v32  ;;  %280 = vmatmul.f32.gmra.mxu0 %v86_v28  ;;  %v108_v29 = vld [vmem:[%s2296_s0 + $0x2f0] sm:$0xff]  ;;  %v106_v32 = vld [vmem:[%s2296_s0 + $0x2e0] sm:$0xff] }
  0xb4   :  { %619 = vmatmul.f32.gmra.mxu3 %v89_v30 }
  0xb5   :  { %v459_v35 = vpop.f32.mrf.mxu2  ;;  %393 = vmatmul.f32.gmra.mxu1 %v87_v33 }
  0xb6   :  { %v460_v36 = vadd.f32 %v459_v35, %v347_v34  ;;  %v572_v37 = vpop.f32.mrf.mxu3  ;;  %v109_v34 = vld [vmem:[%s2296_s0 + $0x2f8] sm:$0xff] }
  0xb8   :  { %v236_v39 = vpop.f32.mrf.mxu0  ;;  %v1672_v40 = vadd.f32 %v572_v37, %v460_v36  ;;  %v107_v37 = vld [vmem:[%s2296_s0 + $0x2e8] sm:$0xff] }
  0xb9   :  { %v237_v42 = vadd.f32 %v1620_v0, %v236_v39 }
  0xba   :  { %509 = vmatmul.f32.gmra.mxu2 %v92_v38  ;;  %v349_v44 = vpop.f32.mrf.mxu1  ;;  %v669_v45 = vsel %vm662_vm0, %v1672_v40, -inf }
  0xbb   :  { %v350_v47 = vadd.f32 %v349_v44, %v237_v42  ;;  %670 = vmax.xlane.f32.xlu1 %v669_v45  ;;  %283 = vmatmul.f32.gmra.mxu0 %v90_v41 }
  0xbc   :  { %622 = vmatmul.f32.gmra.mxu3 %v93_v43  ;;  %v112_v43 = vld [vmem:[%s2296_s0 + $0x310] sm:$0xff] }
  0xbd   :  { %v462_v48 = vpop.f32.mrf.mxu2  ;;  %396 = vmatmul.f32.gmra.mxu1 %v91_v46  ;;  %v110_v46 = vld [vmem:[%s2296_s0 + $0x300] sm:$0xff] }
  0xbe   :  { %v463_v49 = vadd.f32 %v462_v48, %v350_v47  ;;  %v575_v50 = vpop.f32.mrf.mxu3  ;;  %v113_v48 = vld [vmem:[%s2296_s0 + $0x318] sm:$0xff] }
  0xc0   :  { %v1689_v52 = vadd.f32 %v575_v50, %v463_v49  ;;  %v239_v53 = vpop.f32.mrf.mxu0 }
  0xc1   :  { %v240_v55 = vadd.f32 %v1620_v0, %v239_v53 }
  0xc2   :  { %512 = vmatmul.f32.gmra.mxu2 %v96_v51  ;;  %v352_v57 = vpop.f32.mrf.mxu1  ;;  %v672_v58 = vsel %vm662_vm0, %v1689_v52, -inf  ;;  %v111_v51 = vld [vmem:[%s2296_s0 + $0x308] sm:$0xff] }
  0xc3   :  { %v353_v60 = vadd.f32 %v352_v57, %v240_v55  ;;  %673 = vmax.xlane.f32.xlu1 %v672_v58  ;;  %286 = vmatmul.f32.gmra.mxu0 %v94_v54  ;;  %v116_v57 = vld [vmem:[%s2296_s0 + $0x330] sm:$0xff] }
  0xc4   :  { %625 = vmatmul.f32.gmra.mxu3 %v97_v56 }
  0xc5   :  { %v465_v61 = vpop.f32.mrf.mxu2  ;;  %399 = vmatmul.f32.gmra.mxu1 %v95_v59 }
  0xc6   :  { %v466_v62 = vadd.f32 %v465_v61, %v353_v60  ;;  %v578_v63 = vpop.f32.mrf.mxu3  ;;  %v114_v60 = vld [vmem:[%s2296_s0 + $0x320] sm:$0xff] }
  0xc8   :  { %v242_v2 = vpop.f32.mrf.mxu0  ;;  %v1706_v3 = vadd.f32 %v578_v63, %v466_v62  ;;  %v117_v62 = vld [vmem:[%s2296_s0 + $0x338] sm:$0xff] }
  0xc9   :  { %v243_v5 = vadd.f32 %v1620_v0, %v242_v2  ;;  %v115_v2 = vld [vmem:[%s2296_s0 + $0x328] sm:$0xff] }
  0xca   :  { %515 = vmatmul.f32.gmra.mxu2 %v100_v1  ;;  %v355_v7 = vpop.f32.mrf.mxu1  ;;  %v675_v8 = vsel %vm662_vm0, %v1706_v3, -inf }
  0xcb   :  { %v356_v10 = vadd.f32 %v355_v7, %v243_v5  ;;  %676 = vmax.xlane.f32.xlu2 %v675_v8  ;;  %289 = vmatmul.f32.gmra.mxu0 %v98_v4  ;;  %v120_v8 = vld [vmem:[%s2296_s0 + $0x350] sm:$0xff] }
  0xcc   :  { %628 = vmatmul.f32.gmra.mxu3 %v101_v6 }
  0xcd   :  { %v468_v11 = vpop.f32.mrf.mxu2  ;;  %402 = vmatmul.f32.gmra.mxu1 %v99_v9 }
  0xce   :  { %v469_v12 = vadd.f32 %v468_v11, %v356_v10  ;;  %v581_v13 = vpop.f32.mrf.mxu3  ;;  %v118_v11 = vld [vmem:[%s2296_s0 + $0x340] sm:$0xff] }
  0xd0   :  { %v1723_v16 = vadd.f32 %v581_v13, %v469_v12  ;;  %v245_v17 = vpop.f32.mrf.mxu0  ;;  %v121_v13 = vld [vmem:[%s2296_s0 + $0x358] sm:$0xff] }
  0xd1   :  { %v246_v19 = vadd.f32 %v1620_v0, %v245_v17 }
  0xd2   :  { %518 = vmatmul.f32.gmra.mxu2 %v104_v15  ;;  %v358_v21 = vpop.f32.mrf.mxu1  ;;  %v678_v22 = vsel %vm662_vm0, %v1723_v16, -inf }
  0xd3   :  { %v359_v24 = vadd.f32 %v358_v21, %v246_v19  ;;  %679 = vmax.xlane.f32.xlu2 %v678_v22  ;;  %292 = vmatmul.f32.gmra.mxu0 %v102_v18  ;;  %v119_v18 = vld [vmem:[%s2296_s0 + $0x348] sm:$0xff] }
  0xd4   :  { %631 = vmatmul.f32.gmra.mxu3 %v105_v20 }
  0xd5   :  { %v471_v25 = vpop.f32.mrf.mxu2  ;;  %405 = vmatmul.f32.gmra.mxu1 %v103_v23  ;;  %v124_v23 = vld [vmem:[%s2296_s0 + $0x370] sm:$0xff] }
  0xd6   :  { %v472_v27 = vadd.f32 %v471_v25, %v359_v24  ;;  %v584_v28 = vpop.f32.mrf.mxu3 }
  0xd8   :  { %v1740_v30 = vadd.f32 %v584_v28, %v472_v27  ;;  %v248_v31 = vpop.f32.mrf.mxu0  ;;  %v122_v27 = vld [vmem:[%s2296_s0 + $0x360] sm:$0xff] }
  0xd9   :  { %v249_v33 = vadd.f32 %v1620_v0, %v248_v31 }
  0xda   :  { %521 = vmatmul.f32.gmra.mxu2 %v108_v29  ;;  %v361_v35 = vpop.f32.mrf.mxu1  ;;  %v681_v36 = vsel %vm662_vm0, %v1740_v30, -inf  ;;  %v125_v29 = vld [vmem:[%s2296_s0 + $0x378] sm:$0xff] }
  0xdb   :  { %v362_v38 = vadd.f32 %v361_v35, %v249_v33  ;;  %682 = vmax.xlane.f32.xlu0 %v681_v36  ;;  %295 = vmatmul.f32.gmra.mxu0 %v106_v32  ;;  %v123_v33 = vld [vmem:[%s2296_s0 + $0x368] sm:$0xff] }
  0xdc   :  { %634 = vmatmul.f32.gmra.mxu3 %v109_v34 }
  0xdd   :  { %v474_v39 = vpop.f32.mrf.mxu2  ;;  %408 = vmatmul.f32.gmra.mxu1 %v107_v37 }
  0xde   :  { %v475_v41 = vadd.f32 %v474_v39, %v362_v38  ;;  %v587_v42 = vpop.f32.mrf.mxu3  ;;  %v128_v38 = vld [vmem:[%s2296_s0 + $0x390] sm:$0xff] }
  0xe0   :  { %v1757_v44 = vadd.f32 %v587_v42, %v475_v41  ;;  %v251_v45 = vpop.f32.mrf.mxu0  ;;  %v126_v42 = vld [vmem:[%s2296_s0 + $0x380] sm:$0xff] }
  0xe1   :  { %v252_v47 = vadd.f32 %v1620_v0, %v251_v45  ;;  %v129_v45 = vld [vmem:[%s2296_s0 + $0x398] sm:$0xff] }
  0xe2   :  { %524 = vmatmul.f32.gmra.mxu2 %v112_v43  ;;  %v364_v49 = vpop.f32.mrf.mxu1  ;;  %v684_v50 = vsel %vm662_vm0, %v1757_v44, -inf }
  0xe3   :  { %v365_v53 = vadd.f32 %v364_v49, %v252_v47  ;;  %685 = vmax.xlane.f32.xlu1 %v684_v50  ;;  %298 = vmatmul.f32.gmra.mxu0 %v110_v46 }
  0xe4   :  { %637 = vmatmul.f32.gmra.mxu3 %v113_v48  ;;  %v127_v48 = vld [vmem:[%s2296_s0 + $0x388] sm:$0xff] }
  0xe5   :  { %v477_v54 = vpop.f32.mrf.mxu2  ;;  %411 = vmatmul.f32.gmra.mxu1 %v111_v51 }
  0xe6   :  { %v478_v55 = vadd.f32 %v477_v54, %v365_v53  ;;  %v590_v56 = vpop.f32.mrf.mxu3  ;;  %v132_v54 = vld [vmem:[%s2296_s0 + $0x3b0] sm:$0xff] }
  0xe8   :  { %v1774_v58 = vadd.f32 %v590_v56, %v478_v55  ;;  %v254_v59 = vpop.f32.mrf.mxu0 }
  0xe9   :  { %v255_v61 = vadd.f32 %v1620_v0, %v254_v59 }
  0xea   :  { %527 = vmatmul.f32.gmra.mxu2 %v116_v57  ;;  %v367_v63 = vpop.f32.mrf.mxu1  ;;  %v687_v1 = vsel %vm662_vm0, %v1774_v58, -inf  ;;  %v130_v57 = vld [vmem:[%s2296_s0 + $0x3a0] sm:$0xff] }
  0xeb   :  { %v368_v4 = vadd.f32 %v367_v63, %v255_v61  ;;  %688 = vmax.xlane.f32.xlu2 %v687_v1  ;;  %301 = vmatmul.f32.gmra.mxu0 %v114_v60  ;;  %v133_v60 = vld [vmem:[%s2296_s0 + $0x3b8] sm:$0xff]  ;;  %v131_v63 = vld [vmem:[%s2296_s0 + $0x3a8] sm:$0xff] }
  0xec   :  { %640 = vmatmul.f32.gmra.mxu3 %v117_v62 }
  0xed   :  { %v480_v5 = vpop.f32.mrf.mxu2  ;;  %414 = vmatmul.f32.gmra.mxu1 %v115_v2 }
  0xee   :  { %v481_v6 = vadd.f32 %v480_v5, %v368_v4  ;;  %v593_v7 = vpop.f32.mrf.mxu3 }
  0xf0   :  { %v1791_v9 = vadd.f32 %v593_v7, %v481_v6  ;;  %v257_v10 = vpop.f32.mrf.mxu0  ;;  %v136_v6 = vld [vmem:[%s2296_s0 + $0x3d0] sm:$0xff] }
  0xf1   :  { %v258_v12 = vadd.f32 %v1620_v0, %v257_v10  ;;  %v134_v10 = vld [vmem:[%s2296_s0 + $0x3c0] sm:$0xff] }
  0xf2   :  { %530 = vmatmul.f32.gmra.mxu2 %v120_v8  ;;  %v370_v15 = vpop.f32.mrf.mxu1  ;;  %v690_v17 = vsel %vm662_vm0, %v1791_v9, -inf }
  0xf3   :  { %v371_v19 = vadd.f32 %v370_v15, %v258_v12  ;;  %691 = vmax.xlane.f32.xlu0 %v690_v17  ;;  %304 = vmatmul.f32.gmra.mxu0 %v118_v11  ;;  %v137_v12 = vld [vmem:[%s2296_s0 + $0x3d8] sm:$0xff]  ;;  %v135_v17 = vld [vmem:[%s2296_s0 + $0x3c8] sm:$0xff] }
  0xf4   :  { %643 = vmatmul.f32.gmra.mxu3 %v121_v13 }
  0xf5   :  { %v483_v20 = vpop.f32.mrf.mxu2  ;;  %417 = vmatmul.f32.gmra.mxu1 %v119_v18 }
  0xf6   :  { %v484_v21 = vadd.f32 %v483_v20, %v371_v19  ;;  %v596_v22 = vpop.f32.mrf.mxu3 }
  0xf8   :  { %v1808_v24 = vadd.f32 %v596_v22, %v484_v21  ;;  %v260_v25 = vpop.f32.mrf.mxu0  ;;  %v140_v22 = vld [vmem:[%s2296_s0 + $0x3f0] sm:$0xff] }
  0xf9   :  { %v261_v28 = vadd.f32 %v1620_v0, %v260_v25 }
  0xfa   :  { %533 = vmatmul.f32.gmra.mxu2 %v124_v23  ;;  %v373_v31 = vpop.f32.mrf.mxu1  ;;  %v693_v32 = vsel %vm662_vm0, %v1808_v24, -inf }
  0xfb   :  { %v374_v34 = vadd.f32 %v373_v31, %v261_v28  ;;  %694 = vmax.xlane.f32.xlu1 %v693_v32  ;;  %307 = vmatmul.f32.gmra.mxu0 %v122_v27  ;;  %v138_v27 = vld [vmem:[%s2296_s0 + $0x3e0] sm:$0xff] }
  0xfc   :  { %646 = vmatmul.f32.gmra.mxu3 %v125_v29  ;;  %v141_v29 = vld [vmem:[%s2296_s0 + $0x3f8] sm:$0xff] }
  0xfd   :  { %v486_v35 = vpop.f32.mrf.mxu2  ;;  %420 = vmatmul.f32.gmra.mxu1 %v123_v33  ;;  %v139_v33 = vld [vmem:[%s2296_s0 + $0x3e8] sm:$0xff] }
  0xfe   :  { %v487_v36 = vadd.f32 %v486_v35, %v374_v34  ;;  %v599_v37 = vpop.f32.mrf.mxu3 }
 0x100   :  { %v1825_v39 = vadd.f32 %v599_v37, %v487_v36  ;;  %v263_v41 = vpop.f32.mrf.mxu0 }
 0x101   :  { %v264_v43 = vadd.f32 %v1620_v0, %v263_v41 }
 0x102   :  { %536 = vmatmul.f32.gmra.mxu2 %v128_v38  ;;  %v376_v46 = vpop.f32.mrf.mxu1  ;;  %v696_v47 = vsel %vm662_vm0, %v1825_v39, -inf }
 0x103   :  { %v377_v49 = vadd.f32 %v376_v46, %v264_v43  ;;  %697 = vmax.xlane.f32.xlu2 %v696_v47  ;;  %310 = vmatmul.f32.gmra.mxu0 %v126_v42 }
 0x104   :  { %649 = vmatmul.f32.gmra.mxu3 %v129_v45 }
 0x105   :  { %v489_v50 = vpop.f32.mrf.mxu2  ;;  %423 = vmatmul.f32.gmra.mxu1 %v127_v48 }
 0x106   :  { %v490_v51 = vadd.f32 %v489_v50, %v377_v49  ;;  %v602_v53 = vpop.f32.mrf.mxu3 }
 0x108   :  { %v1842_v55 = vadd.f32 %v602_v53, %v490_v51  ;;  %v266_v56 = vpop.f32.mrf.mxu0 }
 0x109   :  { %v267_v59 = vadd.f32 %v1620_v0, %v266_v56 }
 0x10a   :  { %539 = vmatmul.f32.gmra.mxu2 %v132_v54  ;;  %v379_v61 = vpop.f32.mrf.mxu1  ;;  %v699_v62 = vsel %vm662_vm0, %v1842_v55, -inf }
 0x10b   :  { %v380_v1 = vadd.f32 %v379_v61, %v267_v59  ;;  %700 = vmax.xlane.f32.xlu0 %v699_v62  ;;  %313 = vmatmul.f32.gmra.mxu0 %v130_v57 }
 0x10c   :  { %652 = vmatmul.f32.gmra.mxu3 %v133_v60 }
 0x10d   :  { %v492_v2 = vpop.f32.mrf.mxu2  ;;  %426 = vmatmul.f32.gmra.mxu1 %v131_v63 }
 0x10e   :  { %v493_v4 = vadd.f32 %v492_v2, %v380_v1  ;;  %v605_v5 = vpop.f32.mrf.mxu3 }
 0x110   :  { %v1859_v7 = vadd.f32 %v605_v5, %v493_v4  ;;  %v269_v8 = vpop.f32.mrf.mxu0 }
 0x111   :  { %v270_v11 = vadd.f32 %v1620_v0, %v269_v8 }
 0x112   :  { %542 = vmatmul.f32.gmra.mxu2 %v136_v6  ;;  %v382_v13 = vpop.f32.mrf.mxu1  ;;  %v702_v15 = vsel %vm662_vm0, %v1859_v7, -inf }
 0x113   :  { %v383_v18 = vadd.f32 %v382_v13, %v270_v11  ;;  %703 = vmax.xlane.f32.xlu1 %v702_v15  ;;  %316 = vmatmul.f32.gmra.mxu0 %v134_v10 }
 0x114   :  { %655 = vmatmul.f32.gmra.mxu3 %v137_v12 }
 0x115   :  { %v495_v19 = vpop.f32.mrf.mxu2  ;;  %429 = vmatmul.f32.gmra.mxu1 %v135_v17 }
 0x116   :  { %v496_v20 = vadd.f32 %v495_v19, %v383_v18  ;;  %v608_v21 = vpop.f32.mrf.mxu3 }
 0x118   :  { %v1876_v23 = vadd.f32 %v608_v21, %v496_v20  ;;  %v272_v25 = vpop.f32.mrf.mxu0 }
 0x119   :  { %v273_v28 = vadd.f32 %v1620_v0, %v272_v25 }
 0x11a   :  { %545 = vmatmul.f32.gmra.mxu2 %v140_v22  ;;  %v385_v31 = vpop.f32.mrf.mxu1  ;;  %v705_v32 = vsel %vm662_vm0, %v1876_v23, -inf }
 0x11b   :  { %v386_v34 = vadd.f32 %v385_v31, %v273_v28  ;;  %706 = vmax.xlane.f32.xlu2 %v705_v32  ;;  %319 = vmatmul.f32.gmra.mxu0 %v138_v27 }
 0x11c   :  { %658 = vmatmul.f32.gmra.mxu3 %v141_v29 }
 0x11d   :  { %v498_v35 = vpop.f32.mrf.mxu2  ;;  %432 = vmatmul.f32.gmra.mxu1 %v139_v33 }
 0x11e   :  { %v499_v36 = vadd.f32 %v498_v35, %v386_v34  ;;  %v665_v37 = vpop.xlane.xlu0 %664  ;;  %v611_v38 = vpop.f32.mrf.mxu3 }
 0x11f   :  { %v1891_v41 = vsub.f32 %v1638_v14, %v665_v37 }
 0x120   :  { %v1893_v42 = vadd.f32 %v611_v38, %v499_v36  ;;  %v275_v43 = vpop.f32.mrf.mxu0 }
 0x121   :  { %v791_v45 = vmul.f32 1.442695, %v1891_v41  ;;  %v276_v46 = vadd.f32 %v1620_v0, %v275_v43 }
 0x122   :  { %v388_v47 = vpop.f32.mrf.mxu1  ;;  %v708_v48 = vsel %vm662_vm0, %v1893_v42, -inf }
 0x123   :  { %1084 = vpow2.f32 %v791_v45  ;;  %v389_v49 = vadd.f32 %v388_v47, %v276_v46  ;;  %709 = vmax.xlane.f32.xlu0 %v708_v48 }
 0x125   :  { %v501_v50 = vpop.f32.mrf.mxu2 }
 0x126   :  { %v502_v51 = vadd.f32 %v501_v50, %v389_v49  ;;  %v668_v53 = vpop.xlane.xlu0 %667  ;;  %v614_v54 = vpop.f32.mrf.mxu3 }
 0x127   :  { %v1900_v14 = vsub.f32 %v1655_v26, %v668_v53 }
 0x128   :  { %v1902_v56 = vadd.f32 %v614_v54, %v502_v51  ;;  %v278_v57 = vpop.f32.mrf.mxu0 }
 0x129   :  { %v1085_v59 = vpop.eup %1084  ;;  %v793_v60 = vmul.f32 1.442695, %v1900_v14  ;;  %v279_v61 = vadd.f32 %v1620_v0, %v278_v57 }
 0x12a   :  { %v391_v62 = vpop.f32.mrf.mxu1  ;;  %v711_v63 = vsel %vm662_vm0, %v1902_v56, -inf  ;;  %v855_v1 = vsel %vm662_vm0, %v1085_v59, 0.0 }
 0x12b   :  { %1086 = vpow2.f32 %v793_v60  ;;  %v392_v2 = vadd.f32 %v391_v62, %v279_v61  ;;  %712 = vmax.xlane.f32.xlu1 %v711_v63  ;;  %856 = vadd.xlane.f32.xlu2 %v855_v1 }
 0x12d   :  { %v504_v26 = vpop.f32.mrf.mxu2 }
 0x12e   :  { %v505_v4 = vadd.f32 %v504_v26, %v392_v2  ;;  %v671_v5 = vpop.xlane.xlu1 %670 }
 0x12f   :  { %v1910_v6 = vsub.f32 %v1672_v40, %v671_v5  ;;  %v617_v8 = vpop.f32.mrf.mxu3 }
 0x130   :  { %v1912_v10 = vadd.f32 %v617_v8, %v505_v4  ;;  %v281_v11 = vpop.f32.mrf.mxu0 }
 0x131   :  { %v1087_v12 = vpop.eup %1086  ;;  %v795_v13 = vmul.f32 1.442695, %v1910_v6  ;;  %v282_v15 = vadd.f32 %v1620_v0, %v281_v11 }
 0x132   :  { %v394_v17 = vpop.f32.mrf.mxu1  ;;  %v714_v18 = vsel %vm662_vm0, %v1912_v10, -inf  ;;  %v858_v19 = vsel %vm662_vm0, %v1087_v12, 0.0 }
 0x133   :  { %1088 = vpow2.f32 %v795_v13  ;;  %v395_v20 = vadd.f32 %v394_v17, %v282_v15  ;;  %715 = vmax.xlane.f32.xlu2 %v714_v18  ;;  %859 = vadd.xlane.f32.xlu0 %v858_v19 }
 0x135   :  { %v507_v40 = vpop.f32.mrf.mxu2 }
 0x136   :  { %v508_v21 = vadd.f32 %v507_v40, %v395_v20  ;;  %v674_v22 = vpop.xlane.xlu1 %673 }
 0x137   :  { %v1920_v25 = vsub.f32 %v1689_v52, %v674_v22  ;;  %v620_v27 = vpop.f32.mrf.mxu3 }
 0x138   :  { %v1922_v28 = vadd.f32 %v620_v27, %v508_v21  ;;  %v284_v29 = vpop.f32.mrf.mxu0 }
 0x139   :  { %v1089_v31 = vpop.eup %1088  ;;  %v797_v32 = vmul.f32 1.442695, %v1920_v25  ;;  %v285_v33 = vadd.f32 %v1620_v0, %v284_v29 }
 0x13a   :  { %v397_v34 = vpop.f32.mrf.mxu1  ;;  %v861_v35 = vsel %vm662_vm0, %v1089_v31, 0.0  ;;  %v717_v36 = vsel %vm662_vm0, %v1922_v28, -inf }
 0x13b   :  { %1090 = vpow2.f32 %v797_v32  ;;  %v398_v37 = vadd.f32 %v397_v34, %v285_v33  ;;  %862 = vadd.xlane.f32.xlu1 %v861_v35  ;;  %718 = vmax.xlane.f32.xlu0 %v717_v36 }
 0x13d   :  { %v510_v52 = vpop.f32.mrf.mxu2 }
 0x13e   :  { %v511_v38 = vadd.f32 %v510_v52, %v398_v37  ;;  %v677_v43 = vpop.xlane.xlu2 %676 }
 0x13f   :  { %v1930_v45 = vsub.f32 %v1706_v3, %v677_v43  ;;  %v623_v46 = vpop.f32.mrf.mxu3 }
 0x140   :  { %v1932_v47 = vadd.f32 %v623_v46, %v511_v38  ;;  %v287_v48 = vpop.f32.mrf.mxu0 }
 0x141   :  { %v1091_v49 = vpop.eup %1090  ;;  %v799_v50 = vmul.f32 1.442695, %v1930_v45  ;;  %v288_v51 = vadd.f32 %v1620_v0, %v287_v48 }
 0x142   :  { %v400_v53 = vpop.f32.mrf.mxu1  ;;  %v720_v54 = vsel %vm662_vm0, %v1932_v47, -inf  ;;  %v864_v57 = vsel %vm662_vm0, %v1091_v49, 0.0 }
 0x143   :  { %1092 = vpow2.f32 %v799_v50  ;;  %v401_v59 = vadd.f32 %v400_v53, %v288_v51  ;;  %721 = vmax.xlane.f32.xlu1 %v720_v54  ;;  %865 = vadd.xlane.f32.xlu2 %v864_v57 }
 0x145   :  { %v513_v3 = vpop.f32.mrf.mxu2 }
 0x146   :  { %v514_v60 = vadd.f32 %v513_v3, %v401_v59  ;;  %v680_v61 = vpop.xlane.xlu2 %679 }
 0x147   :  { %v1940_v62 = vsub.f32 %v1723_v16, %v680_v61  ;;  %v626_v63 = vpop.f32.mrf.mxu3 }
 0x148   :  { %v1942_v1 = vadd.f32 %v626_v63, %v514_v60  ;;  %v290_v2 = vpop.f32.mrf.mxu0 }
 0x149   :  { %v1093_v26 = vpop.eup %1092  ;;  %v801_v4 = vmul.f32 1.442695, %v1940_v62  ;;  %v291_v5 = vadd.f32 %v1620_v0, %v290_v2 }
 0x14a   :  { %v403_v8 = vpop.f32.mrf.mxu1  ;;  %v723_v11 = vsel %vm662_vm0, %v1942_v1, -inf  ;;  %v867_v12 = vsel %vm662_vm0, %v1093_v26, 0.0 }
 0x14b   :  { %1094 = vpow2.f32 %v801_v4  ;;  %v404_v13 = vadd.f32 %v403_v8, %v291_v5  ;;  %724 = vmax.xlane.f32.xlu2 %v723_v11  ;;  %868 = vadd.xlane.f32.xlu0 %v867_v12 }
 0x14d   :  { %v516_v16 = vpop.f32.mrf.mxu2 }
 0x14e   :  { %v517_v15 = vadd.f32 %v516_v16, %v404_v13  ;;  %v683_v17 = vpop.xlane.xlu0 %682 }
 0x14f   :  { %v1950_v18 = vsub.f32 %v1740_v30, %v683_v17  ;;  %v629_v19 = vpop.f32.mrf.mxu3 }
 0x150   :  { %v1952_v20 = vadd.f32 %v629_v19, %v517_v15  ;;  %v293_v40 = vpop.f32.mrf.mxu0 }
 0x151   :  { %v1095_v21 = vpop.eup %1094  ;;  %v803_v22 = vmul.f32 1.442695, %v1950_v18  ;;  %v294_v27 = vadd.f32 %v1620_v0, %v293_v40 }
 0x152   :  { %v406_v29 = vpop.f32.mrf.mxu1  ;;  %v870_v31 = vsel %vm662_vm0, %v1095_v21, 0.0  ;;  %v726_v32 = vsel %vm662_vm0, %v1952_v20, -inf }
 0x153   :  { %1096 = vpow2.f32 %v803_v22  ;;  %v407_v33 = vadd.f32 %v406_v29, %v294_v27  ;;  %871 = vadd.xlane.f32.xlu1 %v870_v31  ;;  %727 = vmax.xlane.f32.xlu0 %v726_v32 }
 0x155   :  { %v519_v30 = vpop.f32.mrf.mxu2 }
 0x156   :  { %v520_v34 = vadd.f32 %v519_v30, %v407_v33  ;;  %v686_v35 = vpop.xlane.xlu1 %685 }
 0x157   :  { %v1960_v36 = vsub.f32 %v1757_v44, %v686_v35  ;;  %v632_v37 = vpop.f32.mrf.mxu3 }
 0x158   :  { %v1962_v52 = vadd.f32 %v632_v37, %v520_v34  ;;  %v296_v38 = vpop.f32.mrf.mxu0 }
 0x159   :  { %v1097_v43 = vpop.eup %1096  ;;  %v805_v46 = vmul.f32 1.442695, %v1960_v36  ;;  %v297_v48 = vadd.f32 %v1620_v0, %v296_v38 }
 0x15a   :  { %v409_v49 = vpop.f32.mrf.mxu1  ;;  %v729_v50 = vsel %vm662_vm0, %v1962_v52, -inf  ;;  %v873_v51 = vsel %vm662_vm0, %v1097_v43, 0.0 }
 0x15b   :  { %1098 = vpow2.f32 %v805_v46  ;;  %v410_v53 = vadd.f32 %v409_v49, %v297_v48  ;;  %730 = vmax.xlane.f32.xlu1 %v729_v50  ;;  %874 = vadd.xlane.f32.xlu2 %v873_v51 }
 0x15d   :  { %v522_v44 = vpop.f32.mrf.mxu2 }
 0x15e   :  { %v523_v54 = vadd.f32 %v522_v44, %v410_v53  ;;  %v689_v57 = vpop.xlane.xlu2 %688 }
 0x15f   :  { %v1970_v59 = vsub.f32 %v1774_v58, %v689_v57  ;;  %v635_v3 = vpop.f32.mrf.mxu3 }
 0x160   :  { %v1972_v60 = vadd.f32 %v635_v3, %v523_v54  ;;  %v299_v61 = vpop.f32.mrf.mxu0 }
 0x161   :  { %v1099_v63 = vpop.eup %1098  ;;  %v807_v2 = vmul.f32 1.442695, %v1970_v59  ;;  %v300_v26 = vadd.f32 %v1620_v0, %v299_v61 }
 0x162   :  { %v412_v4 = vpop.f32.mrf.mxu1  ;;  %v876_v5 = vsel %vm662_vm0, %v1099_v63, 0.0  ;;  %v732_v8 = vsel %vm662_vm0, %v1972_v60, -inf }
 0x163   :  { %1100 = vpow2.f32 %v807_v2  ;;  %v413_v11 = vadd.f32 %v412_v4, %v300_v26  ;;  %877 = vadd.xlane.f32.xlu0 %v876_v5  ;;  %733 = vmax.xlane.f32.xlu2 %v732_v8 }
 0x165   :  { %v525_v58 = vpop.f32.mrf.mxu2 }
 0x166   :  { %v526_v12 = vadd.f32 %v525_v58, %v413_v11  ;;  %v692_v13 = vpop.xlane.xlu0 %691 }
 0x167   :  { %v1980_v16 = vsub.f32 %v1791_v9, %v692_v13  ;;  %v638_v15 = vpop.f32.mrf.mxu3 }
 0x168   :  { %v1982_v17 = vadd.f32 %v638_v15, %v526_v12  ;;  %v302_v19 = vpop.f32.mrf.mxu0 }
 0x169   :  { %v1101_v40 = vpop.eup %1100  ;;  %v809_v21 = vmul.f32 1.442695, %v1980_v16  ;;  %v303_v22 = vadd.f32 %v1620_v0, %v302_v19 }
 0x16a   :  { %v415_v27 = vpop.f32.mrf.mxu1  ;;  %v879_v29 = vsel %vm662_vm0, %v1101_v40, 0.0  ;;  %v735_v31 = vsel %vm662_vm0, %v1982_v17, -inf }
 0x16b   :  { %1102 = vpow2.f32 %v809_v21  ;;  %v416_v32 = vadd.f32 %v415_v27, %v303_v22  ;;  %880 = vadd.xlane.f32.xlu1 %v879_v29  ;;  %736 = vmax.xlane.f32.xlu0 %v735_v31 }
 0x16d   :  { %v528_v9 = vpop.f32.mrf.mxu2 }
 0x16e   :  { %v529_v33 = vadd.f32 %v528_v9, %v416_v32  ;;  %v695_v30 = vpop.xlane.xlu1 %694 }
 0x16f   :  { %v1990_v34 = vsub.f32 %v1808_v24, %v695_v30  ;;  %v641_v35 = vpop.f32.mrf.mxu3 }
 0x170   :  { %v1992_v37 = vadd.f32 %v641_v35, %v529_v33  ;;  %v305_v38 = vpop.f32.mrf.mxu0 }
 0x171   :  { %v1103_v43 = vpop.eup %1102  ;;  %v811_v46 = vmul.f32 1.442695, %v1990_v34  ;;  %v306_v48 = vadd.f32 %v1620_v0, %v305_v38 }
 0x172   :  { %v418_v49 = vpop.f32.mrf.mxu1  ;;  %v738_v50 = vsel %vm662_vm0, %v1992_v37, -inf  ;;  %v882_v51 = vsel %vm662_vm0, %v1103_v43, 0.0 }
 0x173   :  { %1104 = vpow2.f32 %v811_v46  ;;  %v419_v53 = vadd.f32 %v418_v49, %v306_v48  ;;  %739 = vmax.xlane.f32.xlu1 %v738_v50  ;;  %883 = vadd.xlane.f32.xlu2 %v882_v51 }
 0x175   :  { %v531_v24 = vpop.f32.mrf.mxu2 }
 0x176   :  { %v532_v44 = vadd.f32 %v531_v24, %v419_v53  ;;  %v698_v49 = vpop.xlane.xlu2 %697 }
 0x177   :  { %v644_v54 = vpop.f32.mrf.mxu3 }
 0x178   :  { %v1999_v57 = vadd.f32 %v644_v54, %v532_v44  ;;  %v308_v3 = vpop.f32.mrf.mxu0 }
 0x179   :  { %v1105_v61 = vpop.eup %1104  ;;  %v309_v63 = vadd.f32 %v1620_v0, %v308_v3 }
 0x17a   :  { %v421_v2 = vpop.f32.mrf.mxu1  ;;  %v885_v26 = vsel %vm662_vm0, %v1105_v61, 0.0  ;;  %v741_v4 = vsel %vm662_vm0, %v1999_v57, -inf }
 0x17b   :  { %v422_v5 = vadd.f32 %v421_v2, %v309_v63  ;;  %886 = vadd.xlane.f32.xlu0 %v885_v26  ;;  %742 = vmax.xlane.f32.xlu2 %v741_v4 }
 0x17d   :  { %v534_v8 = vpop.f32.mrf.mxu2 }
 0x17e   :  { %v535_v11 = vadd.f32 %v534_v8, %v422_v5  ;;  %v701_v27 = vpop.xlane.xlu0 %700 }
 0x17f   :  { %v647_v58 = vpop.f32.mrf.mxu3  ;;  %v2013_v33 = vsub.f32 %v1842_v55, %v701_v27 }
 0x180   :  { %v2005_v12 = vadd.f32 %v647_v58, %v535_v11  ;;  %v311_v13 = vpop.f32.mrf.mxu0 }
 0x181   :  { %v312_v15 = vadd.f32 %v1620_v0, %v311_v13  ;;  %v815_v46 = vmul.f32 1.442695, %v2013_v33 }
 0x182   :  { %v424_v19 = vpop.f32.mrf.mxu1  ;;  %v744_v40 = vsel %vm662_vm0, %v2005_v12, -inf }
 0x183   :  { %v425_v21 = vadd.f32 %v424_v19, %v312_v15  ;;  %745 = vmax.xlane.f32.xlu0 %v744_v40  ;;  %1106 = vpow2.f32 %v815_v46  ;;  %v2036_v19 = vsub.f32 %v1825_v39, %v698_v49 }
 0x185   :  { %v537_v22 = vpop.f32.mrf.mxu2 }
 0x186   :  { %v538_v29 = vadd.f32 %v537_v22, %v425_v21  ;;  %v704_v50 = vpop.xlane.xlu1 %703 }
 0x187   :  { %v650_v31 = vpop.f32.mrf.mxu3  ;;  %v2022_v55 = vsub.f32 %v1859_v7, %v704_v50 }
 0x188   :  { %v2010_v32 = vadd.f32 %v650_v31, %v538_v29  ;;  %v314_v9 = vpop.f32.mrf.mxu0  ;;  %v813_v31 = vmul.f32 1.442695, %v2036_v19 }
 0x189   :  { %v315_v30 = vadd.f32 %v1620_v0, %v314_v9  ;;  %v1212_v0 = vld [vmem:[%s2297_s2] ss:$0 sm:$0xff]  ;;  %v817_v2 = vmul.f32 1.442695, %v2022_v55  ;;  %v1107_v11 = vpop.eup %1106 }
 0x18a   :  { %v427_v35 = vpop.f32.mrf.mxu1  ;;  %v747_v38 = vsel %vm662_vm0, %v2010_v32, -inf  ;;  %v891_v29 = vsel %vm662_vm0, %v1107_v11, 0.0 }
 0x18b   :  { %v428_v43 = vadd.f32 %v427_v35, %v315_v30  ;;  %748 = vmax.xlane.f32.xlu1 %v747_v38  ;;  %1108 = vpow2.f32 %v817_v2 }
 0x18d   :  { %v540_v48 = vpop.f32.mrf.mxu2 }
 0x18e   :  { %v541_v51 = vadd.f32 %v540_v48, %v428_v43  ;;  %v707_v4 = vpop.xlane.xlu2 %706 }
 0x18f   :  { %v653_v53 = vpop.f32.mrf.mxu3  ;;  %v2049_v50 = vsub.f32 %v1876_v23, %v707_v4 }
 0x190   :  { %v2019_v24 = vadd.f32 %v653_v53, %v541_v51  ;;  %v317_v44 = vpop.f32.mrf.mxu0 }
 0x191   :  { %v318_v54 = vadd.f32 %v1212_v0, %v317_v44  ;;  %v1109_v38 = vpop.eup %1108 }
 0x192   :  { %v430_v3 = vpop.f32.mrf.mxu1  ;;  %v750_v61 = vsel %vm662_vm0, %v2019_v24, -inf  ;;  %v894_v44 = vsel %vm662_vm0, %v1109_v38, 0.0 }
 0x193   :  { %v431_v63 = vadd.f32 %v430_v3, %v318_v54  ;;  %751 = vmax.xlane.f32.xlu2 %v750_v61  ;;  %v819_v54 = vmul.f32 1.442695, %v2049_v50 }
 0x195   :  { %v543_v26 = vpop.f32.mrf.mxu2 }
 0x196   :  { %v544_v5 = vadd.f32 %v543_v26, %v431_v63  ;;  %v710_v8 = vpop.xlane.xlu0 %709 }
 0x197   :  { %v2031_v7 = vsub.f32 %v1893_v42, %v710_v8  ;;  %v656_v58 = vpop.f32.mrf.mxu3 }
 0x198   :  { %v2033_v13 = vadd.f32 %v656_v58, %v544_v5  ;;  %v320_v15 = vpop.f32.mrf.mxu0 }
 0x199   :  { %v821_v40 = vmul.f32 1.442695, %v2031_v7  ;;  %v321_v21 = vadd.f32 %v1212_v0, %v320_v15 }
 0x19a   :  { %v433_v22 = vpop.f32.mrf.mxu1  ;;  %v753_v27 = vsel %vm662_vm0, %v2033_v13, -inf }
 0x19b   :  { %1110 = vpow2.f32 %v821_v40  ;;  %v434_v42 = vadd.f32 %v433_v22, %v321_v21  ;;  %754 = vmax.xlane.f32.xlu0 %v753_v27  ;;  %892 = vadd.xlane.f32.xlu2 %v891_v29 }
 0x19d   :  { %v546_v9 = vpop.f32.mrf.mxu2 }
 0x19e   :  { %v547_v30 = vadd.f32 %v546_v9, %v434_v42  ;;  %v713_v39 = vpop.xlane.xlu1 %712  ;;  %v857_v35 = vpop.xlane.xlu2 %856 }
 0x19f   :  { %v2044_v43 = vsub.f32 %v1902_v56, %v713_v39  ;;  %1112 = vlog2.f32 %v857_v35  ;;  %v659_v46 = vpop.f32.mrf.mxu3 }
 0x1a0   :  { %v2046_v48 = vadd.f32 %v659_v46, %v547_v30  ;;  %1114 = vpow2.f32 %v813_v31 }
 0x1a1   :  { %v1111_v49 = vpop.eup %1110  ;;  %v823_v51 = vmul.f32 1.442695, %v2044_v43 }
 0x1a2   :  { %v756_v53 = vsel %vm662_vm0, %v2046_v48, -inf  ;;  %v900_v0 = vsel %vm662_vm0, %v1111_v49, 0.0 }
 0x1a3   :  { %1116 = vpow2.f32 %v823_v51  ;;  %757 = vmax.xlane.f32.xlu1 %v756_v53  ;;  %895 = vadd.xlane.f32.xlu0 %v894_v44 }
 0x1a4   :  { %901 = vadd.xlane.f32.xlu2 %v900_v0 }
 0x1a5   :  { %v1113_v56 = vpop.eup %1112 }
 0x1a6   :  { %v952_v3 = vmul.f32 0.6931472, %v1113_v56  ;;  %v716_v61 = vpop.xlane.xlu2 %715  ;;  %v860_v23 = vpop.xlane.xlu0 %859 }
 0x1a7   :  { %v1115_v63 = vpop.eup %1114  ;;  %1118 = vlog2.f32 %v860_v23  ;;  %v2059_v4 = vsub.f32 %v1912_v10, %v716_v61 }
 0x1a8   :  { %v1015_v2 = vsub.f32 %v1891_v41, %v952_v3  ;;  %1120 = vpow2.f32 %v819_v54  ;;  %v888_v5 = vsel %vm662_vm0, %v1115_v63, 0.0 }
 0x1a9   :  { %v1117_v26 = vpop.eup %1116  ;;  %v825_v58 = vmul.f32 1.442695, %v2059_v4 }
 0x1aa   :  { %1047 = vst.msk [vmem:[%s2298_s3] sm:$0xff] %vm662_vm0, %v1015_v2  ;;  %v903_v8 = vsel %vm662_vm0, %v1117_v26, 0.0 }
 0x1ab   :  { %889 = vadd.xlane.f32.xlu1 %v888_v5  ;;  %904 = vadd.xlane.f32.xlu0 %v903_v8 }
 0x1ad   :  { %v1119_v11 = vpop.eup %1118 }
 0x1ae   :  { %v954_v41 = vmul.f32 0.6931472, %v1119_v11  ;;  %v863_v15 = vpop.xlane.xlu1 %862  ;;  %v719_v40 = vpop.xlane.xlu0 %718 }
 0x1af   :  { %v1121_v21 = vpop.eup %1120  ;;  %1122 = vlog2.f32 %v863_v15  ;;  %v2069_v10 = vsub.f32 %v1922_v28, %v719_v40 }
 0x1b0   :  { %v1016_v22 = vsub.f32 %v1900_v14, %v954_v41  ;;  %1124 = vpow2.f32 %v825_v58  ;;  %v897_v29 = vsel %vm662_vm0, %v1121_v21, 0.0 }
 0x1b1   :  { %v827_v27 = vmul.f32 1.442695, %v2069_v10 }
 0x1b2   :  { %1048 = vst.msk [vmem:[%s2298_s3 + $0x8] sm:$0xff] %vm662_vm0, %v1016_v22 }
 0x1b3   :  { %1126 = vpow2.f32 %v827_v27  ;;  %898 = vadd.xlane.f32.xlu1 %v897_v29 }
 0x1b5   :  { %v1123_v42 = vpop.eup %1122 }
 0x1b6   :  { %v956_v31 = vmul.f32 0.6931472, %v1123_v42  ;;  %v722_v9 = vpop.xlane.xlu1 %721  ;;  %v866_v30 = vpop.xlane.xlu2 %865 }
 0x1b7   :  { %v1125_v28 = vpop.eup %1124  ;;  %v2079_v39 = vsub.f32 %v1932_v47, %v722_v9  ;;  %1128 = vlog2.f32 %v866_v30 }
 0x1b8   :  { %v1017_v14 = vsub.f32 %v1910_v6, %v956_v31  ;;  %v906_v46 = vsel %vm662_vm0, %v1125_v28, 0.0 }
 0x1b9   :  { %v1127_v35 = vpop.eup %1126  ;;  %v829_v38 = vmul.f32 1.442695, %v2079_v39 }
 0x1ba   :  { %1049 = vst.msk [vmem:[%s2298_s3 + $0x10] sm:$0xff] %vm662_vm0, %v1017_v14  ;;  %v909_v49 = vsel %vm662_vm0, %v1127_v35, 0.0 }
 0x1bb   :  { %1130 = vpow2.f32 %v829_v38  ;;  %907 = vadd.xlane.f32.xlu1 %v906_v46  ;;  %910 = vadd.xlane.f32.xlu2 %v909_v49 }
 0x1bd   :  { %v1129_v47 = vpop.eup %1128 }
 0x1be   :  { %v958_v51 = vmul.f32 0.6931472, %v1129_v47  ;;  %v725_v53 = vpop.xlane.xlu2 %724  ;;  %v869_v44 = vpop.xlane.xlu0 %868 }
 0x1bf   :  { %v2090_v6 = vsub.f32 %v1942_v1, %v725_v53  ;;  %1132 = vlog2.f32 %v869_v44 }
 0x1c0   :  { %v1018_v0 = vsub.f32 %v1920_v25, %v958_v51 }
 0x1c1   :  { %v1131_v56 = vpop.eup %1130  ;;  %v831_v54 = vmul.f32 1.442695, %v2090_v6 }
 0x1c2   :  { %1050 = vst.msk [vmem:[%s2298_s3 + $0x18] sm:$0xff] %vm662_vm0, %v1018_v0  ;;  %v912_v3 = vsel %vm662_vm0, %v1131_v56, 0.0 }
 0x1c3   :  { %1134 = vpow2.f32 %v831_v54  ;;  %913 = vadd.xlane.f32.xlu0 %v912_v3 }
 0x1c5   :  { %v1133_v61 = vpop.eup %1132 }
 0x1c6   :  { %v960_v23 = vmul.f32 0.6931472, %v1133_v61  ;;  %v872_v63 = vpop.xlane.xlu1 %871  ;;  %v728_v1 = vpop.xlane.xlu0 %727 }
 0x1c7   :  { %1136 = vlog2.f32 %v872_v63  ;;  %v2100_v2 = vsub.f32 %v1952_v20, %v728_v1 }
 0x1c8   :  { %v1019_v25 = vsub.f32 %v1930_v45, %v960_v23 }
 0x1c9   :  { %v1135_v26 = vpop.eup %1134  ;;  %v833_v5 = vmul.f32 1.442695, %v2100_v2 }
 0x1ca   :  { %1051 = vst.msk [vmem:[%s2298_s3 + $0x20] sm:$0xff] %vm662_vm0, %v1019_v25  ;;  %v915_v8 = vsel %vm662_vm0, %v1135_v26, 0.0 }
 0x1cb   :  { %1138 = vpow2.f32 %v833_v5  ;;  %916 = vadd.xlane.f32.xlu1 %v915_v8 }
 0x1cd   :  { %v1137_v11 = vpop.eup %1136 }
 0x1ce   :  { %v962_v58 = vmul.f32 0.6931472, %v1137_v11  ;;  %v731_v41 = vpop.xlane.xlu1 %730  ;;  %v875_v15 = vpop.xlane.xlu2 %874 }
 0x1cf   :  { %v2110_v20 = vsub.f32 %v1962_v52, %v731_v41  ;;  %1140 = vlog2.f32 %v875_v15 }
 0x1d0   :  { %v1020_v45 = vsub.f32 %v1940_v62, %v962_v58 }
 0x1d1   :  { %v1139_v40 = vpop.eup %1138  ;;  %v835_v21 = vmul.f32 1.442695, %v2110_v20 }
 0x1d2   :  { %1052 = vst.msk [vmem:[%s2298_s3 + $0x28] sm:$0xff] %vm662_vm0, %v1020_v45  ;;  %v918_v22 = vsel %vm662_vm0, %v1139_v40, 0.0 }
 0x1d3   :  { %1142 = vpow2.f32 %v835_v21  ;;  %919 = vadd.xlane.f32.xlu2 %v918_v22 }
 0x1d5   :  { %v1141_v27 = vpop.eup %1140 }
 0x1d6   :  { %v964_v29 = vmul.f32 0.6931472, %v1141_v27  ;;  %v734_v42 = vpop.xlane.xlu2 %733  ;;  %v878_v52 = vpop.xlane.xlu0 %877 }
 0x1d7   :  { %v2120_v31 = vsub.f32 %v1972_v60, %v734_v42  ;;  %1144 = vlog2.f32 %v878_v52 }
 0x1d8   :  { %v1021_v62 = vsub.f32 %v1950_v18, %v964_v29 }
 0x1d9   :  { %v1143_v9 = vpop.eup %1142  ;;  %v837_v30 = vmul.f32 1.442695, %v2120_v31 }
 0x1da   :  { %1053 = vst.msk [vmem:[%s2298_s3 + $0x30] sm:$0xff] %vm662_vm0, %v1021_v62  ;;  %v921_v28 = vsel %vm662_vm0, %v1143_v9, 0.0 }
 0x1db   :  { %1146 = vpow2.f32 %v837_v30  ;;  %922 = vadd.xlane.f32.xlu0 %v921_v28 }
 0x1dd   :  { %v1145_v14 = vpop.eup %1144 }
 0x1de   :  { %v966_v35 = vmul.f32 0.6931472, %v1145_v14  ;;  %v881_v38 = vpop.xlane.xlu1 %880  ;;  %v737_v60 = vpop.xlane.xlu0 %736 }
 0x1df   :  { %1148 = vlog2.f32 %v881_v38  ;;  %v2130_v46 = vsub.f32 %v1982_v17, %v737_v60 }
 0x1e0   :  { %v1022_v18 = vsub.f32 %v1960_v36, %v966_v35 }
 0x1e1   :  { %v1147_v49 = vpop.eup %1146  ;;  %v839_v47 = vmul.f32 1.442695, %v2130_v46 }
 0x1e2   :  { %1054 = vst.msk [vmem:[%s2298_s3 + $0x38] sm:$0xff] %vm662_vm0, %v1022_v18  ;;  %v924_v51 = vsel %vm662_vm0, %v1147_v49, 0.0 }
 0x1e3   :  { %1150 = vpow2.f32 %v839_v47  ;;  %925 = vadd.xlane.f32.xlu1 %v924_v51 }
 0x1e5   :  { %v1149_v53 = vpop.eup %1148 }
 0x1e6   :  { %v968_v44 = vmul.f32 0.6931472, %v1149_v53  ;;  %v740_v0 = vpop.xlane.xlu1 %739  ;;  %v884_v56 = vpop.xlane.xlu2 %883 }
 0x1e7   :  { %v2140_v17 = vsub.f32 %v1992_v37, %v740_v0  ;;  %1152 = vlog2.f32 %v884_v56 }
 0x1e8   :  { %v1023_v36 = vsub.f32 %v1970_v59, %v968_v44 }
 0x1e9   :  { %v1151_v54 = vpop.eup %1150  ;;  %v841_v3 = vmul.f32 1.442695, %v2140_v17 }
 0x1ea   :  { %1055 = vst.msk [vmem:[%s2298_s3 + $0x40] sm:$0xff] %vm662_vm0, %v1023_v36  ;;  %v927_v61 = vsel %vm662_vm0, %v1151_v54, 0.0 }
 0x1eb   :  { %1154 = vpow2.f32 %v841_v3  ;;  %928 = vadd.xlane.f32.xlu2 %v927_v61 }
 0x1ed   :  { %v1153_v23 = vpop.eup %1152 }
 0x1ee   :  { %v970_v63 = vmul.f32 0.6931472, %v1153_v23  ;;  %v743_v1 = vpop.xlane.xlu2 %742  ;;  %v887_v37 = vpop.xlane.xlu0 %886 }
 0x1ef   :  { %v2150_v25 = vsub.f32 %v1999_v57, %v743_v1  ;;  %1156 = vlog2.f32 %v887_v37 }
 0x1f0   :  { %v1024_v59 = vsub.f32 %v1980_v16, %v970_v63 }
 0x1f1   :  { %v1155_v26 = vpop.eup %1154  ;;  %v843_v5 = vmul.f32 1.442695, %v2150_v25 }
 0x1f2   :  { %1056 = vst.msk [vmem:[%s2298_s3 + $0x48] sm:$0xff] %vm662_vm0, %v1024_v59  ;;  %v930_v8 = vsel %vm662_vm0, %v1155_v26, 0.0 }
 0x1f3   :  { %1158 = vpow2.f32 %v843_v5  ;;  %931 = vadd.xlane.f32.xlu0 %v930_v8 }
 0x1f5   :  { %v1157_v11 = vpop.eup %1156 }
 0x1f6   :  { %v972_v58 = vmul.f32 0.6931472, %v1157_v11  ;;  %v746_v41 = vpop.xlane.xlu0 %745 }
 0x1f7   :  { %v2160_v57 = vsub.f32 %v2005_v12, %v746_v41 }
 0x1f8   :  { %v1025_v16 = vsub.f32 %v1990_v34, %v972_v58 }
 0x1f9   :  { %v1159_v15 = vpop.eup %1158  ;;  %v845_v45 = vmul.f32 1.442695, %v2160_v57 }
 0x1fa   :  { %1057 = vst.msk [vmem:[%s2298_s3 + $0x50] sm:$0xff] %vm662_vm0, %v1025_v16  ;;  %v933_v40 = vsel %vm662_vm0, %v1159_v15, 0.0 }
 0x1fb   :  { %1160 = vpow2.f32 %v845_v45  ;;  %934 = vadd.xlane.f32.xlu1 %v933_v40 }
 0x1fe   :  { %v749_v21 = vpop.xlane.xlu1 %748 }
 0x1ff   :  { %v2170_v22 = vsub.f32 %v2010_v32, %v749_v21 }
 0x201   :  { %v1161_v12 = vpop.eup %1160  ;;  %v847_v27 = vmul.f32 1.442695, %v2170_v22 }
 0x202   :  { %v936_v34 = vsel %vm662_vm0, %v1161_v12, 0.0 }
 0x203   :  { %1162 = vpow2.f32 %v847_v27  ;;  %937 = vadd.xlane.f32.xlu2 %v936_v34 }
 0x206   :  { %v752_v29 = vpop.xlane.xlu2 %751 }
 0x207   :  { %v2175_v42 = vsub.f32 %v2019_v24, %v752_v29 }
 0x209   :  { %v1163_v52 = vpop.eup %1162  ;;  %v849_v62 = vmul.f32 1.442695, %v2175_v42 }
 0x20a   :  { %v939_v9 = vsel %vm662_vm0, %v1163_v52, 0.0 }
 0x20b   :  { %1164 = vpow2.f32 %v849_v62  ;;  %940 = vadd.xlane.f32.xlu0 %v939_v9 }
 0x20e   :  { %v893_v32 = vpop.xlane.xlu2 %892  ;;  %v755_v30 = vpop.xlane.xlu0 %754 }
 0x20f   :  { %1166 = vlog2.f32 %v893_v32  ;;  %v2180_v28 = vsub.f32 %v2033_v13, %v755_v30 }
 0x211   :  { %v1165_v14 = vpop.eup %1164  ;;  %v851_v35 = vmul.f32 1.442695, %v2180_v28 }
 0x212   :  { %v942_v38 = vsel %vm662_vm0, %v1165_v14, 0.0 }
 0x213   :  { %1168 = vpow2.f32 %v851_v35  ;;  %943 = vadd.xlane.f32.xlu1 %v942_v38 }
 0x215   :  { %v1167_v24 = vpop.eup %1166 }
 0x216   :  { %v976_v60 = vmul.f32 0.6931472, %v1167_v24  ;;  %v758_v18 = vpop.xlane.xlu1 %757  ;;  %v896_v49 = vpop.xlane.xlu0 %895 }
 0x217   :  { %v2185_v47 = vsub.f32 %v2046_v48, %v758_v18  ;;  %v902_v51 = vpop.xlane.xlu2 %901  ;;  %1170 = vlog2.f32 %v896_v49 }
 0x218   :  { %v1027_v53 = vsub.f32 %v2013_v33, %v976_v60  ;;  %1172 = vlog2.f32 %v902_v51 }
 0x219   :  { %v1169_v13 = vpop.eup %1168  ;;  %v853_v44 = vmul.f32 1.442695, %v2185_v47 }
 0x21a   :  { %1059 = vst.msk [vmem:[%s2298_s3 + $0x60] sm:$0xff] %vm662_vm0, %v1027_v53  ;;  %v945_v0 = vsel %vm662_vm0, %v1169_v13, 0.0 }
 0x21b   :  { %1174 = vpow2.f32 %v853_v44  ;;  %946 = vadd.xlane.f32.xlu2 %v945_v0 }
 0x21d   :  { %v1171_v56 = vpop.eup %1170 }
 0x21e   :  { %v1173_v48 = vpop.eup %1172  ;;  %v978_v36 = vmul.f32 0.6931472, %v1171_v56  ;;  %v890_v54 = vpop.xlane.xlu1 %889 }
 0x21f   :  { %v905_v3 = vpop.xlane.xlu0 %904  ;;  %v982_v61 = vmul.f32 0.6931472, %v1173_v48  ;;  %1176 = vlog2.f32 %v890_v54 }
 0x220   :  { %v1028_v33 = vsub.f32 %v2022_v55, %v978_v36  ;;  %1178 = vlog2.f32 %v905_v3 }
 0x221   :  { %v1175_v23 = vpop.eup %1174  ;;  %v1030_v63 = vsub.f32 %v2031_v7, %v982_v61 }
 0x222   :  { %1060 = vst.msk [vmem:[%s2298_s3 + $0x68] sm:$0xff] %vm662_vm0, %v1028_v33  ;;  %v948_v1 = vsel %vm662_vm0, %v1175_v23, 0.0 }
 0x223   :  { %1062 = vst.msk [vmem:[%s2298_s3 + $0x78] sm:$0xff] %vm662_vm0, %v1030_v63  ;;  %949 = vadd.xlane.f32.xlu0 %v948_v1 }
 0x225   :  { %v1177_v37 = vpop.eup %1176 }
 0x226   :  { %v1179_v59 = vpop.eup %1178  ;;  %v974_v55 = vmul.f32 0.6931472, %v1177_v37  ;;  %v899_v26 = vpop.xlane.xlu1 %898 }
 0x227   :  { %v984_v5 = vmul.f32 0.6931472, %v1179_v59  ;;  %1180 = vlog2.f32 %v899_v26 }
 0x228   :  { %v1026_v7 = vsub.f32 %v2036_v19, %v974_v55 }
 0x229   :  { %v1031_v8 = vsub.f32 %v2044_v43, %v984_v5 }
 0x22a   :  { %1058 = vst.msk [vmem:[%s2298_s3 + $0x58] sm:$0xff] %vm662_vm0, %v1026_v7 }
 0x22b   :  { %1063 = vst.msk [vmem:[%s2298_s3 + $0x80] sm:$0xff] %vm662_vm0, %v1031_v8 }
 0x22d   :  { %v1181_v11 = vpop.eup %1180 }
 0x22e   :  { %v980_v58 = vmul.f32 0.6931472, %v1181_v11  ;;  %v908_v41 = vpop.xlane.xlu1 %907  ;;  %v911_v16 = vpop.xlane.xlu2 %910 }
 0x22f   :  { %1182 = vlog2.f32 %v908_v41 }
 0x230   :  { %v1029_v15 = vsub.f32 %v2049_v50, %v980_v58  ;;  %1184 = vlog2.f32 %v911_v16 }
 0x232   :  { %1061 = vst.msk [vmem:[%s2298_s3 + $0x70] sm:$0xff] %vm662_vm0, %v1029_v15 }
 0x235   :  { %v1183_v19 = vpop.eup %1182 }
 0x236   :  { %v1185_v43 = vpop.eup %1184  ;;  %v986_v45 = vmul.f32 0.6931472, %v1183_v19  ;;  %v914_v40 = vpop.xlane.xlu0 %913 }
 0x237   :  { %v988_v21 = vmul.f32 0.6931472, %v1185_v43  ;;  %1186 = vlog2.f32 %v914_v40 }
 0x238   :  { %v1032_v12 = vsub.f32 %v2059_v4, %v986_v45 }
 0x239   :  { %v1033_v27 = vsub.f32 %v2069_v10, %v988_v21 }
 0x23a   :  { %1064 = vst.msk [vmem:[%s2298_s3 + $0x88] sm:$0xff] %vm662_vm0, %v1032_v12 }
 0x23b   :  { %1065 = vst.msk [vmem:[%s2298_s3 + $0x90] sm:$0xff] %vm662_vm0, %v1033_v27 }
 0x23d   :  { %v1187_v50 = vpop.eup %1186 }
 0x23e   :  { %v990_v34 = vmul.f32 0.6931472, %v1187_v50  ;;  %v917_v29 = vpop.xlane.xlu1 %916 }
 0x23f   :  { %1188 = vlog2.f32 %v917_v29 }
 0x240   :  { %v1034_v52 = vsub.f32 %v2079_v39, %v990_v34 }
 0x242   :  { %1066 = vst.msk [vmem:[%s2298_s3 + $0x98] sm:$0xff] %vm662_vm0, %v1034_v52 }
 0x245   :  { %v1189_v4 = vpop.eup %1188 }
 0x246   :  { %v992_v10 = vmul.f32 0.6931472, %v1189_v4  ;;  %v920_v62 = vpop.xlane.xlu2 %919 }
 0x247   :  { %1190 = vlog2.f32 %v920_v62 }
 0x248   :  { %v1035_v9 = vsub.f32 %v2090_v6, %v992_v10 }
 0x24a   :  { %1067 = vst.msk [vmem:[%s2298_s3 + $0xa0] sm:$0xff] %vm662_vm0, %v1035_v9 }
 0x24d   :  { %v1191_v32 = vpop.eup %1190 }
 0x24e   :  { %v994_v30 = vmul.f32 0.6931472, %v1191_v32  ;;  %v923_v14 = vpop.xlane.xlu0 %922 }
 0x24f   :  { %1192 = vlog2.f32 %v923_v14 }
 0x250   :  { %v1036_v39 = vsub.f32 %v2100_v2, %v994_v30 }
 0x252   :  { %1068 = vst.msk [vmem:[%s2298_s3 + $0xa8] sm:$0xff] %vm662_vm0, %v1036_v39 }
 0x255   :  { %v1193_v35 = vpop.eup %1192 }
 0x256   :  { %v996_v38 = vmul.f32 0.6931472, %v1193_v35  ;;  %v926_v24 = vpop.xlane.xlu1 %925 }
 0x257   :  { %1194 = vlog2.f32 %v926_v24 }
 0x258   :  { %v1037_v6 = vsub.f32 %v2110_v20, %v996_v38 }
 0x25a   :  { %1069 = vst.msk [vmem:[%s2298_s3 + $0xb0] sm:$0xff] %vm662_vm0, %v1037_v6 }
 0x25d   :  { %v1195_v60 = vpop.eup %1194 }
 0x25e   :  { %v998_v18 = vmul.f32 0.6931472, %v1195_v60  ;;  %v929_v49 = vpop.xlane.xlu2 %928 }
 0x25f   :  { %1196 = vlog2.f32 %v929_v49 }
 0x260   :  { %v1038_v2 = vsub.f32 %v2120_v31, %v998_v18 }
 0x262   :  { %1070 = vst.msk [vmem:[%s2298_s3 + $0xb8] sm:$0xff] %vm662_vm0, %v1038_v2 }
 0x265   :  { %v1197_v51 = vpop.eup %1196 }
 0x266   :  { %v1000_v53 = vmul.f32 0.6931472, %v1197_v51  ;;  %v932_v13 = vpop.xlane.xlu0 %931 }
 0x267   :  { %1198 = vlog2.f32 %v932_v13 }
 0x268   :  { %v1039_v20 = vsub.f32 %v2130_v46, %v1000_v53 }
 0x26a   :  { %1071 = vst.msk [vmem:[%s2298_s3 + $0xc0] sm:$0xff] %vm662_vm0, %v1039_v20 }
 0x26d   :  { %v1199_v44 = vpop.eup %1198 }
 0x26e   :  { %v1002_v0 = vmul.f32 0.6931472, %v1199_v44  ;;  %v935_v56 = vpop.xlane.xlu1 %934 }
 0x26f   :  { %1200 = vlog2.f32 %v935_v56 }
 0x270   :  { %v1040_v31 = vsub.f32 %v2140_v17, %v1002_v0 }
 0x272   :  { %1072 = vst.msk [vmem:[%s2298_s3 + $0xc8] sm:$0xff] %vm662_vm0, %v1040_v31 }
 0x275   :  { %v1201_v48 = vpop.eup %1200 }
 0x276   :  { %v1004_v36 = vmul.f32 0.6931472, %v1201_v48  ;;  %v938_v54 = vpop.xlane.xlu2 %937 }
 0x277   :  { %1202 = vlog2.f32 %v938_v54 }
 0x278   :  { %v1041_v46 = vsub.f32 %v2150_v25, %v1004_v36 }
 0x27a   :  { %1073 = vst.msk [vmem:[%s2298_s3 + $0xd0] sm:$0xff] %vm662_vm0, %v1041_v46 }
 0x27d   :  { %v1203_v3 = vpop.eup %1202 }
 0x27e   :  { %v1006_v61 = vmul.f32 0.6931472, %v1203_v3  ;;  %v941_v33 = vpop.xlane.xlu0 %940 }
 0x27f   :  { %1204 = vlog2.f32 %v941_v33 }
 0x280   :  { %v1042_v17 = vsub.f32 %v2160_v57, %v1006_v61 }
 0x282   :  { %1074 = vst.msk [vmem:[%s2298_s3 + $0xd8] sm:$0xff] %vm662_vm0, %v1042_v17 }
 0x285   :  { %v1205_v23 = vpop.eup %1204 }
 0x286   :  { %v1008_v63 = vmul.f32 0.6931472, %v1205_v23  ;;  %v944_v1 = vpop.xlane.xlu1 %943 }
 0x287   :  { %1206 = vlog2.f32 %v944_v1 }
 0x288   :  { %v1043_v25 = vsub.f32 %v2170_v22, %v1008_v63 }
 0x28a   :  { %1075 = vst.msk [vmem:[%s2298_s3 + $0xe0] sm:$0xff] %vm662_vm0, %v1043_v25 }
 0x28d   :  { %v1207_v37 = vpop.eup %1206 }
 0x28e   :  { %v1010_v59 = vmul.f32 0.6931472, %v1207_v37  ;;  %v947_v55 = vpop.xlane.xlu2 %946 }
 0x28f   :  { %1208 = vlog2.f32 %v947_v55 }
 0x290   :  { %v1044_v57 = vsub.f32 %v2175_v42, %v1010_v59 }
 0x292   :  { %1076 = vst.msk [vmem:[%s2298_s3 + $0xe8] sm:$0xff] %vm662_vm0, %v1044_v57 }
 0x295   :  { %v1209_v26 = vpop.eup %1208 }
 0x296   :  { %v1012_v5 = vmul.f32 0.6931472, %v1209_v26  ;;  %v950_v7 = vpop.xlane.xlu0 %949 }
 0x297   :  { %1210 = vlog2.f32 %v950_v7 }
 0x298   :  { %v1045_v22 = vsub.f32 %v2180_v28, %v1012_v5 }
 0x29a   :  { %1077 = vst.msk [vmem:[%s2298_s3 + $0xf0] sm:$0xff] %vm662_vm0, %v1045_v22 }
 0x29d   :  { %v1211_v8 = vpop.eup %1210 }
 0x29e   :  { %v1014_v11 = vmul.f32 0.6931472, %v1211_v8 }
 0x2a0   :  { %v1046_v42 = vsub.f32 %v2185_v47, %v1014_v11 }
 0x2a2   :  { %1078 = vst.msk [vmem:[%s2298_s3 + $0xf8] sm:$0xff] %vm662_vm0, %v1046_v42 }

// kernel: model_forward.20
= control target key start
LH: loop header
LB: loop body
LE: loop exit
PB: predicated region body
PF: predicated region fallthrough
CT: control target
= control target key end

     0   :  { %s2273_s15 = smov 0   ;;  %s4809_s0 = inlined_call_operand.vmem [shape: f32[128,2,512], index: 0, kind: input, shape index: {}]   ;;  %s4810_s1 = inlined_call_operand.vmem [shape: f32[512,1024], index: 1, kind: input, shape index: {}]   ;;  %s4811_s2 = inlined_call_operand.vmem [shape: f32[256,1024], index: 2, kind: input, shape index: {}]   ;;  %s4812_s3 = inlined_call_operand.vmem [shape: f32[1,1024], index: 3, kind: input, shape index: {}]   ;;  %s4813_s4 = inlined_call_operand.vmem [shape: f32[128,2,256], index: 4, kind: output, shape index: {}]  }
   0x1 LB: > { %s2178_s16 = sadd.s32 4294967295, %s2245_s15   ;;  %p2182_p0 = scmp.ge.s32.totalorder %s2245_s15, 1  ;;  %s2245_s15 = sphi %s2273_s15, %s14_s15  }
   0x2   : > { %p162_p1 = scmp.lt.s32.totalorder %s2245_s15, 129 }
   0x4   : > { %p163_p2 = pnand %p2182_p0, %p162_p1 }
   0x5   : > { %p188_p3 = scmp.lt.s32.totalorder (!%p163_p2), %s2178_s16, 127  ;;  %p2187_p4 = scmp.ne.s32.totalorder (!%p163_p2), %s2178_s16, 0 }
   0x6   : > { %166 = sbr.rel (%p163_p2) target bundleno = 612 (0x264), region = 36 }
   0xb   : > { %s189_s17 = scalar_select %p188_p3, %s2178_s16, 127 }
   0xc   : > { %201 = sbr.rel (%p2187_p4) target bundleno = 20 (0x14), region = 40 }
   0xd   : > { %s2196_s18 = sshll.u32 %s189_s17, 3  ;;  %s2197_s19 = sshll.u32 %s189_s17, 2 }
   0xe   : > { %s2284_s22 = scalar_lea.vmem %s4809_s0, %s2196_s18  ;;  %s2289_s25 = scalar_lea.vmem %s4813_s4, %s2197_s19 }
  0x11   : > { %v2247_v0 = vmov 0.0  }
  0x12   : > { %202 = vst [vmem:[#allocation2] sm:$0xf] %v2247_v0 }
  0x13   : > { %203 = vst [vmem:[#allocation3] sm:$0xf] %v2247_v0 }
  0x14 PF: > { %v838_v1 = vld [vmem:[%s4811_s2 + $0x3c0] sm:$0xff]  ;;  %v839_v2 = vld [vmem:[%s4811_s2 + $0x3c8] sm:$0xff]  ;;  %v840_v63 = vld [vmem:[%s4811_s2 + $0x3d0] sm:$0xff] }
  0x15   : > { %v830_v3 = vld [vmem:[%s4811_s2 + $0x380] sm:$0xff]  ;;  %980 = vmatpush.msra.mxu0 %v838_v1  ;;  %1020 = vmatpush.msra.mxu2 %v839_v2  ;;  %v831_v5 = vld [vmem:[%s4811_s2 + $0x388] sm:$0xff]  ;;  %v841_v0 = vld [vmem:[%s4811_s2 + $0x3d8] sm:$0xff] }
  0x16   : > { %v966_v4 = vld [vmem:[%s4811_s2 + $0x7c0] sm:$0xff]  ;;  %v967_v6 = vld [vmem:[%s4811_s2 + $0x7c8] sm:$0xff] }
  0x17   : > { %1000 = vmatpush.msra.mxu1 %v966_v4  ;;  %1040 = vmatpush.msra.mxu3 %v967_v6  ;;  %v822_v7 = vld [vmem:[%s4811_s2 + $0x340] sm:$0xff]  ;;  %v823_v9 = vld [vmem:[%s4811_s2 + $0x348] sm:$0xff]  ;;  %v968_v4 = vld [vmem:[%s4811_s2 + $0x7d0] sm:$0xff] }
  0x18   : > { %v958_v8 = vld [vmem:[%s4811_s2 + $0x780] sm:$0xff]  ;;  %981 = vmatpush.msra.mxu0 %v830_v3  ;;  %1021 = vmatpush.msra.mxu2 %v831_v5  ;;  %v959_v10 = vld [vmem:[%s4811_s2 + $0x788] sm:$0xff]  ;;  %v832_v3 = vld [vmem:[%s4811_s2 + $0x390] sm:$0xff] }
  0x19   : > { %v950_v11 = vld [vmem:[%s4811_s2 + $0x740] sm:$0xff]  ;;  %1001 = vmatpush.msra.mxu1 %v958_v8  ;;  %1041 = vmatpush.msra.mxu3 %v959_v10  ;;  %v815_v13 = vld [vmem:[%s4811_s2 + $0x308] sm:$0xff]  ;;  %v833_v5 = vld [vmem:[%s4811_s2 + $0x398] sm:$0xff] }
  0x1a   : > { %v814_v12 = vld [vmem:[%s4811_s2 + $0x300] sm:$0xff]  ;;  %v951_v14 = vld [vmem:[%s4811_s2 + $0x748] sm:$0xff]  ;;  %982 = vmatpush.msra.mxu0 %v822_v7  ;;  %1022 = vmatpush.msra.mxu2 %v823_v9  ;;  %v969_v6 = vld [vmem:[%s4811_s2 + $0x7d8] sm:$0xff] }
  0x1b   : > { %v942_v15 = vld [vmem:[%s4811_s2 + $0x700] sm:$0xff]  ;;  %v943_v16 = vld [vmem:[%s4811_s2 + $0x708] sm:$0xff]  ;;  %1002 = vmatpush.msra.mxu1 %v950_v11  ;;  %1042 = vmatpush.msra.mxu3 %v951_v14  ;;  %v824_v7 = vld [vmem:[%s4811_s2 + $0x350] sm:$0xff] }
  0x1c   : > { %v806_v17 = vld [vmem:[%s4811_s2 + $0x2c0] sm:$0xff]  ;;  %v807_v18 = vld [vmem:[%s4811_s2 + $0x2c8] sm:$0xff]  ;;  %983 = vmatpush.msra.mxu0 %v814_v12  ;;  %1023 = vmatpush.msra.mxu2 %v815_v13  ;;  %v960_v8 = vld [vmem:[%s4811_s2 + $0x790] sm:$0xff] }
  0x1d   : > { %v934_v19 = vld [vmem:[%s4811_s2 + $0x6c0] sm:$0xff]  ;;  %v935_v20 = vld [vmem:[%s4811_s2 + $0x6c8] sm:$0xff]  ;;  %1003 = vmatpush.msra.mxu1 %v942_v15  ;;  %1043 = vmatpush.msra.mxu3 %v943_v16  ;;  %v825_v9 = vld [vmem:[%s4811_s2 + $0x358] sm:$0xff] }
  0x1e   : > { %v798_v21 = vld [vmem:[%s4811_s2 + $0x280] sm:$0xff]  ;;  %v799_v22 = vld [vmem:[%s4811_s2 + $0x288] sm:$0xff]  ;;  %984 = vmatpush.msra.mxu0 %v806_v17  ;;  %1024 = vmatpush.msra.mxu2 %v807_v18  ;;  %v961_v10 = vld [vmem:[%s4811_s2 + $0x798] sm:$0xff] }
  0x1f   : > { %v926_v23 = vld [vmem:[%s4811_s2 + $0x680] sm:$0xff]  ;;  %v927_v24 = vld [vmem:[%s4811_s2 + $0x688] sm:$0xff]  ;;  %1004 = vmatpush.msra.mxu1 %v934_v19  ;;  %1044 = vmatpush.msra.mxu3 %v935_v20  ;;  %v816_v11 = vld [vmem:[%s4811_s2 + $0x310] sm:$0xff] }
  0x20   : > { %v790_v25 = vld [vmem:[%s4811_s2 + $0x240] sm:$0xff]  ;;  %v791_v26 = vld [vmem:[%s4811_s2 + $0x248] sm:$0xff]  ;;  %985 = vmatpush.msra.mxu0 %v798_v21  ;;  %1025 = vmatpush.msra.mxu2 %v799_v22  ;;  %v952_v12 = vld [vmem:[%s4811_s2 + $0x750] sm:$0xff] }
  0x21   : > { %v918_v27 = vld [vmem:[%s4811_s2 + $0x640] sm:$0xff]  ;;  %v919_v28 = vld [vmem:[%s4811_s2 + $0x648] sm:$0xff]  ;;  %1005 = vmatpush.msra.mxu1 %v926_v23  ;;  %1045 = vmatpush.msra.mxu3 %v927_v24  ;;  %v817_v13 = vld [vmem:[%s4811_s2 + $0x318] sm:$0xff] }
  0x22   : > { %v782_v29 = vld [vmem:[%s4811_s2 + $0x200] sm:$0xff]  ;;  %v783_v30 = vld [vmem:[%s4811_s2 + $0x208] sm:$0xff]  ;;  %986 = vmatpush.msra.mxu0 %v790_v25  ;;  %1026 = vmatpush.msra.mxu2 %v791_v26  ;;  %v953_v14 = vld [vmem:[%s4811_s2 + $0x758] sm:$0xff] }
  0x23   : > { %v910_v31 = vld [vmem:[%s4811_s2 + $0x600] sm:$0xff]  ;;  %v911_v32 = vld [vmem:[%s4811_s2 + $0x608] sm:$0xff]  ;;  %1006 = vmatpush.msra.mxu1 %v918_v27  ;;  %1046 = vmatpush.msra.mxu3 %v919_v28  ;;  %v808_v15 = vld [vmem:[%s4811_s2 + $0x2d0] sm:$0xff] }
  0x24   : > { %v774_v33 = vld [vmem:[%s4811_s2 + $0x1c0] sm:$0xff]  ;;  %v775_v34 = vld [vmem:[%s4811_s2 + $0x1c8] sm:$0xff]  ;;  %987 = vmatpush.msra.mxu0 %v782_v29  ;;  %1027 = vmatpush.msra.mxu2 %v783_v30  ;;  %v944_v16 = vld [vmem:[%s4811_s2 + $0x710] sm:$0xff] }
  0x25   : > { %v902_v35 = vld [vmem:[%s4811_s2 + $0x5c0] sm:$0xff]  ;;  %v903_v36 = vld [vmem:[%s4811_s2 + $0x5c8] sm:$0xff]  ;;  %1007 = vmatpush.msra.mxu1 %v910_v31  ;;  %1047 = vmatpush.msra.mxu3 %v911_v32  ;;  %v809_v17 = vld [vmem:[%s4811_s2 + $0x2d8] sm:$0xff] }
  0x26   : > { %v766_v37 = vld [vmem:[%s4811_s2 + $0x180] sm:$0xff]  ;;  %v767_v38 = vld [vmem:[%s4811_s2 + $0x188] sm:$0xff]  ;;  %988 = vmatpush.msra.mxu0 %v774_v33  ;;  %1028 = vmatpush.msra.mxu2 %v775_v34  ;;  %v945_v18 = vld [vmem:[%s4811_s2 + $0x718] sm:$0xff] }
  0x27   : > { %v894_v39 = vld [vmem:[%s4811_s2 + $0x580] sm:$0xff]  ;;  %v895_v40 = vld [vmem:[%s4811_s2 + $0x588] sm:$0xff]  ;;  %1008 = vmatpush.msra.mxu1 %v902_v35  ;;  %1048 = vmatpush.msra.mxu3 %v903_v36  ;;  %v800_v19 = vld [vmem:[%s4811_s2 + $0x290] sm:$0xff] }
  0x28   : > { %v758_v41 = vld [vmem:[%s4811_s2 + $0x140] sm:$0xff]  ;;  %v759_v42 = vld [vmem:[%s4811_s2 + $0x148] sm:$0xff]  ;;  %989 = vmatpush.msra.mxu0 %v766_v37  ;;  %1029 = vmatpush.msra.mxu2 %v767_v38  ;;  %v936_v20 = vld [vmem:[%s4811_s2 + $0x6d0] sm:$0xff] }
  0x29   : > { %v886_v43 = vld [vmem:[%s4811_s2 + $0x540] sm:$0xff]  ;;  %v887_v44 = vld [vmem:[%s4811_s2 + $0x548] sm:$0xff]  ;;  %1009 = vmatpush.msra.mxu1 %v894_v39  ;;  %1049 = vmatpush.msra.mxu3 %v895_v40  ;;  %v801_v21 = vld [vmem:[%s4811_s2 + $0x298] sm:$0xff] }
  0x2a   : > { %v750_v45 = vld [vmem:[%s4811_s2 + $0x100] sm:$0xff]  ;;  %v751_v46 = vld [vmem:[%s4811_s2 + $0x108] sm:$0xff]  ;;  %990 = vmatpush.msra.mxu0 %v758_v41  ;;  %1030 = vmatpush.msra.mxu2 %v759_v42  ;;  %v937_v22 = vld [vmem:[%s4811_s2 + $0x6d8] sm:$0xff] }
  0x2b   : > { %v878_v47 = vld [vmem:[%s4811_s2 + $0x500] sm:$0xff]  ;;  %v879_v48 = vld [vmem:[%s4811_s2 + $0x508] sm:$0xff]  ;;  %1010 = vmatpush.msra.mxu1 %v886_v43  ;;  %1050 = vmatpush.msra.mxu3 %v887_v44  ;;  %v792_v23 = vld [vmem:[%s4811_s2 + $0x250] sm:$0xff] }
  0x2c   : > { %v742_v49 = vld [vmem:[%s4811_s2 + $0xc0] sm:$0xff]  ;;  %v743_v50 = vld [vmem:[%s4811_s2 + $0xc8] sm:$0xff]  ;;  %991 = vmatpush.msra.mxu0 %v750_v45  ;;  %1031 = vmatpush.msra.mxu2 %v751_v46  ;;  %v928_v24 = vld [vmem:[%s4811_s2 + $0x690] sm:$0xff] }
  0x2d   : > { %v870_v51 = vld [vmem:[%s4811_s2 + $0x4c0] sm:$0xff]  ;;  %v871_v52 = vld [vmem:[%s4811_s2 + $0x4c8] sm:$0xff]  ;;  %1011 = vmatpush.msra.mxu1 %v878_v47  ;;  %1051 = vmatpush.msra.mxu3 %v879_v48  ;;  %v793_v25 = vld [vmem:[%s4811_s2 + $0x258] sm:$0xff] }
  0x2e   : > { %v734_v53 = vld [vmem:[%s4811_s2 + $0x80] sm:$0xff]  ;;  %v735_v54 = vld [vmem:[%s4811_s2 + $0x88] sm:$0xff]  ;;  %992 = vmatpush.msra.mxu0 %v742_v49  ;;  %1032 = vmatpush.msra.mxu2 %v743_v50  ;;  %v929_v26 = vld [vmem:[%s4811_s2 + $0x698] sm:$0xff] }
  0x2f   : > { %v862_v55 = vld [vmem:[%s4811_s2 + $0x480] sm:$0xff]  ;;  %v863_v56 = vld [vmem:[%s4811_s2 + $0x488] sm:$0xff]  ;;  %1012 = vmatpush.msra.mxu1 %v870_v51  ;;  %1052 = vmatpush.msra.mxu3 %v871_v52  ;;  %v784_v28 = vld [vmem:[%s4811_s2 + $0x210] sm:$0xff] }
  0x30   : > { %v726_v57 = vld [vmem:[%s4811_s2 + $0x40] sm:$0xff]  ;;  %v727_v58 = vld [vmem:[%s4811_s2 + $0x48] sm:$0xff]  ;;  %993 = vmatpush.msra.mxu0 %v734_v53  ;;  %1033 = vmatpush.msra.mxu2 %v735_v54  ;;  %v920_v29 = vld [vmem:[%s4811_s2 + $0x650] sm:$0xff] }
  0x31   : > { %v854_v59 = vld [vmem:[%s4811_s2 + $0x440] sm:$0xff]  ;;  %v855_v60 = vld [vmem:[%s4811_s2 + $0x448] sm:$0xff]  ;;  %1013 = vmatpush.msra.mxu1 %v862_v55  ;;  %1053 = vmatpush.msra.mxu3 %v863_v56  ;;  %v785_v30 = vld [vmem:[%s4811_s2 + $0x218] sm:$0xff] }
  0x32   : > { %v718_v61 = vld [vmem:[%s4811_s2] sm:$0xff]  ;;  %v719_v62 = vld [vmem:[%s4811_s2 + $0x8] sm:$0xff]  ;;  %994 = vmatpush.msra.mxu0 %v726_v57  ;;  %1034 = vmatpush.msra.mxu2 %v727_v58  ;;  %v921_v31 = vld [vmem:[%s4811_s2 + $0x658] sm:$0xff] }
  0x33   : > { %1014 = vmatpush.msra.mxu1 %v854_v59  ;;  %1054 = vmatpush.msra.mxu3 %v855_v60  ;;  %v846_v1 = vld [vmem:[%s4811_s2 + $0x400] sm:$0xff]  ;;  %v847_v2 = vld [vmem:[%s4811_s2 + $0x408] sm:$0xff]  ;;  %v776_v32 = vld [vmem:[%s4811_s2 + $0x1d0] sm:$0xff] }
  0x34   : > { %995 = vmatpush.msra.mxu0 %v718_v61  ;;  %1035 = vmatpush.msra.mxu2 %v719_v62  ;;  %v717_v27 = vld [vmem:[#allocation2] sm:$0xf]  ;;  %v912_v33 = vld [vmem:[%s4811_s2 + $0x610] sm:$0xff]  ;;  %v777_v34 = vld [vmem:[%s4811_s2 + $0x1d8] sm:$0xff] }
  0x35   : > { %1015 = vmatpush.msra.mxu1 %v846_v1  ;;  %1055 = vmatpush.msra.mxu3 %v847_v2  ;;  %975 = vst [vmem:[#allocation1] ss:$4 sm:$0xff] %v717_v27  ;;  %v913_v35 = vld [vmem:[%s4811_s2 + $0x618] sm:$0xff]  ;;  %v768_v36 = vld [vmem:[%s4811_s2 + $0x190] sm:$0xff]  ;;  %v204_v41 = vld [vmem:[%s2284_s22] sm:$0xff] }
  0x36   : > { %1060 = vmatpush.msrb.mxu0 %v840_v63  ;;  %1100 = vmatpush.msrb.mxu2 %v841_v0  ;;  %v904_v37 = vld [vmem:[%s4811_s2 + $0x5d0] sm:$0xff]  ;;  %v769_v38 = vld [vmem:[%s4811_s2 + $0x198] sm:$0xff]  ;;  %v794_v27 = vld [vmem:[%s4811_s2 + $0x260] sm:$0xff] }
  0x37   : > { %1080 = vmatpush.msrb.mxu1 %v968_v4  ;;  %1120 = vmatpush.msrb.mxu3 %v969_v6  ;;  %v905_v39 = vld [vmem:[%s4811_s2 + $0x5d8] sm:$0xff]  ;;  %v760_v40 = vld [vmem:[%s4811_s2 + $0x150] sm:$0xff]  ;;  %v843_v4 = vld [vmem:[%s4811_s2 + $0x3e8] sm:$0xff] }
  0x38   : > { %1061 = vmatpush.msrb.mxu0 %v832_v3  ;;  %1101 = vmatpush.msrb.mxu2 %v833_v5  ;;  %v896_v42 = vld [vmem:[%s4811_s2 + $0x590] sm:$0xff]  ;;  %v761_v43 = vld [vmem:[%s4811_s2 + $0x158] sm:$0xff]  ;;  %v842_v3 = vld [vmem:[%s4811_s2 + $0x3e0] sm:$0xff] }
  0x39   : > { %1081 = vmatpush.msrb.mxu1 %v960_v8  ;;  %1121 = vmatpush.msrb.mxu3 %v961_v10  ;;  %v897_v44 = vld [vmem:[%s4811_s2 + $0x598] sm:$0xff]  ;;  %v752_v47 = vld [vmem:[%s4811_s2 + $0x110] sm:$0xff]  ;;  %v970_v8 = vld [vmem:[%s4811_s2 + $0x7e0] sm:$0xff] }
  0x3a   : > { %1062 = vmatpush.msrb.mxu0 %v824_v7  ;;  %1102 = vmatpush.msrb.mxu2 %v825_v9  ;;  %v888_v48 = vld [vmem:[%s4811_s2 + $0x550] sm:$0xff]  ;;  %v753_v49 = vld [vmem:[%s4811_s2 + $0x118] sm:$0xff]  ;;  %v834_v7 = vld [vmem:[%s4811_s2 + $0x3a0] sm:$0xff] }
  0x3b   : > { %1082 = vmatpush.msrb.mxu1 %v952_v12  ;;  %1122 = vmatpush.msrb.mxu3 %v953_v14  ;;  %v889_v50 = vld [vmem:[%s4811_s2 + $0x558] sm:$0xff]  ;;  %v744_v51 = vld [vmem:[%s4811_s2 + $0xd0] sm:$0xff]  ;;  %v835_v9 = vld [vmem:[%s4811_s2 + $0x3a8] sm:$0xff] }
  0x3c   : > { %1063 = vmatpush.msrb.mxu0 %v816_v11  ;;  %1103 = vmatpush.msrb.mxu2 %v817_v13  ;;  %v2610_v45 = vld.sshfl [vmem:[#allocation1] sm:$0xff pattern:$0x73625140]  ;;  %v2612_v46 = vld.sshfl [vmem:[#allocation1 + $0x8] sm:$0xff pattern:$0x73625140] }
  0x3d   : > { %1083 = vmatpush.msrb.mxu1 %v944_v16  ;;  %1123 = vmatpush.msrb.mxu3 %v945_v18  ;;  %1301 = vst [vmem:[#allocation1] ss:$4 sm:$0xff] %v204_v41  ;;  %v880_v52 = vld [vmem:[%s4811_s2 + $0x510] sm:$0xff]  ;;  %v745_v53 = vld [vmem:[%s4811_s2 + $0xd8] sm:$0xff]  ;;  %v971_v10 = vld [vmem:[%s4811_s2 + $0x7e8] sm:$0xff] }
  0x3e   : > { %1064 = vmatpush.msrb.mxu0 %v808_v15  ;;  %1104 = vmatpush.msrb.mxu2 %v809_v17  ;;  %v881_v54 = vld [vmem:[%s4811_s2 + $0x518] sm:$0xff]  ;;  %v736_v55 = vld [vmem:[%s4811_s2 + $0x90] sm:$0xff]  ;;  %v826_v11 = vld [vmem:[%s4811_s2 + $0x360] sm:$0xff] }
  0x3f   : > { %1084 = vmatpush.msrb.mxu1 %v936_v20  ;;  %1124 = vmatpush.msrb.mxu3 %v937_v22  ;;  %v872_v56 = vld [vmem:[%s4811_s2 + $0x4d0] sm:$0xff]  ;;  %v737_v57 = vld [vmem:[%s4811_s2 + $0x98] sm:$0xff]  ;;  %v962_v12 = vld [vmem:[%s4811_s2 + $0x7a0] sm:$0xff] }
  0x40   : > { %1065 = vmatpush.msrb.mxu0 %v800_v19  ;;  %1105 = vmatpush.msrb.mxu2 %v801_v21  ;;  %v873_v58 = vld [vmem:[%s4811_s2 + $0x4d8] sm:$0xff]  ;;  %v728_v59 = vld [vmem:[%s4811_s2 + $0x50] sm:$0xff]  ;;  %v827_v13 = vld [vmem:[%s4811_s2 + $0x368] sm:$0xff] }
  0x41   : > { %1085 = vmatpush.msrb.mxu1 %v928_v24  ;;  %1125 = vmatpush.msrb.mxu3 %v929_v26  ;;  %v864_v60 = vld [vmem:[%s4811_s2 + $0x490] sm:$0xff]  ;;  %v729_v61 = vld [vmem:[%s4811_s2 + $0x58] sm:$0xff]  ;;  %v963_v14 = vld [vmem:[%s4811_s2 + $0x7a8] sm:$0xff] }
  0x42   : > { %1066 = vmatpush.msrb.mxu0 %v792_v23  ;;  %1106 = vmatpush.msrb.mxu2 %v793_v25  ;;  %v865_v62 = vld [vmem:[%s4811_s2 + $0x498] sm:$0xff]  ;;  %v720_v63 = vld [vmem:[%s4811_s2 + $0x10] sm:$0xff]  ;;  %v818_v15 = vld [vmem:[%s4811_s2 + $0x320] sm:$0xff] }
  0x43   : > { %1086 = vmatpush.msrb.mxu1 %v920_v29  ;;  %1126 = vmatpush.msrb.mxu3 %v921_v31  ;;  %v856_v0 = vld [vmem:[%s4811_s2 + $0x450] sm:$0xff]  ;;  %v721_v1 = vld [vmem:[%s4811_s2 + $0x18] sm:$0xff]  ;;  %v954_v16 = vld [vmem:[%s4811_s2 + $0x760] sm:$0xff] }
  0x44   : > { %1067 = vmatpush.msrb.mxu0 %v784_v28  ;;  %1107 = vmatpush.msrb.mxu2 %v785_v30  ;;  %v857_v2 = vld [vmem:[%s4811_s2 + $0x458] sm:$0xff]  ;;  %v848_v5 = vld [vmem:[%s4811_s2 + $0x410] sm:$0xff]  ;;  %v819_v17 = vld [vmem:[%s4811_s2 + $0x328] sm:$0xff] }
  0x45   : > { %1087 = vmatpush.msrb.mxu1 %v912_v33  ;;  %1127 = vmatpush.msrb.mxu3 %v913_v35  ;;  %v849_v6 = vld [vmem:[%s4811_s2 + $0x418] sm:$0xff]  ;;  %v955_v18 = vld [vmem:[%s4811_s2 + $0x768] sm:$0xff]  ;;  %v810_v19 = vld [vmem:[%s4811_s2 + $0x2e0] sm:$0xff] }
  0x46   : > { %1068 = vmatpush.msrb.mxu0 %v776_v32  ;;  %1108 = vmatpush.msrb.mxu2 %v777_v34  ;;  %v946_v20 = vld [vmem:[%s4811_s2 + $0x720] sm:$0xff]  ;;  %v811_v21 = vld [vmem:[%s4811_s2 + $0x2e8] sm:$0xff] }
  0x47   : > { %1088 = vmatpush.msrb.mxu1 %v904_v37  ;;  %1128 = vmatpush.msrb.mxu3 %v905_v39  ;;  %v947_v22 = vld [vmem:[%s4811_s2 + $0x728] sm:$0xff]  ;;  %v802_v23 = vld [vmem:[%s4811_s2 + $0x2a0] sm:$0xff] }
  0x48   : > { %1069 = vmatpush.msrb.mxu0 %v768_v36  ;;  %1109 = vmatpush.msrb.mxu2 %v769_v38  ;;  %v938_v24 = vld [vmem:[%s4811_s2 + $0x6e0] sm:$0xff]  ;;  %v803_v25 = vld [vmem:[%s4811_s2 + $0x2a8] sm:$0xff] }
  0x49   : > { %1089 = vmatpush.msrb.mxu1 %v896_v42  ;;  %1129 = vmatpush.msrb.mxu3 %v897_v44  ;;  %v939_v26 = vld [vmem:[%s4811_s2 + $0x6e8] sm:$0xff]  ;;  %v930_v28 = vld [vmem:[%s4811_s2 + $0x6a0] sm:$0xff] }
  0x4a   : > { %1070 = vmatpush.msrb.mxu0 %v760_v40  ;;  %1110 = vmatpush.msrb.mxu2 %v761_v43  ;;  %v795_v29 = vld [vmem:[%s4811_s2 + $0x268] sm:$0xff]  ;;  %v786_v31 = vld [vmem:[%s4811_s2 + $0x220] sm:$0xff] }
  0x4b   : > { %1090 = vmatpush.msrb.mxu1 %v888_v48  ;;  %1130 = vmatpush.msrb.mxu3 %v889_v50  ;;  %v931_v30 = vld [vmem:[%s4811_s2 + $0x6a8] sm:$0xff]  ;;  %v922_v32 = vld [vmem:[%s4811_s2 + $0x660] sm:$0xff] }
  0x4c   : > { %1071 = vmatpush.msrb.mxu0 %v752_v47  ;;  %1111 = vmatpush.msrb.mxu2 %v753_v49  ;;  %v787_v33 = vld [vmem:[%s4811_s2 + $0x228] sm:$0xff]  ;;  %v778_v35 = vld [vmem:[%s4811_s2 + $0x1e0] sm:$0xff] }
  0x4d   : > { %1091 = vmatpush.msrb.mxu1 %v880_v52  ;;  %1131 = vmatpush.msrb.mxu3 %v881_v54  ;;  %v923_v34 = vld [vmem:[%s4811_s2 + $0x668] sm:$0xff]  ;;  %v914_v36 = vld [vmem:[%s4811_s2 + $0x620] sm:$0xff] }
  0x4e   : > { %1072 = vmatpush.msrb.mxu0 %v744_v51  ;;  %1112 = vmatpush.msrb.mxu2 %v745_v53  ;;  %v779_v37 = vld [vmem:[%s4811_s2 + $0x1e8] sm:$0xff]  ;;  %v770_v39 = vld [vmem:[%s4811_s2 + $0x1a0] sm:$0xff] }
  0x4f   : > { %1092 = vmatpush.msrb.mxu1 %v872_v56  ;;  %1132 = vmatpush.msrb.mxu3 %v873_v58  ;;  %v915_v38 = vld [vmem:[%s4811_s2 + $0x628] sm:$0xff]  ;;  %v906_v40 = vld [vmem:[%s4811_s2 + $0x5e0] sm:$0xff] }
  0x50   : > { %1073 = vmatpush.msrb.mxu0 %v736_v55  ;;  %1113 = vmatpush.msrb.mxu2 %v737_v57  ;;  %v771_v41 = vld [vmem:[%s4811_s2 + $0x1a8] sm:$0xff]  ;;  %v762_v43 = vld [vmem:[%s4811_s2 + $0x160] sm:$0xff] }
  0x51   : > { %1093 = vmatpush.msrb.mxu1 %v864_v60  ;;  %1133 = vmatpush.msrb.mxu3 %v865_v62  ;;  %v907_v42 = vld [vmem:[%s4811_s2 + $0x5e8] sm:$0xff]  ;;  %v898_v44 = vld [vmem:[%s4811_s2 + $0x5a0] sm:$0xff] }
  0x52   : > { %1074 = vmatpush.msrb.mxu0 %v728_v59  ;;  %1114 = vmatpush.msrb.mxu2 %v729_v61  ;;  %v763_v47 = vld [vmem:[%s4811_s2 + $0x168] sm:$0xff]  ;;  %v754_v49 = vld [vmem:[%s4811_s2 + $0x120] sm:$0xff] }
  0x53   : > { %1094 = vmatpush.msrb.mxu1 %v856_v0  ;;  %1134 = vmatpush.msrb.mxu3 %v857_v2  ;;  %v899_v48 = vld [vmem:[%s4811_s2 + $0x5a8] sm:$0xff]  ;;  %v890_v50 = vld [vmem:[%s4811_s2 + $0x560] sm:$0xff] }
  0x54   : > { %1075 = vmatpush.msrb.mxu0 %v720_v63  ;;  %1115 = vmatpush.msrb.mxu2 %v721_v1  ;;  %v755_v51 = vld [vmem:[%s4811_s2 + $0x128] sm:$0xff]  ;;  %v746_v53 = vld [vmem:[%s4811_s2 + $0xe0] sm:$0xff] }
  0x55   : > { %996 = vmatmul.f32.vlgmr.msra.gmra.mxu0 %v2610_v45  ;;  %1036 = vmatmul.f32.vlgmr.msra.gmra.mxu2 %v2610_v45  ;;  %v891_v52 = vld [vmem:[%s4811_s2 + $0x568] sm:$0xff]  ;;  %v882_v54 = vld [vmem:[%s4811_s2 + $0x520] sm:$0xff] }
  0x56   : > { %1056 = vmatmul.f32.vlgmr.msra.gmra.mxu3 %v2612_v46  ;;  %1140 = vmatpush.msra.mxu0 %v842_v3  ;;  %v747_v55 = vld [vmem:[%s4811_s2 + $0xe8] sm:$0xff]  ;;  %v738_v57 = vld [vmem:[%s4811_s2 + $0xa0] sm:$0xff] }
  0x57   : > { %1180 = vmatpush.msra.mxu2 %v843_v4  ;;  %1095 = vmatpush.msrb.mxu1 %v848_v5  ;;  %v883_v56 = vld [vmem:[%s4811_s2 + $0x528] sm:$0xff]  ;;  %v874_v58 = vld [vmem:[%s4811_s2 + $0x4e0] sm:$0xff]  ;;  %v844_v5 = vld [vmem:[%s4811_s2 + $0x3f0] sm:$0xff] }
  0x58   : > { %1135 = vmatpush.msrb.mxu3 %v849_v6  ;;  %1016 = vmatmul.f32.vlgmr.msra.gmra.mxu1 %v2612_v46  ;;  %v739_v59 = vld [vmem:[%s4811_s2 + $0xa8] sm:$0xff]  ;;  %v730_v61 = vld [vmem:[%s4811_s2 + $0x60] sm:$0xff]  ;;  %v845_v6 = vld [vmem:[%s4811_s2 + $0x3f8] sm:$0xff] }
  0x59   : > { %1141 = vmatpush.msra.mxu0 %v834_v7  ;;  %1160 = vmatpush.msra.mxu1 %v970_v8  ;;  %v875_v60 = vld [vmem:[%s4811_s2 + $0x4e8] sm:$0xff]  ;;  %v866_v62 = vld [vmem:[%s4811_s2 + $0x4a0] sm:$0xff] }
  0x5a   : > { %1181 = vmatpush.msra.mxu2 %v835_v9  ;;  %1200 = vmatpush.msra.mxu3 %v971_v10  ;;  %v731_v63 = vld [vmem:[%s4811_s2 + $0x68] sm:$0xff]  ;;  %v722_v1 = vld [vmem:[%s4811_s2 + $0x20] sm:$0xff]  ;;  %v836_v9 = vld [vmem:[%s4811_s2 + $0x3b0] sm:$0xff] }
  0x5b   : > { %1142 = vmatpush.msra.mxu0 %v826_v11  ;;  %1161 = vmatpush.msra.mxu1 %v962_v12  ;;  %v867_v0 = vld [vmem:[%s4811_s2 + $0x4a8] sm:$0xff]  ;;  %v858_v2 = vld [vmem:[%s4811_s2 + $0x460] sm:$0xff]  ;;  %v972_v10 = vld [vmem:[%s4811_s2 + $0x7f0] sm:$0xff] }
  0x5c   : > { %1182 = vmatpush.msra.mxu2 %v827_v13  ;;  %1201 = vmatpush.msra.mxu3 %v963_v14  ;;  %v723_v3 = vld [vmem:[%s4811_s2 + $0x28] sm:$0xff]  ;;  %v850_v7 = vld [vmem:[%s4811_s2 + $0x420] sm:$0xff]  ;;  %v837_v11 = vld [vmem:[%s4811_s2 + $0x3b8] sm:$0xff] }
  0x5d   : > { %1143 = vmatpush.msra.mxu0 %v818_v15  ;;  %1162 = vmatpush.msra.mxu1 %v954_v16  ;;  %v859_v4 = vld [vmem:[%s4811_s2 + $0x468] sm:$0xff]  ;;  %v973_v12 = vld [vmem:[%s4811_s2 + $0x7f8] sm:$0xff]  ;;  %v828_v13 = vld [vmem:[%s4811_s2 + $0x370] sm:$0xff] }
  0x5e   : > { %1183 = vmatpush.msra.mxu2 %v819_v17  ;;  %1202 = vmatpush.msra.mxu3 %v955_v18  ;;  %v851_v8 = vld [vmem:[%s4811_s2 + $0x428] sm:$0xff]  ;;  %v964_v14 = vld [vmem:[%s4811_s2 + $0x7b0] sm:$0xff]  ;;  %v829_v15 = vld [vmem:[%s4811_s2 + $0x378] sm:$0xff] }
  0x5f   : > { %1144 = vmatpush.msra.mxu0 %v810_v19  ;;  %1163 = vmatpush.msra.mxu1 %v946_v20  ;;  %v965_v16 = vld [vmem:[%s4811_s2 + $0x7b8] sm:$0xff]  ;;  %v820_v17 = vld [vmem:[%s4811_s2 + $0x330] sm:$0xff] }
  0x60   : > { %1184 = vmatpush.msra.mxu2 %v811_v21  ;;  %1203 = vmatpush.msra.mxu3 %v947_v22  ;;  %v956_v18 = vld [vmem:[%s4811_s2 + $0x770] sm:$0xff]  ;;  %v821_v19 = vld [vmem:[%s4811_s2 + $0x338] sm:$0xff] }
  0x61   : > { %1145 = vmatpush.msra.mxu0 %v802_v23  ;;  %1164 = vmatpush.msra.mxu1 %v938_v24  ;;  %v957_v20 = vld [vmem:[%s4811_s2 + $0x778] sm:$0xff]  ;;  %v812_v21 = vld [vmem:[%s4811_s2 + $0x2f0] sm:$0xff] }
  0x62   : > { %1185 = vmatpush.msra.mxu2 %v803_v25  ;;  %1204 = vmatpush.msra.mxu3 %v939_v26  ;;  %v948_v22 = vld [vmem:[%s4811_s2 + $0x730] sm:$0xff]  ;;  %v813_v23 = vld [vmem:[%s4811_s2 + $0x2f8] sm:$0xff] }
  0x63   : > { %1146 = vmatpush.msra.mxu0 %v794_v27  ;;  %1165 = vmatpush.msra.mxu1 %v930_v28  ;;  %v949_v24 = vld [vmem:[%s4811_s2 + $0x738] sm:$0xff]  ;;  %v804_v25 = vld [vmem:[%s4811_s2 + $0x2b0] sm:$0xff] }
  0x64   : > { %1186 = vmatpush.msra.mxu2 %v795_v29  ;;  %1205 = vmatpush.msra.mxu3 %v931_v30  ;;  %v940_v26 = vld [vmem:[%s4811_s2 + $0x6f0] sm:$0xff]  ;;  %v805_v27 = vld [vmem:[%s4811_s2 + $0x2b8] sm:$0xff] }
  0x65   : > { %1147 = vmatpush.msra.mxu0 %v786_v31  ;;  %1166 = vmatpush.msra.mxu1 %v922_v32  ;;  %v941_v28 = vld [vmem:[%s4811_s2 + $0x6f8] sm:$0xff]  ;;  %v796_v29 = vld [vmem:[%s4811_s2 + $0x270] sm:$0xff] }
  0x66   : > { %1187 = vmatpush.msra.mxu2 %v787_v33  ;;  %1206 = vmatpush.msra.mxu3 %v923_v34  ;;  %v932_v30 = vld [vmem:[%s4811_s2 + $0x6b0] sm:$0xff]  ;;  %v797_v31 = vld [vmem:[%s4811_s2 + $0x278] sm:$0xff] }
  0x67   : > { %1148 = vmatpush.msra.mxu0 %v778_v35  ;;  %1167 = vmatpush.msra.mxu1 %v914_v36  ;;  %v933_v32 = vld [vmem:[%s4811_s2 + $0x6b8] sm:$0xff]  ;;  %v788_v33 = vld [vmem:[%s4811_s2 + $0x230] sm:$0xff] }
  0x68   : > { %1188 = vmatpush.msra.mxu2 %v779_v37  ;;  %1207 = vmatpush.msra.mxu3 %v915_v38  ;;  %v924_v34 = vld [vmem:[%s4811_s2 + $0x670] sm:$0xff]  ;;  %v789_v35 = vld [vmem:[%s4811_s2 + $0x238] sm:$0xff] }
  0x69   : > { %1149 = vmatpush.msra.mxu0 %v770_v39  ;;  %1168 = vmatpush.msra.mxu1 %v906_v40  ;;  %v925_v36 = vld [vmem:[%s4811_s2 + $0x678] sm:$0xff]  ;;  %v780_v37 = vld [vmem:[%s4811_s2 + $0x1f0] sm:$0xff] }
  0x6a   : > { %1189 = vmatpush.msra.mxu2 %v771_v41  ;;  %1208 = vmatpush.msra.mxu3 %v907_v42  ;;  %v916_v38 = vld [vmem:[%s4811_s2 + $0x630] sm:$0xff]  ;;  %v781_v39 = vld [vmem:[%s4811_s2 + $0x1f8] sm:$0xff] }
  0x6b   : > { %1150 = vmatpush.msra.mxu0 %v762_v43  ;;  %1169 = vmatpush.msra.mxu1 %v898_v44  ;;  %v917_v40 = vld [vmem:[%s4811_s2 + $0x638] sm:$0xff]  ;;  %v772_v41 = vld [vmem:[%s4811_s2 + $0x1b0] sm:$0xff] }
  0x6c   : > { %1190 = vmatpush.msra.mxu2 %v763_v47  ;;  %1209 = vmatpush.msra.mxu3 %v899_v48  ;;  %v908_v42 = vld [vmem:[%s4811_s2 + $0x5f0] sm:$0xff]  ;;  %v773_v43 = vld [vmem:[%s4811_s2 + $0x1b8] sm:$0xff] }
  0x6d   : > { %1151 = vmatpush.msra.mxu0 %v754_v49  ;;  %1170 = vmatpush.msra.mxu1 %v890_v50  ;;  %v909_v44 = vld [vmem:[%s4811_s2 + $0x5f8] sm:$0xff]  ;;  %v764_v47 = vld [vmem:[%s4811_s2 + $0x170] sm:$0xff] }
  0x6e   : > { %1191 = vmatpush.msra.mxu2 %v755_v51  ;;  %1210 = vmatpush.msra.mxu3 %v891_v52  ;;  %v900_v48 = vld [vmem:[%s4811_s2 + $0x5b0] sm:$0xff]  ;;  %v765_v49 = vld [vmem:[%s4811_s2 + $0x178] sm:$0xff] }
  0x6f   : > { %1152 = vmatpush.msra.mxu0 %v746_v53  ;;  %1171 = vmatpush.msra.mxu1 %v882_v54  ;;  %v901_v50 = vld [vmem:[%s4811_s2 + $0x5b8] sm:$0xff]  ;;  %v756_v51 = vld [vmem:[%s4811_s2 + $0x130] sm:$0xff] }
  0x70   : > { %1192 = vmatpush.msra.mxu2 %v747_v55  ;;  %1211 = vmatpush.msra.mxu3 %v883_v56  ;;  %v892_v52 = vld [vmem:[%s4811_s2 + $0x570] sm:$0xff]  ;;  %v757_v53 = vld [vmem:[%s4811_s2 + $0x138] sm:$0xff] }
  0x71   : > { %1153 = vmatpush.msra.mxu0 %v738_v57  ;;  %1172 = vmatpush.msra.mxu1 %v874_v58  ;;  %v893_v54 = vld [vmem:[%s4811_s2 + $0x578] sm:$0xff]  ;;  %v748_v55 = vld [vmem:[%s4811_s2 + $0xf0] sm:$0xff] }
  0x72   : > { %1193 = vmatpush.msra.mxu2 %v739_v59  ;;  %1212 = vmatpush.msra.mxu3 %v875_v60  ;;  %v884_v56 = vld [vmem:[%s4811_s2 + $0x530] sm:$0xff]  ;;  %v749_v57 = vld [vmem:[%s4811_s2 + $0xf8] sm:$0xff] }
  0x73   : > { %1154 = vmatpush.msra.mxu0 %v730_v61  ;;  %1173 = vmatpush.msra.mxu1 %v866_v62  ;;  %v885_v58 = vld [vmem:[%s4811_s2 + $0x538] sm:$0xff]  ;;  %v740_v59 = vld [vmem:[%s4811_s2 + $0xb0] sm:$0xff] }
  0x74   : > { %1194 = vmatpush.msra.mxu2 %v731_v63  ;;  %1213 = vmatpush.msra.mxu3 %v867_v0  ;;  %v876_v60 = vld [vmem:[%s4811_s2 + $0x4f0] sm:$0xff]  ;;  %v741_v61 = vld [vmem:[%s4811_s2 + $0xb8] sm:$0xff] }
  0x75   : > { %1155 = vmatpush.msra.mxu0 %v722_v1  ;;  %1174 = vmatpush.msra.mxu1 %v858_v2  ;;  %v877_v62 = vld [vmem:[%s4811_s2 + $0x4f8] sm:$0xff]  ;;  %v732_v63 = vld [vmem:[%s4811_s2 + $0x70] sm:$0xff] }
  0x76   : > { %1195 = vmatpush.msra.mxu2 %v723_v3  ;;  %1214 = vmatpush.msra.mxu3 %v859_v4  ;;  %v868_v0 = vld [vmem:[%s4811_s2 + $0x4b0] sm:$0xff]  ;;  %v733_v1 = vld [vmem:[%s4811_s2 + $0x78] sm:$0xff] }
  0x77   : > { %1076 = vmatmul.f32.vlgmr.msrb.gmra.mxu0 %v2610_v45  ;;  %1116 = vmatmul.f32.vlgmr.msrb.gmra.mxu2 %v2610_v45  ;;  %v869_v2 = vld [vmem:[%s4811_s2 + $0x4b8] sm:$0xff]  ;;  %v724_v3 = vld [vmem:[%s4811_s2 + $0x30] sm:$0xff] }
  0x78   : > { %1136 = vmatmul.f32.vlgmr.msrb.gmra.mxu3 %v2612_v46  ;;  %1220 = vmatpush.msrb.mxu0 %v844_v5  ;;  %v860_v4 = vld [vmem:[%s4811_s2 + $0x470] sm:$0xff]  ;;  %v725_v5 = vld [vmem:[%s4811_s2 + $0x38] sm:$0xff] }
  0x79   : > { %1260 = vmatpush.msrb.mxu2 %v845_v6  ;;  %1175 = vmatpush.msra.mxu1 %v850_v7  ;;  %v861_v6 = vld [vmem:[%s4811_s2 + $0x478] sm:$0xff]  ;;  %v325_v7 = vld [vmem:[%s4810_s1 + $0x3c0] sm:$0xff] }
  0x7a   : > { %1215 = vmatpush.msra.mxu3 %v851_v8  ;;  %1096 = vmatmul.f32.vlgmr.msrb.gmra.mxu1 %v2612_v46  ;;  %v581_v8 = vld [vmem:[%s4810_s1 + $0xbc0] sm:$0xff] }
  0x7b   : > { %1221 = vmatpush.msrb.mxu0 %v836_v9  ;;  %1240 = vmatpush.msrb.mxu1 %v972_v10  ;;  %v852_v9 = vld [vmem:[%s4811_s2 + $0x430] sm:$0xff]  ;;  %v853_v10 = vld [vmem:[%s4811_s2 + $0x438] sm:$0xff] }
  0x7c   : > { %1261 = vmatpush.msrb.mxu2 %v837_v11  ;;  %1280 = vmatpush.msrb.mxu3 %v973_v12  ;;  %v317_v11 = vld [vmem:[%s4810_s1 + $0x380] sm:$0xff] }
  0x7d   : > { %1222 = vmatpush.msrb.mxu0 %v828_v13  ;;  %1241 = vmatpush.msrb.mxu1 %v964_v14  ;;  %v453_v12 = vld [vmem:[%s4810_s1 + $0x7c0] sm:$0xff] }
  0x7e   : > { %1262 = vmatpush.msrb.mxu2 %v829_v15  ;;  %1281 = vmatpush.msrb.mxu3 %v965_v16  ;;  %v573_v13 = vld [vmem:[%s4810_s1 + $0xb80] sm:$0xff] }
  0x7f   : > { %1223 = vmatpush.msrb.mxu0 %v820_v17  ;;  %1242 = vmatpush.msrb.mxu1 %v956_v18  ;;  %v709_v14 = vld [vmem:[%s4810_s1 + $0xfc0] sm:$0xff] }
  0x80   : > { %1263 = vmatpush.msrb.mxu2 %v821_v19  ;;  %1282 = vmatpush.msrb.mxu3 %v957_v20  ;;  %v309_v15 = vld [vmem:[%s4810_s1 + $0x340] sm:$0xff] }
  0x81   : > { %1224 = vmatpush.msrb.mxu0 %v812_v21  ;;  %1243 = vmatpush.msrb.mxu1 %v948_v22  ;;  %v445_v16 = vld [vmem:[%s4810_s1 + $0x780] sm:$0xff] }
  0x82   : > { %1264 = vmatpush.msrb.mxu2 %v813_v23  ;;  %1283 = vmatpush.msrb.mxu3 %v949_v24  ;;  %v565_v17 = vld [vmem:[%s4810_s1 + $0xb40] sm:$0xff] }
  0x83   : > { %1225 = vmatpush.msrb.mxu0 %v804_v25  ;;  %1244 = vmatpush.msrb.mxu1 %v940_v26  ;;  %v701_v18 = vld [vmem:[%s4810_s1 + $0xf80] sm:$0xff]  ;;  %v3123_v25 = vld.sshfl [vmem:[#allocation1 + $0x10] sm:$0xff pattern:$0x73625140] }
  0x84   : > { %1265 = vmatpush.msrb.mxu2 %v805_v27  ;;  %1284 = vmatpush.msrb.mxu3 %v941_v28  ;;  %v301_v19 = vld [vmem:[%s4810_s1 + $0x300] sm:$0xff]  ;;  %v3125_v26 = vld.sshfl [vmem:[#allocation1 + $0x8] sm:$0xff pattern:$0x73625140] }
  0x85   : > { %1226 = vmatpush.msrb.mxu0 %v796_v29  ;;  %1245 = vmatpush.msrb.mxu1 %v932_v30  ;;  %v437_v20 = vld [vmem:[%s4810_s1 + $0x740] sm:$0xff]  ;;  %v3130_v28 = vld.sshfl [vmem:[#allocation1 + $0x18] sm:$0xff pattern:$0x73625140]  ;;  %v2092_v29 = vld [vmem:[#allocation3] sm:$0xf] }
  0x86   : > { %1266 = vmatpush.msrb.mxu2 %v797_v31  ;;  %1285 = vmatpush.msrb.mxu3 %v933_v32  ;;  %v557_v21 = vld [vmem:[%s4810_s1 + $0xb00] sm:$0xff] }
  0x87   : > { %1227 = vmatpush.msrb.mxu0 %v788_v33  ;;  %1246 = vmatpush.msrb.mxu1 %v924_v34  ;;  %v693_v22 = vld [vmem:[%s4810_s1 + $0xf40] sm:$0xff] }
  0x88   : > { %1267 = vmatpush.msrb.mxu2 %v789_v35  ;;  %1286 = vmatpush.msrb.mxu3 %v925_v36  ;;  %v293_v23 = vld [vmem:[%s4810_s1 + $0x2c0] sm:$0xff] }
  0x89   : > { %1228 = vmatpush.msrb.mxu0 %v780_v37  ;;  %1247 = vmatpush.msrb.mxu1 %v916_v38  ;;  %v3121_v24 = vld.sshfl [vmem:[#allocation1] sm:$0xff pattern:$0x73625140] }
  0x8a   : > { %1268 = vmatpush.msrb.mxu2 %v781_v39  ;;  %1287 = vmatpush.msrb.mxu3 %v917_v40  ;;  %v429_v27 = vld [vmem:[%s4810_s1 + $0x700] sm:$0xff]  ;;  %2094 = vst [vmem:[#allocation1] ss:$4 sm:$0xff] %v2092_v29  ;;  %v438_v29 = vld [vmem:[%s4810_s1 + $0x748] sm:$0xff] }
  0x8b   : > { %1229 = vmatpush.msrb.mxu0 %v772_v41  ;;  %1248 = vmatpush.msrb.mxu1 %v908_v42  ;;  %v549_v30 = vld [vmem:[%s4810_s1 + $0xac0] sm:$0xff] }
  0x8c   : > { %1269 = vmatpush.msrb.mxu2 %v773_v43  ;;  %1288 = vmatpush.msrb.mxu3 %v909_v44  ;;  %v685_v31 = vld [vmem:[%s4810_s1 + $0xf00] sm:$0xff] }
  0x8d   : > { %1230 = vmatpush.msrb.mxu0 %v764_v47  ;;  %1249 = vmatpush.msrb.mxu1 %v900_v48  ;;  %v285_v32 = vld [vmem:[%s4810_s1 + $0x280] sm:$0xff] }
  0x8e   : > { %1270 = vmatpush.msrb.mxu2 %v765_v49  ;;  %1289 = vmatpush.msrb.mxu3 %v901_v50  ;;  %v421_v33 = vld [vmem:[%s4810_s1 + $0x6c0] sm:$0xff] }
  0x8f   : > { %1231 = vmatpush.msrb.mxu0 %v756_v51  ;;  %1250 = vmatpush.msrb.mxu1 %v892_v52  ;;  %v541_v34 = vld [vmem:[%s4810_s1 + $0xa80] sm:$0xff] }
  0x90   : > { %1271 = vmatpush.msrb.mxu2 %v757_v53  ;;  %1290 = vmatpush.msrb.mxu3 %v893_v54  ;;  %v677_v35 = vld [vmem:[%s4810_s1 + $0xec0] sm:$0xff] }
  0x91   : > { %1232 = vmatpush.msrb.mxu0 %v748_v55  ;;  %1251 = vmatpush.msrb.mxu1 %v884_v56  ;;  %v277_v36 = vld [vmem:[%s4810_s1 + $0x240] sm:$0xff] }
  0x92   : > { %1272 = vmatpush.msrb.mxu2 %v749_v57  ;;  %1291 = vmatpush.msrb.mxu3 %v885_v58  ;;  %v413_v37 = vld [vmem:[%s4810_s1 + $0x680] sm:$0xff] }
  0x93   : > { %1233 = vmatpush.msrb.mxu0 %v740_v59  ;;  %1252 = vmatpush.msrb.mxu1 %v876_v60  ;;  %v533_v38 = vld [vmem:[%s4810_s1 + $0xa40] sm:$0xff] }
  0x94   : > { %1273 = vmatpush.msrb.mxu2 %v741_v61  ;;  %1292 = vmatpush.msrb.mxu3 %v877_v62  ;;  %v669_v39 = vld [vmem:[%s4810_s1 + $0xe80] sm:$0xff] }
  0x95   : > { %1234 = vmatpush.msrb.mxu0 %v732_v63  ;;  %1253 = vmatpush.msrb.mxu1 %v868_v0  ;;  %v269_v40 = vld [vmem:[%s4810_s1 + $0x200] sm:$0xff] }
  0x96   : > { %1274 = vmatpush.msrb.mxu2 %v733_v1  ;;  %1293 = vmatpush.msrb.mxu3 %v869_v2  ;;  %v405_v41 = vld [vmem:[%s4810_s1 + $0x640] sm:$0xff] }
  0x97   : > { %1235 = vmatpush.msrb.mxu0 %v724_v3  ;;  %1254 = vmatpush.msrb.mxu1 %v860_v4  ;;  %v525_v42 = vld [vmem:[%s4810_s1 + $0xa00] sm:$0xff] }
  0x98   : > { %1275 = vmatpush.msrb.mxu2 %v725_v5  ;;  %1294 = vmatpush.msrb.mxu3 %v861_v6  ;;  %v661_v43 = vld [vmem:[%s4810_s1 + $0xe40] sm:$0xff] }
  0x99   : > { %1156 = vmatmul.f32.vlgmr.msra.gmra.mxu0 %v2610_v45  ;;  %1196 = vmatmul.f32.vlgmr.msra.gmra.mxu2 %v2610_v45  ;;  %v261_v44 = vld [vmem:[%s4810_s1 + $0x1c0] sm:$0xff] }
  0x9a   : > { %1216 = vmatmul.f32.vlgmr.msra.gmra.mxu3 %v2612_v46  ;;  %1310 = vmatpush.msra.mxu0 %v325_v7  ;;  %v397_v47 = vld [vmem:[%s4810_s1 + $0x600] sm:$0xff] }
  0x9b   : > { %1350 = vmatpush.msra.mxu2 %v581_v8  ;;  %1255 = vmatpush.msrb.mxu1 %v852_v9  ;;  %v517_v48 = vld [vmem:[%s4810_s1 + $0x9c0] sm:$0xff] }
  0x9c   : > { %1295 = vmatpush.msrb.mxu3 %v853_v10  ;;  %1176 = vmatmul.f32.vlgmr.msra.gmra.mxu1 %v2612_v46  ;;  %v653_v49 = vld [vmem:[%s4810_s1 + $0xe00] sm:$0xff] }
  0x9d   : > { %1311 = vmatpush.msra.mxu0 %v317_v11  ;;  %1330 = vmatpush.msra.mxu1 %v453_v12  ;;  %v253_v50 = vld [vmem:[%s4810_s1 + $0x180] sm:$0xff]  ;;  %v326_v12 = vld [vmem:[%s4810_s1 + $0x3c8] sm:$0xff] }
  0x9e   : > { %1351 = vmatpush.msra.mxu2 %v573_v13  ;;  %1370 = vmatpush.msra.mxu3 %v709_v14  ;;  %v389_v51 = vld [vmem:[%s4810_s1 + $0x5c0] sm:$0xff]  ;;  %v582_v13 = vld [vmem:[%s4810_s1 + $0xbc8] sm:$0xff] }
  0x9f   : > { %1312 = vmatpush.msra.mxu0 %v309_v15  ;;  %1331 = vmatpush.msra.mxu1 %v445_v16  ;;  %v509_v52 = vld [vmem:[%s4810_s1 + $0x980] sm:$0xff]  ;;  %v318_v16 = vld [vmem:[%s4810_s1 + $0x388] sm:$0xff] }
  0xa0   : > { %1352 = vmatpush.msra.mxu2 %v565_v17  ;;  %1371 = vmatpush.msra.mxu3 %v701_v18  ;;  %v645_v53 = vld [vmem:[%s4810_s1 + $0xdc0] sm:$0xff]  ;;  %v454_v17 = vld [vmem:[%s4810_s1 + $0x7c8] sm:$0xff] }
  0xa1   : > { %1313 = vmatpush.msra.mxu0 %v301_v19  ;;  %1332 = vmatpush.msra.mxu1 %v437_v20  ;;  %v245_v54 = vld [vmem:[%s4810_s1 + $0x140] sm:$0xff]  ;;  %v574_v18 = vld [vmem:[%s4810_s1 + $0xb88] sm:$0xff] }
  0xa2   : > { %1353 = vmatpush.msra.mxu2 %v557_v21  ;;  %1372 = vmatpush.msra.mxu3 %v693_v22  ;;  %v381_v55 = vld [vmem:[%s4810_s1 + $0x580] sm:$0xff]  ;;  %v710_v19 = vld [vmem:[%s4810_s1 + $0xfc8] sm:$0xff] }
  0xa3   : > { %1314 = vmatpush.msra.mxu0 %v293_v23  ;;  %1333 = vmatpush.msra.mxu1 %v429_v27  ;;  %v501_v56 = vld [vmem:[%s4810_s1 + $0x940] sm:$0xff]  ;;  %v310_v20 = vld [vmem:[%s4810_s1 + $0x348] sm:$0xff] }
  0xa4   : > { %1354 = vmatpush.msra.mxu2 %v549_v30  ;;  %1373 = vmatpush.msra.mxu3 %v685_v31  ;;  %v637_v57 = vld [vmem:[%s4810_s1 + $0xd80] sm:$0xff]  ;;  %v446_v21 = vld [vmem:[%s4810_s1 + $0x788] sm:$0xff] }
  0xa5   : > { %1315 = vmatpush.msra.mxu0 %v285_v32  ;;  %1334 = vmatpush.msra.mxu1 %v421_v33  ;;  %v237_v58 = vld [vmem:[%s4810_s1 + $0x100] sm:$0xff]  ;;  %v566_v22 = vld [vmem:[%s4810_s1 + $0xb48] sm:$0xff] }
  0xa6   : > { %1355 = vmatpush.msra.mxu2 %v541_v34  ;;  %1374 = vmatpush.msra.mxu3 %v677_v35  ;;  %v373_v59 = vld [vmem:[%s4810_s1 + $0x540] sm:$0xff]  ;;  %v702_v23 = vld [vmem:[%s4810_s1 + $0xf88] sm:$0xff] }
  0xa7   : > { %1316 = vmatpush.msra.mxu0 %v277_v36  ;;  %1335 = vmatpush.msra.mxu1 %v413_v37  ;;  %v493_v60 = vld [vmem:[%s4810_s1 + $0x900] sm:$0xff]  ;;  %v302_v27 = vld [vmem:[%s4810_s1 + $0x308] sm:$0xff] }
  0xa8   : > { %1356 = vmatpush.msra.mxu2 %v533_v38  ;;  %1375 = vmatpush.msra.mxu3 %v669_v39  ;;  %v629_v61 = vld [vmem:[%s4810_s1 + $0xd40] sm:$0xff]  ;;  %v558_v30 = vld [vmem:[%s4810_s1 + $0xb08] sm:$0xff] }
  0xa9   : > { %1317 = vmatpush.msra.mxu0 %v269_v40  ;;  %1336 = vmatpush.msra.mxu1 %v405_v41  ;;  %v229_v62 = vld [vmem:[%s4810_s1 + $0xc0] sm:$0xff]  ;;  %v694_v31 = vld [vmem:[%s4810_s1 + $0xf48] sm:$0xff] }
  0xaa   : > { %1357 = vmatpush.msra.mxu2 %v525_v42  ;;  %1376 = vmatpush.msra.mxu3 %v661_v43  ;;  %v365_v63 = vld [vmem:[%s4810_s1 + $0x500] sm:$0xff]  ;;  %v294_v32 = vld [vmem:[%s4810_s1 + $0x2c8] sm:$0xff] }
  0xab   : > { %1318 = vmatpush.msra.mxu0 %v261_v44  ;;  %1337 = vmatpush.msra.mxu1 %v397_v47  ;;  %v485_v0 = vld [vmem:[%s4810_s1 + $0x8c0] sm:$0xff]  ;;  %v430_v33 = vld [vmem:[%s4810_s1 + $0x708] sm:$0xff] }
  0xac   : > { %1358 = vmatpush.msra.mxu2 %v517_v48  ;;  %1377 = vmatpush.msra.mxu3 %v653_v49  ;;  %v621_v1 = vld [vmem:[%s4810_s1 + $0xd00] sm:$0xff]  ;;  %v550_v34 = vld [vmem:[%s4810_s1 + $0xac8] sm:$0xff] }
  0xad   : > { %1319 = vmatpush.msra.mxu0 %v253_v50  ;;  %1338 = vmatpush.msra.mxu1 %v389_v51  ;;  %v221_v2 = vld [vmem:[%s4810_s1 + $0x80] sm:$0xff]  ;;  %v686_v35 = vld [vmem:[%s4810_s1 + $0xf08] sm:$0xff] }
  0xae   : > { %1359 = vmatpush.msra.mxu2 %v509_v52  ;;  %1378 = vmatpush.msra.mxu3 %v645_v53  ;;  %v357_v3 = vld [vmem:[%s4810_s1 + $0x4c0] sm:$0xff]  ;;  %v286_v36 = vld [vmem:[%s4810_s1 + $0x288] sm:$0xff] }
  0xaf   : > { %1320 = vmatpush.msra.mxu0 %v245_v54  ;;  %1339 = vmatpush.msra.mxu1 %v381_v55  ;;  %v477_v4 = vld [vmem:[%s4810_s1 + $0x880] sm:$0xff]  ;;  %v422_v37 = vld [vmem:[%s4810_s1 + $0x6c8] sm:$0xff] }
  0xb0   : > { %1360 = vmatpush.msra.mxu2 %v501_v56  ;;  %1379 = vmatpush.msra.mxu3 %v637_v57  ;;  %v213_v5 = vld [vmem:[%s4810_s1 + $0x40] sm:$0xff]  ;;  %v542_v38 = vld [vmem:[%s4810_s1 + $0xa88] sm:$0xff] }
  0xb1   : > { %1321 = vmatpush.msra.mxu0 %v237_v58  ;;  %1340 = vmatpush.msra.mxu1 %v373_v59  ;;  %v349_v6 = vld [vmem:[%s4810_s1 + $0x480] sm:$0xff]  ;;  %v678_v39 = vld [vmem:[%s4810_s1 + $0xec8] sm:$0xff] }
  0xb2   : > { %1361 = vmatpush.msra.mxu2 %v493_v60  ;;  %1380 = vmatpush.msra.mxu3 %v629_v61  ;;  %v469_v7 = vld [vmem:[%s4810_s1 + $0x840] sm:$0xff]  ;;  %v278_v40 = vld [vmem:[%s4810_s1 + $0x248] sm:$0xff] }
  0xb3   : > { %1236 = vmatmul.f32.vlgmr.msrb.gmra.mxu0 %v2610_v45  ;;  %1276 = vmatmul.f32.vlgmr.msrb.gmra.mxu2 %v2610_v45  ;;  %v613_v45 = vld [vmem:[%s4810_s1 + $0xcc0] sm:$0xff]  ;;  %v414_v41 = vld [vmem:[%s4810_s1 + $0x688] sm:$0xff] }
  0xb4   : > { %1322 = vmatpush.msra.mxu0 %v229_v62  ;;  %1341 = vmatpush.msra.mxu1 %v365_v63  ;;  %v605_v8 = vld [vmem:[%s4810_s1 + $0xc80] sm:$0xff]  ;;  %v534_v42 = vld [vmem:[%s4810_s1 + $0xa48] sm:$0xff] }
  0xb5   : > { %1362 = vmatpush.msra.mxu2 %v485_v0  ;;  %1381 = vmatpush.msra.mxu3 %v621_v1  ;;  %v341_v9 = vld [vmem:[%s4810_s1 + $0x440] sm:$0xff]  ;;  %v670_v43 = vld [vmem:[%s4810_s1 + $0xe88] sm:$0xff] }
  0xb6   : > { %1256 = vmatmul.f32.vlgmr.msrb.gmra.mxu1 %v2612_v46  ;;  %1296 = vmatmul.f32.vlgmr.msrb.gmra.mxu3 %v2612_v46  ;;  %v205_v46 = vld [vmem:[%s4810_s1] sm:$0xff]  ;;  %v270_v44 = vld [vmem:[%s4810_s1 + $0x208] sm:$0xff] }
  0xb7   : > { %1323 = vmatpush.msra.mxu0 %v221_v2  ;;  %1342 = vmatpush.msra.mxu1 %v357_v3  ;;  %v461_v10 = vld [vmem:[%s4810_s1 + $0x800] sm:$0xff]  ;;  %v406_v47 = vld [vmem:[%s4810_s1 + $0x648] sm:$0xff] }
  0xb8   : > { %1363 = vmatpush.msra.mxu2 %v477_v4  ;;  %1382 = vmatpush.msra.mxu3 %v613_v45  ;;  %v597_v11 = vld [vmem:[%s4810_s1 + $0xc40] sm:$0xff]  ;;  %v526_v48 = vld [vmem:[%s4810_s1 + $0xa08] sm:$0xff] }
  0xb9   : > { %1324 = vmatpush.msra.mxu0 %v213_v5  ;;  %1343 = vmatpush.msra.mxu1 %v349_v6  ;;  %v333_v14 = vld [vmem:[%s4810_s1 + $0x400] sm:$0xff]  ;;  %v662_v49 = vld [vmem:[%s4810_s1 + $0xe48] sm:$0xff] }
  0xba   : > { %1364 = vmatpush.msra.mxu2 %v469_v7  ;;  %1383 = vmatpush.msra.mxu3 %v605_v8  ;;  %v589_v15 = vld [vmem:[%s4810_s1 + $0xc00] sm:$0xff]  ;;  %v262_v50 = vld [vmem:[%s4810_s1 + $0x1c8] sm:$0xff] }
  0xbb   : > { %1325 = vmatpush.msra.mxu0 %v205_v46  ;;  %1344 = vmatpush.msra.mxu1 %v341_v9  ;;  %v398_v51 = vld [vmem:[%s4810_s1 + $0x608] sm:$0xff] }
  0xbc   : > { %1365 = vmatpush.msra.mxu2 %v461_v10  ;;  %1384 = vmatpush.msra.mxu3 %v597_v11  ;;  %v518_v52 = vld [vmem:[%s4810_s1 + $0x9c8] sm:$0xff] }
  0xbd   : > { %1326 = vmatmul.f32.vlgmr.msra.gmra.mxu0 %v3121_v24  ;;  %1366 = vmatmul.f32.vlgmr.msra.gmra.mxu2 %v3123_v25  ;;  %v654_v53 = vld [vmem:[%s4810_s1 + $0xe08] sm:$0xff] }
  0xbe   : > { %1390 = vmatpush.msrb.mxu0 %v326_v12  ;;  %1430 = vmatpush.msrb.mxu2 %v582_v13  ;;  %v254_v54 = vld [vmem:[%s4810_s1 + $0x188] sm:$0xff] }
  0xbf   : > { %1345 = vmatpush.msra.mxu1 %v333_v14  ;;  %1385 = vmatpush.msra.mxu3 %v589_v15  ;;  %v390_v55 = vld [vmem:[%s4810_s1 + $0x5c8] sm:$0xff] }
  0xc0   : > { %1346 = vmatmul.f32.vlgmr.msra.gmra.mxu1 %v3125_v26  ;;  %1386 = vmatmul.f32.vlgmr.msra.gmra.mxu3 %v3130_v28  ;;  %v510_v56 = vld [vmem:[%s4810_s1 + $0x988] sm:$0xff] }
  0xc1   : > { %1391 = vmatpush.msrb.mxu0 %v318_v16  ;;  %1410 = vmatpush.msrb.mxu1 %v454_v17  ;;  %v646_v57 = vld [vmem:[%s4810_s1 + $0xdc8] sm:$0xff]  ;;  %v327_v16 = vld [vmem:[%s4810_s1 + $0x3d0] sm:$0xff] }
  0xc2   : > { %1431 = vmatpush.msrb.mxu2 %v574_v18  ;;  %1450 = vmatpush.msrb.mxu3 %v710_v19  ;;  %v246_v58 = vld [vmem:[%s4810_s1 + $0x148] sm:$0xff]  ;;  %v583_v17 = vld [vmem:[%s4810_s1 + $0xbd0] sm:$0xff] }
  0xc3   : > { %1392 = vmatpush.msrb.mxu0 %v310_v20  ;;  %1411 = vmatpush.msrb.mxu1 %v446_v21  ;;  %v382_v59 = vld [vmem:[%s4810_s1 + $0x588] sm:$0xff]  ;;  %v319_v20 = vld [vmem:[%s4810_s1 + $0x390] sm:$0xff] }
  0xc4   : > { %1432 = vmatpush.msrb.mxu2 %v566_v22  ;;  %1451 = vmatpush.msrb.mxu3 %v702_v23  ;;  %v502_v60 = vld [vmem:[%s4810_s1 + $0x948] sm:$0xff]  ;;  %v455_v21 = vld [vmem:[%s4810_s1 + $0x7d0] sm:$0xff] }
  0xc5   : > { %1393 = vmatpush.msrb.mxu0 %v302_v27  ;;  %1412 = vmatpush.msrb.mxu1 %v438_v29  ;;  %v638_v61 = vld [vmem:[%s4810_s1 + $0xd88] sm:$0xff]  ;;  %v575_v22 = vld [vmem:[%s4810_s1 + $0xb90] sm:$0xff] }
  0xc6   : > { %1433 = vmatpush.msrb.mxu2 %v558_v30  ;;  %1452 = vmatpush.msrb.mxu3 %v694_v31  ;;  %v238_v62 = vld [vmem:[%s4810_s1 + $0x108] sm:$0xff]  ;;  %v711_v23 = vld [vmem:[%s4810_s1 + $0xfd0] sm:$0xff] }
  0xc7   : > { %1394 = vmatpush.msrb.mxu0 %v294_v32  ;;  %1413 = vmatpush.msrb.mxu1 %v430_v33  ;;  %v374_v63 = vld [vmem:[%s4810_s1 + $0x548] sm:$0xff]  ;;  %v311_v27 = vld [vmem:[%s4810_s1 + $0x350] sm:$0xff] }
  0xc8   : > { %1434 = vmatpush.msrb.mxu2 %v550_v34  ;;  %1453 = vmatpush.msrb.mxu3 %v686_v35  ;;  %v494_v0 = vld [vmem:[%s4810_s1 + $0x908] sm:$0xff]  ;;  %v447_v29 = vld [vmem:[%s4810_s1 + $0x790] sm:$0xff] }
  0xc9   : > { %1395 = vmatpush.msrb.mxu0 %v286_v36  ;;  %1414 = vmatpush.msrb.mxu1 %v422_v37  ;;  %v630_v1 = vld [vmem:[%s4810_s1 + $0xd48] sm:$0xff]  ;;  %v567_v30 = vld [vmem:[%s4810_s1 + $0xb50] sm:$0xff] }
  0xca   : > { %1435 = vmatpush.msrb.mxu2 %v542_v38  ;;  %1454 = vmatpush.msrb.mxu3 %v678_v39  ;;  %v230_v2 = vld [vmem:[%s4810_s1 + $0xc8] sm:$0xff]  ;;  %v703_v31 = vld [vmem:[%s4810_s1 + $0xf90] sm:$0xff] }
  0xcb   : > { %1396 = vmatpush.msrb.mxu0 %v278_v40  ;;  %1415 = vmatpush.msrb.mxu1 %v414_v41  ;;  %v366_v3 = vld [vmem:[%s4810_s1 + $0x508] sm:$0xff]  ;;  %v303_v32 = vld [vmem:[%s4810_s1 + $0x310] sm:$0xff] }
  0xcc   : > { %1436 = vmatpush.msrb.mxu2 %v534_v42  ;;  %1455 = vmatpush.msrb.mxu3 %v670_v43  ;;  %v486_v4 = vld [vmem:[%s4810_s1 + $0x8c8] sm:$0xff]  ;;  %v439_v33 = vld [vmem:[%s4810_s1 + $0x750] sm:$0xff] }
  0xcd   : > { %1397 = vmatpush.msrb.mxu0 %v270_v44  ;;  %1416 = vmatpush.msrb.mxu1 %v406_v47  ;;  %v622_v45 = vld [vmem:[%s4810_s1 + $0xd08] sm:$0xff]  ;;  %v559_v34 = vld [vmem:[%s4810_s1 + $0xb10] sm:$0xff] }
  0xce   : > { %1437 = vmatpush.msrb.mxu2 %v526_v48  ;;  %1456 = vmatpush.msrb.mxu3 %v662_v49  ;;  %v222_v5 = vld [vmem:[%s4810_s1 + $0x88] sm:$0xff]  ;;  %v695_v35 = vld [vmem:[%s4810_s1 + $0xf50] sm:$0xff] }
  0xcf   : > { %1398 = vmatpush.msrb.mxu0 %v262_v50  ;;  %1417 = vmatpush.msrb.mxu1 %v398_v51  ;;  %v358_v6 = vld [vmem:[%s4810_s1 + $0x4c8] sm:$0xff]  ;;  %v295_v36 = vld [vmem:[%s4810_s1 + $0x2d0] sm:$0xff] }
  0xd0   : > { %1438 = vmatpush.msrb.mxu2 %v518_v52  ;;  %1457 = vmatpush.msrb.mxu3 %v654_v53  ;;  %v478_v7 = vld [vmem:[%s4810_s1 + $0x888] sm:$0xff]  ;;  %v431_v37 = vld [vmem:[%s4810_s1 + $0x710] sm:$0xff] }
  0xd1   : > { %1399 = vmatpush.msrb.mxu0 %v254_v54  ;;  %1418 = vmatpush.msrb.mxu1 %v390_v55  ;;  %v614_v8 = vld [vmem:[%s4810_s1 + $0xcc8] sm:$0xff]  ;;  %v551_v38 = vld [vmem:[%s4810_s1 + $0xad0] sm:$0xff] }
  0xd2   : > { %1439 = vmatpush.msrb.mxu2 %v510_v56  ;;  %1458 = vmatpush.msrb.mxu3 %v646_v57  ;;  %v214_v46 = vld [vmem:[%s4810_s1 + $0x48] sm:$0xff]  ;;  %v687_v39 = vld [vmem:[%s4810_s1 + $0xf10] sm:$0xff] }
  0xd3   : > { %1400 = vmatpush.msrb.mxu0 %v246_v58  ;;  %1419 = vmatpush.msrb.mxu1 %v382_v59  ;;  %v350_v9 = vld [vmem:[%s4810_s1 + $0x488] sm:$0xff]  ;;  %v287_v40 = vld [vmem:[%s4810_s1 + $0x290] sm:$0xff] }
  0xd4   : > { %1440 = vmatpush.msrb.mxu2 %v502_v60  ;;  %1459 = vmatpush.msrb.mxu3 %v638_v61  ;;  %v470_v10 = vld [vmem:[%s4810_s1 + $0x848] sm:$0xff]  ;;  %v423_v41 = vld [vmem:[%s4810_s1 + $0x6d0] sm:$0xff] }
  0xd5   : > { %1401 = vmatpush.msrb.mxu0 %v238_v62  ;;  %1420 = vmatpush.msrb.mxu1 %v374_v63  ;;  %v606_v11 = vld [vmem:[%s4810_s1 + $0xc88] sm:$0xff]  ;;  %v543_v42 = vld [vmem:[%s4810_s1 + $0xa90] sm:$0xff] }
  0xd6   : > { %1441 = vmatpush.msrb.mxu2 %v494_v0  ;;  %1460 = vmatpush.msrb.mxu3 %v630_v1  ;;  %v206_v12 = vld [vmem:[%s4810_s1 + $0x8] sm:$0xff]  ;;  %v679_v43 = vld [vmem:[%s4810_s1 + $0xed0] sm:$0xff] }
  0xd7   : > { %1402 = vmatpush.msrb.mxu0 %v230_v2  ;;  %1421 = vmatpush.msrb.mxu1 %v366_v3  ;;  %v342_v13 = vld [vmem:[%s4810_s1 + $0x448] sm:$0xff]  ;;  %v279_v44 = vld [vmem:[%s4810_s1 + $0x250] sm:$0xff] }
  0xd8   : > { %1442 = vmatpush.msrb.mxu2 %v486_v4  ;;  %1461 = vmatpush.msrb.mxu3 %v622_v45  ;;  %v462_v14 = vld [vmem:[%s4810_s1 + $0x808] sm:$0xff]  ;;  %v415_v47 = vld [vmem:[%s4810_s1 + $0x690] sm:$0xff] }
  0xd9   : > { %1403 = vmatpush.msrb.mxu0 %v222_v5  ;;  %1422 = vmatpush.msrb.mxu1 %v358_v6  ;;  %v598_v15 = vld [vmem:[%s4810_s1 + $0xc48] sm:$0xff]  ;;  %v535_v48 = vld [vmem:[%s4810_s1 + $0xa50] sm:$0xff] }
  0xda   : > { %1443 = vmatpush.msrb.mxu2 %v478_v7  ;;  %1462 = vmatpush.msrb.mxu3 %v614_v8  ;;  %v334_v18 = vld [vmem:[%s4810_s1 + $0x408] sm:$0xff]  ;;  %v671_v49 = vld [vmem:[%s4810_s1 + $0xe90] sm:$0xff] }
  0xdb   : > { %1404 = vmatpush.msrb.mxu0 %v214_v46  ;;  %1423 = vmatpush.msrb.mxu1 %v350_v9  ;;  %v590_v19 = vld [vmem:[%s4810_s1 + $0xc08] sm:$0xff]  ;;  %v271_v50 = vld [vmem:[%s4810_s1 + $0x210] sm:$0xff] }
  0xdc   : > { %1444 = vmatpush.msrb.mxu2 %v470_v10  ;;  %1463 = vmatpush.msrb.mxu3 %v606_v11  ;;  %v407_v51 = vld [vmem:[%s4810_s1 + $0x650] sm:$0xff] }
  0xdd   : > { %1405 = vmatpush.msrb.mxu0 %v206_v12  ;;  %1424 = vmatpush.msrb.mxu1 %v342_v13  ;;  %v527_v52 = vld [vmem:[%s4810_s1 + $0xa10] sm:$0xff] }
  0xde   : > { %1445 = vmatpush.msrb.mxu2 %v462_v14  ;;  %1464 = vmatpush.msrb.mxu3 %v598_v15  ;;  %v663_v53 = vld [vmem:[%s4810_s1 + $0xe50] sm:$0xff] }
  0xdf   : > { %1406 = vmatmul.f32.vlgmr.msrb.gmra.mxu0 %v3121_v24  ;;  %1446 = vmatmul.f32.vlgmr.msrb.gmra.mxu2 %v3123_v25  ;;  %v263_v54 = vld [vmem:[%s4810_s1 + $0x1d0] sm:$0xff] }
  0xe0   : > { %1470 = vmatpush.msra.mxu0 %v327_v16  ;;  %1510 = vmatpush.msra.mxu2 %v583_v17  ;;  %v399_v55 = vld [vmem:[%s4810_s1 + $0x610] sm:$0xff] }
  0xe1   : > { %1425 = vmatpush.msrb.mxu1 %v334_v18  ;;  %1465 = vmatpush.msrb.mxu3 %v590_v19  ;;  %v519_v56 = vld [vmem:[%s4810_s1 + $0x9d0] sm:$0xff] }
  0xe2   : > { %1426 = vmatmul.f32.vlgmr.msrb.gmra.mxu1 %v3125_v26  ;;  %1466 = vmatmul.f32.vlgmr.msrb.gmra.mxu3 %v3130_v28  ;;  %v655_v57 = vld [vmem:[%s4810_s1 + $0xe10] sm:$0xff] }
  0xe3   : > { %1471 = vmatpush.msra.mxu0 %v319_v20  ;;  %1490 = vmatpush.msra.mxu1 %v455_v21  ;;  %v255_v58 = vld [vmem:[%s4810_s1 + $0x190] sm:$0xff]  ;;  %v328_v20 = vld [vmem:[%s4810_s1 + $0x3d8] sm:$0xff] }
  0xe4   : > { %1511 = vmatpush.msra.mxu2 %v575_v22  ;;  %1530 = vmatpush.msra.mxu3 %v711_v23  ;;  %v391_v59 = vld [vmem:[%s4810_s1 + $0x5d0] sm:$0xff]  ;;  %v584_v21 = vld [vmem:[%s4810_s1 + $0xbd8] sm:$0xff] }
  0xe5   : > { %1472 = vmatpush.msra.mxu0 %v311_v27  ;;  %1491 = vmatpush.msra.mxu1 %v447_v29  ;;  %v511_v60 = vld [vmem:[%s4810_s1 + $0x990] sm:$0xff]  ;;  %v320_v27 = vld [vmem:[%s4810_s1 + $0x398] sm:$0xff] }
  0xe6   : > { %1512 = vmatpush.msra.mxu2 %v567_v30  ;;  %1531 = vmatpush.msra.mxu3 %v703_v31  ;;  %v647_v61 = vld [vmem:[%s4810_s1 + $0xdd0] sm:$0xff]  ;;  %v456_v29 = vld [vmem:[%s4810_s1 + $0x7d8] sm:$0xff] }
  0xe7   : > { %1473 = vmatpush.msra.mxu0 %v303_v32  ;;  %1492 = vmatpush.msra.mxu1 %v439_v33  ;;  %v247_v62 = vld [vmem:[%s4810_s1 + $0x150] sm:$0xff]  ;;  %v576_v30 = vld [vmem:[%s4810_s1 + $0xb98] sm:$0xff] }
  0xe8   : > { %1513 = vmatpush.msra.mxu2 %v559_v34  ;;  %1532 = vmatpush.msra.mxu3 %v695_v35  ;;  %v383_v63 = vld [vmem:[%s4810_s1 + $0x590] sm:$0xff]  ;;  %v712_v31 = vld [vmem:[%s4810_s1 + $0xfd8] sm:$0xff] }
  0xe9   : > { %1474 = vmatpush.msra.mxu0 %v295_v36  ;;  %1493 = vmatpush.msra.mxu1 %v431_v37  ;;  %v503_v0 = vld [vmem:[%s4810_s1 + $0x950] sm:$0xff]  ;;  %v312_v32 = vld [vmem:[%s4810_s1 + $0x358] sm:$0xff] }
  0xea   : > { %1514 = vmatpush.msra.mxu2 %v551_v38  ;;  %1533 = vmatpush.msra.mxu3 %v687_v39  ;;  %v639_v1 = vld [vmem:[%s4810_s1 + $0xd90] sm:$0xff]  ;;  %v448_v33 = vld [vmem:[%s4810_s1 + $0x798] sm:$0xff] }
  0xeb   : > { %1475 = vmatpush.msra.mxu0 %v287_v40  ;;  %1494 = vmatpush.msra.mxu1 %v423_v41  ;;  %v239_v2 = vld [vmem:[%s4810_s1 + $0x110] sm:$0xff]  ;;  %v568_v34 = vld [vmem:[%s4810_s1 + $0xb58] sm:$0xff] }
  0xec   : > { %1515 = vmatpush.msra.mxu2 %v543_v42  ;;  %1534 = vmatpush.msra.mxu3 %v679_v43  ;;  %v375_v3 = vld [vmem:[%s4810_s1 + $0x550] sm:$0xff]  ;;  %v704_v35 = vld [vmem:[%s4810_s1 + $0xf98] sm:$0xff] }
  0xed   : > { %1476 = vmatpush.msra.mxu0 %v279_v44  ;;  %1495 = vmatpush.msra.mxu1 %v415_v47  ;;  %v495_v4 = vld [vmem:[%s4810_s1 + $0x910] sm:$0xff]  ;;  %v304_v36 = vld [vmem:[%s4810_s1 + $0x318] sm:$0xff] }
  0xee   : > { %1516 = vmatpush.msra.mxu2 %v535_v48  ;;  %1535 = vmatpush.msra.mxu3 %v671_v49  ;;  %v631_v45 = vld [vmem:[%s4810_s1 + $0xd50] sm:$0xff]  ;;  %v440_v37 = vld [vmem:[%s4810_s1 + $0x758] sm:$0xff] }
  0xef   : > { %1477 = vmatpush.msra.mxu0 %v271_v50  ;;  %1496 = vmatpush.msra.mxu1 %v407_v51  ;;  %v231_v5 = vld [vmem:[%s4810_s1 + $0xd0] sm:$0xff]  ;;  %v560_v38 = vld [vmem:[%s4810_s1 + $0xb18] sm:$0xff] }
  0xf0   : > { %1517 = vmatpush.msra.mxu2 %v527_v52  ;;  %1536 = vmatpush.msra.mxu3 %v663_v53  ;;  %v367_v6 = vld [vmem:[%s4810_s1 + $0x510] sm:$0xff]  ;;  %v696_v39 = vld [vmem:[%s4810_s1 + $0xf58] sm:$0xff] }
  0xf1   : > { %1478 = vmatpush.msra.mxu0 %v263_v54  ;;  %1497 = vmatpush.msra.mxu1 %v399_v55  ;;  %v487_v7 = vld [vmem:[%s4810_s1 + $0x8d0] sm:$0xff]  ;;  %v296_v40 = vld [vmem:[%s4810_s1 + $0x2d8] sm:$0xff] }
  0xf2   : > { %1518 = vmatpush.msra.mxu2 %v519_v56  ;;  %1537 = vmatpush.msra.mxu3 %v655_v57  ;;  %v623_v8 = vld [vmem:[%s4810_s1 + $0xd10] sm:$0xff]  ;;  %v432_v41 = vld [vmem:[%s4810_s1 + $0x718] sm:$0xff] }
  0xf3   : > { %1479 = vmatpush.msra.mxu0 %v255_v58  ;;  %1498 = vmatpush.msra.mxu1 %v391_v59  ;;  %v223_v46 = vld [vmem:[%s4810_s1 + $0x90] sm:$0xff]  ;;  %v552_v42 = vld [vmem:[%s4810_s1 + $0xad8] sm:$0xff] }
  0xf4   : > { %1519 = vmatpush.msra.mxu2 %v511_v60  ;;  %1538 = vmatpush.msra.mxu3 %v647_v61  ;;  %v359_v9 = vld [vmem:[%s4810_s1 + $0x4d0] sm:$0xff]  ;;  %v688_v43 = vld [vmem:[%s4810_s1 + $0xf18] sm:$0xff] }
  0xf5   : > { %1480 = vmatpush.msra.mxu0 %v247_v62  ;;  %1499 = vmatpush.msra.mxu1 %v383_v63  ;;  %v479_v10 = vld [vmem:[%s4810_s1 + $0x890] sm:$0xff]  ;;  %v288_v44 = vld [vmem:[%s4810_s1 + $0x298] sm:$0xff] }
  0xf6   : > { %1520 = vmatpush.msra.mxu2 %v503_v0  ;;  %1539 = vmatpush.msra.mxu3 %v639_v1  ;;  %v615_v11 = vld [vmem:[%s4810_s1 + $0xcd0] sm:$0xff]  ;;  %v424_v47 = vld [vmem:[%s4810_s1 + $0x6d8] sm:$0xff] }
  0xf7   : > { %1481 = vmatpush.msra.mxu0 %v239_v2  ;;  %1500 = vmatpush.msra.mxu1 %v375_v3  ;;  %v215_v12 = vld [vmem:[%s4810_s1 + $0x50] sm:$0xff]  ;;  %v544_v48 = vld [vmem:[%s4810_s1 + $0xa98] sm:$0xff] }
  0xf8   : > { %1521 = vmatpush.msra.mxu2 %v495_v4  ;;  %1540 = vmatpush.msra.mxu3 %v631_v45  ;;  %v351_v13 = vld [vmem:[%s4810_s1 + $0x490] sm:$0xff]  ;;  %v680_v49 = vld [vmem:[%s4810_s1 + $0xed8] sm:$0xff] }
  0xf9   : > { %1482 = vmatpush.msra.mxu0 %v231_v5  ;;  %1501 = vmatpush.msra.mxu1 %v367_v6  ;;  %v471_v14 = vld [vmem:[%s4810_s1 + $0x850] sm:$0xff]  ;;  %v280_v50 = vld [vmem:[%s4810_s1 + $0x258] sm:$0xff] }
  0xfa   : > { %1522 = vmatpush.msra.mxu2 %v487_v7  ;;  %1541 = vmatpush.msra.mxu3 %v623_v8  ;;  %v607_v15 = vld [vmem:[%s4810_s1 + $0xc90] sm:$0xff]  ;;  %v416_v51 = vld [vmem:[%s4810_s1 + $0x698] sm:$0xff] }
  0xfb   : > { %1483 = vmatpush.msra.mxu0 %v223_v46  ;;  %1502 = vmatpush.msra.mxu1 %v359_v9  ;;  %v207_v16 = vld [vmem:[%s4810_s1 + $0x10] sm:$0xff]  ;;  %v536_v52 = vld [vmem:[%s4810_s1 + $0xa58] sm:$0xff] }
  0xfc   : > { %1523 = vmatpush.msra.mxu2 %v479_v10  ;;  %1542 = vmatpush.msra.mxu3 %v615_v11  ;;  %v343_v17 = vld [vmem:[%s4810_s1 + $0x450] sm:$0xff]  ;;  %v672_v53 = vld [vmem:[%s4810_s1 + $0xe98] sm:$0xff] }
  0xfd   : > { %1484 = vmatpush.msra.mxu0 %v215_v12  ;;  %1503 = vmatpush.msra.mxu1 %v351_v13  ;;  %v463_v18 = vld [vmem:[%s4810_s1 + $0x810] sm:$0xff]  ;;  %v272_v54 = vld [vmem:[%s4810_s1 + $0x218] sm:$0xff] }
  0xfe   : > { %v599_v19 = vld [vmem:[%s4810_s1 + $0xc50] sm:$0xff]  ;;  %1524 = vmatpush.msra.mxu2 %v471_v14  ;;  %1543 = vmatpush.msra.mxu3 %v607_v15  ;;  %v408_v55 = vld [vmem:[%s4810_s1 + $0x658] sm:$0xff]  ;;  %v3832_v14 = vpop.f32.mrf.mxu0  ;;  %v3834_v15 = vpop.f32.mrf.mxu1 }
  0xff   : > { %1485 = vmatpush.msra.mxu0 %v207_v16  ;;  %1504 = vmatpush.msra.mxu1 %v343_v17  ;;  %v335_v22 = vld [vmem:[%s4810_s1 + $0x410] sm:$0xff]  ;;  %v528_v56 = vld [vmem:[%s4810_s1 + $0xa18] sm:$0xff] }
 0x100   : > { %1525 = vmatpush.msra.mxu2 %v463_v18  ;;  %1544 = vmatpush.msra.mxu3 %v599_v19  ;;  %v591_v23 = vld [vmem:[%s4810_s1 + $0xc10] sm:$0xff]  ;;  %v664_v57 = vld [vmem:[%s4810_s1 + $0xe58] sm:$0xff] }
 0x101   : > { %1486 = vmatmul.f32.vlgmr.msra.gmra.mxu0 %v3121_v24  ;;  %1526 = vmatmul.f32.vlgmr.msra.gmra.mxu2 %v3123_v25  ;;  %v264_v58 = vld [vmem:[%s4810_s1 + $0x1d8] sm:$0xff] }
 0x102   : > { %1550 = vmatpush.msrb.mxu0 %v328_v20  ;;  %1590 = vmatpush.msrb.mxu2 %v584_v21  ;;  %v400_v59 = vld [vmem:[%s4810_s1 + $0x618] sm:$0xff] }
 0x103   : > { %1505 = vmatpush.msra.mxu1 %v335_v22  ;;  %1545 = vmatpush.msra.mxu3 %v591_v23  ;;  %v520_v60 = vld [vmem:[%s4810_s1 + $0x9d8] sm:$0xff] }
 0x104   : > { %1506 = vmatmul.f32.vlgmr.msra.gmra.mxu1 %v3125_v26  ;;  %1546 = vmatmul.f32.vlgmr.msra.gmra.mxu3 %v3130_v28  ;;  %v656_v61 = vld [vmem:[%s4810_s1 + $0xe18] sm:$0xff] }
 0x105   : > { %1551 = vmatpush.msrb.mxu0 %v320_v27  ;;  %1570 = vmatpush.msrb.mxu1 %v456_v29  ;;  %v256_v62 = vld [vmem:[%s4810_s1 + $0x198] sm:$0xff] }
 0x106   : > { %1591 = vmatpush.msrb.mxu2 %v576_v30  ;;  %1610 = vmatpush.msrb.mxu3 %v712_v31  ;;  %v392_v63 = vld [vmem:[%s4810_s1 + $0x5d8] sm:$0xff]  ;;  %v3866_v30 = vpop.f32.mrf.mxu2  ;;  %v3868_v31 = vpop.f32.mrf.mxu3 }
 0x107   : > { %1552 = vmatpush.msrb.mxu0 %v312_v32  ;;  %1571 = vmatpush.msrb.mxu1 %v448_v33  ;;  %v512_v0 = vld [vmem:[%s4810_s1 + $0x998] sm:$0xff]  ;;  %v329_v32 = vld [vmem:[%s4810_s1 + $0x3e0] sm:$0xff] }
 0x108   : > { %1592 = vmatpush.msrb.mxu2 %v568_v34  ;;  %1611 = vmatpush.msrb.mxu3 %v704_v35  ;;  %v648_v1 = vld [vmem:[%s4810_s1 + $0xdd8] sm:$0xff]  ;;  %v585_v33 = vld [vmem:[%s4810_s1 + $0xbe0] sm:$0xff] }
 0x109   : > { %1553 = vmatpush.msrb.mxu0 %v304_v36  ;;  %1572 = vmatpush.msrb.mxu1 %v440_v37  ;;  %v248_v2 = vld [vmem:[%s4810_s1 + $0x158] sm:$0xff]  ;;  %v3882_v36 = vpop.f32.mrf.mxu0  ;;  %v3884_v37 = vpop.f32.mrf.mxu1 }
 0x10a   : > { %1593 = vmatpush.msrb.mxu2 %v560_v38  ;;  %1612 = vmatpush.msrb.mxu3 %v696_v39  ;;  %v384_v3 = vld [vmem:[%s4810_s1 + $0x598] sm:$0xff]  ;;  %v321_v38 = vld [vmem:[%s4810_s1 + $0x3a0] sm:$0xff] }
 0x10b   : > { %1554 = vmatpush.msrb.mxu0 %v296_v40  ;;  %1573 = vmatpush.msrb.mxu1 %v432_v41  ;;  %v504_v4 = vld [vmem:[%s4810_s1 + $0x958] sm:$0xff]  ;;  %v457_v39 = vld [vmem:[%s4810_s1 + $0x7e0] sm:$0xff] }
 0x10c   : > { %1594 = vmatpush.msrb.mxu2 %v552_v42  ;;  %1613 = vmatpush.msrb.mxu3 %v688_v43  ;;  %v640_v45 = vld [vmem:[%s4810_s1 + $0xd98] sm:$0xff]  ;;  %v577_v40 = vld [vmem:[%s4810_s1 + $0xba0] sm:$0xff] }
 0x10d   : > { %1555 = vmatpush.msrb.mxu0 %v288_v44  ;;  %1574 = vmatpush.msrb.mxu1 %v424_v47  ;;  %v240_v5 = vld [vmem:[%s4810_s1 + $0x118] sm:$0xff]  ;;  %v713_v41 = vld [vmem:[%s4810_s1 + $0xfe0] sm:$0xff] }
 0x10e   : > { %1595 = vmatpush.msrb.mxu2 %v544_v48  ;;  %1614 = vmatpush.msrb.mxu3 %v680_v49  ;;  %v376_v6 = vld [vmem:[%s4810_s1 + $0x558] sm:$0xff]  ;;  %v313_v42 = vld [vmem:[%s4810_s1 + $0x360] sm:$0xff] }
 0x10f   : > { %1556 = vmatpush.msrb.mxu0 %v280_v50  ;;  %1575 = vmatpush.msrb.mxu1 %v416_v51  ;;  %v496_v7 = vld [vmem:[%s4810_s1 + $0x918] sm:$0xff]  ;;  %v449_v43 = vld [vmem:[%s4810_s1 + $0x7a0] sm:$0xff]  ;;  %v3920_v50 = vpop.f32.mrf.mxu2  ;;  %v3922_v51 = vpop.f32.mrf.mxu3 }
 0x110   : > { %1596 = vmatpush.msrb.mxu2 %v536_v52  ;;  %1615 = vmatpush.msrb.mxu3 %v672_v53  ;;  %v632_v8 = vld [vmem:[%s4810_s1 + $0xd58] sm:$0xff]  ;;  %v569_v44 = vld [vmem:[%s4810_s1 + $0xb60] sm:$0xff] }
 0x111   : > { %1557 = vmatpush.msrb.mxu0 %v272_v54  ;;  %1576 = vmatpush.msrb.mxu1 %v408_v55  ;;  %v232_v46 = vld [vmem:[%s4810_s1 + $0xd8] sm:$0xff]  ;;  %v705_v47 = vld [vmem:[%s4810_s1 + $0xfa0] sm:$0xff] }
 0x112   : > { %1597 = vmatpush.msrb.mxu2 %v528_v56  ;;  %1616 = vmatpush.msrb.mxu3 %v664_v57  ;;  %v368_v9 = vld [vmem:[%s4810_s1 + $0x518] sm:$0xff]  ;;  %v305_v48 = vld [vmem:[%s4810_s1 + $0x320] sm:$0xff] }
 0x113   : > { %1558 = vmatpush.msrb.mxu0 %v264_v58  ;;  %1577 = vmatpush.msrb.mxu1 %v400_v59  ;;  %v488_v10 = vld [vmem:[%s4810_s1 + $0x8d8] sm:$0xff]  ;;  %v441_v49 = vld [vmem:[%s4810_s1 + $0x760] sm:$0xff] }
 0x114   : > { %1598 = vmatpush.msrb.mxu2 %v520_v60  ;;  %1617 = vmatpush.msrb.mxu3 %v656_v61  ;;  %v624_v11 = vld [vmem:[%s4810_s1 + $0xd18] sm:$0xff]  ;;  %v561_v52 = vld [vmem:[%s4810_s1 + $0xb20] sm:$0xff] }
 0x115   : > { %1559 = vmatpush.msrb.mxu0 %v256_v62  ;;  %1578 = vmatpush.msrb.mxu1 %v392_v63  ;;  %v224_v12 = vld [vmem:[%s4810_s1 + $0x98] sm:$0xff]  ;;  %v697_v53 = vld [vmem:[%s4810_s1 + $0xf60] sm:$0xff] }
 0x116   : > { %1599 = vmatpush.msrb.mxu2 %v512_v0  ;;  %1618 = vmatpush.msrb.mxu3 %v648_v1  ;;  %v360_v13 = vld [vmem:[%s4810_s1 + $0x4d8] sm:$0xff]  ;;  %v297_v54 = vld [vmem:[%s4810_s1 + $0x2e0] sm:$0xff]  ;;  %v3936_v56 = vpop.f32.mrf.mxu0 }
 0x117   : > { %1560 = vmatpush.msrb.mxu0 %v248_v2  ;;  %1579 = vmatpush.msrb.mxu1 %v384_v3  ;;  %v480_v16 = vld [vmem:[%s4810_s1 + $0x898] sm:$0xff]  ;;  %v433_v55 = vld [vmem:[%s4810_s1 + $0x720] sm:$0xff] }
 0x118   : > { %1600 = vmatpush.msrb.mxu2 %v504_v4  ;;  %1619 = vmatpush.msrb.mxu3 %v640_v45  ;;  %v616_v17 = vld [vmem:[%s4810_s1 + $0xcd8] sm:$0xff]  ;;  %v553_v58 = vld [vmem:[%s4810_s1 + $0xae0] sm:$0xff] }
 0x119   : > { %1561 = vmatpush.msrb.mxu0 %v240_v5  ;;  %1580 = vmatpush.msrb.mxu1 %v376_v6  ;;  %v216_v18 = vld [vmem:[%s4810_s1 + $0x58] sm:$0xff]  ;;  %v3938_v57 = vpop.f32.mrf.mxu1  ;;  %v689_v59 = vld [vmem:[%s4810_s1 + $0xf20] sm:$0xff] }
 0x11a   : > { %1601 = vmatpush.msrb.mxu2 %v496_v7  ;;  %1620 = vmatpush.msrb.mxu3 %v632_v8  ;;  %v352_v19 = vld [vmem:[%s4810_s1 + $0x498] sm:$0xff]  ;;  %v289_v60 = vld [vmem:[%s4810_s1 + $0x2a0] sm:$0xff] }
 0x11b   : > { %1562 = vmatpush.msrb.mxu0 %v232_v46  ;;  %1581 = vmatpush.msrb.mxu1 %v368_v9  ;;  %v472_v20 = vld [vmem:[%s4810_s1 + $0x858] sm:$0xff]  ;;  %v425_v61 = vld [vmem:[%s4810_s1 + $0x6e0] sm:$0xff] }
 0x11c   : > { %1602 = vmatpush.msrb.mxu2 %v488_v10  ;;  %1621 = vmatpush.msrb.mxu3 %v624_v11  ;;  %v608_v21 = vld [vmem:[%s4810_s1 + $0xc98] sm:$0xff]  ;;  %v545_v62 = vld [vmem:[%s4810_s1 + $0xaa0] sm:$0xff]  ;;  %v3976_v5 = vpop.f32.mrf.mxu2 }
 0x11d   : > { %1563 = vmatpush.msrb.mxu0 %v224_v12  ;;  %1582 = vmatpush.msrb.mxu1 %v360_v13  ;;  %v208_v22 = vld [vmem:[%s4810_s1 + $0x18] sm:$0xff]  ;;  %v681_v63 = vld [vmem:[%s4810_s1 + $0xee0] sm:$0xff]  ;;  %v3978_v6 = vpop.f32.mrf.mxu3 }
 0x11e   : > { %1603 = vmatpush.msrb.mxu2 %v480_v16  ;;  %1622 = vmatpush.msrb.mxu3 %v616_v17  ;;  %v344_v23 = vld [vmem:[%s4810_s1 + $0x458] sm:$0xff]  ;;  %v281_v0 = vld [vmem:[%s4810_s1 + $0x260] sm:$0xff] }
 0x11f   : > { %1564 = vmatpush.msrb.mxu0 %v216_v18  ;;  %1583 = vmatpush.msrb.mxu1 %v352_v19  ;;  %v464_v27 = vld [vmem:[%s4810_s1 + $0x818] sm:$0xff]  ;;  %v417_v1 = vld [vmem:[%s4810_s1 + $0x6a0] sm:$0xff] }
 0x120   : > { %v600_v29 = vld [vmem:[%s4810_s1 + $0xc58] sm:$0xff]  ;;  %1604 = vmatpush.msrb.mxu2 %v472_v20  ;;  %1623 = vmatpush.msrb.mxu3 %v608_v21  ;;  %v537_v2 = vld [vmem:[%s4810_s1 + $0xa60] sm:$0xff] }
 0x121   : > { %1565 = vmatpush.msrb.mxu0 %v208_v22  ;;  %1584 = vmatpush.msrb.mxu1 %v344_v23  ;;  %v336_v34 = vld [vmem:[%s4810_s1 + $0x418] sm:$0xff]  ;;  %v673_v3 = vld [vmem:[%s4810_s1 + $0xea0] sm:$0xff] }
 0x122   : > { %1605 = vmatpush.msrb.mxu2 %v464_v27  ;;  %1624 = vmatpush.msrb.mxu3 %v600_v29  ;;  %v592_v35 = vld [vmem:[%s4810_s1 + $0xc18] sm:$0xff]  ;;  %v273_v4 = vld [vmem:[%s4810_s1 + $0x220] sm:$0xff] }
 0x123   : > { %1566 = vmatmul.f32.vlgmr.msrb.gmra.mxu0 %v3121_v24  ;;  %1606 = vmatmul.f32.vlgmr.msrb.gmra.mxu2 %v3123_v25  ;;  %v409_v45 = vld [vmem:[%s4810_s1 + $0x660] sm:$0xff] }
 0x124   : > { %1630 = vmatpush.msra.mxu0 %v329_v32  ;;  %1670 = vmatpush.msra.mxu2 %v585_v33  ;;  %v529_v7 = vld [vmem:[%s4810_s1 + $0xa20] sm:$0xff] }
 0x125   : > { %1585 = vmatpush.msrb.mxu1 %v336_v34  ;;  %1625 = vmatpush.msrb.mxu3 %v592_v35  ;;  %v665_v8 = vld [vmem:[%s4810_s1 + $0xe60] sm:$0xff] }
 0x126   : > { %1586 = vmatmul.f32.vlgmr.msrb.gmra.mxu1 %v3125_v26  ;;  %1626 = vmatmul.f32.vlgmr.msrb.gmra.mxu3 %v3130_v28  ;;  %v265_v46 = vld [vmem:[%s4810_s1 + $0x1e0] sm:$0xff] }
 0x127   : > { %1631 = vmatpush.msra.mxu0 %v321_v38  ;;  %1650 = vmatpush.msra.mxu1 %v457_v39  ;;  %v401_v9 = vld [vmem:[%s4810_s1 + $0x620] sm:$0xff] }
 0x128   : > { %1671 = vmatpush.msra.mxu2 %v577_v40  ;;  %1690 = vmatpush.msra.mxu3 %v713_v41  ;;  %v521_v10 = vld [vmem:[%s4810_s1 + $0x9e0] sm:$0xff] }
 0x129   : > { %1632 = vmatpush.msra.mxu0 %v313_v42  ;;  %1651 = vmatpush.msra.mxu1 %v449_v43  ;;  %v657_v11 = vld [vmem:[%s4810_s1 + $0xe20] sm:$0xff] }
 0x12a   : > { %1672 = vmatpush.msra.mxu2 %v569_v44  ;;  %1691 = vmatpush.msra.mxu3 %v705_v47  ;;  %v257_v16 = vld [vmem:[%s4810_s1 + $0x1a0] sm:$0xff] }
 0x12b   : > { %1633 = vmatpush.msra.mxu0 %v305_v48  ;;  %1652 = vmatpush.msra.mxu1 %v441_v49  ;;  %v393_v17 = vld [vmem:[%s4810_s1 + $0x5e0] sm:$0xff] }
 0x12c   : > { %1673 = vmatpush.msra.mxu2 %v561_v52  ;;  %1692 = vmatpush.msra.mxu3 %v697_v53  ;;  %v513_v19 = vld [vmem:[%s4810_s1 + $0x9a0] sm:$0xff] }
 0x12d   : > { %1634 = vmatpush.msra.mxu0 %v297_v54  ;;  %1653 = vmatpush.msra.mxu1 %v433_v55  ;;  %v649_v20 = vld [vmem:[%s4810_s1 + $0xde0] sm:$0xff] }
 0x12e   : > { %1674 = vmatpush.msra.mxu2 %v553_v58  ;;  %1693 = vmatpush.msra.mxu3 %v689_v59  ;;  %v249_v21 = vld [vmem:[%s4810_s1 + $0x160] sm:$0xff] }
 0x12f   : > { %1635 = vmatpush.msra.mxu0 %v289_v60  ;;  %1654 = vmatpush.msra.mxu1 %v425_v61  ;;  %v385_v22 = vld [vmem:[%s4810_s1 + $0x5a0] sm:$0xff] }
 0x130   : > { %1675 = vmatpush.msra.mxu2 %v545_v62  ;;  %1694 = vmatpush.msra.mxu3 %v681_v63  ;;  %v1237_v12 = vpop.f32.mrf.mxu0  ;;  %v505_v23 = vld [vmem:[%s4810_s1 + $0x960] sm:$0xff]  ;;  %v330_v62 = vld [vmem:[%s4810_s1 + $0x3e8] sm:$0xff] }
 0x131   : > { %1636 = vmatpush.msra.mxu0 %v281_v0  ;;  %1655 = vmatpush.msra.mxu1 %v417_v1  ;;  %v641_v27 = vld [vmem:[%s4810_s1 + $0xda0] sm:$0xff]  ;;  %v586_v63 = vld [vmem:[%s4810_s1 + $0xbe8] sm:$0xff] }
 0x132   : > { %1676 = vmatpush.msra.mxu2 %v537_v2  ;;  %1695 = vmatpush.msra.mxu3 %v673_v3  ;;  %v241_v29 = vld [vmem:[%s4810_s1 + $0x120] sm:$0xff]  ;;  %v322_v2 = vld [vmem:[%s4810_s1 + $0x3a8] sm:$0xff] }
 0x133   : > { %1637 = vmatpush.msra.mxu0 %v273_v4  ;;  %1656 = vmatpush.msra.mxu1 %v409_v45  ;;  %v1257_v13 = vpop.f32.mrf.mxu1  ;;  %v377_v32 = vld [vmem:[%s4810_s1 + $0x560] sm:$0xff]  ;;  %v458_v3 = vld [vmem:[%s4810_s1 + $0x7e8] sm:$0xff] }
 0x134   : > { %1677 = vmatpush.msra.mxu2 %v529_v7  ;;  %1696 = vmatpush.msra.mxu3 %v665_v8  ;;  %v4004_v18 = vadd.f32 %v1257_v13, %v1237_v12  ;;  %v497_v33 = vld [vmem:[%s4810_s1 + $0x920] sm:$0xff]  ;;  %v578_v4 = vld [vmem:[%s4810_s1 + $0xba8] sm:$0xff] }
 0x135   : > { %1638 = vmatpush.msra.mxu0 %v265_v46  ;;  %1657 = vmatpush.msra.mxu1 %v401_v9  ;;  %v633_v34 = vld [vmem:[%s4810_s1 + $0xd60] sm:$0xff]  ;;  %v714_v45 = vld [vmem:[%s4810_s1 + $0xfe8] sm:$0xff] }
 0x136   : > { %1678 = vmatpush.msra.mxu2 %v521_v10  ;;  %1697 = vmatpush.msra.mxu3 %v657_v11  ;;  %v1277_v35 = vpop.f32.mrf.mxu2  ;;  %v233_v39 = vld [vmem:[%s4810_s1 + $0xe0] sm:$0xff]  ;;  %v314_v7 = vld [vmem:[%s4810_s1 + $0x368] sm:$0xff] }
 0x137   : > { %1639 = vmatpush.msra.mxu0 %v257_v16  ;;  %1658 = vmatpush.msra.mxu1 %v393_v17  ;;  %v369_v40 = vld [vmem:[%s4810_s1 + $0x520] sm:$0xff]  ;;  %v450_v8 = vld [vmem:[%s4810_s1 + $0x7a8] sm:$0xff] }
 0x138   : > { %1679 = vmatpush.msra.mxu2 %v513_v19  ;;  %1698 = vmatpush.msra.mxu3 %v649_v20  ;;  %v489_v42 = vld [vmem:[%s4810_s1 + $0x8e0] sm:$0xff]  ;;  %v570_v46 = vld [vmem:[%s4810_s1 + $0xb68] sm:$0xff] }
 0x139   : > { %1640 = vmatpush.msra.mxu0 %v249_v21  ;;  %1659 = vmatpush.msra.mxu1 %v385_v22  ;;  %v1297_v38 = vpop.f32.mrf.mxu3  ;;  %v625_v43 = vld [vmem:[%s4810_s1 + $0xd20] sm:$0xff]  ;;  %v706_v9 = vld [vmem:[%s4810_s1 + $0xfa8] sm:$0xff] }
 0x13a   : > { %1680 = vmatpush.msra.mxu2 %v505_v23  ;;  %1699 = vmatpush.msra.mxu3 %v641_v27  ;;  %v4042_v41 = vadd.f32 %v1297_v38, %v1277_v35  ;;  %v225_v44 = vld [vmem:[%s4810_s1 + $0xa0] sm:$0xff]  ;;  %v306_v10 = vld [vmem:[%s4810_s1 + $0x328] sm:$0xff] }
 0x13b   : > { %1641 = vmatpush.msra.mxu0 %v241_v29  ;;  %1660 = vmatpush.msra.mxu1 %v377_v32  ;;  %v361_v47 = vld [vmem:[%s4810_s1 + $0x4e0] sm:$0xff]  ;;  %v442_v11 = vld [vmem:[%s4810_s1 + $0x768] sm:$0xff] }
 0x13c   : > { %1681 = vmatpush.msra.mxu2 %v497_v33  ;;  %1700 = vmatpush.msra.mxu3 %v633_v34  ;;  %v481_v48 = vld [vmem:[%s4810_s1 + $0x8a0] sm:$0xff]  ;;  %v562_v12 = vld [vmem:[%s4810_s1 + $0xb28] sm:$0xff] }
 0x13d   : > { %1642 = vmatpush.msra.mxu0 %v233_v39  ;;  %1661 = vmatpush.msra.mxu1 %v369_v40  ;;  %v617_v49 = vld [vmem:[%s4810_s1 + $0xce0] sm:$0xff]  ;;  %v698_v13 = vld [vmem:[%s4810_s1 + $0xf68] sm:$0xff] }
 0x13e   : > { %1682 = vmatpush.msra.mxu2 %v489_v42  ;;  %1701 = vmatpush.msra.mxu3 %v625_v43  ;;  %v217_v52 = vld [vmem:[%s4810_s1 + $0x60] sm:$0xff]  ;;  %v298_v16 = vld [vmem:[%s4810_s1 + $0x2e8] sm:$0xff] }
 0x13f   : > { %v353_v53 = vld [vmem:[%s4810_s1 + $0x4a0] sm:$0xff]  ;;  %1643 = vmatpush.msra.mxu0 %v225_v44  ;;  %1662 = vmatpush.msra.mxu1 %v361_v47  ;;  %v434_v17 = vld [vmem:[%s4810_s1 + $0x728] sm:$0xff] }
 0x140   : > { %v473_v54 = vld [vmem:[%s4810_s1 + $0x860] sm:$0xff]  ;;  %1683 = vmatpush.msra.mxu2 %v481_v48  ;;  %1702 = vmatpush.msra.mxu3 %v617_v49  ;;  %v554_v19 = vld [vmem:[%s4810_s1 + $0xae8] sm:$0xff] }
 0x141   : > { %v609_v55 = vld [vmem:[%s4810_s1 + $0xca0] sm:$0xff]  ;;  %1644 = vmatpush.msra.mxu0 %v217_v52  ;;  %1663 = vmatpush.msra.mxu1 %v353_v53  ;;  %v690_v20 = vld [vmem:[%s4810_s1 + $0xf28] sm:$0xff] }
 0x142   : > { %v209_v58 = vld [vmem:[%s4810_s1 + $0x20] sm:$0xff]  ;;  %1684 = vmatpush.msra.mxu2 %v473_v54  ;;  %1703 = vmatpush.msra.mxu3 %v609_v55  ;;  %v290_v21 = vld [vmem:[%s4810_s1 + $0x2a8] sm:$0xff] }
 0x143   : > { %v345_v59 = vld [vmem:[%s4810_s1 + $0x460] sm:$0xff]  ;;  %1645 = vmatpush.msra.mxu0 %v209_v58  ;;  %v426_v22 = vld [vmem:[%s4810_s1 + $0x6e8] sm:$0xff] }
 0x144   : > { %v465_v60 = vld [vmem:[%s4810_s1 + $0x820] sm:$0xff]  ;;  %1664 = vmatpush.msra.mxu1 %v345_v59  ;;  %1646 = vmatmul.f32.vlgmr.msra.gmra.mxu0 %v3121_v24  ;;  %v546_v23 = vld [vmem:[%s4810_s1 + $0xaa8] sm:$0xff] }
 0x145   : > { %v601_v61 = vld [vmem:[%s4810_s1 + $0xc60] sm:$0xff]  ;;  %1685 = vmatpush.msra.mxu2 %v465_v60  ;;  %1710 = vmatpush.msrb.mxu0 %v330_v62  ;;  %v682_v27 = vld [vmem:[%s4810_s1 + $0xee8] sm:$0xff] }
 0x146   : > { %1704 = vmatpush.msra.mxu3 %v601_v61  ;;  %v337_v0 = vld [vmem:[%s4810_s1 + $0x420] sm:$0xff]  ;;  %1686 = vmatmul.f32.vlgmr.msra.gmra.mxu2 %v3123_v25  ;;  %v282_v29 = vld [vmem:[%s4810_s1 + $0x268] sm:$0xff] }
 0x147   : > { %v593_v1 = vld [vmem:[%s4810_s1 + $0xc20] sm:$0xff]  ;;  %1750 = vmatpush.msrb.mxu2 %v586_v63  ;;  %1665 = vmatpush.msra.mxu1 %v337_v0  ;;  %v418_v32 = vld [vmem:[%s4810_s1 + $0x6a8] sm:$0xff] }
 0x148   : > { %1705 = vmatpush.msra.mxu3 %v593_v1  ;;  %1666 = vmatmul.f32.vlgmr.msra.gmra.mxu1 %v3125_v26  ;;  %v538_v33 = vld [vmem:[%s4810_s1 + $0xa68] sm:$0xff] }
 0x149   : > { %1706 = vmatmul.f32.vlgmr.msra.gmra.mxu3 %v3130_v28  ;;  %1711 = vmatpush.msrb.mxu0 %v322_v2  ;;  %v674_v34 = vld [vmem:[%s4810_s1 + $0xea8] sm:$0xff] }
 0x14a   : > { %1730 = vmatpush.msrb.mxu1 %v458_v3  ;;  %1751 = vmatpush.msrb.mxu2 %v578_v4  ;;  %v274_v35 = vld [vmem:[%s4810_s1 + $0x228] sm:$0xff] }
 0x14b   : > { %1770 = vmatpush.msrb.mxu3 %v714_v45  ;;  %1712 = vmatpush.msrb.mxu0 %v314_v7  ;;  %v410_v38 = vld [vmem:[%s4810_s1 + $0x668] sm:$0xff] }
 0x14c   : > { %1731 = vmatpush.msrb.mxu1 %v450_v8  ;;  %1752 = vmatpush.msrb.mxu2 %v570_v46  ;;  %v530_v39 = vld [vmem:[%s4810_s1 + $0xa28] sm:$0xff] }
 0x14d   : > { %1771 = vmatpush.msrb.mxu3 %v706_v9  ;;  %1713 = vmatpush.msrb.mxu0 %v306_v10  ;;  %v666_v40 = vld [vmem:[%s4810_s1 + $0xe68] sm:$0xff] }
 0x14e   : > { %1732 = vmatpush.msrb.mxu1 %v442_v11  ;;  %1753 = vmatpush.msrb.mxu2 %v562_v12  ;;  %v266_v42 = vld [vmem:[%s4810_s1 + $0x1e8] sm:$0xff] }
 0x14f   : > { %1772 = vmatpush.msrb.mxu3 %v698_v13  ;;  %1714 = vmatpush.msrb.mxu0 %v298_v16  ;;  %v402_v43 = vld [vmem:[%s4810_s1 + $0x628] sm:$0xff] }
 0x150   : > { %1733 = vmatpush.msrb.mxu1 %v434_v17  ;;  %1754 = vmatpush.msrb.mxu2 %v554_v19  ;;  %v522_v44 = vld [vmem:[%s4810_s1 + $0x9e8] sm:$0xff]  ;;  %v331_v19 = vld [vmem:[%s4810_s1 + $0x3f0] sm:$0xff] }
 0x151   : > { %1773 = vmatpush.msrb.mxu3 %v690_v20  ;;  %1715 = vmatpush.msrb.mxu0 %v290_v21  ;;  %v658_v47 = vld [vmem:[%s4810_s1 + $0xe28] sm:$0xff]  ;;  %v587_v20 = vld [vmem:[%s4810_s1 + $0xbf0] sm:$0xff] }
 0x152   : > { %1734 = vmatpush.msrb.mxu1 %v426_v22  ;;  %1755 = vmatpush.msrb.mxu2 %v546_v23  ;;  %v258_v48 = vld [vmem:[%s4810_s1 + $0x1a8] sm:$0xff]  ;;  %v323_v23 = vld [vmem:[%s4810_s1 + $0x3b0] sm:$0xff] }
 0x153   : > { %1774 = vmatpush.msrb.mxu3 %v682_v27  ;;  %1716 = vmatpush.msrb.mxu0 %v282_v29  ;;  %v394_v49 = vld [vmem:[%s4810_s1 + $0x5e8] sm:$0xff]  ;;  %v459_v27 = vld [vmem:[%s4810_s1 + $0x7f0] sm:$0xff] }
 0x154   : > { %1735 = vmatpush.msrb.mxu1 %v418_v32  ;;  %1756 = vmatpush.msrb.mxu2 %v538_v33  ;;  %v514_v52 = vld [vmem:[%s4810_s1 + $0x9a8] sm:$0xff]  ;;  %v579_v29 = vld [vmem:[%s4810_s1 + $0xbb0] sm:$0xff] }
 0x155   : > { %1775 = vmatpush.msrb.mxu3 %v674_v34  ;;  %1717 = vmatpush.msrb.mxu0 %v274_v35  ;;  %v650_v53 = vld [vmem:[%s4810_s1 + $0xde8] sm:$0xff]  ;;  %v715_v32 = vld [vmem:[%s4810_s1 + $0xff0] sm:$0xff] }
 0x156   : > { %1736 = vmatpush.msrb.mxu1 %v410_v38  ;;  %1757 = vmatpush.msrb.mxu2 %v530_v39  ;;  %v250_v54 = vld [vmem:[%s4810_s1 + $0x168] sm:$0xff]  ;;  %v315_v33 = vld [vmem:[%s4810_s1 + $0x370] sm:$0xff] }
 0x157   : > { %1776 = vmatpush.msrb.mxu3 %v666_v40  ;;  %1718 = vmatpush.msrb.mxu0 %v266_v42  ;;  %v386_v55 = vld [vmem:[%s4810_s1 + $0x5a8] sm:$0xff]  ;;  %v451_v34 = vld [vmem:[%s4810_s1 + $0x7b0] sm:$0xff] }
 0x158   : > { %1737 = vmatpush.msrb.mxu1 %v402_v43  ;;  %1758 = vmatpush.msrb.mxu2 %v522_v44  ;;  %v506_v58 = vld [vmem:[%s4810_s1 + $0x968] sm:$0xff]  ;;  %v571_v35 = vld [vmem:[%s4810_s1 + $0xb70] sm:$0xff] }
 0x159   : > { %1777 = vmatpush.msrb.mxu3 %v658_v47  ;;  %1719 = vmatpush.msrb.mxu0 %v258_v48  ;;  %v642_v59 = vld [vmem:[%s4810_s1 + $0xda8] sm:$0xff]  ;;  %v707_v38 = vld [vmem:[%s4810_s1 + $0xfb0] sm:$0xff] }
 0x15a   : > { %1738 = vmatpush.msrb.mxu1 %v394_v49  ;;  %1759 = vmatpush.msrb.mxu2 %v514_v52  ;;  %v242_v60 = vld [vmem:[%s4810_s1 + $0x128] sm:$0xff]  ;;  %v307_v39 = vld [vmem:[%s4810_s1 + $0x330] sm:$0xff] }
 0x15b   : > { %1778 = vmatpush.msrb.mxu3 %v650_v53  ;;  %v378_v61 = vld [vmem:[%s4810_s1 + $0x568] sm:$0xff]  ;;  %1720 = vmatpush.msrb.mxu0 %v250_v54  ;;  %v443_v40 = vld [vmem:[%s4810_s1 + $0x770] sm:$0xff] }
 0x15c   : > { %1739 = vmatpush.msrb.mxu1 %v386_v55  ;;  %v498_v62 = vld [vmem:[%s4810_s1 + $0x928] sm:$0xff]  ;;  %1760 = vmatpush.msrb.mxu2 %v506_v58  ;;  %v563_v42 = vld [vmem:[%s4810_s1 + $0xb30] sm:$0xff] }
 0x15d   : > { %v634_v63 = vld [vmem:[%s4810_s1 + $0xd68] sm:$0xff]  ;;  %1779 = vmatpush.msrb.mxu3 %v642_v59  ;;  %1721 = vmatpush.msrb.mxu0 %v242_v60  ;;  %v699_v43 = vld [vmem:[%s4810_s1 + $0xf70] sm:$0xff] }
 0x15e   : > { %v234_v0 = vld [vmem:[%s4810_s1 + $0xe8] sm:$0xff]  ;;  %1740 = vmatpush.msrb.mxu1 %v378_v61  ;;  %1761 = vmatpush.msrb.mxu2 %v498_v62  ;;  %v299_v44 = vld [vmem:[%s4810_s1 + $0x2f0] sm:$0xff] }
 0x15f   : > { %v370_v1 = vld [vmem:[%s4810_s1 + $0x528] sm:$0xff]  ;;  %1780 = vmatpush.msrb.mxu3 %v634_v63  ;;  %1722 = vmatpush.msrb.mxu0 %v234_v0  ;;  %v435_v47 = vld [vmem:[%s4810_s1 + $0x730] sm:$0xff] }
 0x160   : > { %v490_v2 = vld [vmem:[%s4810_s1 + $0x8e8] sm:$0xff]  ;;  %1741 = vmatpush.msrb.mxu1 %v370_v1  ;;  %v555_v48 = vld [vmem:[%s4810_s1 + $0xaf0] sm:$0xff] }
 0x161   : > { %v626_v3 = vld [vmem:[%s4810_s1 + $0xd28] sm:$0xff]  ;;  %1762 = vmatpush.msrb.mxu2 %v490_v2  ;;  %v691_v49 = vld [vmem:[%s4810_s1 + $0xf30] sm:$0xff] }
 0x162   : > { %v226_v4 = vld [vmem:[%s4810_s1 + $0xa8] sm:$0xff]  ;;  %1781 = vmatpush.msrb.mxu3 %v626_v3  ;;  %v291_v52 = vld [vmem:[%s4810_s1 + $0x2b0] sm:$0xff] }
 0x163   : > { %v362_v45 = vld [vmem:[%s4810_s1 + $0x4e8] sm:$0xff]  ;;  %1723 = vmatpush.msrb.mxu0 %v226_v4  ;;  %v427_v53 = vld [vmem:[%s4810_s1 + $0x6f0] sm:$0xff] }
 0x164   : > { %v482_v7 = vld [vmem:[%s4810_s1 + $0x8a8] sm:$0xff]  ;;  %1742 = vmatpush.msrb.mxu1 %v362_v45  ;;  %v547_v54 = vld [vmem:[%s4810_s1 + $0xab0] sm:$0xff] }
 0x165   : > { %v618_v8 = vld [vmem:[%s4810_s1 + $0xce8] sm:$0xff]  ;;  %1763 = vmatpush.msrb.mxu2 %v482_v7  ;;  %v683_v55 = vld [vmem:[%s4810_s1 + $0xef0] sm:$0xff] }
 0x166   : > { %v218_v46 = vld [vmem:[%s4810_s1 + $0x68] sm:$0xff]  ;;  %1782 = vmatpush.msrb.mxu3 %v618_v8  ;;  %v283_v58 = vld [vmem:[%s4810_s1 + $0x270] sm:$0xff] }
 0x167   : > { %v354_v9 = vld [vmem:[%s4810_s1 + $0x4a8] sm:$0xff]  ;;  %1724 = vmatpush.msrb.mxu0 %v218_v46  ;;  %v419_v59 = vld [vmem:[%s4810_s1 + $0x6b0] sm:$0xff] }
 0x168   : > { %v474_v10 = vld [vmem:[%s4810_s1 + $0x868] sm:$0xff]  ;;  %1743 = vmatpush.msrb.mxu1 %v354_v9  ;;  %v539_v60 = vld [vmem:[%s4810_s1 + $0xa70] sm:$0xff] }
 0x169   : > { %v610_v11 = vld [vmem:[%s4810_s1 + $0xca8] sm:$0xff]  ;;  %1764 = vmatpush.msrb.mxu2 %v474_v10  ;;  %v675_v61 = vld [vmem:[%s4810_s1 + $0xeb0] sm:$0xff] }
 0x16a   : > { %v210_v12 = vld [vmem:[%s4810_s1 + $0x28] sm:$0xff]  ;;  %1783 = vmatpush.msrb.mxu3 %v610_v11  ;;  %v275_v62 = vld [vmem:[%s4810_s1 + $0x230] sm:$0xff] }
 0x16b   : > { %v346_v13 = vld [vmem:[%s4810_s1 + $0x468] sm:$0xff]  ;;  %1725 = vmatpush.msrb.mxu0 %v210_v12  ;;  %v411_v63 = vld [vmem:[%s4810_s1 + $0x670] sm:$0xff] }
 0x16c   : > { %v466_v16 = vld [vmem:[%s4810_s1 + $0x828] sm:$0xff]  ;;  %1744 = vmatpush.msrb.mxu1 %v346_v13  ;;  %1726 = vmatmul.f32.vlgmr.msrb.gmra.mxu0 %v3121_v24  ;;  %v531_v0 = vld [vmem:[%s4810_s1 + $0xa30] sm:$0xff] }
 0x16d   : > { %v602_v17 = vld [vmem:[%s4810_s1 + $0xc68] sm:$0xff]  ;;  %1765 = vmatpush.msrb.mxu2 %v466_v16  ;;  %1790 = vmatpush.msra.mxu0 %v331_v19  ;;  %v667_v1 = vld [vmem:[%s4810_s1 + $0xe70] sm:$0xff] }
 0x16e   : > { %1784 = vmatpush.msrb.mxu3 %v602_v17  ;;  %v338_v21 = vld [vmem:[%s4810_s1 + $0x428] sm:$0xff]  ;;  %1766 = vmatmul.f32.vlgmr.msrb.gmra.mxu2 %v3123_v25  ;;  %v267_v2 = vld [vmem:[%s4810_s1 + $0x1f0] sm:$0xff] }
 0x16f   : > { %v594_v22 = vld [vmem:[%s4810_s1 + $0xc28] sm:$0xff]  ;;  %1830 = vmatpush.msra.mxu2 %v587_v20  ;;  %1745 = vmatpush.msrb.mxu1 %v338_v21  ;;  %v403_v3 = vld [vmem:[%s4810_s1 + $0x630] sm:$0xff] }
 0x170   : > { %1785 = vmatpush.msrb.mxu3 %v594_v22  ;;  %1746 = vmatmul.f32.vlgmr.msrb.gmra.mxu1 %v3125_v26  ;;  %v523_v4 = vld [vmem:[%s4810_s1 + $0x9f0] sm:$0xff] }
 0x171   : > { %1786 = vmatmul.f32.vlgmr.msrb.gmra.mxu3 %v3130_v28  ;;  %1791 = vmatpush.msra.mxu0 %v323_v23  ;;  %v659_v45 = vld [vmem:[%s4810_s1 + $0xe30] sm:$0xff] }
 0x172   : > { %1810 = vmatpush.msra.mxu1 %v459_v27  ;;  %1831 = vmatpush.msra.mxu2 %v579_v29  ;;  %v259_v7 = vld [vmem:[%s4810_s1 + $0x1b0] sm:$0xff] }
 0x173   : > { %1850 = vmatpush.msra.mxu3 %v715_v32  ;;  %1792 = vmatpush.msra.mxu0 %v315_v33  ;;  %v395_v8 = vld [vmem:[%s4810_s1 + $0x5f0] sm:$0xff] }
 0x174   : > { %1811 = vmatpush.msra.mxu1 %v451_v34  ;;  %1832 = vmatpush.msra.mxu2 %v571_v35  ;;  %v515_v46 = vld [vmem:[%s4810_s1 + $0x9b0] sm:$0xff] }
 0x175   : > { %1851 = vmatpush.msra.mxu3 %v707_v38  ;;  %1793 = vmatpush.msra.mxu0 %v307_v39  ;;  %v651_v9 = vld [vmem:[%s4810_s1 + $0xdf0] sm:$0xff] }
 0x176   : > { %1812 = vmatpush.msra.mxu1 %v443_v40  ;;  %1833 = vmatpush.msra.mxu2 %v563_v42  ;;  %v251_v10 = vld [vmem:[%s4810_s1 + $0x170] sm:$0xff] }
 0x177   : > { %1852 = vmatpush.msra.mxu3 %v699_v43  ;;  %1794 = vmatpush.msra.mxu0 %v299_v44  ;;  %v387_v11 = vld [vmem:[%s4810_s1 + $0x5b0] sm:$0xff] }
 0x178   : > { %1813 = vmatpush.msra.mxu1 %v435_v47  ;;  %1834 = vmatpush.msra.mxu2 %v555_v48  ;;  %v507_v12 = vld [vmem:[%s4810_s1 + $0x970] sm:$0xff]  ;;  %v332_v48 = vld [vmem:[%s4810_s1 + $0x3f8] sm:$0xff] }
 0x179   : > { %1853 = vmatpush.msra.mxu3 %v691_v49  ;;  %1795 = vmatpush.msra.mxu0 %v291_v52  ;;  %v643_v13 = vld [vmem:[%s4810_s1 + $0xdb0] sm:$0xff]  ;;  %v588_v49 = vld [vmem:[%s4810_s1 + $0xbf8] sm:$0xff] }
 0x17a   : > { %1814 = vmatpush.msra.mxu1 %v427_v53  ;;  %1835 = vmatpush.msra.mxu2 %v547_v54  ;;  %v243_v16 = vld [vmem:[%s4810_s1 + $0x130] sm:$0xff]  ;;  %v324_v54 = vld [vmem:[%s4810_s1 + $0x3b8] sm:$0xff] }
 0x17b   : > { %1854 = vmatpush.msra.mxu3 %v683_v55  ;;  %1796 = vmatpush.msra.mxu0 %v283_v58  ;;  %v379_v17 = vld [vmem:[%s4810_s1 + $0x570] sm:$0xff]  ;;  %v460_v55 = vld [vmem:[%s4810_s1 + $0x7f8] sm:$0xff] }
 0x17c   : > { %1815 = vmatpush.msra.mxu1 %v419_v59  ;;  %1836 = vmatpush.msra.mxu2 %v539_v60  ;;  %v499_v19 = vld [vmem:[%s4810_s1 + $0x930] sm:$0xff]  ;;  %v580_v58 = vld [vmem:[%s4810_s1 + $0xbb8] sm:$0xff] }
 0x17d   : > { %1855 = vmatpush.msra.mxu3 %v675_v61  ;;  %1797 = vmatpush.msra.mxu0 %v275_v62  ;;  %v635_v20 = vld [vmem:[%s4810_s1 + $0xd70] sm:$0xff]  ;;  %v716_v59 = vld [vmem:[%s4810_s1 + $0xff8] sm:$0xff] }
 0x17e   : > { %1816 = vmatpush.msra.mxu1 %v411_v63  ;;  %1837 = vmatpush.msra.mxu2 %v531_v0  ;;  %v235_v21 = vld [vmem:[%s4810_s1 + $0xf0] sm:$0xff]  ;;  %v316_v60 = vld [vmem:[%s4810_s1 + $0x378] sm:$0xff] }
 0x17f   : > { %1856 = vmatpush.msra.mxu3 %v667_v1  ;;  %1798 = vmatpush.msra.mxu0 %v267_v2  ;;  %v371_v22 = vld [vmem:[%s4810_s1 + $0x530] sm:$0xff]  ;;  %v452_v61 = vld [vmem:[%s4810_s1 + $0x7b8] sm:$0xff] }
 0x180   : > { %1817 = vmatpush.msra.mxu1 %v403_v3  ;;  %1838 = vmatpush.msra.mxu2 %v523_v4  ;;  %v491_v23 = vld [vmem:[%s4810_s1 + $0x8f0] sm:$0xff]  ;;  %v572_v62 = vld [vmem:[%s4810_s1 + $0xb78] sm:$0xff] }
 0x181   : > { %1857 = vmatpush.msra.mxu3 %v659_v45  ;;  %1799 = vmatpush.msra.mxu0 %v259_v7  ;;  %v627_v27 = vld [vmem:[%s4810_s1 + $0xd30] sm:$0xff]  ;;  %v708_v63 = vld [vmem:[%s4810_s1 + $0xfb8] sm:$0xff] }
 0x182   : > { %1818 = vmatpush.msra.mxu1 %v395_v8  ;;  %1839 = vmatpush.msra.mxu2 %v515_v46  ;;  %v227_v29 = vld [vmem:[%s4810_s1 + $0xb0] sm:$0xff]  ;;  %v308_v0 = vld [vmem:[%s4810_s1 + $0x338] sm:$0xff] }
 0x183   : > { %1858 = vmatpush.msra.mxu3 %v651_v9  ;;  %1800 = vmatpush.msra.mxu0 %v251_v10  ;;  %v363_v32 = vld [vmem:[%s4810_s1 + $0x4f0] sm:$0xff]  ;;  %v444_v1 = vld [vmem:[%s4810_s1 + $0x778] sm:$0xff] }
 0x184   : > { %1819 = vmatpush.msra.mxu1 %v387_v11  ;;  %1840 = vmatpush.msra.mxu2 %v507_v12  ;;  %v483_v33 = vld [vmem:[%s4810_s1 + $0x8b0] sm:$0xff]  ;;  %v564_v2 = vld [vmem:[%s4810_s1 + $0xb38] sm:$0xff] }
 0x185   : > { %1859 = vmatpush.msra.mxu3 %v643_v13  ;;  %1801 = vmatpush.msra.mxu0 %v243_v16  ;;  %v619_v34 = vld [vmem:[%s4810_s1 + $0xcf0] sm:$0xff]  ;;  %v700_v3 = vld [vmem:[%s4810_s1 + $0xf78] sm:$0xff] }
 0x186   : > { %1820 = vmatpush.msra.mxu1 %v379_v17  ;;  %1841 = vmatpush.msra.mxu2 %v499_v19  ;;  %v219_v35 = vld [vmem:[%s4810_s1 + $0x70] sm:$0xff]  ;;  %v300_v4 = vld [vmem:[%s4810_s1 + $0x2f8] sm:$0xff] }
 0x187   : > { %1860 = vmatpush.msra.mxu3 %v635_v20  ;;  %1802 = vmatpush.msra.mxu0 %v235_v21  ;;  %v355_v38 = vld [vmem:[%s4810_s1 + $0x4b0] sm:$0xff]  ;;  %v436_v45 = vld [vmem:[%s4810_s1 + $0x738] sm:$0xff] }
 0x188   : > { %1821 = vmatpush.msra.mxu1 %v371_v22  ;;  %1842 = vmatpush.msra.mxu2 %v491_v23  ;;  %v475_v39 = vld [vmem:[%s4810_s1 + $0x870] sm:$0xff]  ;;  %v556_v7 = vld [vmem:[%s4810_s1 + $0xaf8] sm:$0xff] }
 0x189   : > { %1861 = vmatpush.msra.mxu3 %v627_v27  ;;  %1803 = vmatpush.msra.mxu0 %v227_v29  ;;  %v611_v40 = vld [vmem:[%s4810_s1 + $0xcb0] sm:$0xff]  ;;  %v692_v8 = vld [vmem:[%s4810_s1 + $0xf38] sm:$0xff] }
 0x18a   : > { %1822 = vmatpush.msra.mxu1 %v363_v32  ;;  %1843 = vmatpush.msra.mxu2 %v483_v33  ;;  %v211_v42 = vld [vmem:[%s4810_s1 + $0x30] sm:$0xff]  ;;  %v292_v46 = vld [vmem:[%s4810_s1 + $0x2b8] sm:$0xff] }
 0x18b   : > { %1862 = vmatpush.msra.mxu3 %v619_v34  ;;  %v347_v43 = vld [vmem:[%s4810_s1 + $0x470] sm:$0xff]  ;;  %1804 = vmatpush.msra.mxu0 %v219_v35  ;;  %v428_v9 = vld [vmem:[%s4810_s1 + $0x6f8] sm:$0xff] }
 0x18c   : > { %1823 = vmatpush.msra.mxu1 %v355_v38  ;;  %v467_v44 = vld [vmem:[%s4810_s1 + $0x830] sm:$0xff]  ;;  %1844 = vmatpush.msra.mxu2 %v475_v39  ;;  %v548_v10 = vld [vmem:[%s4810_s1 + $0xab8] sm:$0xff]  ;;  %v4602_v39 = vpop.f32.mrf.mxu0 }
 0x18d   : > { %v603_v47 = vld [vmem:[%s4810_s1 + $0xc70] sm:$0xff]  ;;  %1863 = vmatpush.msra.mxu3 %v611_v40  ;;  %1805 = vmatpush.msra.mxu0 %v211_v42  ;;  %v684_v11 = vld [vmem:[%s4810_s1 + $0xef8] sm:$0xff] }
 0x18e   : > { %1824 = vmatpush.msra.mxu1 %v347_v43  ;;  %1845 = vmatpush.msra.mxu2 %v467_v44  ;;  %v339_v52 = vld [vmem:[%s4810_s1 + $0x430] sm:$0xff]  ;;  %v284_v12 = vld [vmem:[%s4810_s1 + $0x278] sm:$0xff] }
 0x18f   : > { %1864 = vmatpush.msra.mxu3 %v603_v47  ;;  %v595_v53 = vld [vmem:[%s4810_s1 + $0xc30] sm:$0xff]  ;;  %1806 = vmatmul.f32.vlgmr.msra.gmra.mxu0 %v3121_v24  ;;  %v420_v13 = vld [vmem:[%s4810_s1 + $0x6b8] sm:$0xff] }
 0x190   : > { %1846 = vmatmul.f32.vlgmr.msra.gmra.mxu2 %v3123_v25  ;;  %1870 = vmatpush.msrb.mxu0 %v332_v48  ;;  %v540_v16 = vld [vmem:[%s4810_s1 + $0xa78] sm:$0xff] }
 0x191   : > { %1910 = vmatpush.msrb.mxu2 %v588_v49  ;;  %1825 = vmatpush.msra.mxu1 %v339_v52  ;;  %v676_v17 = vld [vmem:[%s4810_s1 + $0xeb8] sm:$0xff] }
 0x192   : > { %1865 = vmatpush.msra.mxu3 %v595_v53  ;;  %1826 = vmatmul.f32.vlgmr.msra.gmra.mxu1 %v3125_v26  ;;  %v276_v19 = vld [vmem:[%s4810_s1 + $0x238] sm:$0xff]  ;;  %v4628_v53 = vpop.f32.mrf.mxu1 }
 0x193   : > { %1866 = vmatmul.f32.vlgmr.msra.gmra.mxu3 %v3130_v28  ;;  %1871 = vmatpush.msrb.mxu0 %v324_v54  ;;  %v412_v20 = vld [vmem:[%s4810_s1 + $0x678] sm:$0xff] }
 0x194   : > { %1890 = vmatpush.msrb.mxu1 %v460_v55  ;;  %1911 = vmatpush.msrb.mxu2 %v580_v58  ;;  %v532_v21 = vld [vmem:[%s4810_s1 + $0xa38] sm:$0xff] }
 0x195   : > { %1930 = vmatpush.msrb.mxu3 %v716_v59  ;;  %1872 = vmatpush.msrb.mxu0 %v316_v60  ;;  %v668_v22 = vld [vmem:[%s4810_s1 + $0xe78] sm:$0xff]  ;;  %v1367_v60 = vpop.f32.mrf.mxu2 }
 0x196   : > { %1891 = vmatpush.msrb.mxu1 %v452_v61  ;;  %1912 = vmatpush.msrb.mxu2 %v572_v62  ;;  %v268_v23 = vld [vmem:[%s4810_s1 + $0x1f8] sm:$0xff] }
 0x197   : > { %1931 = vmatpush.msrb.mxu3 %v708_v63  ;;  %1873 = vmatpush.msrb.mxu0 %v308_v0  ;;  %v404_v27 = vld [vmem:[%s4810_s1 + $0x638] sm:$0xff] }
 0x198   : > { %1892 = vmatpush.msrb.mxu1 %v444_v1  ;;  %1913 = vmatpush.msrb.mxu2 %v564_v2  ;;  %v524_v29 = vld [vmem:[%s4810_s1 + $0x9f8] sm:$0xff]  ;;  %v1407_v1 = vpop.f32.mrf.mxu0 }
 0x199   : > { %1932 = vmatpush.msrb.mxu3 %v700_v3  ;;  %1874 = vmatpush.msrb.mxu0 %v300_v4  ;;  %v660_v32 = vld [vmem:[%s4810_s1 + $0xe38] sm:$0xff] }
 0x19a   : > { %1893 = vmatpush.msrb.mxu1 %v436_v45  ;;  %1914 = vmatpush.msrb.mxu2 %v556_v7  ;;  %v260_v33 = vld [vmem:[%s4810_s1 + $0x1b8] sm:$0xff]  ;;  %v1387_v7 = vpop.f32.mrf.mxu3 }
 0x19b   : > { %1933 = vmatpush.msrb.mxu3 %v692_v8  ;;  %1875 = vmatpush.msrb.mxu0 %v292_v46  ;;  %v396_v34 = vld [vmem:[%s4810_s1 + $0x5f8] sm:$0xff] }
 0x19c   : > { %1894 = vmatpush.msrb.mxu1 %v428_v9  ;;  %1915 = vmatpush.msrb.mxu2 %v548_v10  ;;  %v516_v35 = vld [vmem:[%s4810_s1 + $0x9b8] sm:$0xff] }
 0x19d   : > { %1934 = vmatpush.msrb.mxu3 %v684_v11  ;;  %1876 = vmatpush.msrb.mxu0 %v284_v12  ;;  %v652_v38 = vld [vmem:[%s4810_s1 + $0xdf8] sm:$0xff]  ;;  %v1427_v11 = vpop.f32.mrf.mxu1 }
 0x19e   : > { %1895 = vmatpush.msrb.mxu1 %v420_v13  ;;  %1916 = vmatpush.msrb.mxu2 %v540_v16  ;;  %v252_v40 = vld [vmem:[%s4810_s1 + $0x178] sm:$0xff]  ;;  %v1447_v16 = vpop.f32.mrf.mxu2 }
 0x19f   : > { %1935 = vmatpush.msrb.mxu3 %v676_v17  ;;  %1877 = vmatpush.msrb.mxu0 %v276_v19  ;;  %v388_v42 = vld [vmem:[%s4810_s1 + $0x5b8] sm:$0xff] }
 0x1a0   : > { %1896 = vmatpush.msrb.mxu1 %v412_v20  ;;  %1917 = vmatpush.msrb.mxu2 %v532_v21  ;;  %v508_v43 = vld [vmem:[%s4810_s1 + $0x978] sm:$0xff]  ;;  %v1487_v17 = vpop.f32.mrf.mxu0 }
 0x1a1   : > { %1936 = vmatpush.msrb.mxu3 %v668_v22  ;;  %1878 = vmatpush.msrb.mxu0 %v268_v23  ;;  %v644_v44 = vld [vmem:[%s4810_s1 + $0xdb8] sm:$0xff]  ;;  %v1018_v22 = vadd.f32 %v3834_v15, %v3832_v14 }
 0x1a2   : > { %1897 = vmatpush.msrb.mxu1 %v404_v27  ;;  %1918 = vmatpush.msrb.mxu2 %v524_v29  ;;  %v244_v47 = vld [vmem:[%s4810_s1 + $0x138] sm:$0xff]  ;;  %v1467_v19 = vpop.f32.mrf.mxu3  ;;  %v1138_v27 = vadd.f32 %v3922_v51, %v3920_v50 }
 0x1a3   : > { %1937 = vmatpush.msrb.mxu3 %v660_v32  ;;  %1879 = vmatpush.msrb.mxu0 %v260_v33  ;;  %v380_v48 = vld [vmem:[%s4810_s1 + $0x578] sm:$0xff] }
 0x1a4   : > { %1898 = vmatpush.msrb.mxu1 %v396_v34  ;;  %1919 = vmatpush.msrb.mxu2 %v516_v35  ;;  %v500_v49 = vld [vmem:[%s4810_s1 + $0x938] sm:$0xff] }
 0x1a5   : > { %1938 = vmatpush.msrb.mxu3 %v652_v38  ;;  %1880 = vmatpush.msrb.mxu0 %v252_v40  ;;  %v636_v52 = vld [vmem:[%s4810_s1 + $0xd78] sm:$0xff]  ;;  %v1507_v20 = vpop.f32.mrf.mxu1 }
 0x1a6   : > { %1899 = vmatpush.msrb.mxu1 %v388_v42  ;;  %1920 = vmatpush.msrb.mxu2 %v508_v43  ;;  %v236_v54 = vld [vmem:[%s4810_s1 + $0xf8] sm:$0xff]  ;;  %v1527_v21 = vpop.f32.mrf.mxu2 }
 0x1a7   : > { %1939 = vmatpush.msrb.mxu3 %v644_v44  ;;  %v372_v55 = vld [vmem:[%s4810_s1 + $0x538] sm:$0xff]  ;;  %1881 = vmatpush.msrb.mxu0 %v244_v47 }
 0x1a8   : > { %1900 = vmatpush.msrb.mxu1 %v380_v48  ;;  %v492_v58 = vld [vmem:[%s4810_s1 + $0x8f8] sm:$0xff]  ;;  %1921 = vmatpush.msrb.mxu2 %v500_v49  ;;  %v1567_v23 = vpop.f32.mrf.mxu0 }
 0x1a9   : > { %v628_v59 = vld [vmem:[%s4810_s1 + $0xd38] sm:$0xff]  ;;  %1940 = vmatpush.msrb.mxu3 %v636_v52  ;;  %1882 = vmatpush.msrb.mxu0 %v236_v54 }
 0x1aa   : > { %v228_v61 = vld [vmem:[%s4810_s1 + $0xb8] sm:$0xff]  ;;  %1901 = vmatpush.msrb.mxu1 %v372_v55  ;;  %1922 = vmatpush.msrb.mxu2 %v492_v58  ;;  %v1547_v29 = vpop.f32.mrf.mxu3 }
 0x1ab   : > { %v364_v62 = vld [vmem:[%s4810_s1 + $0x4f8] sm:$0xff]  ;;  %1941 = vmatpush.msrb.mxu3 %v628_v59  ;;  %1883 = vmatpush.msrb.mxu0 %v228_v61 }
 0x1ac   : > { %v484_v63 = vld [vmem:[%s4810_s1 + $0x8b8] sm:$0xff]  ;;  %1902 = vmatpush.msrb.mxu1 %v364_v62 }
 0x1ad   : > { %v620_v0 = vld [vmem:[%s4810_s1 + $0xcf8] sm:$0xff]  ;;  %1923 = vmatpush.msrb.mxu2 %v484_v63  ;;  %v1587_v33 = vpop.f32.mrf.mxu1 }
 0x1ae   : > { %v220_v2 = vld [vmem:[%s4810_s1 + $0x78] sm:$0xff]  ;;  %1942 = vmatpush.msrb.mxu3 %v620_v0  ;;  %v1607_v14 = vpop.f32.mrf.mxu2 }
 0x1af   : > { %v356_v3 = vld [vmem:[%s4810_s1 + $0x4b8] sm:$0xff]  ;;  %1884 = vmatpush.msrb.mxu0 %v220_v2 }
 0x1b0   : > { %v476_v4 = vld [vmem:[%s4810_s1 + $0x878] sm:$0xff]  ;;  %1903 = vmatpush.msrb.mxu1 %v356_v3 }
 0x1b1   : > { %v612_v45 = vld [vmem:[%s4810_s1 + $0xcb8] sm:$0xff]  ;;  %1924 = vmatpush.msrb.mxu2 %v476_v4 }
 0x1b2   : > { %v212_v8 = vld [vmem:[%s4810_s1 + $0x38] sm:$0xff]  ;;  %1943 = vmatpush.msrb.mxu3 %v612_v45 }
 0x1b3   : > { %v348_v46 = vld [vmem:[%s4810_s1 + $0x478] sm:$0xff]  ;;  %1885 = vmatpush.msrb.mxu0 %v212_v8 }
 0x1b4   : > { %v468_v9 = vld [vmem:[%s4810_s1 + $0x838] sm:$0xff]  ;;  %1904 = vmatpush.msrb.mxu1 %v348_v46  ;;  %1886 = vmatmul.f32.vlgmr.msrb.gmra.mxu0 %v3121_v24  ;;  %v1058_v24 = vadd.f32 %v3868_v31, %v3866_v30  ;;  %v4701_v30 = vld [vmem:[%s4812_s3] sm:$0xff]  ;;  %v1178_v46 = vadd.f32 %v3938_v57, %v3936_v56 }
 0x1b5   : > { %v604_v10 = vld [vmem:[%s4810_s1 + $0xc78] sm:$0xff]  ;;  %1925 = vmatpush.msrb.mxu2 %v468_v9  ;;  %v1952_v42 = vperm.slane %v4701_v30, 0  ;;  %v1955_v44 = vperm.slane %v4701_v30, 3  ;;  %v1953_v48 = vperm.slane %v4701_v30, 1  ;;  %v1954_v52 = vperm.slane %v4701_v30, 2 }
 0x1b6   : > { %v340_v12 = vld [vmem:[%s4810_s1 + $0x438] sm:$0xff]  ;;  %1944 = vmatpush.msrb.mxu3 %v604_v10  ;;  %1926 = vmatmul.f32.vlgmr.msrb.gmra.mxu2 %v3123_v25  ;;  %v1328_v25 = vadd.f32 %v4602_v39, %v1018_v22  ;;  %v1408_v32 = vadd.f32 %v1407_v1, %v1058_v24  ;;  %v1627_v39 = vpop.f32.mrf.mxu3 }
 0x1b7   : > { %v596_v13 = vld [vmem:[%s4810_s1 + $0xc38] sm:$0xff]  ;;  %1905 = vmatpush.msrb.mxu1 %v340_v12 }
 0x1b8   : > { %1945 = vmatpush.msrb.mxu3 %v596_v13  ;;  %1906 = vmatmul.f32.vlgmr.msrb.gmra.mxu1 %v3125_v26  ;;  %v1098_v26 = vadd.f32 %v3884_v37, %v3882_v36  ;;  %v1348_v35 = vadd.f32 %v4628_v53, %v1328_v25  ;;  %v1428_v40 = vadd.f32 %v1427_v11, %v1408_v32  ;;  %v1956_v32 = vperm.slane %v4701_v30, 4 }
 0x1b9   : > { %1946 = vmatmul.f32.vlgmr.msrb.gmra.mxu3 %v3130_v28  ;;  %v1568_v28 = vadd.f32 %v1567_v23, %v1138_v27 }
 0x1ba   : > { %v1488_v34 = vadd.f32 %v1487_v17, %v1098_v26  ;;  %v1368_v38 = vadd.f32 %v1367_v60, %v1348_v35  ;;  %v1448_v51 = vadd.f32 %v1447_v16, %v1428_v40 }
 0x1bb   : > { %v1588_v15 = vadd.f32 %v1587_v33, %v1568_v28 }
 0x1bc   : > { %v1508_v31 = vadd.f32 %v1507_v20, %v1488_v34  ;;  %v1388_v37 = vadd.f32 %v1387_v7, %v1368_v38  ;;  %v1468_v47 = vadd.f32 %v1467_v19, %v1448_v51  ;;  %v1218_v20 = vadd.f32 %v3978_v6, %v3976_v5 }
 0x1bd   : > { %v1608_v50 = vadd.f32 %v1607_v14, %v1588_v15 }
 0x1be   : > { %v1528_v36 = vadd.f32 %v1527_v21, %v1508_v31  ;;  %v1968_v53 = vadd.f32 %v1952_v42, %v1388_v37  ;;  %v1969_v55 = vadd.f32 %v1953_v48, %v1468_v47  ;;  %v1957_v31 = vperm.slane %v4701_v30, 5 }
 0x1bf   : > { %v1628_v43 = vadd.f32 %v1627_v39, %v1608_v50 }
 0x1c0   : > { %v1548_v49 = vadd.f32 %v1547_v29, %v1528_v36  ;;  %v2188_v59 = vmul.f32 -1.442695, %v1968_v53  ;;  %v2189_v61 = vmul.f32 -1.442695, %v1969_v55 }
 0x1c1   : > { %v1971_v54 = vadd.f32 %v1955_v44, %v1628_v43  ;;  %v1647_v8 = vpop.f32.mrf.mxu0 }
 0x1c2   : > { %v1970_v58 = vadd.f32 %v1954_v52, %v1548_v49  ;;  %2207 = vpow2.f32 %v2188_v59  ;;  %v1648_v9 = vadd.f32 %v1647_v8, %v1178_v46 }
 0x1c3   : > { %v2191_v60 = vmul.f32 -1.442695, %v1971_v54 }
 0x1c4   : > { %v2190_v62 = vmul.f32 -1.442695, %v1970_v58 }
 0x1c5   : > { %2209 = vpow2.f32 %v2191_v60  ;;  %v1667_v11 = vpop.f32.mrf.mxu1 }
 0x1c6   : > { %2211 = vpow2.f32 %v2189_v61  ;;  %v1668_v19 = vadd.f32 %v1667_v11, %v1648_v9  ;;  %v2096_v11 = vld.sshfl [vmem:[#allocation1 + $0x8] sm:$0xff pattern:$0x73625140] }
 0x1c7   : > { %2213 = vpow2.f32 %v2190_v62 }
 0x1c8   : > { %v2208_v63 = vpop.eup %2207 }
 0x1c9   : > { %v4707_v3 = vadd.f32 1.0, %v2208_v63  ;;  %v1687_v16 = vpop.f32.mrf.mxu2 }
 0x1ca   : > { %v1688_v22 = vadd.f32 %v1687_v16, %v1668_v19  ;;  %v2095_v19 = vld.sshfl [vmem:[#allocation1] sm:$0xff pattern:$0x73625140] }
 0x1cb   : > { %v2210_v0 = vpop.eup %2209  ;;  %2215 = vrcp.f32 %v4707_v3  ;;  %vm1989_vm0 = vweird.f32 %v4707_v3  ;;  %v1993_v36 = vand.u32 2147483647, %v4707_v3  ;;  %v1995_v37 = vand.u32 2147483648, %v4707_v3 }
 0x1cc   : > { %v2212_v1 = vpop.eup %2211  ;;  %v4709_v4 = vadd.f32 1.0, %v2210_v0  ;;  %v1707_v24 = vpop.f32.mrf.mxu3 }
 0x1cd   : > { %v2214_v2 = vpop.eup %2213  ;;  %v4711_v45 = vadd.f32 1.0, %v2212_v1  ;;  %v1708_v6 = vadd.f32 %v1707_v24, %v1688_v22  ;;  %v1996_v8 = vor.u32 1.1754944e-38, %v1995_v37  ;;  %vm1994_vm13 = vcmp.eq.f32.partialorder %v1993_v36, 8.507059e+37 }
 0x1ce   : > { %v4713_v7 = vadd.f32 1.0, %v2214_v2  ;;  %2217 = vrcp.f32 %v4709_v4  ;;  %v2048_v47 = vand.u32 2147483648, %v4709_v4  ;;  %vm2042_vm5 = vweird.f32 %v4709_v4 }
 0x1cf   : > { %2219 = vrcp.f32 %v4711_v45  ;;  %v1972_v40 = vadd.f32 %v1956_v32, %v1708_v6  ;;  %v2046_v54 = vand.u32 2147483647, %v4709_v4  ;;  %vm2004_vm8 = vweird.f32 %v4711_v45 }
 0x1d0   : > { %2221 = vrcp.f32 %v4713_v7  ;;  %v2033_v55 = vand.u32 2147483648, %v4713_v7  ;;  %v2010_v59 = vand.u32 2147483648, %v4711_v45  ;;  %vm2027_vm9 = vweird.f32 %v4713_v7 }
 0x1d1   : > { %v4721_v10 = vpop.eup %2215  ;;  %2223 = vtanh.f32 %v1972_v40  ;;  %v2031_v60 = vand.u32 2147483647, %v4713_v7  ;;  %v2008_v62 = vand.u32 2147483647, %v4711_v45  ;;  %v2049_v1 = vor.u32 1.1754944e-38, %v2048_v47 }
 0x1d2   : > { %v1985_v56 = vmul.f32 %v4721_v10, %v4707_v3  ;;  %vm1990_vm1 = vweird.f32 %v4721_v10  ;;  %vm2047_vm12 = vcmp.eq.f32.partialorder %v2046_v54, 8.507059e+37  ;;  %v2011_v46 = vor.u32 1.1754944e-38, %v2010_v59 }
 0x1d3   : > { %vm4759_vm6 = vmor %vm1989_vm0, %vm1990_vm1  ;;  %vm2032_vm14 = vcmp.eq.f32.partialorder %v2031_v60, 8.507059e+37  ;;  %vm2009_vm15 = vcmp.eq.f32.partialorder %v2008_v62, 8.507059e+37  ;;  %vm2112_vm0 = vcmask 1041408   ;;  %v1958_v6 = vperm.slane %v4701_v30, 6 }
 0x1d4   : > { %v4723_v12 = vpop.eup %2217  ;;  %v1986_v29 = vsub.f32 1.0, %v1985_v56  ;;  %v1959_v54 = vperm.slane %v4701_v30, 7 }
 0x1d5   : > { %v4725_v13 = vpop.eup %2219  ;;  %v2038_v57 = vmul.f32 %v4723_v12, %v4709_v4  ;;  %vm2043_vm2 = vweird.f32 %v4723_v12 }
 0x1d6   : > { %v4727_v17 = vpop.eup %2221  ;;  %v2000_v21 = vmul.f32 %v4725_v13, %v4711_v45  ;;  %v1987_v15 = vmul.f32 %v4721_v10, %v1986_v29  ;;  %vm2005_vm3 = vweird.f32 %v4725_v13  ;;  %vm4766_vm7 = vmor %vm2042_vm5, %vm2043_vm2 }
 0x1d7   : > { %v2023_v27 = vmul.f32 %v4727_v17, %v4713_v7  ;;  %v2039_v26 = vsub.f32 1.0, %v2038_v57  ;;  %vm2028_vm4 = vweird.f32 %v4727_v17  ;;  %vm4776_vm10 = vmor %vm2004_vm8, %vm2005_vm3  ;;  %v2224_v45 = vpop.eup %2223  ;;  %v2034_v7 = vor.u32 1.1754944e-38, %v2033_v55 }
 0x1d8   : > { %v2001_v5 = vsub.f32 1.0, %v2000_v21  ;;  %v1988_v43 = vadd.f32 %v4721_v10, %v1987_v15  ;;  %vm4786_vm11 = vmor %vm2027_vm9, %vm2028_vm4 }
 0x1d9   : > { %v2024_v33 = vsub.f32 1.0, %v2023_v27  ;;  %v2040_v14 = vmul.f32 %v4723_v12, %v2039_v26 }
 0x1da   : > { %v2002_v50 = vmul.f32 %v4725_v13, %v2001_v5  ;;  %v1992_v2 = vsel %vm4759_vm6, %v4721_v10, %v1988_v43 }
 0x1db   : > { %v2025_v51 = vmul.f32 %v4727_v17, %v2024_v33  ;;  %v2041_v44 = vadd.f32 %v4723_v12, %v2040_v14  ;;  %v1997_v10 = vsel %vm1994_vm13, %v1996_v8, %v1992_v2 }
 0x1dc   : > { %v2003_v49 = vadd.f32 %v4725_v13, %v2002_v50 }
 0x1dd   : > { %v2026_v53 = vadd.f32 %v4727_v17, %v2025_v51  ;;  %v2045_v63 = vsel %vm4766_vm7, %v4723_v12, %v2041_v44 }
 0x1de   : > { %v2007_v4 = vsel %vm4776_vm10, %v4725_v13, %v2003_v49  ;;  %v2050_v9 = vsel %vm2047_vm12, %v2049_v1, %v2045_v63 }
 0x1df   : > { %v2030_v3 = vsel %vm4786_vm11, %v4727_v17, %v2026_v53  ;;  %v2101_v17 = vmul.f32 %v2224_v45, %v1997_v10  ;;  %v2100_v56 = vmul.f32 %v2096_v11, %v2050_v9 }
 0x1e0   : > { %v2035_v16 = vsel %vm2032_vm14, %v2034_v7, %v2030_v3 }
 0x1e1   : > { %v2099_v21 = vmul.f32 %v2095_v19, %v2035_v16 }
 0x1e3   : > { %v2103_v22 = vadd.f32 %v2101_v17, %v2099_v21 }
 0x1e9   : > { %v1727_v23 = vpop.f32.mrf.mxu0 }
 0x1ea   : > { %v1728_v25 = vadd.f32 %v1727_v23, %v1218_v20  ;;  %v2012_v20 = vsel %vm2009_vm15, %v2011_v46, %v2007_v4 }
 0x1ed   : > { %v1747_v28 = vpop.f32.mrf.mxu1 }
 0x1ee   : > { %v1748_v34 = vadd.f32 %v1747_v28, %v1728_v25 }
 0x1f1   : > { %v1767_v35 = vpop.f32.mrf.mxu2 }
 0x1f2   : > { %v1768_v38 = vadd.f32 %v1767_v35, %v1748_v34 }
 0x1f4   : > { %v1787_v39 = vpop.f32.mrf.mxu3 }
 0x1f5   : > { %v1788_v42 = vadd.f32 %v1787_v39, %v1768_v38 }
 0x1f7   : > { %v1973_v48 = vadd.f32 %v1957_v31, %v1788_v42 }
 0x1f9   : > { %2225 = vtanh.f32 %v1973_v48 }
 0x1ff   : > { %v2226_v12 = vpop.eup %2225 }
 0x200   : > { %v2102_v57 = vmul.f32 %v2226_v12, %v2012_v20 }
 0x202   : > { %v2104_v13 = vadd.f32 %v2102_v57, %v2100_v56 }
 0x204   : > { %v2111_v23 = vrot.slane %v2104_v13, 6 }
 0x206   : > { %v2113_v27 = vsel %vm2112_vm0, %v2103_v22, %v2111_v23 }
 0x207   : > { %2115 = vst [vmem:[#allocation3] sm:$0xf] %v2113_v27 }
 0x20c   : > { %v1807_v24 = vpop.f32.mrf.mxu0 }
 0x20d   : > { %v1808_v25 = vadd.f32 %v1807_v24, %v4004_v18 }
 0x20f   : > { %v1827_v29 = vpop.f32.mrf.mxu1 }
 0x210   : > { %v1828_v26 = vadd.f32 %v1827_v29, %v1808_v25 }
 0x213   : > { %v1847_v28 = vpop.f32.mrf.mxu2 }
 0x214   : > { %v1848_v5 = vadd.f32 %v1847_v28, %v1828_v26 }
 0x216   : > { %v1867_v32 = vpop.f32.mrf.mxu3 }
 0x217   : > { %v1868_v33 = vadd.f32 %v1867_v32, %v1848_v5 }
 0x219   : > { %v1974_v34 = vadd.f32 %v1958_v6, %v1868_v33 }
 0x21b   : > { %v2192_v35 = vmul.f32 -1.442695, %v1974_v34 }
 0x21d   : > { %2227 = vpow2.f32 %v2192_v35 }
 0x223   : > { %v2228_v14 = vpop.eup %2227 }
 0x224   : > { %v2060_v15 = vadd.f32 1.0, %v2228_v14 }
 0x226   : > { %2229 = vrcp.f32 %v2060_v15  ;;  %v2073_v18 = vand.u32 2147483648, %v2060_v15  ;;  %v2071_v36 = vand.u32 2147483647, %v2060_v15  ;;  %vm2067_vm2 = vweird.f32 %v2060_v15 }
 0x227   : > { %2231 = vtanh.f32 %v2103_v22 }
 0x228   : > { %v2074_v43 = vor.u32 1.1754944e-38, %v2073_v18  ;;  %vm2072_vm4 = vcmp.eq.f32.partialorder %v2071_v36, 8.507059e+37 }
 0x22c   : > { %v2230_v38 = vpop.eup %2229 }
 0x22d   : > { %v2063_v40 = vmul.f32 %v2230_v38, %v2060_v15  ;;  %vm2068_vm1 = vweird.f32 %v2230_v38  ;;  %v2232_v49 = vpop.eup %2231 }
 0x22e   : > { %vm2069_vm3 = vmor %vm2067_vm2, %vm2068_vm1 }
 0x22f   : > { %v2064_v31 = vsub.f32 1.0, %v2063_v40 }
 0x231   : > { %v1887_v50 = vpop.f32.mrf.mxu0  ;;  %v2065_v39 = vmul.f32 %v2230_v38, %v2064_v31 }
 0x232   : > { %v1888_v51 = vadd.f32 %v1887_v50, %v4042_v41 }
 0x233   : > { %v2066_v42 = vadd.f32 %v2230_v38, %v2065_v39 }
 0x235   : > { %v1907_v37 = vpop.f32.mrf.mxu1  ;;  %v2070_v47 = vsel %vm2069_vm3, %v2230_v38, %v2066_v42 }
 0x236   : > { %v1908_v44 = vadd.f32 %v1907_v37, %v1888_v51  ;;  %v2075_v52 = vsel %vm2072_vm4, %v2074_v43, %v2070_v47 }
 0x237   : > { %v2107_v55 = vmul.f32 %v2232_v49, %v2075_v52 }
 0x239   : > { %v1927_v48 = vpop.f32.mrf.mxu2 }
 0x23a   : > { %v1928_v53 = vadd.f32 %v1927_v48, %v1908_v44 }
 0x23c   : > { %v1947_v58 = vpop.f32.mrf.mxu3 }
 0x23d   : > { %v1948_v41 = vadd.f32 %v1947_v58, %v1928_v53 }
 0x23f   : > { %v1975_v59 = vadd.f32 %v1959_v54, %v1948_v41 }
 0x241   : > { %v2193_v60 = vmul.f32 -1.442695, %v1975_v59 }
 0x243   : > { %2233 = vpow2.f32 %v2193_v60 }
 0x249   : > { %v2234_v61 = vpop.eup %2233 }
 0x24a   : > { %v2061_v62 = vadd.f32 1.0, %v2234_v61 }
 0x24c   : > { %2235 = vrcp.f32 %v2061_v62  ;;  %v2088_v2 = vand.u32 2147483648, %v2061_v62  ;;  %v2086_v4 = vand.u32 2147483647, %v2061_v62  ;;  %vm2082_vm6 = vweird.f32 %v2061_v62 }
 0x24d   : > { %2237 = vtanh.f32 %v2104_v13 }
 0x24e   : > { %v2089_v30 = vor.u32 1.1754944e-38, %v2088_v2  ;;  %vm2087_vm8 = vcmp.eq.f32.partialorder %v2086_v4, 8.507059e+37 }
 0x252   : > { %v2236_v63 = vpop.eup %2235 }
 0x253   : > { %v2078_v0 = vmul.f32 %v2236_v63, %v2061_v62  ;;  %vm2083_vm5 = vweird.f32 %v2236_v63  ;;  %v2238_v8 = vpop.eup %2237 }
 0x254   : > { %vm2084_vm7 = vmor %vm2082_vm6, %vm2083_vm5 }
 0x255   : > { %v2079_v1 = vsub.f32 1.0, %v2078_v0 }
 0x257   : > { %v2080_v3 = vmul.f32 %v2236_v63, %v2079_v1 }
 0x259   : > { %v2081_v45 = vadd.f32 %v2236_v63, %v2080_v3 }
 0x25b   : > { %v2085_v7 = vsel %vm2084_vm7, %v2236_v63, %v2081_v45 }
 0x25c   : > { %v2090_v46 = vsel %vm2087_vm8, %v2089_v30, %v2085_v7 }
 0x25d   : > { %v2108_v9 = vmul.f32 %v2238_v8, %v2090_v46 }
 0x25f   : > { %v2118_v11 = vrot.slane %v2108_v9, 6 }
 0x261   : > { %v2119_v12 = vsel %vm2112_vm0, %v2107_v55, %v2118_v11 }
 0x262   : > { %2121 = vst [vmem:[#allocation2] sm:$0xf] %v2119_v12 }
 0x263   : > { %2122 = vst [vmem:[%s2289_s25] sm:$0xf] %v2119_v12 }
 0x264 PF: > { %s14_s15 = sadd.s32 1, %s2245_s15  }
 0x265   : > { %p11_p5 = scmp.ge.s32.totalorder %s14_s15, 130  }
 0x267   :  { %13 = sbr.rel (!%p11_p5) target bundleno = 1 (0x1), region = 70 }

</bundles_post_ra>
